<compile_context>
chip_gen: v7x
topology: tpu7x:2x2x1
jax: 0.10.0
libtpu: 0.0.40
codegen_flags: <defaults>
</compile_context>

<pallas_src>
import math

import numpy as np
import jax
import jax.numpy as jnp
from jax.experimental import pallas as pl
from jax.experimental.pallas import tpu as pltpu

TB = 128    # batch tile == lane width; every lane slice below is 128-aligned
C1P = 16    # conv1 out channels padded 10 -> 16 (bf16 sublane tile)
C2P = 24    # conv2 out channels padded 20 -> 24 (f32 sublane tile)
K1 = 5 * 32           # conv1 banded-matmul K: 5 kw-blocks of 32 (28 rows + 4 zero pad)
K2 = 5 * 12 * C1P     # conv2 banded-matmul K: 5 kw-blocks of the (12*16)-row pooled act.


# ------------------------------ fused Pallas kernel ------------------------------ #

def net_fwd_kernel(x_ref, a1w_ref, b1_ref, a2w_ref, b2_ref,
                   fc1w_ref, fc1b_ref, fc2w_ref, fc2b_ref,
                   logp_ref, feat_ref):
    """Forward pass for one tile of TB images, entirely in VMEM.

    Activation layout is (H, Cpad, W*TB): trailing dim packs (image column,
    batch lane) so it is a dense multiple of 128 lanes everywhere; Cpad keeps
    every sublane slab tile-aligned.
    """
    f32 = jnp.float32
    bf16 = jnp.bfloat16

    xb = x_ref[0]                                                # (28, 28*TB) bf16
    # pad rows 28..31 with zeros once so all K-stack pieces are 32-row aligned
    xb32 = jnp.concatenate([xb, jnp.zeros((4, 28 * TB), bf16)], axis=0)   # (32, 28*TB)

    # ---- conv1 (1 -> 10, k=5) as ONE banded matmul (K = 5*32 = 160) ----
    # RHS stacks the 5 kw lane-shifts of the input along K (aligned dense copies).
    x5 = jnp.concatenate([xb32[:, kw * TB:(kw + 24) * TB] for kw in range(5)],
                         axis=0)                                 # (160, 24*TB) bf16
    c1 = jnp.dot(a1w_ref[...], x5,
                 preferred_element_type=f32)                     # (24*C1P, 24*TB) f32

    # ---- 2x2 max-pool + bias + relu  (bias/relu commute with the max) ----
    c1r = c1.reshape(12, 2, C1P, 24 * TB)                        # free leading split
    v1 = jnp.maximum(c1r[:, 0], c1r[:, 1])                       # row pool, f32
    b1 = b1_ref[...]                                             # (C1P, 1) f32
    a1 = jnp.concatenate(
        [jnp.maximum(
            jnp.maximum(v1[:, :, (2 * j) * TB:(2 * j + 1) * TB],
                        v1[:, :, (2 * j + 1) * TB:(2 * j + 2) * TB]) + b1,
            0.0).astype(bf16)
         for j in range(12)], axis=-1)                           # (12, C1P, 12*TB) bf16
    g1 = a1.reshape(12 * C1P, 12 * TB)                           # free view (C1P=16)

    # ---- conv2 (10 -> 20, k=5) as ONE banded matmul (K = 5*192 = 960) ----
    # TODO(synk): Dropout2d on the conv2 output is identity (eval mode).
    x52 = jnp.concatenate([g1[:, kw * TB:(kw + 8) * TB] for kw in range(5)],
                          axis=0)                                # (960, 8*TB) bf16
    c2 = jnp.dot(a2w_ref[...], x52,
                 preferred_element_type=f32)                     # (8*C2P, 8*TB) f32

    c2r = c2.reshape(4, 2, C2P, 8 * TB)
    v2 = jnp.maximum(c2r[:, 0], c2r[:, 1])                       # (4, C2P, 8*TB) f32
    b2 = b2_ref[...]                                             # (C2P, 1) f32
    a2 = jnp.concatenate(
        [jnp.maximum(
            jnp.maximum(v2[:, :, (2 * j) * TB:(2 * j + 1) * TB],
                        v2[:, :, (2 * j + 1) * TB:(2 * j + 2) * TB]) + b2,
            0.0)
         for j in range(4)], axis=-1)                            # (4, C2P, 4*TB) f32

    # ---- flatten (kernel-natural, channel-padded); torch order restored in wrapper
    feat_ref[0] = a2.reshape(4 * C2P, 4 * TB)                    # free view (C2P=24)

    # ---- fc1 (320 -> 50): 4 accumulating matmuls over the w-blocks + relu ----
    acc = jnp.zeros((50, TB), f32)
    for ww in range(4):
        blk = a2[:, :, ww * TB:(ww + 1) * TB].reshape(4 * C2P, TB)   # free view
        acc = acc + jnp.dot(fc1w_ref[ww], blk, preferred_element_type=f32)
    h1 = jnp.maximum(acc + fc1b_ref[...], 0.0)                   # (50, TB) f32
    # TODO(synk): F.dropout between fc1 and fc2 is identity (eval mode).

    # ---- fc2 (50 -> 10) + log_softmax over the class dim (axis 0) ----
    logits = jnp.dot(fc2w_ref[...], h1,
                     preferred_element_type=f32) + fc2b_ref[...]  # (10, TB)
    m = jnp.max(logits, axis=0, keepdims=True)
    z = logits - m
    lse = jnp.log(jnp.sum(jnp.exp(z), axis=0, keepdims=True))
    logp_ref[0] = z - lse


# ---------------------------------- JAX wrapper ---------------------------------- #

def net_forward(x_nchw, kp):
    n = x_nchw.shape[0]
    npad = ((n + TB - 1) // TB) * TB
    ntiles = npad // TB

    xs = x_nchw[:, 0, :, :]                                      # (N, 28, 28)
    if npad != n:
        xs = jnp.pad(xs, ((0, npad - n), (0, 0), (0, 0)))
    # (ntiles, 28, 28*TB), lane index = w*TB + (batch index within tile); bf16
    xk = (xs.reshape(ntiles, TB, 28, 28).transpose(0, 2, 3, 1)
          .reshape(ntiles, 28, 28 * TB).astype(jnp.bfloat16))

    logp_t, feat_t = pl.pallas_call(
        net_fwd_kernel,
        out_shape=(jax.ShapeDtypeStruct((ntiles, 10, TB), jnp.float32),
                   jax.ShapeDtypeStruct((ntiles, 4 * C2P, 4 * TB), jnp.float32)),
        grid=(ntiles,),
        in_specs=[
            pl.BlockSpec((1, 28, 28 * TB), lambda t: (t, 0, 0)),     # input tile
            pl.BlockSpec((24 * C1P, K1), lambda t: (0, 0)),          # conv1 banded LHS
            pl.BlockSpec((C1P, 1), lambda t: (0, 0)),                # conv1 bias (padded)
            pl.BlockSpec((8 * C2P, K2), lambda t: (0, 0)),           # conv2 banded LHS
            pl.BlockSpec((C2P, 1), lambda t: (0, 0)),                # conv2 bias (padded)
            pl.BlockSpec((4, 50, 4 * C2P), lambda t: (0, 0, 0)),     # fc1 weight (permuted)
            pl.BlockSpec((50, 1), lambda t: (0, 0)),                 # fc1 bias
            pl.BlockSpec((10, 50), lambda t: (0, 0)),                # fc2 weight
            pl.BlockSpec((10, 1), lambda t: (0, 0)),                 # fc2 bias
        ],
        out_specs=(pl.BlockSpec((1, 10, TB), lambda t: (t, 0, 0)),
                   pl.BlockSpec((1, 4 * C2P, 4 * TB), lambda t: (t, 0, 0))),
        compiler_params=pltpu.CompilerParams(
            dimension_semantics=("parallel",),
            vmem_limit_bytes=40 * 1024 * 1024),
    )(xk, kp["A1"], kp["b1"], kp["A2"], kp["b2"],
      kp["fc1w"], kp["fc1b"], kp["fc2w"], kp["fc2b"])

    # restore torch layouts (tiny outputs; pure layout plumbing)
    logp = logp_t.transpose(0, 2, 1).reshape(npad, 10)[:n]
    feat = (feat_t.reshape(ntiles, 4, C2P, 4, TB)     # [t, h, c(pad), w, b]
            .transpose(0, 4, 2, 1, 3)[:, :, :20]      # [t, b, c, h, w], strip pad channels
            .reshape(npad, 320)[:n])                  # torch .view(-1, 320)
    return logp, feat


# ------------------------- parameters & pure-JAX reference ------------------------ #

def init_params(key):
    ks = jax.random.split(key, 8)

    def u(k, shape, fan_in):
        bound = 1.0 / math.sqrt(fan_in)                          # PyTorch default-ish init
        return jax.random.uniform(k, shape, jnp.float32, -bound, bound)

    return {
        "w1": u(ks[0], (10, 1, 5, 5), 25), "b1": u(ks[1], (10,), 25),
        "w2": u(ks[2], (20, 10, 5, 5), 250), "b2": u(ks[3], (20,), 250),
        "fc1w": u(ks[4], (50, 320), 320), "fc1b": u(ks[5], (50,), 320),
        "fc2w": u(ks[6], (10, 50), 50), "fc2b": u(ks[7], (10,), 50),
    }


def prepare_kernel_params(p):
    """Host-side (numpy) expansion of the conv weights into banded matmul LHS."""
    w1 = np.asarray(p["w1"], np.float32)      # (10, 1, 5, 5)
    w2 = np.asarray(p["w2"], np.float32)      # (20, 10, 5, 5)
    fc1w = np.asarray(p["fc1w"], np.float32)  # (50, 320)

    # conv1 banded LHS: A1[h*C1P + co, kw*32 + (h+kh)] = w1[co, 0, kh, kw]
    A1 = np.zeros((24 * C1P, K1), np.float32)
    for h in range(24):
        for kh in range(5):
            for kw in range(5):
                A1[h * C1P:h * C1P + 10, kw * 32 + h + kh] = w1[:, 0, kh, kw]

    # conv2 banded LHS: A2[h*C2P + co, kw*192 + (h+kh)*C1P + ci] = w2[co, ci, kh, kw]
    A2 = np.zeros((8 * C2P, K2), np.float32)
    for h in range(8):
        for kh in range(5):
            for kw in range(5):
                col = kw * (12 * C1P) + (h + kh) * C1P
                A2[h * C2P:h * C2P + 20, col:col + 10] = w2[:, :, kh, kw]

    b1p = np.zeros((C1P, 1), np.float32)
    b1p[:10, 0] = np.asarray(p["b1"], np.float32)
    b2p = np.zeros((C2P, 1), np.float32)
    b2p[:20, 0] = np.asarray(p["b2"], np.float32)

    # fc1: permute columns so fc1w_p[ww][o, hh*C2P + co] == fc1.weight[o, co*16 + hh*4 + ww]
    W = fc1w.reshape(50, 20, 4, 4)            # [o, co, hh, ww]
    W1p = np.zeros((4, 50, 4 * C2P), np.float32)
    for ww in range(4):
        for hh in range(4):
            W1p[ww, :, hh * C2P:hh * C2P + 20] = W[:, :, hh, ww]

    return {
        "A1": jnp.asarray(A1, dtype=jnp.bfloat16),
        "b1": jnp.asarray(b1p),
        "A2": jnp.asarray(A2, dtype=jnp.bfloat16),
        "b2": jnp.asarray(b2p),
        "fc1w": jnp.asarray(W1p),
        "fc1b": jnp.asarray(np.asarray(p["fc1b"], np.float32).reshape(50, 1)),
        "fc2w": p["fc2w"],
        "fc2b": p["fc2b"].reshape(10, 1),
    }


def reference_forward(x, p):
    dn = ("NCHW", "OIHW", "NCHW")
    c1 = jax.lax.conv_general_dilated(x, p["w1"], (1, 1), "VALID",
                                      dimension_numbers=dn) + p["b1"][None, :, None, None]
    a1 = jnp.maximum(jax.lax.reduce_window(c1, -jnp.inf, jax.lax.max,
                                           (1, 1, 2, 2), (1, 1, 2, 2), "VALID"), 0.0)
    c2 = jax.lax.conv_general_dilated(a1, p["w2"], (1, 1), "VALID",
                                      dimension_numbers=dn) + p["b2"][None, :, None, None]
    a2 = jnp.maximum(jax.lax.reduce_window(c2, -jnp.inf, jax.lax.max,
                                           (1, 1, 2, 2), (1, 1, 2, 2), "VALID"), 0.0)
    feat = a2.reshape(x.shape[0], 320)
    h = jnp.maximum(feat @ p["fc1w"].T + p["fc1b"], 0.0)
    logits = h @ p["fc2w"].T + p["fc2b"]
    return jax.nn.log_softmax(logits, axis=-1), feat


if __name__ == "__main__":
    key = jax.random.PRNGKey(0)
    kx, kparam = jax.random.split(key)
    x = jax.random.normal(kx, (2, 1, 28, 28), jnp.float32)       # NCHW, like PyTorch
    params = init_params(kparam)
    kp = prepare_kernel_params(params)

    fwd = jax.jit(lambda xx: net_forward(xx, kp))
    logp, feat = fwd(x)
    jax.block_until_ready((logp, feat))

    ref_logp, ref_feat = jax.jit(lambda xx: reference_forward(xx, params))(x)

    assert logp.shape == (2, 10) and feat.shape == (2, 320)
    assert bool(jnp.allclose(jnp.sum(jnp.exp(logp), axis=-1), 1.0, atol=1e-4))
    assert bool(jnp.allclose(feat, ref_feat, atol=5e-2, rtol=5e-2))
    assert bool(jnp.allclose(logp, ref_logp, atol=5e-2, rtol=5e-2))
    print("KERNEL_OK")
</pallas_src>

<mosaic_0001>
module attributes {stable_mosaic.version = 11 : i64} {
  func.func @net_fwd_kernel(%arg0: i32, %arg1: memref<1x28x3584xbf16, #tpu.memory_space<vmem>>, %arg2: memref<384x160xbf16, #tpu.memory_space<vmem>>, %arg3: memref<16x1xf32, #tpu.memory_space<vmem>>, %arg4: memref<192x960xbf16, #tpu.memory_space<vmem>>, %arg5: memref<24x1xf32, #tpu.memory_space<vmem>>, %arg6: memref<4x50x96xf32, #tpu.memory_space<vmem>>, %arg7: memref<50x1xf32, #tpu.memory_space<vmem>>, %arg8: memref<10x50xf32, #tpu.memory_space<vmem>>, %arg9: memref<10x1xf32, #tpu.memory_space<vmem>>, %arg10: memref<1x10x128xf32, #tpu.memory_space<vmem>>, %arg11: memref<1x96x512xf32, #tpu.memory_space<vmem>>) attributes {dimension_semantics = [#tpu.dimension_semantics<parallel>], iteration_bounds = array<i64: 1>, scalar_prefetch = 0 : i64, scratch_operands = 0 : i64, tpu.core_type = #tpu.core_type<tc>, window_params = [{transform_indices = @transform_0, window_bounds = array<i64: 1, 28, 3584>}, {pipeline_mode = #tpu.pipeline_mode<synchronous>, transform_indices = @transform_1, window_bounds = array<i64: 384, 160>}, {pipeline_mode = #tpu.pipeline_mode<synchronous>, transform_indices = @transform_2, window_bounds = array<i64: 16, 1>}, {pipeline_mode = #tpu.pipeline_mode<synchronous>, transform_indices = @transform_3, window_bounds = array<i64: 192, 960>}, {pipeline_mode = #tpu.pipeline_mode<synchronous>, transform_indices = @transform_4, window_bounds = array<i64: 24, 1>}, {pipeline_mode = #tpu.pipeline_mode<synchronous>, transform_indices = @transform_5, window_bounds = array<i64: 4, 50, 96>}, {pipeline_mode = #tpu.pipeline_mode<synchronous>, transform_indices = @transform_6, window_bounds = array<i64: 50, 1>}, {pipeline_mode = #tpu.pipeline_mode<synchronous>, transform_indices = @transform_7, window_bounds = array<i64: 10, 50>}, {pipeline_mode = #tpu.pipeline_mode<synchronous>, transform_indices = @transform_8, window_bounds = array<i64: 10, 1>}, {transform_indices = @transform_9, window_bounds = array<i64: 1, 10, 128>}, {transform_indices = @transform_10, window_bounds = array<i64: 1, 96, 512>}]} {
    %c0 = arith.constant 0 : index
    %c0_0 = arith.constant 0 : index
    %c0_1 = arith.constant 0 : index
    %0 = vector.load %arg1[%c0, %c0_0, %c0_1] : memref<1x28x3584xbf16, #tpu.memory_space<vmem>>, vector<1x28x3584xbf16>
    %1 = vector.shape_cast %0 : vector<1x28x3584xbf16> to vector<28x3584xbf16>
    %cst = arith.constant 0.000000e+00 : bf16
    %2 = vector.broadcast %cst : bf16 to vector<4x3584xbf16>
    %3 = tpu.concatenate %1, %2 in 0 : vector<28x3584xbf16>, vector<4x3584xbf16> -> vector<32x3584xbf16>
    %4 = vector.extract_strided_slice %3 {offsets = [0, 0], sizes = [32, 3072], strides = [1, 1]} : vector<32x3584xbf16> to vector<32x3072xbf16>
    %5 = vector.extract_strided_slice %3 {offsets = [0, 128], sizes = [32, 3072], strides = [1, 1]} : vector<32x3584xbf16> to vector<32x3072xbf16>
    %6 = vector.extract_strided_slice %3 {offsets = [0, 256], sizes = [32, 3072], strides = [1, 1]} : vector<32x3584xbf16> to vector<32x3072xbf16>
    %7 = vector.extract_strided_slice %3 {offsets = [0, 384], sizes = [32, 3072], strides = [1, 1]} : vector<32x3584xbf16> to vector<32x3072xbf16>
    %8 = vector.extract_strided_slice %3 {offsets = [0, 512], sizes = [32, 3072], strides = [1, 1]} : vector<32x3584xbf16> to vector<32x3072xbf16>
    %9 = tpu.concatenate %4, %5, %6, %7, %8 in 0 : vector<32x3072xbf16>, vector<32x3072xbf16>, vector<32x3072xbf16>, vector<32x3072xbf16>, vector<32x3072xbf16> -> vector<160x3072xbf16>
    %c0_2 = arith.constant 0 : index
    %c0_3 = arith.constant 0 : index
    %10 = vector.load %arg2[%c0_2, %c0_3] : memref<384x160xbf16, #tpu.memory_space<vmem>>, vector<384x160xbf16>
    %cst_4 = arith.constant dense<0.000000e+00> : vector<384x3072xf32>
    %11 = tpu.matmul %10, %9, %cst_4 {dimension_numbers = #tpu.dot_dimension_numbers<[1], [0], [0], [1], [0, 0, 1, 1], [], []>} : vector<384x160xbf16>, vector<160x3072xbf16>, vector<384x3072xf32> -> vector<384x3072xf32>
    %12 = vector.shape_cast %11 : vector<384x3072xf32> to vector<12x2x16x3072xf32>
    %13 = vector.extract_strided_slice %12 {offsets = [0, 0, 0, 0], sizes = [12, 1, 16, 3072], strides = [1, 1, 1, 1]} : vector<12x2x16x3072xf32> to vector<12x1x16x3072xf32>
    %14 = vector.shape_cast %13 : vector<12x1x16x3072xf32> to vector<12x16x3072xf32>
    %15 = vector.extract_strided_slice %12 {offsets = [0, 1, 0, 0], sizes = [12, 1, 16, 3072], strides = [1, 1, 1, 1]} : vector<12x2x16x3072xf32> to vector<12x1x16x3072xf32>
    %16 = vector.shape_cast %15 : vector<12x1x16x3072xf32> to vector<12x16x3072xf32>
    %17 = arith.maximumf %14, %16 : vector<12x16x3072xf32>
    %c0_5 = arith.constant 0 : index
    %c0_6 = arith.constant 0 : index
    %18 = vector.load %arg3[%c0_5, %c0_6] : memref<16x1xf32, #tpu.memory_space<vmem>>, vector<16x1xf32>
    %19 = vector.extract_strided_slice %17 {offsets = [0, 0, 0], sizes = [12, 16, 128], strides = [1, 1, 1]} : vector<12x16x3072xf32> to vector<12x16x128xf32>
    %20 = vector.extract_strided_slice %17 {offsets = [0, 0, 128], sizes = [12, 16, 128], strides = [1, 1, 1]} : vector<12x16x3072xf32> to vector<12x16x128xf32>
    %21 = arith.maximumf %19, %20 : vector<12x16x128xf32>
    %22 = vector.shape_cast %18 : vector<16x1xf32> to vector<1x16x1xf32>
    %23 = vector.broadcast %22 : vector<1x16x1xf32> to vector<12x16x128xf32>
    %24 = arith.addf %21, %23 : vector<12x16x128xf32>
    %cst_7 = arith.constant 0.000000e+00 : f32
    %25 = vector.broadcast %cst_7 : f32 to vector<12x16x128xf32>
    %26 = arith.maximumf %24, %25 : vector<12x16x128xf32>
    %27 = arith.truncf %26 : vector<12x16x128xf32> to vector<12x16x128xbf16>
    %28 = vector.extract_strided_slice %17 {offsets = [0, 0, 256], sizes = [12, 16, 128], strides = [1, 1, 1]} : vector<12x16x3072xf32> to vector<12x16x128xf32>
    %29 = vector.extract_strided_slice %17 {offsets = [0, 0, 384], sizes = [12, 16, 128], strides = [1, 1, 1]} : vector<12x16x3072xf32> to vector<12x16x128xf32>
    %30 = arith.maximumf %28, %29 : vector<12x16x128xf32>
    %31 = vector.shape_cast %18 : vector<16x1xf32> to vector<1x16x1xf32>
    %32 = vector.broadcast %31 : vector<1x16x1xf32> to vector<12x16x128xf32>
    %33 = arith.addf %30, %32 : vector<12x16x128xf32>
    %cst_8 = arith.constant 0.000000e+00 : f32
    %34 = vector.broadcast %cst_8 : f32 to vector<12x16x128xf32>
    %35 = arith.maximumf %33, %34 : vector<12x16x128xf32>
    %36 = arith.truncf %35 : vector<12x16x128xf32> to vector<12x16x128xbf16>
    %37 = vector.extract_strided_slice %17 {offsets = [0, 0, 512], sizes = [12, 16, 128], strides = [1, 1, 1]} : vector<12x16x3072xf32> to vector<12x16x128xf32>
    %38 = vector.extract_strided_slice %17 {offsets = [0, 0, 640], sizes = [12, 16, 128], strides = [1, 1, 1]} : vector<12x16x3072xf32> to vector<12x16x128xf32>
    %39 = arith.maximumf %37, %38 : vector<12x16x128xf32>
    %40 = vector.shape_cast %18 : vector<16x1xf32> to vector<1x16x1xf32>
    %41 = vector.broadcast %40 : vector<1x16x1xf32> to vector<12x16x128xf32>
    %42 = arith.addf %39, %41 : vector<12x16x128xf32>
    %cst_9 = arith.constant 0.000000e+00 : f32
    %43 = vector.broadcast %cst_9 : f32 to vector<12x16x128xf32>
    %44 = arith.maximumf %42, %43 : vector<12x16x128xf32>
    %45 = arith.truncf %44 : vector<12x16x128xf32> to vector<12x16x128xbf16>
    %46 = vector.extract_strided_slice %17 {offsets = [0, 0, 768], sizes = [12, 16, 128], strides = [1, 1, 1]} : vector<12x16x3072xf32> to vector<12x16x128xf32>
    %47 = vector.extract_strided_slice %17 {offsets = [0, 0, 896], sizes = [12, 16, 128], strides = [1, 1, 1]} : vector<12x16x3072xf32> to vector<12x16x128xf32>
    %48 = arith.maximumf %46, %47 : vector<12x16x128xf32>
    %49 = vector.shape_cast %18 : vector<16x1xf32> to vector<1x16x1xf32>
    %50 = vector.broadcast %49 : vector<1x16x1xf32> to vector<12x16x128xf32>
    %51 = arith.addf %48, %50 : vector<12x16x128xf32>
    %cst_10 = arith.constant 0.000000e+00 : f32
    %52 = vector.broadcast %cst_10 : f32 to vector<12x16x128xf32>
    %53 = arith.maximumf %51, %52 : vector<12x16x128xf32>
    %54 = arith.truncf %53 : vector<12x16x128xf32> to vector<12x16x128xbf16>
    %55 = vector.extract_strided_slice %17 {offsets = [0, 0, 1024], sizes = [12, 16, 128], strides = [1, 1, 1]} : vector<12x16x3072xf32> to vector<12x16x128xf32>
    %56 = vector.extract_strided_slice %17 {offsets = [0, 0, 1152], sizes = [12, 16, 128], strides = [1, 1, 1]} : vector<12x16x3072xf32> to vector<12x16x128xf32>
    %57 = arith.maximumf %55, %56 : vector<12x16x128xf32>
    %58 = vector.shape_cast %18 : vector<16x1xf32> to vector<1x16x1xf32>
    %59 = vector.broadcast %58 : vector<1x16x1xf32> to vector<12x16x128xf32>
    %60 = arith.addf %57, %59 : vector<12x16x128xf32>
    %cst_11 = arith.constant 0.000000e+00 : f32
    %61 = vector.broadcast %cst_11 : f32 to vector<12x16x128xf32>
    %62 = arith.maximumf %60, %61 : vector<12x16x128xf32>
    %63 = arith.truncf %62 : vector<12x16x128xf32> to vector<12x16x128xbf16>
    %64 = vector.extract_strided_slice %17 {offsets = [0, 0, 1280], sizes = [12, 16, 128], strides = [1, 1, 1]} : vector<12x16x3072xf32> to vector<12x16x128xf32>
    %65 = vector.extract_strided_slice %17 {offsets = [0, 0, 1408], sizes = [12, 16, 128], strides = [1, 1, 1]} : vector<12x16x3072xf32> to vector<12x16x128xf32>
    %66 = arith.maximumf %64, %65 : vector<12x16x128xf32>
    %67 = vector.shape_cast %18 : vector<16x1xf32> to vector<1x16x1xf32>
    %68 = vector.broadcast %67 : vector<1x16x1xf32> to vector<12x16x128xf32>
    %69 = arith.addf %66, %68 : vector<12x16x128xf32>
    %cst_12 = arith.constant 0.000000e+00 : f32
    %70 = vector.broadcast %cst_12 : f32 to vector<12x16x128xf32>
    %71 = arith.maximumf %69, %70 : vector<12x16x128xf32>
    %72 = arith.truncf %71 : vector<12x16x128xf32> to vector<12x16x128xbf16>
    %73 = vector.extract_strided_slice %17 {offsets = [0, 0, 1536], sizes = [12, 16, 128], strides = [1, 1, 1]} : vector<12x16x3072xf32> to vector<12x16x128xf32>
    %74 = vector.extract_strided_slice %17 {offsets = [0, 0, 1664], sizes = [12, 16, 128], strides = [1, 1, 1]} : vector<12x16x3072xf32> to vector<12x16x128xf32>
    %75 = arith.maximumf %73, %74 : vector<12x16x128xf32>
    %76 = vector.shape_cast %18 : vector<16x1xf32> to vector<1x16x1xf32>
    %77 = vector.broadcast %76 : vector<1x16x1xf32> to vector<12x16x128xf32>
    %78 = arith.addf %75, %77 : vector<12x16x128xf32>
    %cst_13 = arith.constant 0.000000e+00 : f32
    %79 = vector.broadcast %cst_13 : f32 to vector<12x16x128xf32>
    %80 = arith.maximumf %78, %79 : vector<12x16x128xf32>
    %81 = arith.truncf %80 : vector<12x16x128xf32> to vector<12x16x128xbf16>
    %82 = vector.extract_strided_slice %17 {offsets = [0, 0, 1792], sizes = [12, 16, 128], strides = [1, 1, 1]} : vector<12x16x3072xf32> to vector<12x16x128xf32>
    %83 = vector.extract_strided_slice %17 {offsets = [0, 0, 1920], sizes = [12, 16, 128], strides = [1, 1, 1]} : vector<12x16x3072xf32> to vector<12x16x128xf32>
    %84 = arith.maximumf %82, %83 : vector<12x16x128xf32>
    %85 = vector.shape_cast %18 : vector<16x1xf32> to vector<1x16x1xf32>
    %86 = vector.broadcast %85 : vector<1x16x1xf32> to vector<12x16x128xf32>
    %87 = arith.addf %84, %86 : vector<12x16x128xf32>
    %cst_14 = arith.constant 0.000000e+00 : f32
    %88 = vector.broadcast %cst_14 : f32 to vector<12x16x128xf32>
    %89 = arith.maximumf %87, %88 : vector<12x16x128xf32>
    %90 = arith.truncf %89 : vector<12x16x128xf32> to vector<12x16x128xbf16>
    %91 = vector.extract_strided_slice %17 {offsets = [0, 0, 2048], sizes = [12, 16, 128], strides = [1, 1, 1]} : vector<12x16x3072xf32> to vector<12x16x128xf32>
    %92 = vector.extract_strided_slice %17 {offsets = [0, 0, 2176], sizes = [12, 16, 128], strides = [1, 1, 1]} : vector<12x16x3072xf32> to vector<12x16x128xf32>
    %93 = arith.maximumf %91, %92 : vector<12x16x128xf32>
    %94 = vector.shape_cast %18 : vector<16x1xf32> to vector<1x16x1xf32>
    %95 = vector.broadcast %94 : vector<1x16x1xf32> to vector<12x16x128xf32>
    %96 = arith.addf %93, %95 : vector<12x16x128xf32>
    %cst_15 = arith.constant 0.000000e+00 : f32
    %97 = vector.broadcast %cst_15 : f32 to vector<12x16x128xf32>
    %98 = arith.maximumf %96, %97 : vector<12x16x128xf32>
    %99 = arith.truncf %98 : vector<12x16x128xf32> to vector<12x16x128xbf16>
    %100 = vector.extract_strided_slice %17 {offsets = [0, 0, 2304], sizes = [12, 16, 128], strides = [1, 1, 1]} : vector<12x16x3072xf32> to vector<12x16x128xf32>
    %101 = vector.extract_strided_slice %17 {offsets = [0, 0, 2432], sizes = [12, 16, 128], strides = [1, 1, 1]} : vector<12x16x3072xf32> to vector<12x16x128xf32>
    %102 = arith.maximumf %100, %101 : vector<12x16x128xf32>
    %103 = vector.shape_cast %18 : vector<16x1xf32> to vector<1x16x1xf32>
    %104 = vector.broadcast %103 : vector<1x16x1xf32> to vector<12x16x128xf32>
    %105 = arith.addf %102, %104 : vector<12x16x128xf32>
    %cst_16 = arith.constant 0.000000e+00 : f32
    %106 = vector.broadcast %cst_16 : f32 to vector<12x16x128xf32>
    %107 = arith.maximumf %105, %106 : vector<12x16x128xf32>
    %108 = arith.truncf %107 : vector<12x16x128xf32> to vector<12x16x128xbf16>
    %109 = vector.extract_strided_slice %17 {offsets = [0, 0, 2560], sizes = [12, 16, 128], strides = [1, 1, 1]} : vector<12x16x3072xf32> to vector<12x16x128xf32>
    %110 = vector.extract_strided_slice %17 {offsets = [0, 0, 2688], sizes = [12, 16, 128], strides = [1, 1, 1]} : vector<12x16x3072xf32> to vector<12x16x128xf32>
    %111 = arith.maximumf %109, %110 : vector<12x16x128xf32>
    %112 = vector.shape_cast %18 : vector<16x1xf32> to vector<1x16x1xf32>
    %113 = vector.broadcast %112 : vector<1x16x1xf32> to vector<12x16x128xf32>
    %114 = arith.addf %111, %113 : vector<12x16x128xf32>
    %cst_17 = arith.constant 0.000000e+00 : f32
    %115 = vector.broadcast %cst_17 : f32 to vector<12x16x128xf32>
    %116 = arith.maximumf %114, %115 : vector<12x16x128xf32>
    %117 = arith.truncf %116 : vector<12x16x128xf32> to vector<12x16x128xbf16>
    %118 = vector.extract_strided_slice %17 {offsets = [0, 0, 2816], sizes = [12, 16, 128], strides = [1, 1, 1]} : vector<12x16x3072xf32> to vector<12x16x128xf32>
    %119 = vector.extract_strided_slice %17 {offsets = [0, 0, 2944], sizes = [12, 16, 128], strides = [1, 1, 1]} : vector<12x16x3072xf32> to vector<12x16x128xf32>
    %120 = arith.maximumf %118, %119 : vector<12x16x128xf32>
    %121 = vector.shape_cast %18 : vector<16x1xf32> to vector<1x16x1xf32>
    %122 = vector.broadcast %121 : vector<1x16x1xf32> to vector<12x16x128xf32>
    %123 = arith.addf %120, %122 : vector<12x16x128xf32>
    %cst_18 = arith.constant 0.000000e+00 : f32
    %124 = vector.broadcast %cst_18 : f32 to vector<12x16x128xf32>
    %125 = arith.maximumf %123, %124 : vector<12x16x128xf32>
    %126 = arith.truncf %125 : vector<12x16x128xf32> to vector<12x16x128xbf16>
    %127 = tpu.concatenate %27, %36, %45, %54, %63, %72, %81, %90, %99, %108, %117, %126 in 2 : vector<12x16x128xbf16>, vector<12x16x128xbf16>, vector<12x16x128xbf16>, vector<12x16x128xbf16>, vector<12x16x128xbf16>, vector<12x16x128xbf16>, vector<12x16x128xbf16>, vector<12x16x128xbf16>, vector<12x16x128xbf16>, vector<12x16x128xbf16>, vector<12x16x128xbf16>, vector<12x16x128xbf16> -> vector<12x16x1536xbf16>
    %128 = vector.shape_cast %127 : vector<12x16x1536xbf16> to vector<192x1536xbf16>
    %129 = vector.extract_strided_slice %128 {offsets = [0, 0], sizes = [192, 1024], strides = [1, 1]} : vector<192x1536xbf16> to vector<192x1024xbf16>
    %130 = vector.extract_strided_slice %128 {offsets = [0, 128], sizes = [192, 1024], strides = [1, 1]} : vector<192x1536xbf16> to vector<192x1024xbf16>
    %131 = vector.extract_strided_slice %128 {offsets = [0, 256], sizes = [192, 1024], strides = [1, 1]} : vector<192x1536xbf16> to vector<192x1024xbf16>
    %132 = vector.extract_strided_slice %128 {offsets = [0, 384], sizes = [192, 1024], strides = [1, 1]} : vector<192x1536xbf16> to vector<192x1024xbf16>
    %133 = vector.extract_strided_slice %128 {offsets = [0, 512], sizes = [192, 1024], strides = [1, 1]} : vector<192x1536xbf16> to vector<192x1024xbf16>
    %134 = tpu.concatenate %129, %130, %131, %132, %133 in 0 : vector<192x1024xbf16>, vector<192x1024xbf16>, vector<192x1024xbf16>, vector<192x1024xbf16>, vector<192x1024xbf16> -> vector<960x1024xbf16>
    %c0_19 = arith.constant 0 : index
    %c0_20 = arith.constant 0 : index
    %135 = vector.load %arg4[%c0_19, %c0_20] : memref<192x960xbf16, #tpu.memory_space<vmem>>, vector<192x960xbf16>
    %cst_21 = arith.constant dense<0.000000e+00> : vector<192x1024xf32>
    %136 = tpu.matmul %135, %134, %cst_21 {dimension_numbers = #tpu.dot_dimension_numbers<[1], [0], [0], [1], [0, 0, 1, 1], [], []>} : vector<192x960xbf16>, vector<960x1024xbf16>, vector<192x1024xf32> -> vector<192x1024xf32>
    %137 = vector.shape_cast %136 : vector<192x1024xf32> to vector<4x2x24x1024xf32>
    %138 = vector.extract_strided_slice %137 {offsets = [0, 0, 0, 0], sizes = [4, 1, 24, 1024], strides = [1, 1, 1, 1]} : vector<4x2x24x1024xf32> to vector<4x1x24x1024xf32>
    %139 = vector.shape_cast %138 : vector<4x1x24x1024xf32> to vector<4x24x1024xf32>
    %140 = vector.extract_strided_slice %137 {offsets = [0, 1, 0, 0], sizes = [4, 1, 24, 1024], strides = [1, 1, 1, 1]} : vector<4x2x24x1024xf32> to vector<4x1x24x1024xf32>
    %141 = vector.shape_cast %140 : vector<4x1x24x1024xf32> to vector<4x24x1024xf32>
    %142 = arith.maximumf %139, %141 : vector<4x24x1024xf32>
    %c0_22 = arith.constant 0 : index
    %c0_23 = arith.constant 0 : index
    %143 = vector.load %arg5[%c0_22, %c0_23] : memref<24x1xf32, #tpu.memory_space<vmem>>, vector<24x1xf32>
    %144 = vector.extract_strided_slice %142 {offsets = [0, 0, 0], sizes = [4, 24, 128], strides = [1, 1, 1]} : vector<4x24x1024xf32> to vector<4x24x128xf32>
    %145 = vector.extract_strided_slice %142 {offsets = [0, 0, 128], sizes = [4, 24, 128], strides = [1, 1, 1]} : vector<4x24x1024xf32> to vector<4x24x128xf32>
    %146 = arith.maximumf %144, %145 : vector<4x24x128xf32>
    %147 = vector.shape_cast %143 : vector<24x1xf32> to vector<1x24x1xf32>
    %148 = vector.broadcast %147 : vector<1x24x1xf32> to vector<4x24x128xf32>
    %149 = arith.addf %146, %148 : vector<4x24x128xf32>
    %cst_24 = arith.constant 0.000000e+00 : f32
    %150 = vector.broadcast %cst_24 : f32 to vector<4x24x128xf32>
    %151 = arith.maximumf %149, %150 : vector<4x24x128xf32>
    %152 = vector.extract_strided_slice %142 {offsets = [0, 0, 256], sizes = [4, 24, 128], strides = [1, 1, 1]} : vector<4x24x1024xf32> to vector<4x24x128xf32>
    %153 = vector.extract_strided_slice %142 {offsets = [0, 0, 384], sizes = [4, 24, 128], strides = [1, 1, 1]} : vector<4x24x1024xf32> to vector<4x24x128xf32>
    %154 = arith.maximumf %152, %153 : vector<4x24x128xf32>
    %155 = vector.shape_cast %143 : vector<24x1xf32> to vector<1x24x1xf32>
    %156 = vector.broadcast %155 : vector<1x24x1xf32> to vector<4x24x128xf32>
    %157 = arith.addf %154, %156 : vector<4x24x128xf32>
    %cst_25 = arith.constant 0.000000e+00 : f32
    %158 = vector.broadcast %cst_25 : f32 to vector<4x24x128xf32>
    %159 = arith.maximumf %157, %158 : vector<4x24x128xf32>
    %160 = vector.extract_strided_slice %142 {offsets = [0, 0, 512], sizes = [4, 24, 128], strides = [1, 1, 1]} : vector<4x24x1024xf32> to vector<4x24x128xf32>
    %161 = vector.extract_strided_slice %142 {offsets = [0, 0, 640], sizes = [4, 24, 128], strides = [1, 1, 1]} : vector<4x24x1024xf32> to vector<4x24x128xf32>
    %162 = arith.maximumf %160, %161 : vector<4x24x128xf32>
    %163 = vector.shape_cast %143 : vector<24x1xf32> to vector<1x24x1xf32>
    %164 = vector.broadcast %163 : vector<1x24x1xf32> to vector<4x24x128xf32>
    %165 = arith.addf %162, %164 : vector<4x24x128xf32>
    %cst_26 = arith.constant 0.000000e+00 : f32
    %166 = vector.broadcast %cst_26 : f32 to vector<4x24x128xf32>
    %167 = arith.maximumf %165, %166 : vector<4x24x128xf32>
    %168 = vector.extract_strided_slice %142 {offsets = [0, 0, 768], sizes = [4, 24, 128], strides = [1, 1, 1]} : vector<4x24x1024xf32> to vector<4x24x128xf32>
    %169 = vector.extract_strided_slice %142 {offsets = [0, 0, 896], sizes = [4, 24, 128], strides = [1, 1, 1]} : vector<4x24x1024xf32> to vector<4x24x128xf32>
    %170 = arith.maximumf %168, %169 : vector<4x24x128xf32>
    %171 = vector.shape_cast %143 : vector<24x1xf32> to vector<1x24x1xf32>
    %172 = vector.broadcast %171 : vector<1x24x1xf32> to vector<4x24x128xf32>
    %173 = arith.addf %170, %172 : vector<4x24x128xf32>
    %cst_27 = arith.constant 0.000000e+00 : f32
    %174 = vector.broadcast %cst_27 : f32 to vector<4x24x128xf32>
    %175 = arith.maximumf %173, %174 : vector<4x24x128xf32>
    %176 = tpu.concatenate %151, %159, %167, %175 in 2 : vector<4x24x128xf32>, vector<4x24x128xf32>, vector<4x24x128xf32>, vector<4x24x128xf32> -> vector<4x24x512xf32>
    %177 = vector.shape_cast %176 : vector<4x24x512xf32> to vector<96x512xf32>
    %c0_28 = arith.constant 0 : index
    %c0_29 = arith.constant 0 : index
    %c0_30 = arith.constant 0 : index
    %178 = vector.load %arg11[%c0_28, %c0_29, %c0_30] : memref<1x96x512xf32, #tpu.memory_space<vmem>>, vector<1x96x512xf32>
    %179 = vector.shape_cast %178 : vector<1x96x512xf32> to vector<96x512xf32>
    %180 = vector.shape_cast %177 : vector<96x512xf32> to vector<1x96x512xf32>
    tpu.vector_store %arg11[%c0_28, %c0_29, %c0_30], %180 {strides = array<i32>} : memref<1x96x512xf32, #tpu.memory_space<vmem>>, vector<1x96x512xf32>,
    %cst_31 = arith.constant 0.000000e+00 : f32
    %181 = vector.broadcast %cst_31 : f32 to vector<50x128xf32>
    %182 = vector.extract_strided_slice %176 {offsets = [0, 0, 0], sizes = [4, 24, 128], strides = [1, 1, 1]} : vector<4x24x512xf32> to vector<4x24x128xf32>
    %183 = vector.shape_cast %182 : vector<4x24x128xf32> to vector<96x128xf32>
    %c0_32 = arith.constant 0 : index
    %c0_33 = arith.constant 0 : index
    %c0_34 = arith.constant 0 : index
    %184 = vector.load %arg6[%c0_32, %c0_33, %c0_34] : memref<4x50x96xf32, #tpu.memory_space<vmem>>, vector<1x50x96xf32>
    %185 = vector.shape_cast %184 : vector<1x50x96xf32> to vector<50x96xf32>
    %cst_35 = arith.constant dense<0.000000e+00> : vector<50x128xf32>
    %186 = tpu.matmul %185, %183, %cst_35 {dimension_numbers = #tpu.dot_dimension_numbers<[1], [0], [0], [1], [0, 0, 1, 1], [], []>} : vector<50x96xf32>, vector<96x128xf32>, vector<50x128xf32> -> vector<50x128xf32>
    %187 = arith.addf %181, %186 : vector<50x128xf32>
    %188 = vector.extract_strided_slice %176 {offsets = [0, 0, 128], sizes = [4, 24, 128], strides = [1, 1, 1]} : vector<4x24x512xf32> to vector<4x24x128xf32>
    %189 = vector.shape_cast %188 : vector<4x24x128xf32> to vector<96x128xf32>
    %c1 = arith.constant 1 : index
    %c0_36 = arith.constant 0 : index
    %c0_37 = arith.constant 0 : index
    %190 = vector.load %arg6[%c1, %c0_36, %c0_37] : memref<4x50x96xf32, #tpu.memory_space<vmem>>, vector<1x50x96xf32>
    %191 = vector.shape_cast %190 : vector<1x50x96xf32> to vector<50x96xf32>
    %cst_38 = arith.constant dense<0.000000e+00> : vector<50x128xf32>
    %192 = tpu.matmul %191, %189, %cst_38 {dimension_numbers = #tpu.dot_dimension_numbers<[1], [0], [0], [1], [0, 0, 1, 1], [], []>} : vector<50x96xf32>, vector<96x128xf32>, vector<50x128xf32> -> vector<50x128xf32>
    %193 = arith.addf %187, %192 : vector<50x128xf32>
    %194 = vector.extract_strided_slice %176 {offsets = [0, 0, 256], sizes = [4, 24, 128], strides = [1, 1, 1]} : vector<4x24x512xf32> to vector<4x24x128xf32>
    %195 = vector.shape_cast %194 : vector<4x24x128xf32> to vector<96x128xf32>
    %c2 = arith.constant 2 : index
    %c0_39 = arith.constant 0 : index
    %c0_40 = arith.constant 0 : index
    %196 = vector.load %arg6[%c2, %c0_39, %c0_40] : memref<4x50x96xf32, #tpu.memory_space<vmem>>, vector<1x50x96xf32>
    %197 = vector.shape_cast %196 : vector<1x50x96xf32> to vector<50x96xf32>
    %cst_41 = arith.constant dense<0.000000e+00> : vector<50x128xf32>
    %198 = tpu.matmul %197, %195, %cst_41 {dimension_numbers = #tpu.dot_dimension_numbers<[1], [0], [0], [1], [0, 0, 1, 1], [], []>} : vector<50x96xf32>, vector<96x128xf32>, vector<50x128xf32> -> vector<50x128xf32>
    %199 = arith.addf %193, %198 : vector<50x128xf32>
    %200 = vector.extract_strided_slice %176 {offsets = [0, 0, 384], sizes = [4, 24, 128], strides = [1, 1, 1]} : vector<4x24x512xf32> to vector<4x24x128xf32>
    %201 = vector.shape_cast %200 : vector<4x24x128xf32> to vector<96x128xf32>
    %c3 = arith.constant 3 : index
    %c0_42 = arith.constant 0 : index
    %c0_43 = arith.constant 0 : index
    %202 = vector.load %arg6[%c3, %c0_42, %c0_43] : memref<4x50x96xf32, #tpu.memory_space<vmem>>, vector<1x50x96xf32>
    %203 = vector.shape_cast %202 : vector<1x50x96xf32> to vector<50x96xf32>
    %cst_44 = arith.constant dense<0.000000e+00> : vector<50x128xf32>
    %204 = tpu.matmul %203, %201, %cst_44 {dimension_numbers = #tpu.dot_dimension_numbers<[1], [0], [0], [1], [0, 0, 1, 1], [], []>} : vector<50x96xf32>, vector<96x128xf32>, vector<50x128xf32> -> vector<50x128xf32>
    %205 = arith.addf %199, %204 : vector<50x128xf32>
    %c0_45 = arith.constant 0 : index
    %c0_46 = arith.constant 0 : index
    %206 = vector.load %arg7[%c0_45, %c0_46] : memref<50x1xf32, #tpu.memory_space<vmem>>, vector<50x1xf32>
    %207 = vector.broadcast %206 : vector<50x1xf32> to vector<50x128xf32>
    %208 = arith.addf %205, %207 : vector<50x128xf32>
    %cst_47 = arith.constant 0.000000e+00 : f32
    %209 = vector.broadcast %cst_47 : f32 to vector<50x128xf32>
    %210 = arith.maximumf %208, %209 : vector<50x128xf32>
    %c0_48 = arith.constant 0 : index
    %c0_49 = arith.constant 0 : index
    %211 = vector.load %arg8[%c0_48, %c0_49] : memref<10x50xf32, #tpu.memory_space<vmem>>, vector<10x50xf32>
    %cst_50 = arith.constant dense<0.000000e+00> : vector<10x128xf32>
    %212 = tpu.matmul %211, %210, %cst_50 {dimension_numbers = #tpu.dot_dimension_numbers<[1], [0], [0], [1], [0, 0, 1, 1], [], []>} : vector<10x50xf32>, vector<50x128xf32>, vector<10x128xf32> -> vector<10x128xf32>
    %c0_51 = arith.constant 0 : index
    %c0_52 = arith.constant 0 : index
    %213 = vector.load %arg9[%c0_51, %c0_52] : memref<10x1xf32, #tpu.memory_space<vmem>>, vector<10x1xf32>
    %214 = vector.broadcast %213 : vector<10x1xf32> to vector<10x128xf32>
    %215 = arith.addf %212, %214 : vector<10x128xf32>
    %cst_53 = arith.constant dense<0xFF800000> : vector<128xf32>
    %216 = vector.multi_reduction <maximumf>, %215, %cst_53 [0] : vector<10x128xf32> to vector<128xf32>
    %217 = vector.shape_cast %216 : vector<128xf32> to vector<1x128xf32>
    %218 = vector.broadcast %217 : vector<1x128xf32> to vector<10x128xf32>
    %219 = arith.subf %215, %218 : vector<10x128xf32>
    %220 = math.exp %219 : vector<10x128xf32>
    %cst_54 = arith.constant dense<0.000000e+00> : vector<128xf32>
    %221 = vector.multi_reduction <add>, %220, %cst_54 [0] : vector<10x128xf32> to vector<128xf32>
    %222 = vector.shape_cast %221 : vector<128xf32> to vector<1x128xf32>
    %223 = math.log %222 : vector<1x128xf32>
    %224 = vector.broadcast %223 : vector<1x128xf32> to vector<10x128xf32>
    %225 = arith.subf %219, %224 : vector<10x128xf32>
    %c0_55 = arith.constant 0 : index
    %c0_56 = arith.constant 0 : index
    %c0_57 = arith.constant 0 : index
    %226 = vector.load %arg10[%c0_55, %c0_56, %c0_57] : memref<1x10x128xf32, #tpu.memory_space<vmem>>, vector<1x10x128xf32>
    %227 = vector.shape_cast %226 : vector<1x10x128xf32> to vector<10x128xf32>
    %228 = vector.shape_cast %225 : vector<10x128xf32> to vector<1x10x128xf32>
    tpu.vector_store %arg10[%c0_55, %c0_56, %c0_57], %228 {strides = array<i32>} : memref<1x10x128xf32, #tpu.memory_space<vmem>>, vector<1x10x128xf32>,
    return
  }
  func.func @transform_0(%arg0: i32) -> (i32, i32, i32) {
    %c0_i32 = arith.constant 0 : i32
    %c0_i32_0 = arith.constant 0 : i32
    %c0_i32_1 = arith.constant 0 : i32
    return %arg0, %c0_i32, %c0_i32_0 : i32, i32, i32
  }
  func.func @transform_1(%arg0: i32) -> (i32, i32) {
    %c0_i32 = arith.constant 0 : i32
    %c0_i32_0 = arith.constant 0 : i32
    %c0_i32_1 = arith.constant 0 : i32
    return %c0_i32, %c0_i32_0 : i32, i32
  }
  func.func @transform_2(%arg0: i32) -> (i32, i32) {
    %c0_i32 = arith.constant 0 : i32
    %c0_i32_0 = arith.constant 0 : i32
    %c0_i32_1 = arith.constant 0 : i32
    return %c0_i32, %c0_i32_0 : i32, i32
  }
  func.func @transform_3(%arg0: i32) -> (i32, i32) {
    %c0_i32 = arith.constant 0 : i32
    %c0_i32_0 = arith.constant 0 : i32
    %c0_i32_1 = arith.constant 0 : i32
    return %c0_i32, %c0_i32_0 : i32, i32
  }
  func.func @transform_4(%arg0: i32) -> (i32, i32) {
    %c0_i32 = arith.constant 0 : i32
    %c0_i32_0 = arith.constant 0 : i32
    %c0_i32_1 = arith.constant 0 : i32
    return %c0_i32, %c0_i32_0 : i32, i32
  }
  func.func @transform_5(%arg0: i32) -> (i32, i32, i32) {
    %c0_i32 = arith.constant 0 : i32
    %c0_i32_0 = arith.constant 0 : i32
    %c0_i32_1 = arith.constant 0 : i32
    %c0_i32_2 = arith.constant 0 : i32
    return %c0_i32, %c0_i32_0, %c0_i32_1 : i32, i32, i32
  }
  func.func @transform_6(%arg0: i32) -> (i32, i32) {
    %c0_i32 = arith.constant 0 : i32
    %c0_i32_0 = arith.constant 0 : i32
    %c0_i32_1 = arith.constant 0 : i32
    return %c0_i32, %c0_i32_0 : i32, i32
  }
  func.func @transform_7(%arg0: i32) -> (i32, i32) {
    %c0_i32 = arith.constant 0 : i32
    %c0_i32_0 = arith.constant 0 : i32
    %c0_i32_1 = arith.constant 0 : i32
    return %c0_i32, %c0_i32_0 : i32, i32
  }
  func.func @transform_8(%arg0: i32) -> (i32, i32) {
    %c0_i32 = arith.constant 0 : i32
    %c0_i32_0 = arith.constant 0 : i32
    %c0_i32_1 = arith.constant 0 : i32
    return %c0_i32, %c0_i32_0 : i32, i32
  }
  func.func @transform_9(%arg0: i32) -> (i32, i32, i32) {
    %c0_i32 = arith.constant 0 : i32
    %c0_i32_0 = arith.constant 0 : i32
    %c0_i32_1 = arith.constant 0 : i32
    return %arg0, %c0_i32, %c0_i32_0 : i32, i32, i32
  }
  func.func @transform_10(%arg0: i32) -> (i32, i32, i32) {
    %c0_i32 = arith.constant 0 : i32
    %c0_i32_0 = arith.constant 0 : i32
    %c0_i32_1 = arith.constant 0 : i32
    return %arg0, %c0_i32, %c0_i32_0 : i32, i32, i32
  }
}

</mosaic_0001>

<bundles_post_ra>
// kernel: _lambda_.1
= control target key start
LH: loop header
LB: loop body
LE: loop exit
PB: predicated region body
PF: predicated region fallthrough
CT: control target
= control target key end

     0   :  { %16 = vsyncpa [#allocation3], 0  ;;  %s16377_s0 = inlined_call_operand.vmem [shape: bf16[1,28,3584], index: 0, kind: input, shape index: {}]   ;;  %s16378_s1 = inlined_call_operand.vmem [shape: bf16[384,160], index: 1, kind: input, shape index: {}]   ;;  %s16379_s2 = inlined_call_operand.hbm [shape: f32[16,1], index: 2, kind: input, shape index: {}]   ;;  %s16380_s3 = inlined_call_operand.vmem [shape: bf16[192,960], index: 3, kind: input, shape index: {}]   ;;  %s16381_s4 = inlined_call_operand.hbm [shape: f32[24,1], index: 4, kind: input, shape index: {}]   ;;  %s16382_s5 = inlined_call_operand.hbm [shape: f32[4,50,96], index: 5, kind: input, shape index: {}]   ;;  %s16383_s6 = inlined_call_operand.hbm [shape: f32[50,1], index: 6, kind: input, shape index: {}]   ;;  %s16384_s7 = inlined_call_operand.hbm [shape: f32[10,50], index: 7, kind: input, shape index: {}]   ;;  %s16385_s8 = inlined_call_operand.hbm [shape: f32[10,1], index: 8, kind: input, shape index: {}]   ;;  %s16386_s9 = inlined_call_operand.vmem [shape: f32[1,10,128], index: 9, kind: output, shape index: {0}]   ;;  %s16387_s10 = inlined_call_operand.vmem [shape: f32[1,96,512], index: 10, kind: output, shape index: {1}]  }
   0x1   :  { %17 = vsyncpa [#allocation5], 0 }
   0x2   :  { %18 = vsyncpa [#allocation8], 0 }
   0x3   :  { %19 = vsyncpa [#allocation11], 0  ;;  %s11899_s13 = smov [#allocation4]   ;;  %s11900_s15 = smov [#allocation7]  }
   0x4   :  { %s43_s14 = sshll.u32 %s11899_s13, 4  ;;  %s67_s16 = sshll.u32 %s11900_s15, 4  ;;  %s44_s14 = int_to_ptr.vmem [resolvable:$true] %s43_s14  ;;  %s11966_s16 = int_to_ptr.vmem [resolvable:$true] %s67_s16 }
   0x5   :  { %s11759_s19 = scalar_lea.hbm %s16381_s4, 384 }
   0x6   :  { %p11760_p0 = scmp.ne.s32.totalorder %s16381_s4, %s11759_s19  ;;  %p11763_p1 = scmp.lt.u32.totalorder %s11759_s19, %s16381_s4 }
   0x8   :  { %p11765_p2 = pnand %p11763_p1, %p11760_p0 }
   0xa   :  { %11768 = shalt.err (!%p11765_p2)
}
   0xb   :  { %s11769_s24 = scalar_lea.vmem %s44_s14, 384  ;;  %p11774_p4 = scmp.lt.s32.totalorder %s44_s14, %s44_s14 }
   0xc   :  { %p11770_p3 = scmp.ne.s32.totalorder %s44_s14, %s11769_s24  ;;  %p11775_p5 = scmp.lt.s32.totalorder %s11769_s24, %s11769_s24 }
   0xe   :  { %p11776_p6 = por %p11775_p5, %p11774_p4 }
  0x10   :  { %p11777_p7 = pnand %p11776_p6, %p11770_p3 }
  0x12   :  { %11780 = shalt.err (!%p11777_p7)
}
  0x13   :  { %s11901_s25 = smov 128   ;;  %s11902_s26 = smov 8  }
  0x14   :  { %49 = dma.hbm_to_vmem [thread:$0]  %s16381_s4, 384, %s44_s14, [#allocation5], %s11901_s25, %s11901_s25, %s11902_s26  }
  0x15   :  { %s11781_s11 = scalar_lea.hbm %s16383_s6, 896 }
  0x16   :  { %p11782_p8 = scmp.ne.s32.totalorder %s16383_s6, %s11781_s11  ;;  %p11785_p9 = scmp.lt.u32.totalorder %s11781_s11, %s16383_s6 }
  0x18   :  { %p11787_p10 = pnand %p11785_p9, %p11782_p8 }
  0x1a   :  { %11790 = shalt.err (!%p11787_p10)
}
  0x1b   :  { %s11791_s18 = scalar_lea.vmem %s11966_s16, 896  ;;  %p11796_p12 = scmp.lt.s32.totalorder %s11966_s16, %s11966_s16 }
  0x1c   :  { %p11792_p11 = scmp.ne.s32.totalorder %s11966_s16, %s11791_s18  ;;  %p11797_p13 = scmp.lt.s32.totalorder %s11791_s18, %s11791_s18 }
  0x1e   :  { %p11798_p0 = por %p11797_p13, %p11796_p12 }
  0x20   :  { %p11799_p1 = pnand %p11798_p0, %p11792_p11 }
  0x22   :  { %11802 = shalt.err (!%p11799_p1)
}
  0x23   :  { %73 = dma.hbm_to_vmem [thread:$0]  %s16383_s6, 896, %s11966_s16, [#allocation8], %s11901_s25, %s11901_s25, %s11902_s26  }
  0x24   :  { %s11903_s19 = smov [#allocation2]   ;;  %s11904_s21 = smov [#allocation6]  }
  0x25   :  { %s29_s20 = sshll.u32 %s11903_s19, 4  ;;  %s55_s22 = sshll.u32 %s11904_s21, 4  ;;  %s30_s20 = int_to_ptr.vmem [resolvable:$true] %s29_s20  ;;  %s12003_s22 = int_to_ptr.vmem [resolvable:$true] %s55_s22 }
  0x26   :  { %s11803_s27 = scalar_lea.hbm %s16379_s2, 256 }
  0x27   :  { %p11804_p2 = scmp.ne.s32.totalorder %s16379_s2, %s11803_s27  ;;  %p11807_p3 = scmp.lt.u32.totalorder %s11803_s27, %s16379_s2 }
  0x29   :  { %p11809_p4 = pnand %p11807_p3, %p11804_p2 }
  0x2b   :  { %11812 = shalt.err (!%p11809_p4)
}
  0x2c   :  { %s11813_s6 = scalar_lea.vmem %s30_s20, 256  ;;  %p11818_p6 = scmp.lt.s32.totalorder %s30_s20, %s30_s20 }
  0x2d   :  { %p11814_p5 = scmp.ne.s32.totalorder %s30_s20, %s11813_s6  ;;  %p11819_p7 = scmp.lt.s32.totalorder %s11813_s6, %s11813_s6 }
  0x2f   :  { %p11820_p8 = por %p11819_p7, %p11818_p6 }
  0x31   :  { %p11821_p9 = pnand %p11820_p8, %p11814_p5 }
  0x33   :  { %11824 = shalt.err (!%p11821_p9)
}
  0x34   :  { %35 = dma.hbm_to_vmem [thread:$0]  %s16379_s2, 256, %s30_s20, [#allocation3], %s11901_s25, %s11901_s25, %s11902_s26  }
  0x35   :  { %s11825_s17 = scalar_lea.hbm %s16382_s5, 3584 }
  0x36   :  { %p11826_p10 = scmp.ne.s32.totalorder %s16382_s5, %s11825_s17  ;;  %p11829_p11 = scmp.lt.u32.totalorder %s11825_s17, %s16382_s5 }
  0x38   :  { %p11831_p12 = pnand %p11829_p11, %p11826_p10 }
  0x3a   :  { %11834 = shalt.err (!%p11831_p12)
}
  0x3b   :  { %s11835_s21 = scalar_lea.vmem %s12003_s22, 3584  ;;  %p11840_p0 = scmp.lt.s32.totalorder %s12003_s22, %s12003_s22 }
  0x3c   :  { %p11836_p13 = scmp.ne.s32.totalorder %s12003_s22, %s11835_s21  ;;  %p11841_p1 = scmp.lt.s32.totalorder %s11835_s21, %s11835_s21 }
  0x3e   :  { %p11842_p2 = por %p11841_p1, %p11840_p0 }
  0x40   :  { %p11843_p3 = pnand %p11842_p2, %p11836_p13 }
  0x42   :  { %11846 = shalt.err (!%p11843_p3)
}
  0x43   :  { %61 = dma.hbm_to_vmem [thread:$0]  %s16382_s5, 3584, %s12003_s22, [#allocation5], %s11901_s25, %s11901_s25, %s11902_s26  }
  0x44   :  { %s11905_s23 = smov [#allocation9]   ;;  %s11906_s27 = smov [#allocation10]  }
  0x45   :  { %s79_s24 = sshll.u32 %s11905_s23, 4  ;;  %s91_s28 = sshll.u32 %s11906_s27, 4  ;;  %s80_s24 = int_to_ptr.vmem [resolvable:$true] %s79_s24  ;;  %s12040_s28 = int_to_ptr.vmem [resolvable:$true] %s91_s28 }
  0x46   :  { %s11847_s11 = scalar_lea.hbm %s16384_s7, 256 }
  0x47   :  { %p11848_p4 = scmp.ne.s32.totalorder %s16384_s7, %s11847_s11  ;;  %p11851_p5 = scmp.lt.u32.totalorder %s11847_s11, %s16384_s7 }
  0x49   :  { %p11853_p6 = pnand %p11851_p5, %p11848_p4 }
  0x4b   :  { %11856 = shalt.err (!%p11853_p6)
}
  0x4c   :  { %s11857_s5 = scalar_lea.vmem %s80_s24, 256  ;;  %p11862_p8 = scmp.lt.s32.totalorder %s80_s24, %s80_s24 }
  0x4d   :  { %p11858_p7 = scmp.ne.s32.totalorder %s80_s24, %s11857_s5  ;;  %p11863_p9 = scmp.lt.s32.totalorder %s11857_s5, %s11857_s5 }
  0x4f   :  { %p11864_p10 = por %p11863_p9, %p11862_p8 }
  0x51   :  { %p11865_p11 = pnand %p11864_p10, %p11858_p7 }
  0x53   :  { %11868 = shalt.err (!%p11865_p11)
}
  0x54   :  { %85 = dma.hbm_to_vmem [thread:$0]  %s16384_s7, 256, %s80_s24, [#allocation8], %s11901_s25, %s11901_s25, %s11902_s26  }
  0x55   :  { %s11869_s4 = scalar_lea.hbm %s16385_s8, 256 }
  0x56   :  { %p11870_p12 = scmp.ne.s32.totalorder %s16385_s8, %s11869_s4  ;;  %p11873_p13 = scmp.lt.u32.totalorder %s11869_s4, %s16385_s8 }
  0x58   :  { %p11875_p0 = pnand %p11873_p13, %p11870_p12 }
  0x5a   :  { %11878 = shalt.err (!%p11875_p0)
}
  0x5b   :  { %s11879_s20 = scalar_lea.vmem %s12040_s28, 256  ;;  %p11884_p2 = scmp.lt.s32.totalorder %s12040_s28, %s12040_s28 }
  0x5c   :  { %p11880_p1 = scmp.ne.s32.totalorder %s12040_s28, %s11879_s20  ;;  %p11885_p3 = scmp.lt.s32.totalorder %s11879_s20, %s11879_s20 }
  0x5e   :  { %p11886_p4 = por %p11885_p3, %p11884_p2 }
  0x60   :  { %p11887_p5 = pnand %p11886_p4, %p11880_p1 }
  0x62   :  { %11890 = shalt.err (!%p11887_p5)
}
  0x63   :  { %97 = dma.hbm_to_vmem [thread:$0]  %s16385_s8, 256, %s12040_s28, [#allocation11], %s11901_s25, %s11901_s25, %s11902_s26  }
  0x64   :  { %11891 = dma.done.wait [#allocation3], 256  }
  0x65   :  { %11892 = vsyncadd [#allocation3], 4294967040 }
  0x66   :  { %11893 = dma.done.wait [#allocation5], 3968  }
  0x67   :  { %11894 = vsyncadd [#allocation5], 4294963328 }
  0x68   :  { %11895 = dma.done.wait [#allocation8], 1152  }
  0x69   :  { %11896 = vsyncadd [#allocation8], 4294966144 }
  0x6a   :  { %11897 = dma.done.wait [#allocation11], 256  }
  0x6b   :  { %11898 = vsyncadd [#allocation11], 4294967040  ;;  %v11384_v0 = vld [vmem:[%s16377_s0 + $0x4] ss:$112 sps:$4 sm:$0xff]   ;;  %v11386_v1 = vld [vmem:[%s16377_s0 + $0xc] ss:$112 sps:$4 sm:$0xff]  }
  0x6c   :  { %848 = vmatprep.subr.bf16.mxu0 %v11384_v0  ;;  %v11388_v2 = vld [vmem:[%s16377_s0] ss:$112 sps:$4 sm:$0xff]   ;;  %v11389_v3 = vld [vmem:[%s16377_s0 + $0x8] ss:$112 sps:$4 sm:$0xff]   ;;  %vm425_vm0 = vcmask 1045504   ;;  %1121 = vmatprep.subr.bf16.mxu1 %v11386_v1  ;;  %v11907_v12 = vmov 0  }
  0x6d   :  { %v11390_v4 = vld [vmem:[%s16377_s0 + $0xe4] ss:$112 sps:$4 sm:$0x3f]   ;;  %849 = vmatpush1.bf16.msra.mxu0 %v11388_v2  ;;  %1122 = vmatpush1.bf16.msra.mxu1 %v11389_v3  ;;  %v11392_v5 = vld [vmem:[%s16377_s0 + $0xec] ss:$112 sps:$4 sm:$0x3f]  }
  0x6e   :  { %9905 = vmatprep.subr.msk.bf16.mxu0 %vm425_vm0, %v11390_v4  ;;  %v11394_v6 = vld [vmem:[%s16377_s0 + $0xe0] ss:$112 sps:$4 sm:$0x3f]   ;;  %v11395_v7 = vld [vmem:[%s16377_s0 + $0xe8] ss:$112 sps:$4 sm:$0x3f]   ;;  %9934 = vmatprep.subr.msk.bf16.mxu1 %vm425_vm0, %v11392_v5 }
  0x6f   :  { %v12106_v8 = vld [vmem:[%s16377_s0 + $0x10] ss:$112 sps:$4 sm:$0xff]   ;;  %v428_v9 = vsel %vm425_vm0, %v11394_v6, 0  ;;  %v434_v10 = vsel %vm425_vm0, %v11395_v7, 0  ;;  %11382 = vset.pattern.permute.xlu0 %v11907_v12  ;;  %11383 = vset.pattern.permute.xlu1 %v11907_v12  ;;  %vm775_vm1 = vcmask 261120   ;;  %v431_v14 = vsel %vm425_vm0, %v11390_v4, 0 }
  0x70   :  { %v11398_v11 = vld [vmem:[%s16377_s0 + $0xf0] ss:$112 sps:$4 sm:$0x3f]   ;;  %v12117_v13 = vld [vmem:[%s16378_s1 + $0x4] ss:$8 sps:$4 sm:$0xff]   ;;  %v437_v15 = vsel %vm425_vm0, %v11392_v5, 0 }
  0x71   :  { %851 = vmatpush1.bf16.msra.mxu0 %v428_v9  ;;  %1124 = vmatpush1.bf16.msra.mxu1 %v434_v10  ;;  %v12126_v16 = vld [vmem:[%s16377_s0 + $0x14] ss:$112 sps:$4 sm:$0xff]   ;;  %v440_v18 = vsel %vm425_vm0, %v11398_v11, 0  ;;  %v12143_v19 = vld [vmem:[%s16377_s0 + $0x18] ss:$112 sps:$4 sm:$0xff]   ;;  %vm6284_vm2 = vcmask 523264  }
  0x72   :  { %852 = vmatprep.subr.bf16.mxu0 %v11389_v3  ;;  %1125 = vmatprep.subr.bf16.mxu1 %v12106_v8  ;;  %v11401_v17 = vld [vmem:[%s16377_s0 + $0xf4] ss:$112 sps:$4 sm:$0x3f]   ;;  %v11404_v20 = vld [vmem:[%s16377_s0 + $0xf8] ss:$112 sps:$4 sm:$0x3f]  }
  0x73   :  { %9910 = vmatprep.mubr.msk.bf16.mxu0 %vm775_vm1, %v12117_v13  ;;  %9939 = vmatprep.mubr.msk.bf16.mxu1 %vm775_vm1, %v12117_v13  ;;  %v443_v21 = vsel %vm425_vm0, %v11401_v17, 0  ;;  %v12157_v22 = vld [vmem:[%s16377_s0 + $0x1c] ss:$112 sps:$4 sm:$0xff]   ;;  %v4700_v23 = vld [vmem:[#allocation2] sm:$0xff]  ;;  %v446_v26 = vsel %vm425_vm0, %v11404_v20, 0  ;;  %vm9090_vm3 = vcmask 785408  }
  0x74   :  { %4728 = vperm.xlu0 %11382, %v4700_v23   ;;  %v4701_v24 = vld [vmem:[#allocation2 + $0x8] sm:$0xff]  ;;  %v12177_v28 = vld [vmem:[%s16378_s1 + $0x14] ss:$8 sps:$4 sm:$0xff]   ;;  %v12190_v29 = vld [vmem:[%s16377_s0 + $0x20] ss:$112 sps:$4 sm:$0xff]   ;;  %vm11909_vm4 = vmmov 0  }
  0x75   :  { %853 = vmatpush1.bf16.msra.mxu0 %v11384_v0  ;;  %1126 = vmatpush1.bf16.msra.mxu1 %v11386_v1  ;;  %v11407_v25 = vld [vmem:[%s16377_s0 + $0xfc] ss:$112 sps:$4 sm:$0x3f]   ;;  %v12172_v27 = vld [vmem:[%s16378_s1] ss:$8 sps:$4 sm:$0xff]   ;;  %vm9675_vm5 = vcmask 408576  }
  0x76   :  { %9906 = vmatprep.subr.msk.bf16.mxu0 %vm425_vm0, %v11395_v7  ;;  %9935 = vmatprep.subr.msk.bf16.mxu1 %vm425_vm0, %v11398_v11  ;;  %v12195_v30 = vld [vmem:[%s16378_s1 + $0x10] ss:$8 sps:$4 sm:$0xff]   ;;  %v12202_v31 = vld [vmem:[%s16378_s1 + $0x24] ss:$8 sps:$4 sm:$0xff]   ;;  %v12225_v34 = vld [vmem:[%s16378_s1 + $0x20] ss:$8 sps:$4 sm:$0xff]  }
  0x77   :  { %v11437_v32 = vld [vmem:[%s16377_s0 + $0x100] ss:$112 sps:$4 sm:$0x3f]   ;;  %v12220_v33 = vld [vmem:[%s16377_s0 + $0x24] ss:$112 sps:$4 sm:$0xff]   ;;  %v449_v35 = vsel %vm425_vm0, %v11407_v25, 0 }
  0x78   :  { %4733 = vperm.xlu0 %11382, %v4701_v24   ;;  %v12235_v36 = vld [vmem:[%s16378_s1 + $0x34] ss:$8 sps:$4 sm:$0xff]   ;;  %v12256_v38 = vsel %vm425_vm0, %v11437_v32, 0  ;;  %v12261_v39 = vld [vmem:[%s16377_s0 + $0x28] ss:$112 sps:$4 sm:$0xff]   ;;  %vm9682_vm6 = vcmask 1041408  }
  0x79   :  { %855 = vmatpush1.bf16.msra.mxu0 %v431_v14  ;;  %1128 = vmatpush1.bf16.msra.mxu1 %v437_v15  ;;  %v12242_v37 = vld [vmem:[%s16377_s0 + $0x104] ss:$112 sps:$4 sm:$0x3f]   ;;  %v12266_v40 = vld [vmem:[%s16378_s1 + $0x30] ss:$8 sps:$4 sm:$0xff]  }
  0x7a   :  { %856 = vmatprep.subr.bf16.mxu0 %v11386_v1  ;;  %1129 = vmatprep.subr.bf16.mxu1 %v12126_v16  ;;  %v12271_v41 = vld [vmem:[%s16378_s1 + $0x44] ss:$8 sps:$4 sm:$0xff]   ;;  %v12279_v42 = vld [vmem:[%s16377_s0 + $0x108] ss:$112 sps:$4 sm:$0x3f]   ;;  %v12294_v43 = vsel %vm425_vm0, %v12242_v37, 0 }
  0x7b   :  { %v12299_v44 = vld [vmem:[%s16378_s1 + $0x40] ss:$8 sps:$4 sm:$0xff]   ;;  %v12304_v45 = vld [vmem:[%s16378_s1 + $0x54] ss:$8 sps:$4 sm:$0xff]   ;;  %v12327_v47 = vld [vmem:[%s16378_s1 + $0x50] ss:$8 sps:$4 sm:$0xff]  }
  0x7c   :  { %v12313_v46 = vld [vmem:[%s16377_s0 + $0x2c] ss:$112 sps:$4 sm:$0xff]   ;;  %v12345_v49 = vld [vmem:[%s16378_s1 + $0x60] ss:$8 sps:$4 sm:$0xff]   ;;  %v12368_v52 = vld [vmem:[%s16378_s1 + $0x70] ss:$8 sps:$4 sm:$0xff]  }
  0x7d   :  { %857 = vmatpush1.bf16.msra.mxu0 %v11389_v3  ;;  %1130 = vmatpush1.bf16.msra.mxu1 %v12106_v8  ;;  %v12332_v48 = vld [vmem:[%s16378_s1 + $0x64] ss:$8 sps:$4 sm:$0xff]   ;;  %v12350_v50 = vld [vmem:[%s16378_s1 + $0x74] ss:$8 sps:$4 sm:$0xff]   ;;  %v12379_v54 = vsel %vm425_vm0, %v12279_v42, 0 }
  0x7e   :  { %9907 = vmatprep.subr.msk.bf16.mxu0 %vm425_vm0, %v11392_v5  ;;  %9936 = vmatprep.subr.msk.bf16.mxu1 %vm425_vm0, %v11401_v17  ;;  %v12361_v51 = vld [vmem:[%s16377_s0 + $0x10c] ss:$112 sps:$4 sm:$0x3f]   ;;  %v12390_v55 = vld [vmem:[%s16378_s1 + $0x80] ss:$8 sps:$4 sm:$0xff]  }
  0x7f   :  { %v12373_v53 = vld [vmem:[%s16378_s1 + $0x84] ss:$8 sps:$4 sm:$0xff]   ;;  %v12395_v56 = vld [vmem:[%s16378_s1 + $0x94] ss:$8 sps:$4 sm:$0xff]   ;;  %v12406_v57 = vld [vmem:[%s16378_s1 + $0x90] ss:$8 sps:$4 sm:$0xff]  }
  0x80   :  { %v12411_v58 = vld [vmem:[%s16378_s1 + $0xa4] ss:$8 sps:$4 sm:$0xff]   ;;  %v12422_v59 = vld [vmem:[%s16378_s1 + $0xa0] ss:$8 sps:$4 sm:$0xff]   ;;  %v12427_v60 = vld [vmem:[%s16378_s1 + $0xb4] ss:$8 sps:$4 sm:$0xff]  }
  0x81   :  { %859 = vmatpush1.bf16.msra.mxu0 %v434_v10  ;;  %1132 = vmatpush1.bf16.msra.mxu1 %v440_v18  ;;  %v12438_v61 = vld [vmem:[%s16378_s1 + $0xb0] ss:$8 sps:$4 sm:$0xff]   ;;  %v12443_v62 = vld [vmem:[%s16378_s1 + $0xc4] ss:$8 sps:$4 sm:$0xff]   ;;  %v12454_v63 = vld [vmem:[%s16378_s1 + $0xc0] ss:$8 sps:$4 sm:$0xff]  }
  0x82   :  { %860 = vmatprep.subr.bf16.mxu0 %v12106_v8  ;;  %1133 = vmatprep.subr.bf16.mxu1 %v12143_v19  ;;  %v12459_v0 = vld [vmem:[%s16378_s1 + $0xd4] ss:$8 sps:$4 sm:$0xff]   ;;  %v12475_v2 = vld [vmem:[%s16378_s1 + $0xe4] ss:$8 sps:$4 sm:$0xff]   ;;  %v12486_v3 = vld [vmem:[%s16378_s1 + $0xe0] ss:$8 sps:$4 sm:$0xff]  }
  0x83   :  { %v12491_v4 = vld [vmem:[%s16378_s1 + $0xf4] ss:$8 sps:$4 sm:$0xff]   ;;  %v12502_v5 = vld [vmem:[%s16378_s1 + $0xf0] ss:$8 sps:$4 sm:$0xff]   ;;  %v12507_v6 = vld [vmem:[%s16378_s1 + $0x104] ss:$8 sps:$4 sm:$0xff]  }
  0x84   :  { %v12518_v7 = vld [vmem:[%s16378_s1 + $0x100] ss:$8 sps:$4 sm:$0xff]   ;;  %v12534_v9 = vld [vmem:[%s16378_s1 + $0x110] ss:$8 sps:$4 sm:$0xff]   ;;  %v12539_v10 = vld [vmem:[%s16378_s1 + $0x124] ss:$8 sps:$4 sm:$0xff]  }
  0x85   :  { %861 = vmatpush1.bf16.msra.mxu0 %v11386_v1  ;;  %1134 = vmatpush1.bf16.msra.mxu1 %v12126_v16  ;;  %v12470_v1 = vld [vmem:[%s16378_s1 + $0xd0] ss:$8 sps:$4 sm:$0xff]   ;;  %v12555_v12 = vld [vmem:[%s16378_s1 + $0x134] ss:$8 sps:$4 sm:$0xff]   ;;  %v461_v24 = vsel %vm425_vm0, %v12361_v51, 0 }
  0x86   :  { %9908 = vmatprep.subr.msk.bf16.mxu0 %vm425_vm0, %v11398_v11  ;;  %9937 = vmatprep.subr.msk.bf16.mxu1 %vm425_vm0, %v11404_v20  ;;  %v12550_v11 = vld [vmem:[%s16378_s1 + $0x120] ss:$8 sps:$4 sm:$0xff]   ;;  %16705 = vst [vmem:[#allocation16_spill] sm:$0xff] %v12555_v12  ;;  %v12566_v14 = vld [vmem:[%s16378_s1 + $0x130] ss:$8 sps:$4 sm:$0xff]  }
  0x87   :  { %16706 = vst [vmem:[#allocation17_spill] sm:$0xff] %v12566_v14  ;;  %v11494_v23 = vld [vmem:[%s16377_s0 + $0x110] ss:$112 sps:$4 sm:$0x3f]  }
  0x89   :  { %863 = vmatpush1.bf16.msra.mxu0 %v437_v15  ;;  %1136 = vmatpush1.bf16.msra.mxu1 %v443_v21  ;;  %v12571_v15 = vld [vmem:[%s16378_s1 + $0x144] ss:$8 sps:$4 sm:$0xff]  }
  0x8a   :  { %864 = vmatprep.subr.bf16.mxu0 %v12126_v16  ;;  %1137 = vmatprep.subr.bf16.mxu1 %v12157_v22  ;;  %16707 = vst [vmem:[#allocation18_spill] sm:$0xff] %v12571_v15 }
  0x8d   :  { %865 = vmatpush1.bf16.msra.mxu0 %v12106_v8  ;;  %1138 = vmatpush1.bf16.msra.mxu1 %v12143_v19 }
  0x8e   :  { %9909 = vmatprep.subr.msk.bf16.mxu0 %vm425_vm0, %v11401_v17  ;;  %9938 = vmatprep.subr.msk.bf16.mxu1 %vm425_vm0, %v11407_v25 }
  0x91   :  { %867 = vmatpush1.bf16.msra.mxu0 %v440_v18  ;;  %1140 = vmatpush1.bf16.msra.mxu1 %v446_v26 }
  0x92   :  { %1394 = vmatprep.subr.bf16.mxu0 %v12126_v16  ;;  %1667 = vmatprep.subr.bf16.mxu1 %v12157_v22 }
  0x94   :  { %881 = vmatmul.mubr.bf16.vlgmr.msra.gmra.mrb[0].mxu0 %v12172_v27  ;;  %1154 = vmatmul.mubr.bf16.vlgmr.msra.gmra.mrb[0].mxu1 %v12172_v27 }
  0x95   :  { %9911 = vmatprep.mubr.msk.bf16.mxu0 %vm775_vm1, %v12177_v28  ;;  %9940 = vmatprep.mubr.msk.bf16.mxu1 %vm775_vm1, %v12177_v28 }
  0x96   :  { %1395 = vmatpush1.bf16.msra.mxu0 %v12106_v8  ;;  %1668 = vmatpush1.bf16.msra.mxu1 %v12143_v19  ;;  %v12523_v8 = vld [vmem:[%s16378_s1 + $0x114] ss:$8 sps:$4 sm:$0xff]  }
  0x97   :  { %9963 = vmatprep.subr.msk.bf16.mxu0 %vm425_vm0, %v11401_v17  ;;  %9992 = vmatprep.subr.msk.bf16.mxu1 %vm425_vm0, %v11407_v25  ;;  %v12587_v17 = vld [vmem:[%s16378_s1 + $0x154] ss:$8 sps:$4 sm:$0xff]  }
  0x98   :  { %16709 = vst [vmem:[#allocation20_spill] sm:$0xff] %v12587_v17 }
  0x9a   :  { %1397 = vmatpush1.bf16.msra.mxu0 %v440_v18  ;;  %1670 = vmatpush1.bf16.msra.mxu1 %v446_v26  ;;  %v12598_v18 = vld [vmem:[%s16378_s1 + $0x150] ss:$8 sps:$4 sm:$0xff]  }
  0x9b   :  { %1398 = vmatprep.subr.bf16.mxu0 %v12143_v19  ;;  %1671 = vmatprep.subr.bf16.mxu1 %v12190_v29  ;;  %16710 = vst [vmem:[#allocation21_spill] sm:$0xff] %v12598_v18 }
  0x9c   :  { %891 = vmatmul.mubr.bf16.gmra.mrb[4].mxu0 %v12195_v30  ;;  %1164 = vmatmul.mubr.bf16.gmra.mrb[4].mxu1 %v12195_v30 }
  0x9d   :  { %9912 = vmatprep.mubr.msk.bf16.mxu0 %vm775_vm1, %v12202_v31  ;;  %9941 = vmatprep.mubr.msk.bf16.mxu1 %vm775_vm1, %v12202_v31 }
  0x9e   :  { %1399 = vmatpush1.bf16.msra.mxu0 %v12126_v16  ;;  %1672 = vmatpush1.bf16.msra.mxu1 %v12157_v22  ;;  %v12582_v16 = vld [vmem:[%s16378_s1 + $0x140] ss:$8 sps:$4 sm:$0xff]  }
  0x9f   :  { %9964 = vmatprep.subr.msk.bf16.mxu0 %vm425_vm0, %v11404_v20  ;;  %9993 = vmatprep.subr.msk.bf16.mxu1 %vm425_vm0, %v11437_v32  ;;  %16708 = vst [vmem:[#allocation19_spill] sm:$0xff] %v12582_v16  ;;  %v11487_v20 = vld [vmem:[%s16378_s1 + $0x160] ss:$8 sps:$4 sm:$0xff]  }
  0xa2   :  { %1401 = vmatpush1.bf16.msra.mxu0 %v443_v21  ;;  %1674 = vmatpush1.bf16.msra.mxu1 %v449_v35  ;;  %v11488_v21 = vld [vmem:[%s16378_s1 + $0x174] ss:$8 sps:$4 sm:$0xff]  }
  0xa3   :  { %1402 = vmatprep.subr.bf16.mxu0 %v12157_v22  ;;  %1675 = vmatprep.subr.bf16.mxu1 %v12220_v33 }
  0xa4   :  { %901 = vmatmul.mubr.bf16.gmra.mrb[8].mxu0 %v12225_v34  ;;  %1174 = vmatmul.mubr.bf16.gmra.mrb[8].mxu1 %v12225_v34 }
  0xa5   :  { %9913 = vmatprep.mubr.msk.bf16.mxu0 %vm775_vm1, %v12235_v36  ;;  %9942 = vmatprep.mubr.msk.bf16.mxu1 %vm775_vm1, %v12235_v36 }
  0xa6   :  { %1403 = vmatpush1.bf16.msra.mxu0 %v12143_v19  ;;  %1676 = vmatpush1.bf16.msra.mxu1 %v12190_v29  ;;  %v12603_v19 = vld [vmem:[%s16378_s1 + $0x164] ss:$8 sps:$4 sm:$0xff]  }
  0xa7   :  { %9965 = vmatprep.subr.msk.bf16.mxu0 %vm425_vm0, %v11407_v25  ;;  %9994 = vmatprep.subr.msk.bf16.mxu1 %vm425_vm0, %v12242_v37  ;;  %16711 = vst [vmem:[#allocation22_spill] sm:$0xff] %v12603_v19  ;;  %v12666_v25 = vld [vmem:[%s16377_s0 + $0x34] ss:$112 sps:$4 sm:$0xff]  }
  0xaa   :  { %1405 = vmatpush1.bf16.msra.mxu0 %v446_v26  ;;  %1678 = vmatpush1.bf16.msra.mxu1 %v12256_v38  ;;  %v12674_v26 = vld [vmem:[%s16377_s0 + $0x114] ss:$112 sps:$4 sm:$0x3f]  }
  0xab   :  { %1406 = vmatprep.subr.bf16.mxu0 %v12190_v29  ;;  %1679 = vmatprep.subr.bf16.mxu1 %v12261_v39 }
  0xac   :  { %911 = vmatmul.mubr.bf16.gmra.mrb[12].mxu0 %v12266_v40  ;;  %1184 = vmatmul.mubr.bf16.gmra.mrb[12].mxu1 %v12266_v40 }
  0xad   :  { %9914 = vmatprep.mubr.msk.bf16.mxu0 %vm775_vm1, %v12271_v41  ;;  %9943 = vmatprep.mubr.msk.bf16.mxu1 %vm775_vm1, %v12271_v41 }
  0xae   :  { %1407 = vmatpush1.bf16.msra.mxu0 %v12157_v22  ;;  %1680 = vmatpush1.bf16.msra.mxu1 %v12220_v33  ;;  %v11491_v22 = vld [vmem:[%s16378_s1 + $0x170] ss:$8 sps:$4 sm:$0xff]  }
  0xaf   :  { %9966 = vmatprep.subr.msk.bf16.mxu0 %vm425_vm0, %v11437_v32  ;;  %9995 = vmatprep.subr.msk.bf16.mxu1 %vm425_vm0, %v12279_v42 }
  0xb2   :  { %1409 = vmatpush1.bf16.msra.mxu0 %v449_v35  ;;  %1682 = vmatpush1.bf16.msra.mxu1 %v12294_v43 }
  0xb3   :  { %1410 = vmatprep.subr.bf16.mxu0 %v12220_v33  ;;  %1683 = vmatprep.subr.bf16.mxu1 %v12313_v46 }
  0xb4   :  { %921 = vmatmul.mubr.bf16.gmra.mrb[16].mxu0 %v12299_v44  ;;  %1194 = vmatmul.mubr.bf16.gmra.mrb[16].mxu1 %v12299_v44 }
  0xb5   :  { %9915 = vmatprep.mubr.msk.bf16.mxu0 %vm775_vm1, %v12304_v45  ;;  %9944 = vmatprep.mubr.msk.bf16.mxu1 %vm775_vm1, %v12304_v45 }
  0xb6   :  { %1411 = vmatpush1.bf16.msra.mxu0 %v12190_v29  ;;  %1684 = vmatpush1.bf16.msra.mxu1 %v12261_v39 }
  0xb7   :  { %9967 = vmatprep.subr.msk.bf16.mxu0 %vm425_vm0, %v12242_v37  ;;  %9996 = vmatprep.subr.msk.bf16.mxu1 %vm425_vm0, %v12361_v51 }
  0xba   :  { %1413 = vmatpush1.bf16.msra.mxu0 %v12256_v38  ;;  %1686 = vmatpush1.bf16.msra.mxu1 %v12379_v54 }
  0xbb   :  { %1940 = vmatprep.subr.bf16.mxu0 %v12220_v33  ;;  %2213 = vmatprep.subr.bf16.mxu1 %v12313_v46 }
  0xbc   :  { %931 = vmatmul.mubr.bf16.gmra.mrb[20].mxu0 %v12327_v47  ;;  %1204 = vmatmul.mubr.bf16.gmra.mrb[20].mxu1 %v12327_v47 }
  0xbd   :  { %9916 = vmatprep.mubr.msk.bf16.mxu0 %vm775_vm1, %v12332_v48  ;;  %9945 = vmatprep.mubr.msk.bf16.mxu1 %vm775_vm1, %v12332_v48 }
  0xc4   :  { %941 = vmatmul.mubr.bf16.gmra.mrb[24].mxu0 %v12345_v49  ;;  %1214 = vmatmul.mubr.bf16.gmra.mrb[24].mxu1 %v12345_v49 }
  0xc5   :  { %9917 = vmatprep.mubr.msk.bf16.mxu0 %vm775_vm1, %v12350_v50  ;;  %9946 = vmatprep.mubr.msk.bf16.mxu1 %vm775_vm1, %v12350_v50 }
  0xcc   :  { %951 = vmatmul.mubr.bf16.gmra.mrb[28].mxu0 %v12368_v52  ;;  %1224 = vmatmul.mubr.bf16.gmra.mrb[28].mxu1 %v12368_v52 }
  0xcd   :  { %9918 = vmatprep.mubr.msk.bf16.mxu0 %vm775_vm1, %v12373_v53  ;;  %9947 = vmatprep.mubr.msk.bf16.mxu1 %vm775_vm1, %v12373_v53 }
  0xd4   :  { %961 = vmatmul.mubr.bf16.gmra.mrb[32].mxu0 %v12390_v55  ;;  %1234 = vmatmul.mubr.bf16.gmra.mrb[32].mxu1 %v12390_v55 }
  0xd5   :  { %9919 = vmatprep.mubr.msk.bf16.mxu0 %vm775_vm1, %v12395_v56  ;;  %9948 = vmatprep.mubr.msk.bf16.mxu1 %vm775_vm1, %v12395_v56 }
  0xdc   :  { %971 = vmatmul.mubr.bf16.gmra.mrb[36].mxu0 %v12406_v57  ;;  %1244 = vmatmul.mubr.bf16.gmra.mrb[36].mxu1 %v12406_v57 }
  0xdd   :  { %9920 = vmatprep.mubr.msk.bf16.mxu0 %vm775_vm1, %v12411_v58  ;;  %9949 = vmatprep.mubr.msk.bf16.mxu1 %vm775_vm1, %v12411_v58 }
  0xe4   :  { %981 = vmatmul.mubr.bf16.gmra.mrb[40].mxu0 %v12422_v59  ;;  %1254 = vmatmul.mubr.bf16.gmra.mrb[40].mxu1 %v12422_v59 }
  0xe5   :  { %9921 = vmatprep.mubr.msk.bf16.mxu0 %vm775_vm1, %v12427_v60  ;;  %9950 = vmatprep.mubr.msk.bf16.mxu1 %vm775_vm1, %v12427_v60 }
  0xec   :  { %991 = vmatmul.mubr.bf16.gmra.mrb[44].mxu0 %v12438_v61  ;;  %1264 = vmatmul.mubr.bf16.gmra.mrb[44].mxu1 %v12438_v61 }
  0xed   :  { %9922 = vmatprep.mubr.msk.bf16.mxu0 %vm775_vm1, %v12443_v62  ;;  %9951 = vmatprep.mubr.msk.bf16.mxu1 %vm775_vm1, %v12443_v62 }
  0xf4   :  { %1001 = vmatmul.mubr.bf16.gmra.mrb[48].mxu0 %v12454_v63  ;;  %1274 = vmatmul.mubr.bf16.gmra.mrb[48].mxu1 %v12454_v63 }
  0xf5   :  { %9923 = vmatprep.mubr.msk.bf16.mxu0 %vm775_vm1, %v12459_v0  ;;  %9952 = vmatprep.mubr.msk.bf16.mxu1 %vm775_vm1, %v12459_v0 }
  0xfc   :  { %1011 = vmatmul.mubr.bf16.gmra.mrb[52].mxu0 %v12470_v1  ;;  %1284 = vmatmul.mubr.bf16.gmra.mrb[52].mxu1 %v12470_v1 }
  0xfd   :  { %9924 = vmatprep.mubr.msk.bf16.mxu0 %vm775_vm1, %v12475_v2  ;;  %9953 = vmatprep.mubr.msk.bf16.mxu1 %vm775_vm1, %v12475_v2 }
 0x104   :  { %1021 = vmatmul.mubr.bf16.gmra.mrb[56].mxu0 %v12486_v3  ;;  %1294 = vmatmul.mubr.bf16.gmra.mrb[56].mxu1 %v12486_v3 }
 0x105   :  { %9925 = vmatprep.mubr.msk.bf16.mxu0 %vm775_vm1, %v12491_v4  ;;  %9954 = vmatprep.mubr.msk.bf16.mxu1 %vm775_vm1, %v12491_v4 }
 0x10c   :  { %1031 = vmatmul.mubr.bf16.gmra.mrb[60].mxu0 %v12502_v5  ;;  %1304 = vmatmul.mubr.bf16.gmra.mrb[60].mxu1 %v12502_v5 }
 0x10d   :  { %9926 = vmatprep.mubr.msk.bf16.mxu0 %vm775_vm1, %v12507_v6  ;;  %9955 = vmatprep.mubr.msk.bf16.mxu1 %vm775_vm1, %v12507_v6 }
 0x114   :  { %1041 = vmatmul.mubr.bf16.gmra.mrb[64].mxu0 %v12518_v7  ;;  %1314 = vmatmul.mubr.bf16.gmra.mrb[64].mxu1 %v12518_v7 }
 0x115   :  { %9927 = vmatprep.mubr.msk.bf16.mxu0 %vm775_vm1, %v12523_v8  ;;  %9956 = vmatprep.mubr.msk.bf16.mxu1 %vm775_vm1, %v12523_v8 }
 0x11c   :  { %1051 = vmatmul.mubr.bf16.gmra.mrb[68].mxu0 %v12534_v9  ;;  %1324 = vmatmul.mubr.bf16.gmra.mrb[68].mxu1 %v12534_v9 }
 0x11d   :  { %9928 = vmatprep.mubr.msk.bf16.mxu0 %vm775_vm1, %v12539_v10  ;;  %9957 = vmatprep.mubr.msk.bf16.mxu1 %vm775_vm1, %v12539_v10 }
 0x124   :  { %1061 = vmatmul.mubr.bf16.gmra.mrb[72].mxu0 %v12550_v11  ;;  %1334 = vmatmul.mubr.bf16.gmra.mrb[72].mxu1 %v12550_v11 }
 0x125   :  { %9929 = vmatprep.mubr.msk.bf16.mxu0 %vm775_vm1, %v12555_v12  ;;  %9958 = vmatprep.mubr.msk.bf16.mxu1 %vm775_vm1, %v12555_v12 }
 0x12c   :  { %1071 = vmatmul.mubr.bf16.gmra.mrb[76].mxu0 %v12566_v14  ;;  %1344 = vmatmul.mubr.bf16.gmra.mrb[76].mxu1 %v12566_v14 }
 0x12d   :  { %9930 = vmatprep.mubr.msk.bf16.mxu0 %vm775_vm1, %v12571_v15  ;;  %9959 = vmatprep.mubr.msk.bf16.mxu1 %vm775_vm1, %v12571_v15 }
 0x134   :  { %1081 = vmatmul.mubr.bf16.gmra.mrb[80].mxu0 %v12582_v16  ;;  %1354 = vmatmul.mubr.bf16.gmra.mrb[80].mxu1 %v12582_v16 }
 0x135   :  { %9931 = vmatprep.mubr.msk.bf16.mxu0 %vm775_vm1, %v12587_v17  ;;  %9960 = vmatprep.mubr.msk.bf16.mxu1 %vm775_vm1, %v12587_v17 }
 0x13c   :  { %1091 = vmatmul.mubr.bf16.gmra.mrb[84].mxu0 %v12598_v18  ;;  %1364 = vmatmul.mubr.bf16.gmra.mrb[84].mxu1 %v12598_v18 }
 0x13d   :  { %9932 = vmatprep.mubr.msk.bf16.mxu0 %vm775_vm1, %v12603_v19  ;;  %9961 = vmatprep.mubr.msk.bf16.mxu1 %vm775_vm1, %v12603_v19 }
 0x144   :  { %1101 = vmatmul.mubr.bf16.gmra.mrb[88].mxu0 %v11487_v20  ;;  %1374 = vmatmul.mubr.bf16.gmra.mrb[88].mxu1 %v11487_v20 }
 0x145   :  { %9933 = vmatprep.mubr.msk.bf16.mxu0 %vm775_vm1, %v11488_v21  ;;  %9962 = vmatprep.mubr.msk.bf16.mxu1 %vm775_vm1, %v11488_v21 }
 0x14c   :  { %1111 = vmatmul.mubr.bf16.gmra.mrb[92].mxu0 %v11491_v22  ;;  %1384 = vmatmul.mubr.bf16.gmra.mrb[92].mxu1 %v11491_v22 }
 0x14d   :  { %9968 = vmatprep.mubr.msk.bf16.mxu0 %vm775_vm1, %v12117_v13  ;;  %9997 = vmatprep.mubr.msk.bf16.mxu1 %vm775_vm1, %v12117_v13  ;;  %v12641_v13 = vld [vmem:[%s16377_s0 + $0x30] ss:$112 sps:$4 sm:$0xff]  }
 0x154   :  { %1427 = vmatmul.mubr.bf16.vlgmr.msra.gmra.mrb[96].mxu0 %v12172_v27  ;;  %1700 = vmatmul.mubr.bf16.vlgmr.msra.gmra.mrb[96].mxu1 %v12172_v27 }
 0x155   :  { %9969 = vmatprep.mubr.msk.bf16.mxu0 %vm775_vm1, %v12177_v28  ;;  %9998 = vmatprep.mubr.msk.bf16.mxu1 %vm775_vm1, %v12177_v28 }
 0x156   :  { %1941 = vmatpush1.bf16.msra.mxu0 %v12190_v29  ;;  %2214 = vmatpush1.bf16.msra.mxu1 %v12261_v39  ;;  %v12689_v29 = vsel %vm425_vm0, %v11494_v23, 0 }
 0x157   :  { %10021 = vmatprep.subr.msk.bf16.mxu0 %vm425_vm0, %v12242_v37  ;;  %10050 = vmatprep.subr.msk.bf16.mxu1 %vm425_vm0, %v12361_v51  ;;  %v12703_v37 = vld [vmem:[%s16377_s0 + $0x118] ss:$112 sps:$4 sm:$0x3f]  }
 0x15a   :  { %1943 = vmatpush1.bf16.msra.mxu0 %v12256_v38  ;;  %2216 = vmatpush1.bf16.msra.mxu1 %v12379_v54  ;;  %v12711_v38 = vpop.permute.xlu0 %4728 }
 0x15b   :  { %1944 = vmatprep.subr.bf16.mxu0 %v12261_v39  ;;  %2217 = vmatprep.subr.bf16.mxu1 %v12641_v13 }
 0x15c   :  { %1437 = vmatmul.mubr.bf16.gmra.mrb[100].mxu0 %v12195_v30  ;;  %1710 = vmatmul.mubr.bf16.gmra.mrb[100].mxu1 %v12195_v30  ;;  %v12694_v30 = vld [vmem:[%s16377_s0 + $0x38] ss:$112 sps:$4 sm:$0xff]  }
 0x15d   :  { %9970 = vmatprep.mubr.msk.bf16.mxu0 %vm775_vm1, %v12202_v31  ;;  %9999 = vmatprep.mubr.msk.bf16.mxu1 %vm775_vm1, %v12202_v31 }
 0x15e   :  { %1945 = vmatpush1.bf16.msra.mxu0 %v12220_v33  ;;  %2218 = vmatpush1.bf16.msra.mxu1 %v12313_v46 }
 0x15f   :  { %10022 = vmatprep.subr.msk.bf16.mxu0 %vm425_vm0, %v12279_v42  ;;  %10051 = vmatprep.subr.msk.bf16.mxu1 %vm425_vm0, %v11494_v23 }
 0x162   :  { %1947 = vmatpush1.bf16.msra.mxu0 %v12294_v43  ;;  %2220 = vmatpush1.bf16.msra.mxu1 %v461_v24 }
 0x163   :  { %1948 = vmatprep.subr.bf16.mxu0 %v12313_v46  ;;  %2221 = vmatprep.subr.bf16.mxu1 %v12666_v25 }
 0x164   :  { %1447 = vmatmul.mubr.bf16.gmra.mrb[104].mxu0 %v12225_v34  ;;  %1720 = vmatmul.mubr.bf16.gmra.mrb[104].mxu1 %v12225_v34 }
 0x165   :  { %9971 = vmatprep.mubr.msk.bf16.mxu0 %vm775_vm1, %v12235_v36  ;;  %10000 = vmatprep.mubr.msk.bf16.mxu1 %vm775_vm1, %v12235_v36 }
 0x166   :  { %1949 = vmatpush1.bf16.msra.mxu0 %v12261_v39  ;;  %2222 = vmatpush1.bf16.msra.mxu1 %v12641_v13 }
 0x167   :  { %v882_v27 = vpop.f32.mrb[0].mxu0  ;;  %v1155_v28 = vpop.f32.mrb[0].mxu1  ;;  %10023 = vmatprep.subr.msk.bf16.mxu0 %vm425_vm0, %v12361_v51  ;;  %10052 = vmatprep.subr.msk.bf16.mxu1 %vm425_vm0, %v12674_v26 }
 0x168   :  { %v884_v31 = vpop.f32.mrb[1].mxu0  ;;  %v1157_v32 = vpop.f32.mrb[1].mxu1 }
 0x169   :  { %v886_v33 = vpop.f32.mrb[2].mxu0  ;;  %v1159_v34 = vpop.f32.mrb[2].mxu1 }
 0x16a   :  { %v888_v35 = vpop.f32.mrb[3].mxu0  ;;  %v1161_v36 = vpop.f32.mrb[3].mxu1  ;;  %1951 = vmatpush1.bf16.msra.mxu0 %v12379_v54  ;;  %2224 = vmatpush1.bf16.msra.mxu1 %v12689_v29 }
 0x16b   :  { %1952 = vmatprep.subr.bf16.mxu0 %v12641_v13  ;;  %2225 = vmatprep.subr.bf16.mxu1 %v12694_v30 }
 0x16c   :  { %1457 = vmatmul.mubr.bf16.gmra.mrb[108].mxu0 %v12266_v40  ;;  %1730 = vmatmul.mubr.bf16.gmra.mrb[108].mxu1 %v12266_v40  ;;  %v12720_v40 = vsel %vm425_vm0, %v12674_v26, 0 }
 0x16d   :  { %9972 = vmatprep.mubr.msk.bf16.mxu0 %vm775_vm1, %v12271_v41  ;;  %10001 = vmatprep.mubr.msk.bf16.mxu1 %vm775_vm1, %v12271_v41 }
 0x16e   :  { %1953 = vmatpush1.bf16.msra.mxu0 %v12313_v46  ;;  %2226 = vmatpush1.bf16.msra.mxu1 %v12666_v25 }
 0x16f   :  { %v892_v39 = vpop.f32.mrb[4].mxu0  ;;  %v1165_v42 = vpop.f32.mrb[4].mxu1  ;;  %10024 = vmatprep.subr.msk.bf16.mxu0 %vm425_vm0, %v11494_v23  ;;  %10053 = vmatprep.subr.msk.bf16.mxu1 %vm425_vm0, %v12703_v37 }
 0x170   :  { %v4124_v43 = vmax.f32 %v882_v27, %v892_v39  ;;  %v4126_v51 = vmax.f32 %v1155_v28, %v1165_v42  ;;  %v894_v41 = vpop.f32.mrb[5].mxu0  ;;  %v1167_v54 = vpop.f32.mrb[5].mxu1 }
 0x171   :  { %v4125_v20 = vmax.f32 %v884_v31, %v894_v41  ;;  %v4127_v21 = vmax.f32 %v1157_v32, %v1167_v54  ;;  %v896_v46 = vpop.f32.mrb[6].mxu0  ;;  %v1169_v22 = vpop.f32.mrb[6].mxu1 }
 0x172   :  { %v4148_v19 = vmax.f32 %v886_v33, %v896_v46  ;;  %v4150_v18 = vmax.f32 %v1159_v34, %v1169_v22  ;;  %v898_v17 = vpop.f32.mrb[7].mxu0  ;;  %v1171_v16 = vpop.f32.mrb[7].mxu1  ;;  %1955 = vmatpush1.bf16.msra.mxu0 %v461_v24  ;;  %2228 = vmatpush1.bf16.msra.mxu1 %v12720_v40 }
 0x173   :  { %v4702_v23 = vmax.f32 %v4124_v43, %v4125_v20  ;;  %v4796_v15 = vmax.f32 %v4126_v51, %v4127_v21  ;;  %v4149_v14 = vmax.f32 %v888_v35, %v898_v17  ;;  %v4151_v12 = vmax.f32 %v1161_v36, %v1171_v16  ;;  %1956 = vmatprep.subr.bf16.mxu0 %v12666_v25  ;;  %v12726_v27 = vpop.permute.xlu0 %4733 }
 0x174   :  { %1467 = vmatmul.mubr.bf16.gmra.mrb[112].mxu0 %v12299_v44  ;;  %1740 = vmatmul.mubr.bf16.gmra.mrb[112].mxu1 %v12299_v44 }
 0x175   :  { %v4703_v28 = vmax.f32 %v4148_v19, %v4149_v14  ;;  %v4797_v31 = vmax.f32 %v4150_v18, %v4151_v12  ;;  %9973 = vmatprep.mubr.msk.bf16.mxu0 %vm775_vm1, %v12304_v45  ;;  %10002 = vmatprep.mubr.msk.bf16.mxu1 %vm775_vm1, %v12304_v45  ;;  %v4820_v24 = vadd.f32 %v4796_v15, %v12711_v38  ;;  %v12742_v15 = vld [vmem:[%s16377_s0 + $0x3c] ss:$112 sps:$4 sm:$0xff]  }
 0x176   :  { %1957 = vmatpush1.bf16.msra.mxu0 %v12641_v13  ;;  %v4736_v16 = vadd.f32 %v12711_v38, %v4702_v23  ;;  %2229 = vmatprep.subr.bf16.mxu1 %v12742_v15 }
 0x177   :  { %v902_v17 = vpop.f32.mrb[8].mxu0  ;;  %v1175_v32 = vpop.f32.mrb[8].mxu1  ;;  %10025 = vmatprep.subr.msk.bf16.mxu0 %vm425_vm0, %v12674_v26  ;;  %v4821_v44 = vadd.f32 %v4797_v31, %v12726_v27  ;;  %v4737_v12 = vadd.f32 %v12726_v27, %v4703_v28  ;;  %v4844_v19 = vmax.f32 %v4820_v24, 0.0  ;;  %2230 = vmatpush1.bf16.msra.mxu1 %v12694_v30 }
 0x178   :  { %v904_v14 = vpop.f32.mrb[9].mxu0  ;;  %v1177_v18 = vpop.f32.mrb[9].mxu1  ;;  %v4760_v33 = vmax.f32 %v4736_v16, 0.0 }
 0x179   :  { %v906_v45 = vpop.f32.mrb[10].mxu0  ;;  %v1179_v34 = vpop.f32.mrb[10].mxu1  ;;  %v4845_v13 = vmax.f32 %v4821_v44, 0.0  ;;  %v4761_v35 = vmax.f32 %v4737_v12, 0.0 }
 0x17a   :  { %v908_v36 = vpop.f32.mrb[11].mxu0  ;;  %v1181_v39 = vpop.f32.mrb[11].mxu1  ;;  %1959 = vmatpush1.bf16.msra.mxu0 %v12689_v29 }
 0x17b   :  { %2486 = vmatprep.subr.bf16.mxu0 %v12666_v25  ;;  %v12747_v26 = vpack.c.bf16 %v4845_v13, %v4844_v19  ;;  %v12749_v42 = vpack.c.bf16 %v4761_v35, %v4760_v33 }
 0x17c   :  { %1477 = vmatmul.mubr.bf16.gmra.mrb[116].mxu0 %v12327_v47  ;;  %1750 = vmatmul.mubr.bf16.gmra.mrb[116].mxu1 %v12327_v47 }
 0x17d   :  { %9974 = vmatprep.mubr.msk.bf16.mxu0 %vm775_vm1, %v12332_v48  ;;  %10003 = vmatprep.mubr.msk.bf16.mxu1 %vm775_vm1, %v12332_v48 }
 0x17f   :  { %v912_v43 = vpop.f32.mrb[12].mxu0  ;;  %v1185_v51 = vpop.f32.mrb[12].mxu1 }
 0x180   :  { %v4172_v41 = vmax.f32 %v902_v17, %v912_v43  ;;  %v4174_v25 = vmax.f32 %v1175_v32, %v1185_v51  ;;  %v914_v54 = vpop.f32.mrb[13].mxu0  ;;  %v1187_v20 = vpop.f32.mrb[13].mxu1 }
 0x181   :  { %v4173_v21 = vmax.f32 %v904_v14, %v914_v54  ;;  %v4175_v46 = vmax.f32 %v1177_v18, %v1187_v20  ;;  %v916_v22 = vpop.f32.mrb[14].mxu0  ;;  %v1189_v23 = vpop.f32.mrb[14].mxu1 }
 0x182   :  { %v4196_v28 = vmax.f32 %v906_v45, %v916_v22  ;;  %v4198_v47 = vmax.f32 %v1179_v34, %v1189_v23  ;;  %v918_v31 = vpop.f32.mrb[15].mxu0  ;;  %v1191_v24 = vpop.f32.mrb[15].mxu1 }
 0x183   :  { %v4704_v16 = vmax.f32 %v4172_v41, %v4173_v21  ;;  %v4798_v44 = vmax.f32 %v4174_v25, %v4175_v46  ;;  %v4197_v12 = vmax.f32 %v908_v36, %v918_v31  ;;  %v4199_v48 = vmax.f32 %v1181_v39, %v1191_v24 }
 0x184   :  { %1487 = vmatmul.mubr.bf16.gmra.mrb[120].mxu0 %v12345_v49  ;;  %1760 = vmatmul.mubr.bf16.gmra.mrb[120].mxu1 %v12345_v49  ;;  %v12781_v21 = vsel %vm425_vm0, %v12703_v37, 0 }
 0x185   :  { %v4738_v30 = vadd.f32 %v12711_v38, %v4704_v16  ;;  %v4705_v17 = vmax.f32 %v4196_v28, %v4197_v12  ;;  %v4799_v32 = vmax.f32 %v4198_v47, %v4199_v48  ;;  %9975 = vmatprep.mubr.msk.bf16.mxu0 %vm775_vm1, %v12350_v50  ;;  %10004 = vmatprep.mubr.msk.bf16.mxu1 %vm775_vm1, %v12350_v50  ;;  %v12771_v50 = vld [vmem:[%s16377_s0 + $0x11c] ss:$112 sps:$4 sm:$0x3f]  }
 0x186   :  { %v4822_v14 = vadd.f32 %v4798_v44, %v12711_v38  ;;  %10054 = vmatprep.subr.msk.bf16.mxu1 %vm425_vm0, %v12771_v50 }
 0x187   :  { %v4739_v18 = vadd.f32 %v12726_v27, %v4705_v17  ;;  %v922_v19 = vpop.f32.mrb[16].mxu0  ;;  %v1195_v33 = vpop.f32.mrb[16].mxu1  ;;  %v4823_v45 = vadd.f32 %v4799_v32, %v12726_v27  ;;  %v4762_v13 = vmax.f32 %v4738_v30, 0.0  ;;  %2232 = vmatpush1.bf16.msra.mxu1 %v12781_v21 }
 0x188   :  { %v924_v34 = vpop.f32.mrb[17].mxu0  ;;  %v1197_v49 = vpop.f32.mrb[17].mxu1  ;;  %v4846_v43 = vmax.f32 %v4822_v14, 0.0  ;;  %2759 = vmatprep.subr.bf16.mxu1 %v12742_v15 }
 0x189   :  { %v4763_v35 = vmax.f32 %v4739_v18, 0.0  ;;  %v926_v36 = vpop.f32.mrb[18].mxu0  ;;  %v1199_v39 = vpop.f32.mrb[18].mxu1  ;;  %v4847_v51 = vmax.f32 %v4823_v45, 0.0 }
 0x18a   :  { %v928_v41 = vpop.f32.mrb[19].mxu0  ;;  %v1201_v25 = vpop.f32.mrb[19].mxu1 }
 0x18b   :  { %v12773_v54 = vpack.c.bf16 %v4847_v51, %v4846_v43  ;;  %v12775_v20 = vpack.c.bf16 %v4763_v35, %v4762_v13 }
 0x18c   :  { %1497 = vmatmul.mubr.bf16.gmra.mrb[124].mxu0 %v12368_v52  ;;  %1770 = vmatmul.mubr.bf16.gmra.mrb[124].mxu1 %v12368_v52 }
 0x18d   :  { %9976 = vmatprep.mubr.msk.bf16.mxu0 %vm775_vm1, %v12373_v53  ;;  %10005 = vmatprep.mubr.msk.bf16.mxu1 %vm775_vm1, %v12373_v53 }
 0x18f   :  { %v932_v46 = vpop.f32.mrb[20].mxu0  ;;  %v1205_v22 = vpop.f32.mrb[20].mxu1 }
 0x190   :  { %v4220_v23 = vmax.f32 %v922_v19, %v932_v46  ;;  %v4222_v28 = vmax.f32 %v1195_v33, %v1205_v22  ;;  %v934_v52 = vpop.f32.mrb[21].mxu0  ;;  %v1207_v47 = vpop.f32.mrb[21].mxu1 }
 0x191   :  { %v4221_v37 = vmax.f32 %v924_v34, %v934_v52  ;;  %v4223_v31 = vmax.f32 %v1197_v49, %v1207_v47  ;;  %v936_v24 = vpop.f32.mrb[22].mxu0  ;;  %v1209_v16 = vpop.f32.mrb[22].mxu1 }
 0x192   :  { %v4244_v44 = vmax.f32 %v926_v36, %v936_v24  ;;  %v4246_v12 = vmax.f32 %v1199_v39, %v1209_v16  ;;  %v938_v53 = vpop.f32.mrb[23].mxu0  ;;  %v1211_v48 = vpop.f32.mrb[23].mxu1 }
 0x193   :  { %v4706_v30 = vmax.f32 %v4220_v23, %v4221_v37  ;;  %v4800_v17 = vmax.f32 %v4222_v28, %v4223_v31  ;;  %v4245_v32 = vmax.f32 %v928_v41, %v938_v53  ;;  %v4247_v14 = vmax.f32 %v1201_v25, %v1211_v48 }
 0x194   :  { %1507 = vmatmul.mubr.bf16.gmra.mrb[128].mxu0 %v12390_v55  ;;  %1780 = vmatmul.mubr.bf16.gmra.mrb[128].mxu1 %v12390_v55 }
 0x195   :  { %v4740_v18 = vadd.f32 %v12711_v38, %v4706_v30  ;;  %v4707_v19 = vmax.f32 %v4244_v44, %v4245_v32  ;;  %v4801_v33 = vmax.f32 %v4246_v12, %v4247_v14  ;;  %9977 = vmatprep.mubr.msk.bf16.mxu0 %vm775_vm1, %v12395_v56  ;;  %10006 = vmatprep.mubr.msk.bf16.mxu1 %vm775_vm1, %v12395_v56 }
 0x196   :  { %v4824_v45 = vadd.f32 %v4800_v17, %v12711_v38 }
 0x197   :  { %v4741_v34 = vadd.f32 %v12726_v27, %v4707_v19  ;;  %v942_v49 = vpop.f32.mrb[24].mxu0  ;;  %v1215_v13 = vpop.f32.mrb[24].mxu1  ;;  %v4825_v35 = vadd.f32 %v4801_v33, %v12726_v27  ;;  %v4764_v39 = vmax.f32 %v4740_v18, 0.0 }
 0x198   :  { %v944_v36 = vpop.f32.mrb[25].mxu0  ;;  %v1217_v55 = vpop.f32.mrb[25].mxu1  ;;  %v4848_v25 = vmax.f32 %v4824_v45, 0.0 }
 0x199   :  { %v4765_v43 = vmax.f32 %v4741_v34, 0.0  ;;  %v946_v51 = vpop.f32.mrb[26].mxu0  ;;  %v1219_v41 = vpop.f32.mrb[26].mxu1  ;;  %v4849_v46 = vmax.f32 %v4825_v35, 0.0 }
 0x19a   :  { %v948_v22 = vpop.f32.mrb[27].mxu0  ;;  %v1221_v23 = vpop.f32.mrb[27].mxu1 }
 0x19b   :  { %v12801_v28 = vpack.c.bf16 %v4849_v46, %v4848_v25  ;;  %v12803_v56 = vpack.c.bf16 %v4765_v43, %v4764_v39 }
 0x19c   :  { %1517 = vmatmul.mubr.bf16.gmra.mrb[132].mxu0 %v12406_v57  ;;  %1790 = vmatmul.mubr.bf16.gmra.mrb[132].mxu1 %v12406_v57 }
 0x19d   :  { %9978 = vmatprep.mubr.msk.bf16.mxu0 %vm775_vm1, %v12411_v58  ;;  %10007 = vmatprep.mubr.msk.bf16.mxu1 %vm775_vm1, %v12411_v58 }
 0x19f   :  { %v952_v52 = vpop.f32.mrb[28].mxu0  ;;  %v1225_v47 = vpop.f32.mrb[28].mxu1 }
 0x1a0   :  { %v4268_v37 = vmax.f32 %v942_v49, %v952_v52  ;;  %v4270_v31 = vmax.f32 %v1215_v13, %v1225_v47  ;;  %v954_v24 = vpop.f32.mrb[29].mxu0  ;;  %v1227_v16 = vpop.f32.mrb[29].mxu1 }
 0x1a1   :  { %v4269_v44 = vmax.f32 %v944_v36, %v954_v24  ;;  %v4271_v12 = vmax.f32 %v1217_v55, %v1227_v16  ;;  %v956_v53 = vpop.f32.mrb[30].mxu0  ;;  %v1229_v48 = vpop.f32.mrb[30].mxu1 }
 0x1a2   :  { %v4292_v30 = vmax.f32 %v946_v51, %v956_v53  ;;  %v4294_v17 = vmax.f32 %v1219_v41, %v1229_v48  ;;  %v958_v32 = vpop.f32.mrb[31].mxu0  ;;  %v1231_v57 = vpop.f32.mrb[31].mxu1 }
 0x1a3   :  { %v4708_v14 = vmax.f32 %v4268_v37, %v4269_v44  ;;  %v4802_v18 = vmax.f32 %v4270_v31, %v4271_v12  ;;  %v4293_v19 = vmax.f32 %v948_v22, %v958_v32  ;;  %v4295_v33 = vmax.f32 %v1221_v23, %v1231_v57 }
 0x1a4   :  { %1527 = vmatmul.mubr.bf16.gmra.mrb[136].mxu0 %v12422_v59  ;;  %1800 = vmatmul.mubr.bf16.gmra.mrb[136].mxu1 %v12422_v59 }
 0x1a5   :  { %v4742_v58 = vadd.f32 %v12711_v38, %v4708_v14  ;;  %v4709_v45 = vmax.f32 %v4292_v30, %v4293_v19  ;;  %v4803_v34 = vmax.f32 %v4294_v17, %v4295_v33  ;;  %9979 = vmatprep.mubr.msk.bf16.mxu0 %vm775_vm1, %v12427_v60  ;;  %10008 = vmatprep.mubr.msk.bf16.mxu1 %vm775_vm1, %v12427_v60 }
 0x1a6   :  { %v4826_v49 = vadd.f32 %v4802_v18, %v12711_v38 }
 0x1a7   :  { %v4743_v13 = vadd.f32 %v12726_v27, %v4709_v45  ;;  %v962_v35 = vpop.f32.mrb[32].mxu0  ;;  %v1235_v36 = vpop.f32.mrb[32].mxu1  ;;  %v4827_v55 = vadd.f32 %v4803_v34, %v12726_v27  ;;  %v4766_v43 = vmax.f32 %v4742_v58, 0.0 }
 0x1a8   :  { %v964_v39 = vpop.f32.mrb[33].mxu0  ;;  %v1237_v59 = vpop.f32.mrb[33].mxu1  ;;  %v4850_v46 = vmax.f32 %v4826_v49, 0.0 }
 0x1a9   :  { %v4767_v51 = vmax.f32 %v4743_v13, 0.0  ;;  %v966_v41 = vpop.f32.mrb[34].mxu0  ;;  %v1239_v25 = vpop.f32.mrb[34].mxu1  ;;  %v4851_v22 = vmax.f32 %v4827_v55, 0.0 }
 0x1aa   :  { %v968_v23 = vpop.f32.mrb[35].mxu0  ;;  %v1241_v52 = vpop.f32.mrb[35].mxu1 }
 0x1ab   :  { %v12821_v47 = vpack.c.bf16 %v4851_v22, %v4850_v46  ;;  %v12823_v60 = vpack.c.bf16 %v4767_v51, %v4766_v43 }
 0x1ac   :  { %1537 = vmatmul.mubr.bf16.gmra.mrb[140].mxu0 %v12438_v61  ;;  %1810 = vmatmul.mubr.bf16.gmra.mrb[140].mxu1 %v12438_v61 }
 0x1ad   :  { %9980 = vmatprep.mubr.msk.bf16.mxu0 %vm775_vm1, %v12443_v62  ;;  %10009 = vmatprep.mubr.msk.bf16.mxu1 %vm775_vm1, %v12443_v62 }
 0x1af   :  { %v972_v37 = vpop.f32.mrb[36].mxu0  ;;  %v1245_v31 = vpop.f32.mrb[36].mxu1 }
 0x1b0   :  { %v4316_v24 = vmax.f32 %v962_v35, %v972_v37  ;;  %v4318_v16 = vmax.f32 %v1235_v36, %v1245_v31  ;;  %v974_v44 = vpop.f32.mrb[37].mxu0  ;;  %v1247_v12 = vpop.f32.mrb[37].mxu1 }
 0x1b1   :  { %v4317_v53 = vmax.f32 %v964_v39, %v974_v44  ;;  %v4319_v48 = vmax.f32 %v1237_v59, %v1247_v12  ;;  %v976_v30 = vpop.f32.mrb[38].mxu0  ;;  %v1249_v17 = vpop.f32.mrb[38].mxu1 }
 0x1b2   :  { %v4340_v32 = vmax.f32 %v966_v41, %v976_v30  ;;  %v4342_v57 = vmax.f32 %v1239_v25, %v1249_v17  ;;  %v978_v14 = vpop.f32.mrb[39].mxu0  ;;  %v1251_v61 = vpop.f32.mrb[39].mxu1 }
 0x1b3   :  { %v4710_v18 = vmax.f32 %v4316_v24, %v4317_v53  ;;  %v4804_v19 = vmax.f32 %v4318_v16, %v4319_v48  ;;  %v4341_v33 = vmax.f32 %v968_v23, %v978_v14  ;;  %v4343_v58 = vmax.f32 %v1241_v52, %v1251_v61 }
 0x1b4   :  { %1547 = vmatmul.mubr.bf16.gmra.mrb[144].mxu0 %v12454_v63  ;;  %1820 = vmatmul.mubr.bf16.gmra.mrb[144].mxu1 %v12454_v63 }
 0x1b5   :  { %v4744_v62 = vadd.f32 %v12711_v38, %v4710_v18  ;;  %v4711_v45 = vmax.f32 %v4340_v32, %v4341_v33  ;;  %v4805_v34 = vmax.f32 %v4342_v57, %v4343_v58  ;;  %9981 = vmatprep.mubr.msk.bf16.mxu0 %vm775_vm1, %v12459_v0  ;;  %10010 = vmatprep.mubr.msk.bf16.mxu1 %vm775_vm1, %v12459_v0 }
 0x1b6   :  { %v4828_v49 = vadd.f32 %v4804_v19, %v12711_v38 }
 0x1b7   :  { %v4745_v13 = vadd.f32 %v12726_v27, %v4711_v45  ;;  %v982_v35 = vpop.f32.mrb[40].mxu0  ;;  %v1255_v36 = vpop.f32.mrb[40].mxu1  ;;  %v4829_v55 = vadd.f32 %v4805_v34, %v12726_v27  ;;  %v4768_v59 = vmax.f32 %v4744_v62, 0.0 }
 0x1b8   :  { %v984_v39 = vpop.f32.mrb[41].mxu0  ;;  %v1257_v63 = vpop.f32.mrb[41].mxu1  ;;  %v4852_v25 = vmax.f32 %v4828_v49, 0.0 }
 0x1b9   :  { %v4769_v43 = vmax.f32 %v4745_v13, 0.0  ;;  %v986_v51 = vpop.f32.mrb[42].mxu0  ;;  %v1259_v41 = vpop.f32.mrb[42].mxu1  ;;  %v4853_v46 = vmax.f32 %v4829_v55, 0.0 }
 0x1ba   :  { %v988_v22 = vpop.f32.mrb[43].mxu0  ;;  %v1261_v23 = vpop.f32.mrb[43].mxu1 }
 0x1bb   :  { %v12841_v52 = vpack.c.bf16 %v4853_v46, %v4852_v25  ;;  %v12843_v0 = vpack.c.bf16 %v4769_v43, %v4768_v59 }
 0x1bc   :  { %1557 = vmatmul.mubr.bf16.gmra.mrb[148].mxu0 %v12470_v1  ;;  %1830 = vmatmul.mubr.bf16.gmra.mrb[148].mxu1 %v12470_v1 }
 0x1bd   :  { %9982 = vmatprep.mubr.msk.bf16.mxu0 %vm775_vm1, %v12475_v2  ;;  %10011 = vmatprep.mubr.msk.bf16.mxu1 %vm775_vm1, %v12475_v2 }
 0x1bf   :  { %v992_v37 = vpop.f32.mrb[44].mxu0  ;;  %v1265_v31 = vpop.f32.mrb[44].mxu1 }
 0x1c0   :  { %v4364_v24 = vmax.f32 %v982_v35, %v992_v37  ;;  %v4366_v16 = vmax.f32 %v1255_v36, %v1265_v31  ;;  %v994_v44 = vpop.f32.mrb[45].mxu0  ;;  %v1267_v12 = vpop.f32.mrb[45].mxu1 }
 0x1c1   :  { %v4365_v53 = vmax.f32 %v984_v39, %v994_v44  ;;  %v4367_v48 = vmax.f32 %v1257_v63, %v1267_v12  ;;  %v996_v30 = vpop.f32.mrb[46].mxu0  ;;  %v1269_v17 = vpop.f32.mrb[46].mxu1 }
 0x1c2   :  { %v4388_v32 = vmax.f32 %v986_v51, %v996_v30  ;;  %v4390_v57 = vmax.f32 %v1259_v41, %v1269_v17  ;;  %v998_v14 = vpop.f32.mrb[47].mxu0  ;;  %v1271_v1 = vpop.f32.mrb[47].mxu1 }
 0x1c3   :  { %v4712_v61 = vmax.f32 %v4364_v24, %v4365_v53  ;;  %v4806_v18 = vmax.f32 %v4366_v16, %v4367_v48  ;;  %v4389_v19 = vmax.f32 %v988_v22, %v998_v14  ;;  %v4391_v33 = vmax.f32 %v1261_v23, %v1271_v1 }
 0x1c4   :  { %1567 = vmatmul.mubr.bf16.gmra.mrb[152].mxu0 %v12486_v3  ;;  %1840 = vmatmul.mubr.bf16.gmra.mrb[152].mxu1 %v12486_v3 }
 0x1c5   :  { %v4746_v2 = vadd.f32 %v12711_v38, %v4712_v61  ;;  %v4713_v58 = vmax.f32 %v4388_v32, %v4389_v19  ;;  %v4807_v62 = vmax.f32 %v4390_v57, %v4391_v33  ;;  %9983 = vmatprep.mubr.msk.bf16.mxu0 %vm775_vm1, %v12491_v4  ;;  %10012 = vmatprep.mubr.msk.bf16.mxu1 %vm775_vm1, %v12491_v4 }
 0x1c6   :  { %v4830_v45 = vadd.f32 %v4806_v18, %v12711_v38 }
 0x1c7   :  { %v4747_v34 = vadd.f32 %v12726_v27, %v4713_v58  ;;  %v1002_v49 = vpop.f32.mrb[48].mxu0  ;;  %v1275_v13 = vpop.f32.mrb[48].mxu1  ;;  %v4831_v35 = vadd.f32 %v4807_v62, %v12726_v27  ;;  %v4770_v55 = vmax.f32 %v4746_v2, 0.0 }
 0x1c8   :  { %v1004_v36 = vpop.f32.mrb[49].mxu0  ;;  %v1277_v3 = vpop.f32.mrb[49].mxu1  ;;  %v4854_v43 = vmax.f32 %v4830_v45, 0.0 }
 0x1c9   :  { %v4771_v39 = vmax.f32 %v4747_v34, 0.0  ;;  %v1006_v63 = vpop.f32.mrb[50].mxu0  ;;  %v1279_v59 = vpop.f32.mrb[50].mxu1  ;;  %v4855_v51 = vmax.f32 %v4831_v35, 0.0 }
 0x1ca   :  { %v1008_v41 = vpop.f32.mrb[51].mxu0  ;;  %v1281_v25 = vpop.f32.mrb[51].mxu1 }
 0x1cb   :  { %v12861_v46 = vpack.c.bf16 %v4855_v51, %v4854_v43  ;;  %v12863_v4 = vpack.c.bf16 %v4771_v39, %v4770_v55 }
 0x1cc   :  { %1577 = vmatmul.mubr.bf16.gmra.mrb[156].mxu0 %v12502_v5  ;;  %1850 = vmatmul.mubr.bf16.gmra.mrb[156].mxu1 %v12502_v5 }
 0x1cd   :  { %9984 = vmatprep.mubr.msk.bf16.mxu0 %vm775_vm1, %v12507_v6  ;;  %10013 = vmatprep.mubr.msk.bf16.mxu1 %vm775_vm1, %v12507_v6 }
 0x1cf   :  { %v1012_v22 = vpop.f32.mrb[52].mxu0  ;;  %v1285_v23 = vpop.f32.mrb[52].mxu1 }
 0x1d0   :  { %v4412_v37 = vmax.f32 %v1002_v49, %v1012_v22  ;;  %v4414_v31 = vmax.f32 %v1275_v13, %v1285_v23  ;;  %v1014_v24 = vpop.f32.mrb[53].mxu0  ;;  %v1287_v16 = vpop.f32.mrb[53].mxu1 }
 0x1d1   :  { %v4413_v44 = vmax.f32 %v1004_v36, %v1014_v24  ;;  %v4415_v12 = vmax.f32 %v1277_v3, %v1287_v16  ;;  %v1016_v53 = vpop.f32.mrb[54].mxu0  ;;  %v1289_v48 = vpop.f32.mrb[54].mxu1 }
 0x1d2   :  { %v4436_v30 = vmax.f32 %v1006_v63, %v1016_v53  ;;  %v4438_v17 = vmax.f32 %v1279_v59, %v1289_v48  ;;  %v1018_v32 = vpop.f32.mrb[55].mxu0  ;;  %v1291_v5 = vpop.f32.mrb[55].mxu1 }
 0x1d3   :  { %v4714_v57 = vmax.f32 %v4412_v37, %v4413_v44  ;;  %v4808_v14 = vmax.f32 %v4414_v31, %v4415_v12  ;;  %v4437_v1 = vmax.f32 %v1008_v41, %v1018_v32  ;;  %v4439_v61 = vmax.f32 %v1281_v25, %v1291_v5 }
 0x1d4   :  { %1587 = vmatmul.mubr.bf16.gmra.mrb[160].mxu0 %v12518_v7  ;;  %1860 = vmatmul.mubr.bf16.gmra.mrb[160].mxu1 %v12518_v7 }
 0x1d5   :  { %v4748_v6 = vadd.f32 %v12711_v38, %v4714_v57  ;;  %v4715_v18 = vmax.f32 %v4436_v30, %v4437_v1  ;;  %v4809_v19 = vmax.f32 %v4438_v17, %v4439_v61  ;;  %9985 = vmatprep.mubr.msk.bf16.mxu0 %vm775_vm1, %v12523_v8  ;;  %10014 = vmatprep.mubr.msk.bf16.mxu1 %vm775_vm1, %v12523_v8 }
 0x1d6   :  { %v4832_v33 = vadd.f32 %v4808_v14, %v12711_v38  ;;  %v16712_v14 = vld [vmem:[#allocation16_spill] sm:$0xff] }
 0x1d7   :  { %v4749_v2 = vadd.f32 %v12726_v27, %v4715_v18  ;;  %v1022_v58 = vpop.f32.mrb[56].mxu0  ;;  %v1295_v62 = vpop.f32.mrb[56].mxu1  ;;  %v4833_v45 = vadd.f32 %v4809_v19, %v12726_v27  ;;  %v4772_v49 = vmax.f32 %v4748_v6, 0.0 }
 0x1d8   :  { %v1024_v34 = vpop.f32.mrb[57].mxu0  ;;  %v1297_v7 = vpop.f32.mrb[57].mxu1  ;;  %v4856_v39 = vmax.f32 %v4832_v33, 0.0 }
 0x1d9   :  { %v4773_v13 = vmax.f32 %v4749_v2, 0.0  ;;  %v1026_v35 = vpop.f32.mrb[58].mxu0  ;;  %v1299_v36 = vpop.f32.mrb[58].mxu1  ;;  %v4857_v63 = vmax.f32 %v4833_v45, 0.0 }
 0x1da   :  { %v1028_v3 = vpop.f32.mrb[59].mxu0  ;;  %v1301_v55 = vpop.f32.mrb[59].mxu1 }
 0x1db   :  { %v12881_v59 = vpack.c.bf16 %v4773_v13, %v4772_v49  ;;  %v12885_v8 = vpack.c.bf16 %v4857_v63, %v4856_v39 }
 0x1dc   :  { %1597 = vmatmul.mubr.bf16.gmra.mrb[164].mxu0 %v12534_v9  ;;  %1870 = vmatmul.mubr.bf16.gmra.mrb[164].mxu1 %v12534_v9 }
 0x1dd   :  { %9986 = vmatprep.mubr.msk.bf16.mxu0 %vm775_vm1, %v12539_v10  ;;  %10015 = vmatprep.mubr.msk.bf16.mxu1 %vm775_vm1, %v12539_v10 }
 0x1df   :  { %v1032_v43 = vpop.f32.mrb[60].mxu0  ;;  %v1305_v51 = vpop.f32.mrb[60].mxu1 }
 0x1e0   :  { %v4460_v41 = vmax.f32 %v1022_v58, %v1032_v43  ;;  %v4462_v25 = vmax.f32 %v1295_v62, %v1305_v51  ;;  %v1034_v22 = vpop.f32.mrb[61].mxu0  ;;  %v1307_v23 = vpop.f32.mrb[61].mxu1 }
 0x1e1   :  { %v4461_v37 = vmax.f32 %v1024_v34, %v1034_v22  ;;  %v4463_v31 = vmax.f32 %v1297_v7, %v1307_v23  ;;  %v1036_v24 = vpop.f32.mrb[62].mxu0  ;;  %v1309_v16 = vpop.f32.mrb[62].mxu1 }
 0x1e2   :  { %v4484_v44 = vmax.f32 %v1026_v35, %v1036_v24  ;;  %v4486_v9 = vmax.f32 %v1299_v36, %v1309_v16  ;;  %v1038_v12 = vpop.f32.mrb[63].mxu0  ;;  %v1311_v53 = vpop.f32.mrb[63].mxu1 }
 0x1e3   :  { %v4716_v48 = vmax.f32 %v4460_v41, %v4461_v37  ;;  %v4810_v30 = vmax.f32 %v4462_v25, %v4463_v31  ;;  %v4485_v17 = vmax.f32 %v1028_v3, %v1038_v12  ;;  %v4487_v32 = vmax.f32 %v1301_v55, %v1311_v53  ;;  %v16715_v3 = vld [vmem:[#allocation17_spill] sm:$0xff]  ;;  %v16716_v55 = vld [vmem:[#allocation18_spill] sm:$0xff] }
 0x1e4   :  { %1607 = vmatmul.mubr.bf16.gmra.mrb[168].mxu0 %v12550_v11  ;;  %1880 = vmatmul.mubr.bf16.gmra.mrb[168].mxu1 %v12550_v11 }
 0x1e5   :  { %v4750_v10 = vadd.f32 %v12711_v38, %v4716_v48  ;;  %v4717_v5 = vmax.f32 %v4484_v44, %v4485_v17  ;;  %v4811_v57 = vmax.f32 %v4486_v9, %v4487_v32  ;;  %9987 = vmatprep.mubr.msk.bf16.mxu0 %vm775_vm1, %v16712_v14  ;;  %10016 = vmatprep.mubr.msk.bf16.mxu1 %vm775_vm1, %v16712_v14  ;;  %v16717_v17 = vld [vmem:[#allocation19_spill] sm:$0xff] }
 0x1e6   :  { %v4834_v1 = vadd.f32 %v4810_v30, %v12711_v38 }
 0x1e7   :  { %v4751_v61 = vadd.f32 %v12726_v27, %v4717_v5  ;;  %v1042_v6 = vpop.f32.mrb[64].mxu0  ;;  %v1315_v18 = vpop.f32.mrb[64].mxu1  ;;  %v4835_v19 = vadd.f32 %v4811_v57, %v12726_v27  ;;  %v4774_v2 = vmax.f32 %v4750_v10, 0.0  ;;  %v16718_v57 = vld [vmem:[#allocation20_spill] sm:$0xff] }
 0x1e8   :  { %v1044_v33 = vpop.f32.mrb[65].mxu0  ;;  %v1317_v11 = vpop.f32.mrb[65].mxu1  ;;  %v4858_v34 = vmax.f32 %v4834_v1, 0.0 }
 0x1e9   :  { %v4775_v58 = vmax.f32 %v4751_v61, 0.0  ;;  %v1046_v62 = vpop.f32.mrb[66].mxu0  ;;  %v1319_v45 = vpop.f32.mrb[66].mxu1  ;;  %v4859_v7 = vmax.f32 %v4835_v19, 0.0 }
 0x1ea   :  { %v1048_v49 = vpop.f32.mrb[67].mxu0  ;;  %v1321_v13 = vpop.f32.mrb[67].mxu1 }
 0x1eb   :  { %v12901_v35 = vpack.c.bf16 %v4859_v7, %v4858_v34  ;;  %v12903_v36 = vpack.c.bf16 %v4775_v58, %v4774_v2 }
 0x1ec   :  { %1617 = vmatmul.mubr.bf16.gmra.mrb[172].mxu0 %v16715_v3  ;;  %1890 = vmatmul.mubr.bf16.gmra.mrb[172].mxu1 %v16715_v3 }
 0x1ed   :  { %16713 = vst [vmem:[#allocation16_spill] sm:$0xff] %v12901_v35  ;;  %16714 = vst [vmem:[#allocation23_spill] sm:$0xff] %v12903_v36  ;;  %9988 = vmatprep.mubr.msk.bf16.mxu0 %vm775_vm1, %v16716_v55  ;;  %10017 = vmatprep.mubr.msk.bf16.mxu1 %vm775_vm1, %v16716_v55  ;;  %v16721_v55 = vld [vmem:[#allocation21_spill] sm:$0xff] }
 0x1ef   :  { %v1052_v39 = vpop.f32.mrb[68].mxu0  ;;  %v1325_v63 = vpop.f32.mrb[68].mxu1 }
 0x1f0   :  { %v4508_v43 = vmax.f32 %v1042_v6, %v1052_v39  ;;  %v4510_v51 = vmax.f32 %v1315_v18, %v1325_v63  ;;  %v1054_v41 = vpop.f32.mrb[69].mxu0  ;;  %v1327_v25 = vpop.f32.mrb[69].mxu1  ;;  %v16722_v39 = vld [vmem:[#allocation22_spill] sm:$0xff] }
 0x1f1   :  { %v4509_v22 = vmax.f32 %v1044_v33, %v1054_v41  ;;  %v4511_v23 = vmax.f32 %v1317_v11, %v1327_v25  ;;  %v1056_v37 = vpop.f32.mrb[70].mxu0  ;;  %v1329_v31 = vpop.f32.mrb[70].mxu1 }
 0x1f2   :  { %v4532_v24 = vmax.f32 %v1046_v62, %v1056_v37  ;;  %v4534_v16 = vmax.f32 %v1319_v45, %v1329_v31  ;;  %v1058_v44 = vpop.f32.mrb[71].mxu0  ;;  %v1331_v9 = vpop.f32.mrb[71].mxu1 }
 0x1f3   :  { %v4718_v12 = vmax.f32 %v4508_v43, %v4509_v22  ;;  %v4812_v53 = vmax.f32 %v4510_v51, %v4511_v23  ;;  %v4533_v48 = vmax.f32 %v1048_v49, %v1058_v44  ;;  %v4535_v30 = vmax.f32 %v1321_v13, %v1331_v9 }
 0x1f4   :  { %1627 = vmatmul.mubr.bf16.gmra.mrb[176].mxu0 %v16717_v17  ;;  %1900 = vmatmul.mubr.bf16.gmra.mrb[176].mxu1 %v16717_v17 }
 0x1f5   :  { %v4752_v32 = vadd.f32 %v12711_v38, %v4718_v12  ;;  %v4719_v10 = vmax.f32 %v4532_v24, %v4533_v48  ;;  %v4813_v5 = vmax.f32 %v4534_v16, %v4535_v30  ;;  %9989 = vmatprep.mubr.msk.bf16.mxu0 %vm775_vm1, %v16718_v57  ;;  %10018 = vmatprep.mubr.msk.bf16.mxu1 %vm775_vm1, %v16718_v57 }
 0x1f6   :  { %v4836_v14 = vadd.f32 %v4812_v53, %v12711_v38 }
 0x1f7   :  { %v4753_v1 = vadd.f32 %v12726_v27, %v4719_v10  ;;  %v1062_v61 = vpop.f32.mrb[72].mxu0  ;;  %v1335_v6 = vpop.f32.mrb[72].mxu1  ;;  %v4837_v18 = vadd.f32 %v4813_v5, %v12726_v27  ;;  %v4776_v11 = vmax.f32 %v4752_v32, 0.0  ;;  %v11546_v32 = vld [vmem:[%s16378_s1 + $0x160] ss:$8 sps:$4 sm:$0xff]  }
 0x1f8   :  { %v1064_v19 = vpop.f32.mrb[73].mxu0  ;;  %v1337_v33 = vpop.f32.mrb[73].mxu1  ;;  %v4860_v45 = vmax.f32 %v4836_v14, 0.0  ;;  %v11547_v14 = vld [vmem:[%s16378_s1 + $0x174] ss:$8 sps:$4 sm:$0xff]  }
 0x1f9   :  { %v4777_v2 = vmax.f32 %v4753_v1, 0.0  ;;  %v1066_v58 = vpop.f32.mrb[74].mxu0  ;;  %v1339_v62 = vpop.f32.mrb[74].mxu1  ;;  %v4861_v34 = vmax.f32 %v4837_v18, 0.0 }
 0x1fa   :  { %v1068_v7 = vpop.f32.mrb[75].mxu0  ;;  %v1341_v49 = vpop.f32.mrb[75].mxu1 }
 0x1fb   :  { %v12921_v13 = vpack.c.bf16 %v4861_v34, %v4860_v45  ;;  %v12923_v3 = vpack.c.bf16 %v4777_v2, %v4776_v11 }
 0x1fc   :  { %1637 = vmatmul.mubr.bf16.gmra.mrb[180].mxu0 %v16721_v55  ;;  %1910 = vmatmul.mubr.bf16.gmra.mrb[180].mxu1 %v16721_v55 }
 0x1fd   :  { %16719 = vst [vmem:[#allocation17_spill] sm:$0xff] %v12921_v13  ;;  %16720 = vst [vmem:[#allocation18_spill] sm:$0xff] %v12923_v3  ;;  %9990 = vmatprep.mubr.msk.bf16.mxu0 %vm775_vm1, %v16722_v39  ;;  %10019 = vmatprep.mubr.msk.bf16.mxu1 %vm775_vm1, %v16722_v39 }
 0x1ff   :  { %v1072_v63 = vpop.f32.mrb[76].mxu0  ;;  %v1345_v43 = vpop.f32.mrb[76].mxu1 }
 0x200   :  { %v4556_v51 = vmax.f32 %v1062_v61, %v1072_v63  ;;  %v4558_v41 = vmax.f32 %v1335_v6, %v1345_v43  ;;  %v1074_v25 = vpop.f32.mrb[77].mxu0  ;;  %v1347_v22 = vpop.f32.mrb[77].mxu1  ;;  %v11548_v43 = vld [vmem:[%s16378_s1 + $0x170] ss:$8 sps:$4 sm:$0xff]  }
 0x201   :  { %v4557_v23 = vmax.f32 %v1064_v19, %v1074_v25  ;;  %v4559_v37 = vmax.f32 %v1337_v33, %v1347_v22  ;;  %v1076_v31 = vpop.f32.mrb[78].mxu0  ;;  %v1349_v24 = vpop.f32.mrb[78].mxu1 }
 0x202   :  { %v4580_v16 = vmax.f32 %v1066_v58, %v1076_v31  ;;  %v4582_v44 = vmax.f32 %v1339_v62, %v1349_v24  ;;  %v1078_v9 = vpop.f32.mrb[79].mxu0  ;;  %v1351_v12 = vpop.f32.mrb[79].mxu1 }
 0x203   :  { %v4720_v53 = vmax.f32 %v4556_v51, %v4557_v23  ;;  %v4814_v48 = vmax.f32 %v4558_v41, %v4559_v37  ;;  %v4581_v30 = vmax.f32 %v1068_v7, %v1078_v9  ;;  %v4583_v17 = vmax.f32 %v1341_v49, %v1351_v12  ;;  %v11549_v51 = vld [vmem:[%s16378_s1 + $0x4] ss:$8 sps:$4 sm:$0xff]  }
 0x204   :  { %1647 = vmatmul.mubr.bf16.gmra.mrb[184].mxu0 %v11546_v32  ;;  %1920 = vmatmul.mubr.bf16.gmra.mrb[184].mxu1 %v11546_v32 }
 0x205   :  { %v4754_v10 = vadd.f32 %v12711_v38, %v4720_v53  ;;  %v4721_v5 = vmax.f32 %v4580_v16, %v4581_v30  ;;  %v4815_v57 = vmax.f32 %v4582_v44, %v4583_v17  ;;  %9991 = vmatprep.mubr.msk.bf16.mxu0 %vm775_vm1, %v11547_v14  ;;  %10020 = vmatprep.mubr.msk.bf16.mxu1 %vm775_vm1, %v11547_v14 }
 0x206   :  { %v4838_v1 = vadd.f32 %v4814_v48, %v12711_v38 }
 0x207   :  { %v4755_v61 = vadd.f32 %v12726_v27, %v4721_v5  ;;  %v1082_v6 = vpop.f32.mrb[80].mxu0  ;;  %v1355_v18 = vpop.f32.mrb[80].mxu1  ;;  %v4839_v19 = vadd.f32 %v4815_v57, %v12726_v27  ;;  %v4778_v2 = vmax.f32 %v4754_v10, 0.0  ;;  %v11550_v57 = vld [vmem:[%s16378_s1] ss:$8 sps:$4 sm:$0xff]  }
 0x208   :  { %v1084_v33 = vpop.f32.mrb[81].mxu0  ;;  %v1357_v11 = vpop.f32.mrb[81].mxu1  ;;  %v4862_v34 = vmax.f32 %v4838_v1, 0.0 }
 0x209   :  { %v4779_v58 = vmax.f32 %v4755_v61, 0.0  ;;  %v1086_v62 = vpop.f32.mrb[82].mxu0  ;;  %v1359_v45 = vpop.f32.mrb[82].mxu1  ;;  %v4863_v7 = vmax.f32 %v4839_v19, 0.0  ;;  %v12970_v19 = vld [vmem:[%s16377_s0 + $0x38] ss:$112 sps:$4 sm:$0xff]  }
 0x20a   :  { %v1088_v49 = vpop.f32.mrb[83].mxu0  ;;  %v1361_v55 = vpop.f32.mrb[83].mxu1 }
 0x20b   :  { %v12943_v39 = vpack.c.bf16 %v4863_v7, %v4862_v34  ;;  %v12945_v63 = vpack.c.bf16 %v4779_v58, %v4778_v2 }
 0x20c   :  { %1657 = vmatmul.mubr.bf16.gmra.mrb[188].mxu0 %v11548_v43  ;;  %1930 = vmatmul.mubr.bf16.gmra.mrb[188].mxu1 %v11548_v43 }
 0x20d   :  { %16723 = vst [vmem:[#allocation19_spill] sm:$0xff] %v12943_v39  ;;  %16724 = vst [vmem:[#allocation20_spill] sm:$0xff] %v12945_v63  ;;  %10026 = vmatprep.mubr.msk.bf16.mxu0 %vm775_vm1, %v11549_v51  ;;  %10055 = vmatprep.mubr.msk.bf16.mxu1 %vm775_vm1, %v11549_v51 }
 0x20f   :  { %v1092_v41 = vpop.f32.mrb[84].mxu0  ;;  %v1365_v25 = vpop.f32.mrb[84].mxu1 }
 0x210   :  { %v4604_v22 = vmax.f32 %v1082_v6, %v1092_v41  ;;  %v4606_v23 = vmax.f32 %v1355_v18, %v1365_v25  ;;  %v1094_v37 = vpop.f32.mrb[85].mxu0  ;;  %v1367_v31 = vpop.f32.mrb[85].mxu1  ;;  %v11551_v6 = vld [vmem:[%s16378_s1 + $0x14] ss:$8 sps:$4 sm:$0xff]   ;;  %v11552_v18 = vld [vmem:[%s16377_s0 + $0x30] ss:$112 sps:$4 sm:$0xff]  }
 0x211   :  { %v4605_v24 = vmax.f32 %v1084_v33, %v1094_v37  ;;  %v4607_v16 = vmax.f32 %v1357_v11, %v1367_v31  ;;  %v1096_v44 = vpop.f32.mrb[86].mxu0  ;;  %v1369_v9 = vpop.f32.mrb[86].mxu1  ;;  %v12994_v31 = vld [vmem:[%s16377_s0 + $0x120] ss:$112 sps:$4 sm:$0x3f]  }
 0x212   :  { %v4628_v12 = vmax.f32 %v1086_v62, %v1096_v44  ;;  %v4630_v53 = vmax.f32 %v1359_v45, %v1369_v9  ;;  %v1098_v48 = vpop.f32.mrb[87].mxu0  ;;  %v1371_v30 = vpop.f32.mrb[87].mxu1  ;;  %v11554_v62 = vld [vmem:[%s16377_s0 + $0x114] ss:$112 sps:$4 sm:$0x3f]  }
 0x213   :  { %v4722_v17 = vmax.f32 %v4604_v22, %v4605_v24  ;;  %v4816_v32 = vmax.f32 %v4606_v23, %v4607_v16  ;;  %v4629_v10 = vmax.f32 %v1088_v49, %v1098_v48  ;;  %v4631_v5 = vmax.f32 %v1361_v55, %v1371_v30  ;;  %v12984_v45 = vld [vmem:[%s16377_s0 + $0x40] ss:$112 sps:$4 sm:$0xff]   ;;  %v11557_v9 = vld [vmem:[%s16377_s0 + $0x34] ss:$112 sps:$4 sm:$0xff]  }
 0x214   :  { %1973 = vmatmul.mubr.bf16.vlgmr.msra.gmra.mrb[192].mxu0 %v11550_v57  ;;  %2246 = vmatmul.mubr.bf16.vlgmr.msra.gmra.mrb[192].mxu1 %v11550_v57  ;;  %v11555_v44 = vld [vmem:[%s16378_s1 + $0x10] ss:$8 sps:$4 sm:$0xff]   ;;  %v13020_v30 = vsel %vm425_vm0, %v12771_v50, 0 }
 0x215   :  { %v4756_v14 = vadd.f32 %v12711_v38, %v4722_v17  ;;  %v4723_v1 = vmax.f32 %v4628_v12, %v4629_v10  ;;  %v4817_v61 = vmax.f32 %v4630_v53, %v4631_v5  ;;  %10027 = vmatprep.mubr.msk.bf16.mxu0 %vm775_vm1, %v11551_v6  ;;  %10056 = vmatprep.mubr.msk.bf16.mxu1 %vm775_vm1, %v11551_v6  ;;  %v11558_v48 = vld [vmem:[%s16377_s0 + $0x118] ss:$112 sps:$4 sm:$0x3f]  }
 0x216   :  { %2487 = vmatpush1.bf16.msra.mxu0 %v11552_v18  ;;  %2760 = vmatpush1.bf16.msra.mxu1 %v12970_v19  ;;  %v4840_v33 = vadd.f32 %v4816_v32, %v12711_v38 }
 0x217   :  { %v4757_v11 = vadd.f32 %v12726_v27, %v4723_v1  ;;  %v1102_v2 = vpop.f32.mrb[88].mxu0  ;;  %v1375_v58 = vpop.f32.mrb[88].mxu1  ;;  %10079 = vmatprep.subr.msk.bf16.mxu0 %vm425_vm0, %v11554_v62  ;;  %10108 = vmatprep.subr.msk.bf16.mxu1 %vm425_vm0, %v12771_v50  ;;  %v4841_v34 = vadd.f32 %v4817_v61, %v12726_v27  ;;  %v4780_v55 = vmax.f32 %v4756_v14, 0.0 }
 0x218   :  { %v1104_v7 = vpop.f32.mrb[89].mxu0  ;;  %v1377_v49 = vpop.f32.mrb[89].mxu1  ;;  %v4864_v25 = vmax.f32 %v4840_v33, 0.0 }
 0x219   :  { %v4781_v43 = vmax.f32 %v4757_v11, 0.0  ;;  %v1106_v51 = vpop.f32.mrb[90].mxu0  ;;  %v1379_v41 = vpop.f32.mrb[90].mxu1  ;;  %v4865_v22 = vmax.f32 %v4841_v34, 0.0  ;;  %v13027_v11 = vld [vmem:[%s16377_s0 + $0x44] ss:$112 sps:$4 sm:$0xff]  }
 0x21a   :  { %v1108_v23 = vpop.f32.mrb[91].mxu0  ;;  %v1381_v37 = vpop.f32.mrb[91].mxu1  ;;  %2489 = vmatpush1.bf16.msra.mxu0 %v12689_v29  ;;  %2762 = vmatpush1.bf16.msra.mxu1 %v12781_v21  ;;  %v11556_v29 = vld [vmem:[%s16378_s1 + $0x24] ss:$8 sps:$4 sm:$0xff]  }
 0x21b   :  { %2490 = vmatprep.subr.bf16.mxu0 %v12970_v19  ;;  %2763 = vmatprep.subr.bf16.mxu1 %v12984_v45  ;;  %v12996_v24 = vpack.c.bf16 %v4865_v22, %v4864_v25  ;;  %v12998_v16 = vpack.c.bf16 %v4781_v43, %v4780_v55 }
 0x21c   :  { %1983 = vmatmul.mubr.bf16.gmra.mrb[196].mxu0 %v11555_v44  ;;  %2256 = vmatmul.mubr.bf16.gmra.mrb[196].mxu1 %v11555_v44 }
 0x21d   :  { %16725 = vst [vmem:[#allocation21_spill] sm:$0xff] %v12996_v24  ;;  %16726 = vst [vmem:[#allocation22_spill] sm:$0xff] %v12998_v16  ;;  %10028 = vmatprep.mubr.msk.bf16.mxu0 %vm775_vm1, %v11556_v29  ;;  %10057 = vmatprep.mubr.msk.bf16.mxu1 %vm775_vm1, %v11556_v29 }
 0x21e   :  { %2491 = vmatpush1.bf16.msra.mxu0 %v11557_v9  ;;  %2764 = vmatpush1.bf16.msra.mxu1 %v12742_v15 }
 0x21f   :  { %v1112_v12 = vpop.f32.mrb[92].mxu0  ;;  %v1385_v53 = vpop.f32.mrb[92].mxu1  ;;  %10080 = vmatprep.subr.msk.bf16.mxu0 %vm425_vm0, %v11558_v48  ;;  %10109 = vmatprep.subr.msk.bf16.mxu1 %vm425_vm0, %v12994_v31 }
 0x220   :  { %v4652_v17 = vmax.f32 %v1102_v2, %v1112_v12  ;;  %v4654_v32 = vmax.f32 %v1375_v58, %v1385_v53  ;;  %v1114_v10 = vpop.f32.mrb[93].mxu0  ;;  %v1387_v5 = vpop.f32.mrb[93].mxu1 }
 0x221   :  { %v4653_v15 = vmax.f32 %v1104_v7, %v1114_v10  ;;  %v4655_v57 = vmax.f32 %v1377_v49, %v1387_v5  ;;  %v1116_v14 = vpop.f32.mrb[94].mxu0  ;;  %v1389_v1 = vpop.f32.mrb[94].mxu1  ;;  %v11559_v7 = vld [vmem:[%s16377_s0 + $0x3c] ss:$112 sps:$4 sm:$0xff]  }
 0x222   :  { %v4676_v61 = vmax.f32 %v1106_v51, %v1116_v14  ;;  %v4678_v6 = vmax.f32 %v1379_v41, %v1389_v1  ;;  %v1118_v18 = vpop.f32.mrb[95].mxu0  ;;  %v1391_v33 = vpop.f32.mrb[95].mxu1  ;;  %2493 = vmatpush1.bf16.msra.mxu0 %v12720_v40  ;;  %2766 = vmatpush1.bf16.msra.mxu1 %v13020_v30  ;;  %v11560_v40 = vld [vmem:[%s16378_s1 + $0x20] ss:$8 sps:$4 sm:$0xff]   ;;  %v11561_v41 = vld [vmem:[%s16378_s1 + $0x34] ss:$8 sps:$4 sm:$0xff]  }
 0x223   :  { %v4724_v2 = vmax.f32 %v4652_v17, %v4653_v15  ;;  %v4818_v58 = vmax.f32 %v4654_v32, %v4655_v57  ;;  %v4677_v62 = vmax.f32 %v1108_v23, %v1118_v18  ;;  %v4679_v34 = vmax.f32 %v1381_v37, %v1391_v33  ;;  %2494 = vmatprep.subr.bf16.mxu0 %v11559_v7  ;;  %v13038_v49 = vld [vmem:[%s16377_s0 + $0x124] ss:$112 sps:$4 sm:$0x3f]   ;;  %v11562_v14 = vld [vmem:[%s16378_s1 + $0x30] ss:$8 sps:$4 sm:$0xff]  }
 0x224   :  { %1993 = vmatmul.mubr.bf16.gmra.mrb[200].mxu0 %v11560_v40  ;;  %2266 = vmatmul.mubr.bf16.gmra.mrb[200].mxu1 %v11560_v40 }
 0x225   :  { %v4758_v55 = vadd.f32 %v12711_v38, %v4724_v2  ;;  %v4725_v43 = vmax.f32 %v4676_v61, %v4677_v62  ;;  %v4819_v51 = vmax.f32 %v4678_v6, %v4679_v34  ;;  %10029 = vmatprep.mubr.msk.bf16.mxu0 %vm775_vm1, %v11561_v41  ;;  %10058 = vmatprep.mubr.msk.bf16.mxu1 %vm775_vm1, %v11561_v41  ;;  %v11563_v61 = vld [vmem:[%s16378_s1 + $0x44] ss:$8 sps:$4 sm:$0xff]   ;;  %v13093_v34 = vsel %vm425_vm0, %v13038_v49, 0 }
 0x226   :  { %2495 = vmatpush1.bf16.msra.mxu0 %v12970_v19  ;;  %2767 = vmatprep.subr.bf16.mxu1 %v13027_v11  ;;  %v4842_v25 = vadd.f32 %v4818_v58, %v12711_v38  ;;  %v13058_v19 = vsel %vm425_vm0, %v12994_v31, 0 }
 0x227   :  { %v4759_v22 = vadd.f32 %v12726_v27, %v4725_v43  ;;  %v1428_v23 = vpop.f32.mrb[96].mxu0  ;;  %v1701_v37 = vpop.f32.mrb[96].mxu1  ;;  %2768 = vmatpush1.bf16.msra.mxu1 %v12984_v45  ;;  %10081 = vmatprep.subr.msk.bf16.mxu0 %vm425_vm0, %v12771_v50  ;;  %v4843_v44 = vadd.f32 %v4819_v51, %v12726_v27  ;;  %v4782_v12 = vmax.f32 %v4758_v55, 0.0  ;;  %v13064_v50 = vld [vmem:[%s16377_s0 + $0x48] ss:$112 sps:$4 sm:$0xff]  }
 0x228   :  { %v1430_v29 = vpop.f32.mrb[97].mxu0  ;;  %v1703_v9 = vpop.f32.mrb[97].mxu1  ;;  %10110 = vmatprep.subr.msk.bf16.mxu1 %vm425_vm0, %v13038_v49  ;;  %v4866_v5 = vmax.f32 %v4842_v25, 0.0 }
 0x229   :  { %v4783_v53 = vmax.f32 %v4759_v22, 0.0  ;;  %v1432_v48 = vpop.f32.mrb[98].mxu0  ;;  %v1705_v17 = vpop.f32.mrb[98].mxu1  ;;  %v4867_v15 = vmax.f32 %v4843_v44, 0.0 }
 0x22a   :  { %v1434_v32 = vpop.f32.mrb[99].mxu0  ;;  %v1707_v10 = vpop.f32.mrb[99].mxu1  ;;  %2497 = vmatpush1.bf16.msra.mxu0 %v12781_v21  ;;  %v13076_v21 = vld [vmem:[%s16377_s0 + $0x128] ss:$112 sps:$4 sm:$0x3f]  }
 0x22b   :  { %2770 = vmatpush1.bf16.msra.mxu1 %v13058_v19  ;;  %2498 = vmatprep.subr.bf16.mxu0 %v12984_v45  ;;  %v13068_v57 = vpack.c.bf16 %v4783_v53, %v4782_v12  ;;  %v13078_v1 = vpack.c.bf16 %v4867_v15, %v4866_v5  ;;  %v11564_v12 = vld [vmem:[%s16378_s1 + $0x40] ss:$8 sps:$4 sm:$0xff]  }
 0x22c   :  { %2003 = vmatmul.mubr.bf16.gmra.mrb[204].mxu0 %v11562_v14  ;;  %2276 = vmatmul.mubr.bf16.gmra.mrb[204].mxu1 %v11562_v14 }
 0x22d   :  { %16727 = vst [vmem:[#allocation24_spill] sm:$0xff] %v13068_v57  ;;  %16728 = vst [vmem:[#allocation25_spill] sm:$0xff] %v13078_v1  ;;  %10030 = vmatprep.mubr.msk.bf16.mxu0 %vm775_vm1, %v11563_v61  ;;  %10059 = vmatprep.mubr.msk.bf16.mxu1 %vm775_vm1, %v11563_v61 }
 0x22e   :  { %2499 = vmatpush1.bf16.msra.mxu0 %v11559_v7  ;;  %2771 = vmatprep.subr.bf16.mxu1 %v13064_v50 }
 0x22f   :  { %v1438_v6 = vpop.f32.mrb[100].mxu0  ;;  %v1711_v18 = vpop.f32.mrb[100].mxu1  ;;  %2772 = vmatpush1.bf16.msra.mxu1 %v13027_v11  ;;  %10082 = vmatprep.subr.msk.bf16.mxu0 %vm425_vm0, %v12994_v31 }
 0x230   :  { %v4128_v33 = vmax.f32 %v1428_v23, %v1438_v6  ;;  %v4130_v2 = vmax.f32 %v1701_v37, %v1711_v18  ;;  %v1440_v58 = vpop.f32.mrb[101].mxu0  ;;  %v1713_v62 = vpop.f32.mrb[101].mxu1  ;;  %10111 = vmatprep.subr.msk.bf16.mxu1 %vm425_vm0, %v13076_v21 }
 0x231   :  { %v4129_v7 = vmax.f32 %v1430_v29, %v1440_v58  ;;  %v4131_v40 = vmax.f32 %v1703_v9, %v1713_v62  ;;  %v1442_v55 = vpop.f32.mrb[102].mxu0  ;;  %v1715_v43 = vpop.f32.mrb[102].mxu1  ;;  %v13116_v62 = vld [vmem:[%s16377_s0 + $0x4c] ss:$112 sps:$4 sm:$0xff]  }
 0x232   :  { %v4152_v51 = vmax.f32 %v1432_v48, %v1442_v55  ;;  %v4154_v41 = vmax.f32 %v1705_v17, %v1715_v43  ;;  %v1444_v25 = vpop.f32.mrb[103].mxu0  ;;  %v1717_v22 = vpop.f32.mrb[103].mxu1  ;;  %2501 = vmatpush1.bf16.msra.mxu0 %v13020_v30  ;;  %v11565_v30 = vld [vmem:[%s16378_s1 + $0x54] ss:$8 sps:$4 sm:$0xff]   ;;  %v11567_v43 = vld [vmem:[%s16378_s1 + $0x64] ss:$8 sps:$4 sm:$0xff]  }
 0x233   :  { %v4880_v31 = vmax.f32 %v4128_v33, %v4129_v7  ;;  %v4964_v23 = vmax.f32 %v4130_v2, %v4131_v40  ;;  %v4153_v37 = vmax.f32 %v1434_v32, %v1444_v25  ;;  %v4155_v44 = vmax.f32 %v1707_v10, %v1717_v22  ;;  %2774 = vmatpush1.bf16.msra.mxu1 %v13093_v34 }
 0x234   :  { %2013 = vmatmul.mubr.bf16.gmra.mrb[208].mxu0 %v11564_v12  ;;  %2286 = vmatmul.mubr.bf16.gmra.mrb[208].mxu1 %v11564_v12 }
 0x235   :  { %v4904_v29 = vadd.f32 %v4880_v31, %v12711_v38  ;;  %v4988_v9 = vadd.f32 %v4964_v23, %v12711_v38  ;;  %v4881_v53 = vmax.f32 %v4152_v51, %v4153_v37  ;;  %v4965_v48 = vmax.f32 %v4154_v41, %v4155_v44  ;;  %10031 = vmatprep.mubr.msk.bf16.mxu0 %vm775_vm1, %v11565_v30 }
 0x236   :  { %10060 = vmatprep.mubr.msk.bf16.mxu1 %vm775_vm1, %v11565_v30  ;;  %2502 = vmatprep.subr.bf16.mxu0 %v13027_v11 }
 0x237   :  { %v4905_v17 = vadd.f32 %v4881_v53, %v12726_v27  ;;  %v4989_v32 = vadd.f32 %v4965_v48, %v12726_v27  ;;  %v1448_v10 = vpop.f32.mrb[104].mxu0  ;;  %v1721_v5 = vpop.f32.mrb[104].mxu1  ;;  %2503 = vmatpush1.bf16.msra.mxu0 %v12984_v45  ;;  %v4928_v15 = vmax.f32 %v4904_v29, 0.0  ;;  %v5012_v14 = vmax.f32 %v4988_v9, 0.0  ;;  %2775 = vmatprep.subr.bf16.mxu1 %v13116_v62 }
 0x238   :  { %v1450_v61 = vpop.f32.mrb[105].mxu0  ;;  %v1723_v6 = vpop.f32.mrb[105].mxu1  ;;  %10083 = vmatprep.subr.msk.bf16.mxu0 %vm425_vm0, %v13038_v49  ;;  %v11566_v49 = vld [vmem:[%s16378_s1 + $0x50] ss:$8 sps:$4 sm:$0xff]   ;;  %2776 = vmatpush1.bf16.msra.mxu1 %v13064_v50 }
 0x239   :  { %v4929_v18 = vmax.f32 %v4905_v17, 0.0  ;;  %v5013_v33 = vmax.f32 %v4989_v32, 0.0  ;;  %v1452_v2 = vpop.f32.mrb[106].mxu0  ;;  %v1725_v58 = vpop.f32.mrb[106].mxu1 }
 0x23a   :  { %v1454_v7 = vpop.f32.mrb[107].mxu0  ;;  %v1727_v40 = vpop.f32.mrb[107].mxu1 }
 0x23b   :  { %2505 = vmatpush1.bf16.msra.mxu0 %v13058_v19  ;;  %v13120_v45 = vpack.c.bf16 %v5013_v33, %v5012_v14  ;;  %v13122_v55 = vpack.c.bf16 %v4929_v18, %v4928_v15 }
 0x23c   :  { %2023 = vmatmul.mubr.bf16.gmra.mrb[212].mxu0 %v11566_v49  ;;  %2296 = vmatmul.mubr.bf16.gmra.mrb[212].mxu1 %v11566_v49 }
 0x23d   :  { %10032 = vmatprep.mubr.msk.bf16.mxu0 %vm775_vm1, %v11567_v43  ;;  %10061 = vmatprep.mubr.msk.bf16.mxu1 %vm775_vm1, %v11567_v43 }
 0x23e   :  { %3032 = vmatprep.subr.bf16.mxu0 %v13027_v11  ;;  %v11568_v11 = vld [vmem:[%s16378_s1 + $0x60] ss:$8 sps:$4 sm:$0xff]  }
 0x23f   :  { %v1458_v51 = vpop.f32.mrb[108].mxu0  ;;  %v1731_v41 = vpop.f32.mrb[108].mxu1 }
 0x240   :  { %v4176_v25 = vmax.f32 %v1448_v10, %v1458_v51  ;;  %v4178_v22 = vmax.f32 %v1721_v5, %v1731_v41  ;;  %v1460_v31 = vpop.f32.mrb[109].mxu0  ;;  %v1733_v23 = vpop.f32.mrb[109].mxu1 }
 0x241   :  { %v4177_v37 = vmax.f32 %v1450_v61, %v1460_v31  ;;  %v4179_v44 = vmax.f32 %v1723_v6, %v1733_v23  ;;  %v1462_v12 = vpop.f32.mrb[110].mxu0  ;;  %v1735_v29 = vpop.f32.mrb[110].mxu1  ;;  %v11569_v6 = vld [vmem:[%s16378_s1 + $0x74] ss:$8 sps:$4 sm:$0xff]  }
 0x242   :  { %v4200_v9 = vmax.f32 %v1452_v2, %v1462_v12  ;;  %v4202_v53 = vmax.f32 %v1725_v58, %v1735_v29  ;;  %v1464_v48 = vpop.f32.mrb[111].mxu0  ;;  %v1737_v30 = vpop.f32.mrb[111].mxu1  ;;  %v11570_v29 = vld [vmem:[%s16378_s1 + $0x70] ss:$8 sps:$4 sm:$0xff]  }
 0x243   :  { %v4882_v17 = vmax.f32 %v4176_v25, %v4177_v37  ;;  %v4966_v32 = vmax.f32 %v4178_v22, %v4179_v44  ;;  %v4201_v15 = vmax.f32 %v1454_v7, %v1464_v48  ;;  %v4203_v50 = vmax.f32 %v1727_v40, %v1737_v30  ;;  %v13149_v37 = vld [vmem:[%s16377_s0 + $0x12c] ss:$112 sps:$4 sm:$0x3f]  }
 0x244   :  { %2033 = vmatmul.mubr.bf16.gmra.mrb[216].mxu0 %v11568_v11  ;;  %2306 = vmatmul.mubr.bf16.gmra.mrb[216].mxu1 %v11568_v11 }
 0x245   :  { %v4906_v10 = vadd.f32 %v4882_v17, %v12711_v38  ;;  %v4990_v5 = vadd.f32 %v4966_v32, %v12711_v38  ;;  %v4883_v14 = vmax.f32 %v4200_v9, %v4201_v15  ;;  %v4967_v61 = vmax.f32 %v4202_v53, %v4203_v50  ;;  %10033 = vmatprep.mubr.msk.bf16.mxu0 %vm775_vm1, %v11569_v6  ;;  %v11571_v53 = vld [vmem:[%s16378_s1 + $0x84] ss:$8 sps:$4 sm:$0xff]  }
 0x246   :  { %10062 = vmatprep.mubr.msk.bf16.mxu1 %vm775_vm1, %v11569_v6  ;;  %v13160_v9 = vsel %vm425_vm0, %v13076_v21, 0  ;;  %10112 = vmatprep.subr.msk.bf16.mxu1 %vm425_vm0, %v13149_v37 }
 0x247   :  { %v4907_v18 = vadd.f32 %v4883_v14, %v12726_v27  ;;  %v4991_v33 = vadd.f32 %v4967_v61, %v12726_v27  ;;  %v1468_v2 = vpop.f32.mrb[112].mxu0  ;;  %v1741_v58 = vpop.f32.mrb[112].mxu1  ;;  %v4930_v49 = vmax.f32 %v4906_v10, 0.0  ;;  %v5014_v43 = vmax.f32 %v4990_v5, 0.0  ;;  %2778 = vmatpush1.bf16.msra.mxu1 %v13160_v9 }
 0x248   :  { %v1470_v7 = vpop.f32.mrb[113].mxu0  ;;  %v1743_v40 = vpop.f32.mrb[113].mxu1  ;;  %3305 = vmatprep.subr.bf16.mxu1 %v13116_v62 }
 0x249   :  { %v4931_v51 = vmax.f32 %v4907_v18, 0.0  ;;  %v5015_v41 = vmax.f32 %v4991_v33, 0.0  ;;  %v1472_v25 = vpop.f32.mrb[114].mxu0  ;;  %v1745_v22 = vpop.f32.mrb[114].mxu1 }
 0x24a   :  { %v1474_v31 = vpop.f32.mrb[115].mxu0  ;;  %v1747_v23 = vpop.f32.mrb[115].mxu1 }
 0x24b   :  { %v13151_v44 = vpack.c.bf16 %v5015_v41, %v5014_v43  ;;  %v13153_v12 = vpack.c.bf16 %v4931_v51, %v4930_v49 }
 0x24c   :  { %2043 = vmatmul.mubr.bf16.gmra.mrb[220].mxu0 %v11570_v29  ;;  %2316 = vmatmul.mubr.bf16.gmra.mrb[220].mxu1 %v11570_v29 }
 0x24d   :  { %10034 = vmatprep.mubr.msk.bf16.mxu0 %vm775_vm1, %v11571_v53  ;;  %10063 = vmatprep.mubr.msk.bf16.mxu1 %vm775_vm1, %v11571_v53 }
 0x24f   :  { %v1478_v48 = vpop.f32.mrb[116].mxu0  ;;  %v1751_v30 = vpop.f32.mrb[116].mxu1 }
 0x250   :  { %v4224_v17 = vmax.f32 %v1468_v2, %v1478_v48  ;;  %v4226_v32 = vmax.f32 %v1741_v58, %v1751_v30  ;;  %v1480_v15 = vpop.f32.mrb[117].mxu0  ;;  %v1753_v21 = vpop.f32.mrb[117].mxu1  ;;  %v11572_v2 = vld [vmem:[%s16378_s1 + $0x80] ss:$8 sps:$4 sm:$0xff]  }
 0x251   :  { %v4225_v50 = vmax.f32 %v1470_v7, %v1480_v15  ;;  %v4227_v11 = vmax.f32 %v1743_v40, %v1753_v21  ;;  %v1482_v10 = vpop.f32.mrb[118].mxu0  ;;  %v1755_v5 = vpop.f32.mrb[118].mxu1 }
 0x252   :  { %v4248_v14 = vmax.f32 %v1472_v25, %v1482_v10  ;;  %v4250_v61 = vmax.f32 %v1745_v22, %v1755_v5  ;;  %v1484_v6 = vpop.f32.mrb[119].mxu0  ;;  %v1757_v18 = vpop.f32.mrb[119].mxu1  ;;  %v11573_v25 = vld [vmem:[%s16378_s1 + $0x94] ss:$8 sps:$4 sm:$0xff]  }
 0x253   :  { %v4884_v33 = vmax.f32 %v4224_v17, %v4225_v50  ;;  %v4968_v49 = vmax.f32 %v4226_v32, %v4227_v11  ;;  %v4249_v43 = vmax.f32 %v1474_v31, %v1484_v6  ;;  %v4251_v51 = vmax.f32 %v1747_v23, %v1757_v18  ;;  %v11575_v6 = vld [vmem:[%s16378_s1 + $0xa4] ss:$8 sps:$4 sm:$0xff]  }
 0x254   :  { %2053 = vmatmul.mubr.bf16.gmra.mrb[224].mxu0 %v11572_v2  ;;  %2326 = vmatmul.mubr.bf16.gmra.mrb[224].mxu1 %v11572_v2 }
 0x255   :  { %v4908_v58 = vadd.f32 %v4884_v33, %v12711_v38  ;;  %v4992_v7 = vadd.f32 %v4968_v49, %v12711_v38  ;;  %v4885_v40 = vmax.f32 %v4248_v14, %v4249_v43  ;;  %v4969_v41 = vmax.f32 %v4250_v61, %v4251_v51  ;;  %10035 = vmatprep.mubr.msk.bf16.mxu0 %vm775_vm1, %v11573_v25  ;;  %v11574_v61 = vld [vmem:[%s16378_s1 + $0x90] ss:$8 sps:$4 sm:$0xff]  }
 0x256   :  { %10064 = vmatprep.mubr.msk.bf16.mxu1 %vm775_vm1, %v11573_v25 }
 0x257   :  { %v4909_v22 = vadd.f32 %v4885_v40, %v12726_v27  ;;  %v4993_v31 = vadd.f32 %v4969_v41, %v12726_v27  ;;  %v1488_v23 = vpop.f32.mrb[120].mxu0  ;;  %v1761_v29 = vpop.f32.mrb[120].mxu1  ;;  %v4932_v30 = vmax.f32 %v4908_v58, 0.0  ;;  %v5016_v17 = vmax.f32 %v4992_v7, 0.0 }
 0x258   :  { %v1490_v53 = vpop.f32.mrb[121].mxu0  ;;  %v1763_v48 = vpop.f32.mrb[121].mxu1 }
 0x259   :  { %v4933_v32 = vmax.f32 %v4909_v22, 0.0  ;;  %v5017_v15 = vmax.f32 %v4993_v31, 0.0  ;;  %v1492_v21 = vpop.f32.mrb[122].mxu0  ;;  %v1765_v50 = vpop.f32.mrb[122].mxu1 }
 0x25a   :  { %v1494_v11 = vpop.f32.mrb[123].mxu0  ;;  %v1767_v10 = vpop.f32.mrb[123].mxu1 }
 0x25b   :  { %v13183_v5 = vpack.c.bf16 %v5017_v15, %v5016_v17  ;;  %v13185_v14 = vpack.c.bf16 %v4933_v32, %v4932_v30 }
 0x25c   :  { %2063 = vmatmul.mubr.bf16.gmra.mrb[228].mxu0 %v11574_v61  ;;  %2336 = vmatmul.mubr.bf16.gmra.mrb[228].mxu1 %v11574_v61 }
 0x25d   :  { %16729 = vst [vmem:[#allocation26_spill] sm:$0xff] %v13185_v14  ;;  %10036 = vmatprep.mubr.msk.bf16.mxu0 %vm775_vm1, %v11575_v6  ;;  %10065 = vmatprep.mubr.msk.bf16.mxu1 %vm775_vm1, %v11575_v6  ;;  %v11576_v6 = vld [vmem:[%s16378_s1 + $0xa0] ss:$8 sps:$4 sm:$0xff]  }
 0x25f   :  { %v1498_v18 = vpop.f32.mrb[124].mxu0  ;;  %v1771_v33 = vpop.f32.mrb[124].mxu1 }
 0x260   :  { %v4272_v49 = vmax.f32 %v1488_v23, %v1498_v18  ;;  %v4274_v43 = vmax.f32 %v1761_v29, %v1771_v33  ;;  %v1500_v51 = vpop.f32.mrb[125].mxu0  ;;  %v1773_v2 = vpop.f32.mrb[125].mxu1 }
 0x261   :  { %v4273_v58 = vmax.f32 %v1490_v53, %v1500_v51  ;;  %v4275_v7 = vmax.f32 %v1763_v48, %v1773_v2  ;;  %v1502_v40 = vpop.f32.mrb[126].mxu0  ;;  %v1775_v41 = vpop.f32.mrb[126].mxu1 }
 0x262   :  { %v4296_v25 = vmax.f32 %v1492_v21, %v1502_v40  ;;  %v4298_v22 = vmax.f32 %v1765_v50, %v1775_v41  ;;  %v1504_v31 = vpop.f32.mrb[127].mxu0  ;;  %v1777_v30 = vpop.f32.mrb[127].mxu1  ;;  %v11577_v21 = vld [vmem:[%s16378_s1 + $0xb4] ss:$8 sps:$4 sm:$0xff]  }
 0x263   :  { %v4886_v17 = vmax.f32 %v4272_v49, %v4273_v58  ;;  %v4970_v32 = vmax.f32 %v4274_v43, %v4275_v7  ;;  %v4297_v15 = vmax.f32 %v1494_v11, %v1504_v31  ;;  %v4299_v61 = vmax.f32 %v1767_v10, %v1777_v30  ;;  %v11578_v30 = vld [vmem:[%s16378_s1 + $0xb0] ss:$8 sps:$4 sm:$0xff]  }
 0x264   :  { %2073 = vmatmul.mubr.bf16.gmra.mrb[232].mxu0 %v11576_v6  ;;  %2346 = vmatmul.mubr.bf16.gmra.mrb[232].mxu1 %v11576_v6 }
 0x265   :  { %v4910_v23 = vadd.f32 %v4886_v17, %v12711_v38  ;;  %v4994_v29 = vadd.f32 %v4970_v32, %v12711_v38  ;;  %v4887_v53 = vmax.f32 %v4296_v25, %v4297_v15  ;;  %v4971_v48 = vmax.f32 %v4298_v22, %v4299_v61  ;;  %10037 = vmatprep.mubr.msk.bf16.mxu0 %vm775_vm1, %v11577_v21  ;;  %v11579_v17 = vld [vmem:[%s16378_s1 + $0xc4] ss:$8 sps:$4 sm:$0xff]  }
 0x266   :  { %10066 = vmatprep.mubr.msk.bf16.mxu1 %vm775_vm1, %v11577_v21 }
 0x267   :  { %v4911_v50 = vadd.f32 %v4887_v53, %v12726_v27  ;;  %v4995_v11 = vadd.f32 %v4971_v48, %v12726_v27  ;;  %v1508_v10 = vpop.f32.mrb[128].mxu0  ;;  %v1781_v18 = vpop.f32.mrb[128].mxu1  ;;  %v4934_v43 = vmax.f32 %v4910_v23, 0.0  ;;  %v5018_v51 = vmax.f32 %v4994_v29, 0.0 }
 0x268   :  { %v1510_v33 = vpop.f32.mrb[129].mxu0  ;;  %v1783_v49 = vpop.f32.mrb[129].mxu1 }
 0x269   :  { %v4935_v2 = vmax.f32 %v4911_v50, 0.0  ;;  %v5019_v58 = vmax.f32 %v4995_v11, 0.0  ;;  %v1512_v7 = vpop.f32.mrb[130].mxu0  ;;  %v1785_v40 = vpop.f32.mrb[130].mxu1 }
 0x26a   :  { %v1514_v41 = vpop.f32.mrb[131].mxu0  ;;  %v1787_v25 = vpop.f32.mrb[131].mxu1 }
 0x26b   :  { %v13207_v22 = vpack.c.bf16 %v5019_v58, %v5018_v51  ;;  %v13209_v31 = vpack.c.bf16 %v4935_v2, %v4934_v43 }
 0x26c   :  { %2083 = vmatmul.mubr.bf16.gmra.mrb[236].mxu0 %v11578_v30  ;;  %2356 = vmatmul.mubr.bf16.gmra.mrb[236].mxu1 %v11578_v30 }
 0x26d   :  { %16730 = vst [vmem:[#allocation27_spill] sm:$0xff] %v13207_v22  ;;  %16731 = vst [vmem:[#allocation28_spill] sm:$0xff] %v13209_v31  ;;  %10038 = vmatprep.mubr.msk.bf16.mxu0 %vm775_vm1, %v11579_v17  ;;  %10067 = vmatprep.mubr.msk.bf16.mxu1 %vm775_vm1, %v11579_v17  ;;  %v11580_v17 = vld [vmem:[%s16378_s1 + $0xc0] ss:$8 sps:$4 sm:$0xff]  }
 0x26f   :  { %v1518_v32 = vpop.f32.mrb[132].mxu0  ;;  %v1791_v15 = vpop.f32.mrb[132].mxu1 }
 0x270   :  { %v4320_v61 = vmax.f32 %v1508_v10, %v1518_v32  ;;  %v4322_v6 = vmax.f32 %v1781_v18, %v1791_v15  ;;  %v1520_v23 = vpop.f32.mrb[133].mxu0  ;;  %v1793_v29 = vpop.f32.mrb[133].mxu1 }
 0x271   :  { %v4321_v53 = vmax.f32 %v1510_v33, %v1520_v23  ;;  %v4323_v48 = vmax.f32 %v1783_v49, %v1793_v29  ;;  %v1522_v21 = vpop.f32.mrb[134].mxu0  ;;  %v1795_v50 = vpop.f32.mrb[134].mxu1 }
 0x272   :  { %v4344_v11 = vmax.f32 %v1512_v7, %v1522_v21  ;;  %v4346_v43 = vmax.f32 %v1785_v40, %v1795_v50  ;;  %v1524_v51 = vpop.f32.mrb[135].mxu0  ;;  %v1797_v2 = vpop.f32.mrb[135].mxu1  ;;  %v11581_v7 = vld [vmem:[%s16378_s1 + $0xd4] ss:$8 sps:$4 sm:$0xff]  }
 0x273   :  { %v4888_v58 = vmax.f32 %v4320_v61, %v4321_v53  ;;  %v4972_v30 = vmax.f32 %v4322_v6, %v4323_v48  ;;  %v4345_v57 = vmax.f32 %v1514_v41, %v1524_v51  ;;  %v4347_v1 = vmax.f32 %v1787_v25, %v1797_v2  ;;  %v11583_v51 = vld [vmem:[%s16378_s1 + $0xe4] ss:$8 sps:$4 sm:$0xff]  }
 0x274   :  { %2093 = vmatmul.mubr.bf16.gmra.mrb[240].mxu0 %v11580_v17  ;;  %2366 = vmatmul.mubr.bf16.gmra.mrb[240].mxu1 %v11580_v17 }
 0x275   :  { %v4912_v10 = vadd.f32 %v4888_v58, %v12711_v38  ;;  %v4996_v18 = vadd.f32 %v4972_v30, %v12711_v38  ;;  %v4889_v33 = vmax.f32 %v4344_v11, %v4345_v57  ;;  %v4973_v49 = vmax.f32 %v4346_v43, %v4347_v1  ;;  %10039 = vmatprep.mubr.msk.bf16.mxu0 %vm775_vm1, %v11581_v7  ;;  %v11582_v43 = vld [vmem:[%s16378_s1 + $0xd0] ss:$8 sps:$4 sm:$0xff]  }
 0x276   :  { %10068 = vmatprep.mubr.msk.bf16.mxu1 %vm775_vm1, %v11581_v7 }
 0x277   :  { %v4913_v40 = vadd.f32 %v4889_v33, %v12726_v27  ;;  %v4997_v41 = vadd.f32 %v4973_v49, %v12726_v27  ;;  %v1528_v25 = vpop.f32.mrb[136].mxu0  ;;  %v1801_v32 = vpop.f32.mrb[136].mxu1  ;;  %v4936_v6 = vmax.f32 %v4912_v10, 0.0  ;;  %v5020_v23 = vmax.f32 %v4996_v18, 0.0 }
 0x278   :  { %v1530_v15 = vpop.f32.mrb[137].mxu0  ;;  %v1803_v61 = vpop.f32.mrb[137].mxu1 }
 0x279   :  { %v4937_v57 = vmax.f32 %v4913_v40, 0.0  ;;  %v5021_v1 = vmax.f32 %v4997_v41, 0.0  ;;  %v1532_v29 = vpop.f32.mrb[138].mxu0  ;;  %v1805_v53 = vpop.f32.mrb[138].mxu1 }
 0x27a   :  { %v1534_v48 = vpop.f32.mrb[139].mxu0  ;;  %v1807_v21 = vpop.f32.mrb[139].mxu1 }
 0x27b   :  { %v13231_v50 = vpack.c.bf16 %v5021_v1, %v5020_v23  ;;  %v13233_v11 = vpack.c.bf16 %v4937_v57, %v4936_v6 }
 0x27c   :  { %2103 = vmatmul.mubr.bf16.gmra.mrb[244].mxu0 %v11582_v43  ;;  %2376 = vmatmul.mubr.bf16.gmra.mrb[244].mxu1 %v11582_v43 }
 0x27d   :  { %16732 = vst [vmem:[#allocation29_spill] sm:$0xff] %v13233_v11  ;;  %10040 = vmatprep.mubr.msk.bf16.mxu0 %vm775_vm1, %v11583_v51  ;;  %10069 = vmatprep.mubr.msk.bf16.mxu1 %vm775_vm1, %v11583_v51  ;;  %v11584_v51 = vld [vmem:[%s16378_s1 + $0xe0] ss:$8 sps:$4 sm:$0xff]  }
 0x27f   :  { %v1538_v2 = vpop.f32.mrb[140].mxu0  ;;  %v1811_v58 = vpop.f32.mrb[140].mxu1 }
 0x280   :  { %v4368_v30 = vmax.f32 %v1528_v25, %v1538_v2  ;;  %v4370_v17 = vmax.f32 %v1801_v32, %v1811_v58  ;;  %v1540_v10 = vpop.f32.mrb[141].mxu0  ;;  %v1813_v18 = vpop.f32.mrb[141].mxu1 }
 0x281   :  { %v4369_v33 = vmax.f32 %v1530_v15, %v1540_v10  ;;  %v4371_v49 = vmax.f32 %v1803_v61, %v1813_v18  ;;  %v1542_v7 = vpop.f32.mrb[142].mxu0  ;;  %v1815_v40 = vpop.f32.mrb[142].mxu1 }
 0x282   :  { %v4392_v41 = vmax.f32 %v1532_v29, %v1542_v7  ;;  %v4394_v6 = vmax.f32 %v1805_v53, %v1815_v40  ;;  %v1544_v23 = vpop.f32.mrb[143].mxu0  ;;  %v1817_v57 = vpop.f32.mrb[143].mxu1  ;;  %v11585_v29 = vld [vmem:[%s16378_s1 + $0xf4] ss:$8 sps:$4 sm:$0xff]  }
 0x283   :  { %v4890_v1 = vmax.f32 %v4368_v30, %v4369_v33  ;;  %v4974_v43 = vmax.f32 %v4370_v17, %v4371_v49  ;;  %v4393_v16 = vmax.f32 %v1534_v48, %v1544_v23  ;;  %v4395_v24 = vmax.f32 %v1807_v21, %v1817_v57  ;;  %v11587_v23 = vld [vmem:[%s16378_s1 + $0x104] ss:$8 sps:$4 sm:$0xff]  }
 0x284   :  { %2113 = vmatmul.mubr.bf16.gmra.mrb[248].mxu0 %v11584_v51  ;;  %2386 = vmatmul.mubr.bf16.gmra.mrb[248].mxu1 %v11584_v51 }
 0x285   :  { %v4914_v25 = vadd.f32 %v4890_v1, %v12711_v38  ;;  %v4998_v32 = vadd.f32 %v4974_v43, %v12711_v38  ;;  %v4891_v15 = vmax.f32 %v4392_v41, %v4393_v16  ;;  %v4975_v61 = vmax.f32 %v4394_v6, %v4395_v24  ;;  %10041 = vmatprep.mubr.msk.bf16.mxu0 %vm775_vm1, %v11585_v29  ;;  %v11586_v6 = vld [vmem:[%s16378_s1 + $0xf0] ss:$8 sps:$4 sm:$0xff]  }
 0x286   :  { %10070 = vmatprep.mubr.msk.bf16.mxu1 %vm775_vm1, %v11585_v29 }
 0x287   :  { %v4915_v53 = vadd.f32 %v4891_v15, %v12726_v27  ;;  %v4999_v48 = vadd.f32 %v4975_v61, %v12726_v27  ;;  %v1548_v21 = vpop.f32.mrb[144].mxu0  ;;  %v1821_v2 = vpop.f32.mrb[144].mxu1  ;;  %v4938_v17 = vmax.f32 %v4914_v25, 0.0  ;;  %v5022_v10 = vmax.f32 %v4998_v32, 0.0 }
 0x288   :  { %v1550_v58 = vpop.f32.mrb[145].mxu0  ;;  %v1823_v30 = vpop.f32.mrb[145].mxu1 }
 0x289   :  { %v4939_v16 = vmax.f32 %v4915_v53, 0.0  ;;  %v5023_v24 = vmax.f32 %v4999_v48, 0.0  ;;  %v1552_v18 = vpop.f32.mrb[146].mxu0  ;;  %v1825_v33 = vpop.f32.mrb[146].mxu1 }
 0x28a   :  { %v1554_v49 = vpop.f32.mrb[147].mxu0  ;;  %v1827_v7 = vpop.f32.mrb[147].mxu1 }
 0x28b   :  { %v13255_v40 = vpack.c.bf16 %v5023_v24, %v5022_v10  ;;  %v13257_v41 = vpack.c.bf16 %v4939_v16, %v4938_v17 }
 0x28c   :  { %2123 = vmatmul.mubr.bf16.gmra.mrb[252].mxu0 %v11586_v6  ;;  %2396 = vmatmul.mubr.bf16.gmra.mrb[252].mxu1 %v11586_v6 }
 0x28d   :  { %10042 = vmatprep.mubr.msk.bf16.mxu0 %vm775_vm1, %v11587_v23  ;;  %10071 = vmatprep.mubr.msk.bf16.mxu1 %vm775_vm1, %v11587_v23  ;;  %v11588_v23 = vld [vmem:[%s16378_s1 + $0x100] ss:$8 sps:$4 sm:$0xff]  }
 0x28f   :  { %v1558_v57 = vpop.f32.mrb[148].mxu0  ;;  %v1831_v1 = vpop.f32.mrb[148].mxu1 }
 0x290   :  { %v4416_v43 = vmax.f32 %v1548_v21, %v1558_v57  ;;  %v4418_v51 = vmax.f32 %v1821_v2, %v1831_v1  ;;  %v1560_v25 = vpop.f32.mrb[149].mxu0  ;;  %v1833_v32 = vpop.f32.mrb[149].mxu1 }
 0x291   :  { %v4417_v15 = vmax.f32 %v1550_v58, %v1560_v25  ;;  %v4419_v61 = vmax.f32 %v1823_v30, %v1833_v32  ;;  %v1562_v29 = vpop.f32.mrb[150].mxu0  ;;  %v1835_v53 = vpop.f32.mrb[150].mxu1 }
 0x292   :  { %v4440_v48 = vmax.f32 %v1552_v18, %v1562_v29  ;;  %v4442_v17 = vmax.f32 %v1825_v33, %v1835_v53  ;;  %v1564_v10 = vpop.f32.mrb[151].mxu0  ;;  %v1837_v16 = vpop.f32.mrb[151].mxu1  ;;  %v11589_v18 = vld [vmem:[%s16378_s1 + $0x114] ss:$8 sps:$4 sm:$0xff]  }
 0x293   :  { %v4892_v24 = vmax.f32 %v4416_v43, %v4417_v15  ;;  %v4976_v6 = vmax.f32 %v4418_v51, %v4419_v61  ;;  %v4441_v63 = vmax.f32 %v1554_v49, %v1564_v10  ;;  %v4443_v39 = vmax.f32 %v1827_v7, %v1837_v16  ;;  %v11591_v10 = vld [vmem:[%s16378_s1 + $0x124] ss:$8 sps:$4 sm:$0xff]  }
 0x294   :  { %2133 = vmatmul.mubr.bf16.gmra.mrb[0].mxu0 %v11588_v23  ;;  %2406 = vmatmul.mubr.bf16.gmra.mrb[0].mxu1 %v11588_v23 }
 0x295   :  { %v4916_v21 = vadd.f32 %v4892_v24, %v12711_v38  ;;  %v5000_v2 = vadd.f32 %v4976_v6, %v12711_v38  ;;  %v4893_v58 = vmax.f32 %v4440_v48, %v4441_v63  ;;  %v4977_v30 = vmax.f32 %v4442_v17, %v4443_v39  ;;  %10043 = vmatprep.mubr.msk.bf16.mxu0 %vm775_vm1, %v11589_v18  ;;  %v11590_v17 = vld [vmem:[%s16378_s1 + $0x110] ss:$8 sps:$4 sm:$0xff]  }
 0x296   :  { %10072 = vmatprep.mubr.msk.bf16.mxu1 %vm775_vm1, %v11589_v18 }
 0x297   :  { %v4917_v33 = vadd.f32 %v4893_v58, %v12726_v27  ;;  %v5001_v49 = vadd.f32 %v4977_v30, %v12726_v27  ;;  %v1568_v7 = vpop.f32.mrb[152].mxu0  ;;  %v1841_v57 = vpop.f32.mrb[152].mxu1  ;;  %v4940_v51 = vmax.f32 %v4916_v21, 0.0  ;;  %v5024_v25 = vmax.f32 %v5000_v2, 0.0 }
 0x298   :  { %v1570_v1 = vpop.f32.mrb[153].mxu0  ;;  %v1843_v43 = vpop.f32.mrb[153].mxu1 }
 0x299   :  { %v4941_v63 = vmax.f32 %v4917_v33, 0.0  ;;  %v5025_v39 = vmax.f32 %v5001_v49, 0.0  ;;  %v1572_v32 = vpop.f32.mrb[154].mxu0  ;;  %v1845_v15 = vpop.f32.mrb[154].mxu1 }
 0x29a   :  { %v1574_v61 = vpop.f32.mrb[155].mxu0  ;;  %v1847_v29 = vpop.f32.mrb[155].mxu1 }
 0x29b   :  { %v13279_v53 = vpack.c.bf16 %v5025_v39, %v5024_v25  ;;  %v13281_v48 = vpack.c.bf16 %v4941_v63, %v4940_v51 }
 0x29c   :  { %2143 = vmatmul.mubr.bf16.gmra.mrb[4].mxu0 %v11590_v17  ;;  %2416 = vmatmul.mubr.bf16.gmra.mrb[4].mxu1 %v11590_v17 }
 0x29d   :  { %16733 = vst [vmem:[#allocation30_spill] sm:$0xff] %v13279_v53  ;;  %10044 = vmatprep.mubr.msk.bf16.mxu0 %vm775_vm1, %v11591_v10  ;;  %10073 = vmatprep.mubr.msk.bf16.mxu1 %vm775_vm1, %v11591_v10  ;;  %v11592_v10 = vld [vmem:[%s16378_s1 + $0x120] ss:$8 sps:$4 sm:$0xff]  }
 0x29f   :  { %v1578_v16 = vpop.f32.mrb[156].mxu0  ;;  %v1851_v24 = vpop.f32.mrb[156].mxu1 }
 0x2a0   :  { %v4464_v6 = vmax.f32 %v1568_v7, %v1578_v16  ;;  %v4466_v23 = vmax.f32 %v1841_v57, %v1851_v24  ;;  %v1580_v21 = vpop.f32.mrb[157].mxu0  ;;  %v1853_v2 = vpop.f32.mrb[157].mxu1 }
 0x2a1   :  { %v4465_v58 = vmax.f32 %v1570_v1, %v1580_v21  ;;  %v4467_v30 = vmax.f32 %v1843_v43, %v1853_v2  ;;  %v1582_v18 = vpop.f32.mrb[158].mxu0  ;;  %v1855_v33 = vpop.f32.mrb[158].mxu1 }
 0x2a2   :  { %v4488_v49 = vmax.f32 %v1572_v32, %v1582_v18  ;;  %v4490_v51 = vmax.f32 %v1845_v15, %v1855_v33  ;;  %v1584_v25 = vpop.f32.mrb[159].mxu0  ;;  %v1857_v63 = vpop.f32.mrb[159].mxu1  ;;  %v11593_v32 = vld [vmem:[%s16378_s1 + $0x134] ss:$8 sps:$4 sm:$0xff]  }
 0x2a3   :  { %v4894_v39 = vmax.f32 %v4464_v6, %v4465_v58  ;;  %v4978_v17 = vmax.f32 %v4466_v23, %v4467_v30  ;;  %v4489_v3 = vmax.f32 %v1574_v61, %v1584_v25  ;;  %v4491_v13 = vmax.f32 %v1847_v29, %v1857_v63  ;;  %v11595_v25 = vld [vmem:[%s16378_s1 + $0x144] ss:$8 sps:$4 sm:$0xff]  }
 0x2a4   :  { %2153 = vmatmul.mubr.bf16.gmra.mrb[8].mxu0 %v11592_v10  ;;  %2426 = vmatmul.mubr.bf16.gmra.mrb[8].mxu1 %v11592_v10 }
 0x2a5   :  { %v4918_v7 = vadd.f32 %v4894_v39, %v12711_v38  ;;  %v5002_v57 = vadd.f32 %v4978_v17, %v12711_v38  ;;  %v4895_v1 = vmax.f32 %v4488_v49, %v4489_v3  ;;  %v4979_v43 = vmax.f32 %v4490_v51, %v4491_v13  ;;  %10045 = vmatprep.mubr.msk.bf16.mxu0 %vm775_vm1, %v11593_v32  ;;  %v11594_v51 = vld [vmem:[%s16378_s1 + $0x130] ss:$8 sps:$4 sm:$0xff]  }
 0x2a6   :  { %10074 = vmatprep.mubr.msk.bf16.mxu1 %vm775_vm1, %v11593_v32 }
 0x2a7   :  { %v4919_v15 = vadd.f32 %v4895_v1, %v12726_v27  ;;  %v5003_v61 = vadd.f32 %v4979_v43, %v12726_v27  ;;  %v1588_v29 = vpop.f32.mrb[160].mxu0  ;;  %v1861_v16 = vpop.f32.mrb[160].mxu1  ;;  %v4942_v23 = vmax.f32 %v4918_v7, 0.0  ;;  %v5026_v21 = vmax.f32 %v5002_v57, 0.0 }
 0x2a8   :  { %v1590_v24 = vpop.f32.mrb[161].mxu0  ;;  %v1863_v6 = vpop.f32.mrb[161].mxu1 }
 0x2a9   :  { %v4943_v3 = vmax.f32 %v4919_v15, 0.0  ;;  %v5027_v13 = vmax.f32 %v5003_v61, 0.0  ;;  %v1592_v2 = vpop.f32.mrb[162].mxu0  ;;  %v1865_v58 = vpop.f32.mrb[162].mxu1 }
 0x2aa   :  { %v1594_v30 = vpop.f32.mrb[163].mxu0  ;;  %v1867_v18 = vpop.f32.mrb[163].mxu1 }
 0x2ab   :  { %v13303_v33 = vpack.c.bf16 %v5027_v13, %v5026_v21  ;;  %v13305_v49 = vpack.c.bf16 %v4943_v3, %v4942_v23 }
 0x2ac   :  { %2163 = vmatmul.mubr.bf16.gmra.mrb[12].mxu0 %v11594_v51  ;;  %2436 = vmatmul.mubr.bf16.gmra.mrb[12].mxu1 %v11594_v51 }
 0x2ad   :  { %16734 = vst [vmem:[#allocation31_spill] sm:$0xff] %v13303_v33  ;;  %16735 = vst [vmem:[#allocation32_spill] sm:$0xff] %v13305_v49  ;;  %10046 = vmatprep.mubr.msk.bf16.mxu0 %vm775_vm1, %v11595_v25  ;;  %10075 = vmatprep.mubr.msk.bf16.mxu1 %vm775_vm1, %v11595_v25  ;;  %v11596_v25 = vld [vmem:[%s16378_s1 + $0x140] ss:$8 sps:$4 sm:$0xff]   ;;  %v9610_v33 = vld [vmem:[#allocation7 + $0x28] sm:$0xff] }
 0x2af   :  { %v1598_v63 = vpop.f32.mrb[164].mxu0  ;;  %v1871_v39 = vpop.f32.mrb[164].mxu1 }
 0x2b0   :  { %v4512_v17 = vmax.f32 %v1588_v29, %v1598_v63  ;;  %v4514_v10 = vmax.f32 %v1861_v16, %v1871_v39  ;;  %v1600_v7 = vpop.f32.mrb[165].mxu0  ;;  %v1873_v57 = vpop.f32.mrb[165].mxu1 }
 0x2b1   :  { %v4513_v1 = vmax.f32 %v1590_v24, %v1600_v7  ;;  %v4515_v43 = vmax.f32 %v1863_v6, %v1873_v57  ;;  %v1602_v32 = vpop.f32.mrb[166].mxu0  ;;  %v1875_v15 = vpop.f32.mrb[166].mxu1 }
 0x2b2   :  { %v4536_v61 = vmax.f32 %v1592_v2, %v1602_v32  ;;  %v4538_v23 = vmax.f32 %v1865_v58, %v1875_v15  ;;  %v1604_v21 = vpop.f32.mrb[167].mxu0  ;;  %v1877_v3 = vpop.f32.mrb[167].mxu1  ;;  %v11597_v2 = vld [vmem:[%s16378_s1 + $0x154] ss:$8 sps:$4 sm:$0xff]  }
 0x2b3   :  { %v4896_v13 = vmax.f32 %v4512_v17, %v4513_v1  ;;  %v4980_v51 = vmax.f32 %v4514_v10, %v4515_v43  ;;  %v4537_v49 = vmax.f32 %v1594_v30, %v1604_v21  ;;  %v4539_v36 = vmax.f32 %v1867_v18, %v1877_v3  ;;  %v11599_v21 = vld [vmem:[%s16378_s1 + $0x164] ss:$8 sps:$4 sm:$0xff]  }
 0x2b4   :  { %2173 = vmatmul.mubr.bf16.gmra.mrb[16].mxu0 %v11596_v25  ;;  %2446 = vmatmul.mubr.bf16.gmra.mrb[16].mxu1 %v11596_v25 }
 0x2b5   :  { %v4920_v29 = vadd.f32 %v4896_v13, %v12711_v38  ;;  %v5004_v16 = vadd.f32 %v4980_v51, %v12711_v38  ;;  %v4897_v24 = vmax.f32 %v4536_v61, %v4537_v49  ;;  %v4981_v6 = vmax.f32 %v4538_v23, %v4539_v36  ;;  %10047 = vmatprep.mubr.msk.bf16.mxu0 %vm775_vm1, %v11597_v2  ;;  %v11598_v23 = vld [vmem:[%s16378_s1 + $0x150] ss:$8 sps:$4 sm:$0xff]  }
 0x2b6   :  { %10076 = vmatprep.mubr.msk.bf16.mxu1 %vm775_vm1, %v11597_v2 }
 0x2b7   :  { %v4921_v58 = vadd.f32 %v4897_v24, %v12726_v27  ;;  %v5005_v30 = vadd.f32 %v4981_v6, %v12726_v27  ;;  %v1608_v18 = vpop.f32.mrb[168].mxu0  ;;  %v1881_v63 = vpop.f32.mrb[168].mxu1  ;;  %v4944_v10 = vmax.f32 %v4920_v29, 0.0  ;;  %v5028_v7 = vmax.f32 %v5004_v16, 0.0 }
 0x2b8   :  { %v1610_v39 = vpop.f32.mrb[169].mxu0  ;;  %v1883_v17 = vpop.f32.mrb[169].mxu1 }
 0x2b9   :  { %v4945_v49 = vmax.f32 %v4921_v58, 0.0  ;;  %v5029_v36 = vmax.f32 %v5005_v30, 0.0  ;;  %v1612_v57 = vpop.f32.mrb[170].mxu0  ;;  %v1885_v1 = vpop.f32.mrb[170].mxu1 }
 0x2ba   :  { %v1614_v43 = vpop.f32.mrb[171].mxu0  ;;  %v1887_v32 = vpop.f32.mrb[171].mxu1 }
 0x2bb   :  { %v13327_v15 = vpack.c.bf16 %v5029_v36, %v5028_v7  ;;  %v13329_v61 = vpack.c.bf16 %v4945_v49, %v4944_v10 }
 0x2bc   :  { %2183 = vmatmul.mubr.bf16.gmra.mrb[20].mxu0 %v11598_v23  ;;  %2456 = vmatmul.mubr.bf16.gmra.mrb[20].mxu1 %v11598_v23 }
 0x2bd   :  { %16736 = vst [vmem:[#allocation33_spill] sm:$0xff] %v13327_v15  ;;  %16737 = vst [vmem:[#allocation34_spill] sm:$0xff] %v13329_v61  ;;  %10048 = vmatprep.mubr.msk.bf16.mxu0 %vm775_vm1, %v11599_v21  ;;  %10077 = vmatprep.mubr.msk.bf16.mxu1 %vm775_vm1, %v11599_v21  ;;  %v11600_v21 = vld [vmem:[%s16378_s1 + $0x160] ss:$8 sps:$4 sm:$0xff]  }
 0x2bf   :  { %v1618_v3 = vpop.f32.mrb[172].mxu0  ;;  %v1891_v13 = vpop.f32.mrb[172].mxu1 }
 0x2c0   :  { %v4560_v51 = vmax.f32 %v1608_v18, %v1618_v3  ;;  %v4562_v25 = vmax.f32 %v1881_v63, %v1891_v13  ;;  %v1620_v29 = vpop.f32.mrb[173].mxu0  ;;  %v1893_v16 = vpop.f32.mrb[173].mxu1 }
 0x2c1   :  { %v4561_v24 = vmax.f32 %v1610_v39, %v1620_v29  ;;  %v4563_v6 = vmax.f32 %v1883_v17, %v1893_v16  ;;  %v1622_v2 = vpop.f32.mrb[174].mxu0  ;;  %v1895_v58 = vpop.f32.mrb[174].mxu1 }
 0x2c2   :  { %v4584_v30 = vmax.f32 %v1612_v57, %v1622_v2  ;;  %v4586_v10 = vmax.f32 %v1885_v1, %v1895_v58  ;;  %v1624_v7 = vpop.f32.mrb[175].mxu0  ;;  %v1897_v49 = vpop.f32.mrb[175].mxu1  ;;  %v11601_v57 = vld [vmem:[%s16378_s1 + $0x174] ss:$8 sps:$4 sm:$0xff]  }
 0x2c3   :  { %v4898_v36 = vmax.f32 %v4560_v51, %v4561_v24  ;;  %v4982_v23 = vmax.f32 %v4562_v25, %v4563_v6  ;;  %v4585_v61 = vmax.f32 %v1614_v43, %v1624_v7  ;;  %v4587_v15 = vmax.f32 %v1887_v32, %v1897_v49  ;;  %v11603_v7 = vld [vmem:[%s16378_s1 + $0x4] ss:$8 sps:$4 sm:$0xff]  }
 0x2c4   :  { %2193 = vmatmul.mubr.bf16.gmra.mrb[24].mxu0 %v11600_v21  ;;  %2466 = vmatmul.mubr.bf16.gmra.mrb[24].mxu1 %v11600_v21 }
 0x2c5   :  { %v4922_v18 = vadd.f32 %v4898_v36, %v12711_v38  ;;  %v5006_v63 = vadd.f32 %v4982_v23, %v12711_v38  ;;  %v4899_v39 = vmax.f32 %v4584_v30, %v4585_v61  ;;  %v4983_v17 = vmax.f32 %v4586_v10, %v4587_v15  ;;  %10049 = vmatprep.mubr.msk.bf16.mxu0 %vm775_vm1, %v11601_v57  ;;  %v11602_v10 = vld [vmem:[%s16378_s1 + $0x170] ss:$8 sps:$4 sm:$0xff]  }
 0x2c6   :  { %10078 = vmatprep.mubr.msk.bf16.mxu1 %vm775_vm1, %v11601_v57 }
 0x2c7   :  { %v4923_v1 = vadd.f32 %v4899_v39, %v12726_v27  ;;  %v5007_v43 = vadd.f32 %v4983_v17, %v12726_v27  ;;  %v1628_v32 = vpop.f32.mrb[176].mxu0  ;;  %v1901_v3 = vpop.f32.mrb[176].mxu1  ;;  %v4946_v25 = vmax.f32 %v4922_v18, 0.0  ;;  %v5030_v29 = vmax.f32 %v5006_v63, 0.0 }
 0x2c8   :  { %v1630_v13 = vpop.f32.mrb[177].mxu0  ;;  %v1903_v51 = vpop.f32.mrb[177].mxu1 }
 0x2c9   :  { %v4947_v61 = vmax.f32 %v4923_v1, 0.0  ;;  %v5031_v15 = vmax.f32 %v5007_v43, 0.0  ;;  %v1632_v16 = vpop.f32.mrb[178].mxu0  ;;  %v1905_v24 = vpop.f32.mrb[178].mxu1 }
 0x2ca   :  { %v1634_v6 = vpop.f32.mrb[179].mxu0  ;;  %v1907_v2 = vpop.f32.mrb[179].mxu1 }
 0x2cb   :  { %v13351_v58 = vpack.c.bf16 %v5031_v15, %v5030_v29  ;;  %v13353_v30 = vpack.c.bf16 %v4947_v61, %v4946_v25 }
 0x2cc   :  { %2203 = vmatmul.mubr.bf16.gmra.mrb[28].mxu0 %v11602_v10  ;;  %2476 = vmatmul.mubr.bf16.gmra.mrb[28].mxu1 %v11602_v10 }
 0x2cd   :  { %16738 = vst [vmem:[#allocation35_spill] sm:$0xff] %v13351_v58  ;;  %16739 = vst [vmem:[#allocation36_spill] sm:$0xff] %v13353_v30  ;;  %10084 = vmatprep.mubr.msk.bf16.mxu0 %vm775_vm1, %v11603_v7  ;;  %10113 = vmatprep.mubr.msk.bf16.mxu1 %vm775_vm1, %v11603_v7  ;;  %v11604_v7 = vld [vmem:[%s16378_s1] ss:$8 sps:$4 sm:$0xff]  }
 0x2cf   :  { %v1638_v49 = vpop.f32.mrb[180].mxu0  ;;  %v1911_v36 = vpop.f32.mrb[180].mxu1 }
 0x2d0   :  { %v4608_v23 = vmax.f32 %v1628_v32, %v1638_v49  ;;  %v4610_v21 = vmax.f32 %v1901_v3, %v1911_v36  ;;  %v1640_v18 = vpop.f32.mrb[181].mxu0  ;;  %v1913_v63 = vpop.f32.mrb[181].mxu1  ;;  %v11608_v36 = vld [vmem:[%s16377_s0 + $0x124] ss:$112 sps:$4 sm:$0x3f]  }
 0x2d1   :  { %v4609_v39 = vmax.f32 %v1630_v13, %v1640_v18  ;;  %v4611_v17 = vmax.f32 %v1903_v51, %v1913_v63  ;;  %v1642_v57 = vpop.f32.mrb[182].mxu0  ;;  %v1915_v1 = vpop.f32.mrb[182].mxu1 }
 0x2d2   :  { %v4632_v43 = vmax.f32 %v1632_v16, %v1642_v57  ;;  %v4634_v25 = vmax.f32 %v1905_v24, %v1915_v1  ;;  %v1644_v29 = vpop.f32.mrb[183].mxu0  ;;  %v1917_v61 = vpop.f32.mrb[183].mxu1  ;;  %v11605_v16 = vld [vmem:[%s16378_s1 + $0x14] ss:$8 sps:$4 sm:$0xff]   ;;  %v11606_v24 = vld [vmem:[%s16377_s0 + $0x40] ss:$112 sps:$4 sm:$0xff]  }
 0x2d3   :  { %v4900_v15 = vmax.f32 %v4608_v23, %v4609_v39  ;;  %v4984_v10 = vmax.f32 %v4610_v21, %v4611_v17  ;;  %v4633_v30 = vmax.f32 %v1634_v6, %v1644_v29  ;;  %v4635_v58 = vmax.f32 %v1907_v2, %v1917_v61  ;;  %v13394_v29 = vld [vmem:[%s16377_s0 + $0x50] ss:$112 sps:$4 sm:$0xff]  }
 0x2d4   :  { %2519 = vmatmul.mubr.bf16.vlgmr.msra.gmra.mrb[32].mxu0 %v11604_v7  ;;  %2792 = vmatmul.mubr.bf16.vlgmr.msra.gmra.mrb[32].mxu1 %v11604_v7  ;;  %v11610_v7 = vld [vmem:[%s16378_s1 + $0x24] ss:$8 sps:$4 sm:$0xff]  }
 0x2d5   :  { %v4924_v32 = vadd.f32 %v4900_v15, %v12711_v38  ;;  %v5008_v3 = vadd.f32 %v4984_v10, %v12711_v38  ;;  %v4901_v13 = vmax.f32 %v4632_v43, %v4633_v30  ;;  %v4985_v51 = vmax.f32 %v4634_v25, %v4635_v58  ;;  %10085 = vmatprep.mubr.msk.bf16.mxu0 %vm775_vm1, %v11605_v16  ;;  %v13381_v58 = vld [vmem:[%s16377_s0 + $0x48] ss:$112 sps:$4 sm:$0xff]  }
 0x2d6   :  { %10114 = vmatprep.mubr.msk.bf16.mxu1 %vm775_vm1, %v11605_v16  ;;  %3033 = vmatpush1.bf16.msra.mxu0 %v11606_v24  ;;  %v11609_v10 = vld [vmem:[%s16378_s1 + $0x10] ss:$8 sps:$4 sm:$0xff]  }
 0x2d7   :  { %v4925_v6 = vadd.f32 %v4901_v13, %v12726_v27  ;;  %v5009_v2 = vadd.f32 %v4985_v51, %v12726_v27  ;;  %v1648_v49 = vpop.f32.mrb[184].mxu0  ;;  %v1921_v30 = vpop.f32.mrb[184].mxu1  ;;  %3306 = vmatpush1.bf16.msra.mxu1 %v13381_v58  ;;  %10137 = vmatprep.subr.msk.bf16.mxu0 %vm425_vm0, %v11608_v36  ;;  %v4948_v18 = vmax.f32 %v4924_v32, 0.0  ;;  %v5032_v63 = vmax.f32 %v5008_v3, 0.0  ;;  %v11611_v32 = vld [vmem:[%s16377_s0 + $0x44] ss:$112 sps:$4 sm:$0xff]  }
 0x2d8   :  { %v1650_v23 = vpop.f32.mrb[185].mxu0  ;;  %v1923_v21 = vpop.f32.mrb[185].mxu1  ;;  %10166 = vmatprep.subr.msk.bf16.mxu1 %vm425_vm0, %v13149_v37  ;;  %v11612_v51 = vld [vmem:[%s16377_s0 + $0x128] ss:$112 sps:$4 sm:$0x3f]   ;;  %v13428_v36 = vsel %vm425_vm0, %v13149_v37, 0 }
 0x2d9   :  { %v4949_v39 = vmax.f32 %v4925_v6, 0.0  ;;  %v5033_v17 = vmax.f32 %v5009_v2, 0.0  ;;  %v1652_v57 = vpop.f32.mrb[186].mxu0  ;;  %v1925_v1 = vpop.f32.mrb[186].mxu1 }
 0x2da   :  { %v1654_v43 = vpop.f32.mrb[187].mxu0  ;;  %v1927_v25 = vpop.f32.mrb[187].mxu1  ;;  %3035 = vmatpush1.bf16.msra.mxu0 %v13058_v19  ;;  %v13408_v19 = vld [vmem:[%s16377_s0 + $0x130] ss:$112 sps:$4 sm:$0x3f]  }
 0x2db   :  { %3308 = vmatpush1.bf16.msra.mxu1 %v13160_v9  ;;  %3036 = vmatprep.subr.bf16.mxu0 %v13381_v58  ;;  %v13398_v61 = vpack.c.bf16 %v5033_v17, %v5032_v63  ;;  %v13400_v15 = vpack.c.bf16 %v4949_v39, %v4948_v18 }
 0x2dc   :  { %2529 = vmatmul.mubr.bf16.gmra.mrb[36].mxu0 %v11609_v10  ;;  %2802 = vmatmul.mubr.bf16.gmra.mrb[36].mxu1 %v11609_v10 }
 0x2dd   :  { %16740 = vst [vmem:[#allocation37_spill] sm:$0xff] %v13398_v61  ;;  %16741 = vst [vmem:[#allocation38_spill] sm:$0xff] %v13400_v15  ;;  %10086 = vmatprep.mubr.msk.bf16.mxu0 %vm775_vm1, %v11610_v7  ;;  %10115 = vmatprep.mubr.msk.bf16.mxu1 %vm775_vm1, %v11610_v7 }
 0x2de   :  { %3037 = vmatpush1.bf16.msra.mxu0 %v11611_v32  ;;  %3309 = vmatprep.subr.bf16.mxu1 %v13394_v29 }
 0x2df   :  { %v1658_v3 = vpop.f32.mrb[188].mxu0  ;;  %v1931_v13 = vpop.f32.mrb[188].mxu1  ;;  %3310 = vmatpush1.bf16.msra.mxu1 %v13116_v62  ;;  %10138 = vmatprep.subr.msk.bf16.mxu0 %vm425_vm0, %v11612_v51  ;;  %v13435_v51 = vld [vmem:[%s16377_s0 + $0x54] ss:$112 sps:$4 sm:$0xff]  }
 0x2e0   :  { %v4656_v16 = vmax.f32 %v1648_v49, %v1658_v3  ;;  %v4658_v24 = vmax.f32 %v1921_v30, %v1931_v13  ;;  %v1660_v6 = vpop.f32.mrb[189].mxu0  ;;  %v1933_v2 = vpop.f32.mrb[189].mxu1  ;;  %10167 = vmatprep.subr.msk.bf16.mxu1 %vm425_vm0, %v13408_v19 }
 0x2e1   :  { %v4657_v18 = vmax.f32 %v1650_v23, %v1660_v6  ;;  %v4659_v63 = vmax.f32 %v1923_v21, %v1933_v2  ;;  %v1662_v62 = vpop.f32.mrb[190].mxu0  ;;  %v1935_v39 = vpop.f32.mrb[190].mxu1  ;;  %v11613_v23 = vld [vmem:[%s16378_s1 + $0x20] ss:$8 sps:$4 sm:$0xff]  }
 0x2e2   :  { %v4680_v17 = vmax.f32 %v1652_v57, %v1662_v62  ;;  %v4682_v10 = vmax.f32 %v1925_v1, %v1935_v39  ;;  %v1664_v7 = vpop.f32.mrb[191].mxu0  ;;  %v1937_v32 = vpop.f32.mrb[191].mxu1  ;;  %3039 = vmatpush1.bf16.msra.mxu0 %v13093_v34 }
 0x2e3   :  { %v4902_v49 = vmax.f32 %v4656_v16, %v4657_v18  ;;  %v4986_v30 = vmax.f32 %v4658_v24, %v4659_v63  ;;  %v4681_v3 = vmax.f32 %v1654_v43, %v1664_v7  ;;  %v4683_v13 = vmax.f32 %v1927_v25, %v1937_v32  ;;  %3312 = vmatpush1.bf16.msra.mxu1 %v13428_v36  ;;  %v11614_v43 = vld [vmem:[%s16378_s1 + $0x34] ss:$8 sps:$4 sm:$0xff]  }
 0x2e4   :  { %2539 = vmatmul.mubr.bf16.gmra.mrb[40].mxu0 %v11613_v23  ;;  %2812 = vmatmul.mubr.bf16.gmra.mrb[40].mxu1 %v11613_v23  ;;  %v13449_v25 = vld [vmem:[%s16377_s0 + $0x134] ss:$112 sps:$4 sm:$0x3f]   ;;  %v11615_v16 = vld [vmem:[%s16377_s0 + $0x4c] ss:$112 sps:$4 sm:$0xff]  }
 0x2e5   :  { %v4926_v21 = vadd.f32 %v4902_v49, %v12711_v38  ;;  %v5010_v34 = vadd.f32 %v4986_v30, %v12711_v38  ;;  %v4903_v57 = vmax.f32 %v4680_v17, %v4681_v3  ;;  %v4987_v1 = vmax.f32 %v4682_v10, %v4683_v13  ;;  %10087 = vmatprep.mubr.msk.bf16.mxu0 %vm775_vm1, %v11614_v43 }
 0x2e6   :  { %10116 = vmatprep.mubr.msk.bf16.mxu1 %vm775_vm1, %v11614_v43  ;;  %3040 = vmatprep.subr.bf16.mxu0 %v11615_v16  ;;  %v13467_v3 = vsel %vm425_vm0, %v13408_v19, 0 }
 0x2e7   :  { %v4927_v24 = vadd.f32 %v4903_v57, %v12726_v27  ;;  %v5011_v6 = vadd.f32 %v4987_v1, %v12726_v27  ;;  %v1974_v2 = vpop.f32.mrb[192].mxu0  ;;  %v2247_v18 = vpop.f32.mrb[192].mxu1  ;;  %3041 = vmatpush1.bf16.msra.mxu0 %v13381_v58  ;;  %3313 = vmatprep.subr.bf16.mxu1 %v13435_v51  ;;  %v4950_v39 = vmax.f32 %v4926_v21, 0.0  ;;  %v5034_v17 = vmax.f32 %v5010_v34, 0.0  ;;  %v11616_v21 = vld [vmem:[%s16378_s1 + $0x30] ss:$8 sps:$4 sm:$0xff]  }
 0x2e8   :  { %v1976_v63 = vpop.f32.mrb[193].mxu0  ;;  %v2249_v62 = vpop.f32.mrb[193].mxu1  ;;  %3314 = vmatpush1.bf16.msra.mxu1 %v13394_v29  ;;  %10139 = vmatprep.subr.msk.bf16.mxu0 %vm425_vm0, %v13149_v37  ;;  %v13472_v37 = vld [vmem:[%s16377_s0 + $0x58] ss:$112 sps:$4 sm:$0xff]  }
 0x2e9   :  { %v4951_v10 = vmax.f32 %v4927_v24, 0.0  ;;  %v5035_v7 = vmax.f32 %v5011_v6, 0.0  ;;  %v1978_v32 = vpop.f32.mrb[194].mxu0  ;;  %v2251_v49 = vpop.f32.mrb[194].mxu1  ;;  %10168 = vmatprep.subr.msk.bf16.mxu1 %vm425_vm0, %v13449_v25 }
 0x2ea   :  { %v1980_v30 = vpop.f32.mrb[195].mxu0  ;;  %v2253_v58 = vpop.f32.mrb[195].mxu1 }
 0x2eb   :  { %3043 = vmatpush1.bf16.msra.mxu0 %v13160_v9  ;;  %v13474_v13 = vpack.c.bf16 %v5035_v7, %v5034_v17  ;;  %v13476_v23 = vpack.c.bf16 %v4951_v10, %v4950_v39  ;;  %v11617_v9 = vld [vmem:[%s16378_s1 + $0x44] ss:$8 sps:$4 sm:$0xff]  }
 0x2ec   :  { %2549 = vmatmul.mubr.bf16.gmra.mrb[44].mxu0 %v11616_v21  ;;  %2822 = vmatmul.mubr.bf16.gmra.mrb[44].mxu1 %v11616_v21 }
 0x2ed   :  { %16742 = vst [vmem:[#allocation39_spill] sm:$0xff] %v13474_v13  ;;  %16743 = vst [vmem:[#allocation40_spill] sm:$0xff] %v13476_v23  ;;  %10088 = vmatprep.mubr.msk.bf16.mxu0 %vm775_vm1, %v11617_v9  ;;  %10117 = vmatprep.mubr.msk.bf16.mxu1 %vm775_vm1, %v11617_v9 }
 0x2ee   :  { %3316 = vmatpush1.bf16.msra.mxu1 %v13467_v3  ;;  %3044 = vmatprep.subr.bf16.mxu0 %v13394_v29 }
 0x2ef   :  { %v1984_v34 = vpop.f32.mrb[196].mxu0  ;;  %v2257_v57 = vpop.f32.mrb[196].mxu1  ;;  %3045 = vmatpush1.bf16.msra.mxu0 %v11615_v16  ;;  %3317 = vmatprep.subr.bf16.mxu1 %v13472_v37  ;;  %v13495_v16 = vld [vmem:[%s16377_s0 + $0x138] ss:$112 sps:$4 sm:$0x3f]  }
 0x2f0   :  { %v4132_v1 = vmax.f32 %v1974_v2, %v1984_v34  ;;  %v4134_v43 = vmax.f32 %v2247_v18, %v2257_v57  ;;  %v1986_v24 = vpop.f32.mrb[197].mxu0  ;;  %v2259_v6 = vpop.f32.mrb[197].mxu1  ;;  %10140 = vmatprep.subr.msk.bf16.mxu0 %vm425_vm0, %v13408_v19  ;;  %v11618_v19 = vld [vmem:[%s16378_s1 + $0x40] ss:$8 sps:$4 sm:$0xff]  }
 0x2f1   :  { %v4133_v39 = vmax.f32 %v1976_v63, %v1986_v24  ;;  %v4135_v17 = vmax.f32 %v2249_v62, %v2259_v6  ;;  %v1988_v10 = vpop.f32.mrb[198].mxu0  ;;  %v2261_v7 = vpop.f32.mrb[198].mxu1  ;;  %v13503_v63 = vsel %vm425_vm0, %v13449_v25, 0 }
 0x2f2   :  { %v4156_v21 = vmax.f32 %v1978_v32, %v1988_v10  ;;  %v4158_v9 = vmax.f32 %v2251_v49, %v2261_v7  ;;  %v1990_v23 = vpop.f32.mrb[199].mxu0  ;;  %v2263_v13 = vpop.f32.mrb[199].mxu1  ;;  %3318 = vmatpush1.bf16.msra.mxu1 %v13435_v51 }
 0x2f3   :  { %v5048_v2 = vmax.f32 %v4132_v1, %v4133_v39  ;;  %v5132_v18 = vmax.f32 %v4134_v43, %v4135_v17  ;;  %v4157_v34 = vmax.f32 %v1980_v30, %v1990_v23  ;;  %v4159_v57 = vmax.f32 %v2253_v58, %v2263_v13  ;;  %3047 = vmatpush1.bf16.msra.mxu0 %v13428_v36  ;;  %v11619_v36 = vld [vmem:[%s16378_s1 + $0x54] ss:$8 sps:$4 sm:$0xff]  }
 0x2f4   :  { %2559 = vmatmul.mubr.bf16.gmra.mrb[48].mxu0 %v11618_v19  ;;  %2832 = vmatmul.mubr.bf16.gmra.mrb[48].mxu1 %v11618_v19 }
 0x2f5   :  { %v5072_v62 = vadd.f32 %v5048_v2, %v12711_v38  ;;  %v5156_v32 = vadd.f32 %v5132_v18, %v12711_v38  ;;  %v5049_v49 = vmax.f32 %v4156_v21, %v4157_v34  ;;  %v5133_v1 = vmax.f32 %v4158_v9, %v4159_v57  ;;  %10089 = vmatprep.mubr.msk.bf16.mxu0 %vm775_vm1, %v11619_v36  ;;  %v13528_v57 = vld [vmem:[%s16377_s0 + $0x5c] ss:$112 sps:$4 sm:$0xff]  }
 0x2f6   :  { %10118 = vmatprep.mubr.msk.bf16.mxu1 %vm775_vm1, %v11619_v36  ;;  %10169 = vmatprep.subr.msk.bf16.mxu1 %vm425_vm0, %v13495_v16 }
 0x2f7   :  { %v5073_v30 = vadd.f32 %v5049_v49, %v12726_v27  ;;  %v5157_v58 = vadd.f32 %v5133_v1, %v12726_v27  ;;  %v1994_v13 = vpop.f32.mrb[200].mxu0  ;;  %v2267_v23 = vpop.f32.mrb[200].mxu1  ;;  %3320 = vmatpush1.bf16.msra.mxu1 %v13503_v63  ;;  %3048 = vmatprep.subr.bf16.mxu0 %v13435_v51  ;;  %v5096_v6 = vmax.f32 %v5072_v62, 0.0  ;;  %v5180_v39 = vmax.f32 %v5156_v32, 0.0 }
 0x2f8   :  { %v1996_v43 = vpop.f32.mrb[201].mxu0  ;;  %v2269_v24 = vpop.f32.mrb[201].mxu1  ;;  %3049 = vmatpush1.bf16.msra.mxu0 %v13394_v29  ;;  %v11620_v29 = vld [vmem:[%s16378_s1 + $0x50] ss:$8 sps:$4 sm:$0xff]   ;;  %3321 = vmatprep.subr.bf16.mxu1 %v13528_v57 }
 0x2f9   :  { %v5097_v17 = vmax.f32 %v5073_v30, 0.0  ;;  %v5181_v10 = vmax.f32 %v5157_v58, 0.0  ;;  %v1998_v7 = vpop.f32.mrb[202].mxu0  ;;  %v2271_v21 = vpop.f32.mrb[202].mxu1  ;;  %10141 = vmatprep.subr.msk.bf16.mxu0 %vm425_vm0, %v13449_v25  ;;  %v11621_v25 = vld [vmem:[%s16378_s1 + $0x64] ss:$8 sps:$4 sm:$0xff]  }
 0x2fa   :  { %v2000_v9 = vpop.f32.mrb[203].mxu0  ;;  %v2273_v2 = vpop.f32.mrb[203].mxu1 }
 0x2fb   :  { %v13521_v18 = vpack.c.bf16 %v5097_v17, %v5096_v6  ;;  %v13523_v34 = vpack.c.bf16 %v5181_v10, %v5180_v39  ;;  %3322 = vmatpush1.bf16.msra.mxu1 %v13472_v37 }
 0x2fc   :  { %2569 = vmatmul.mubr.bf16.gmra.mrb[52].mxu0 %v11620_v29  ;;  %2842 = vmatmul.mubr.bf16.gmra.mrb[52].mxu1 %v11620_v29 }
 0x2fd   :  { %16744 = vst [vmem:[#allocation41_spill] sm:$0xff] %v13521_v18  ;;  %16745 = vst [vmem:[#allocation42_spill] sm:$0xff] %v13523_v34  ;;  %10090 = vmatprep.mubr.msk.bf16.mxu0 %vm775_vm1, %v11621_v25  ;;  %10119 = vmatprep.mubr.msk.bf16.mxu1 %vm775_vm1, %v11621_v25 }
 0x2fe   :  { %3051 = vmatpush1.bf16.msra.mxu0 %v13467_v3 }
 0x2ff   :  { %v2004_v19 = vpop.f32.mrb[204].mxu0  ;;  %v2277_v62 = vpop.f32.mrb[204].mxu1  ;;  %3578 = vmatprep.subr.bf16.mxu0 %v13435_v51  ;;  %v11622_v51 = vld [vmem:[%s16378_s1 + $0x60] ss:$8 sps:$4 sm:$0xff]  }
 0x300   :  { %v4180_v32 = vmax.f32 %v1994_v13, %v2004_v19  ;;  %v4182_v49 = vmax.f32 %v2267_v23, %v2277_v62  ;;  %v2006_v1 = vpop.f32.mrb[205].mxu0  ;;  %v2279_v36 = vpop.f32.mrb[205].mxu1 }
 0x301   :  { %v4181_v30 = vmax.f32 %v1996_v43, %v2006_v1  ;;  %v4183_v58 = vmax.f32 %v2269_v24, %v2279_v36  ;;  %v2008_v6 = vpop.f32.mrb[206].mxu0  ;;  %v2281_v39 = vpop.f32.mrb[206].mxu1  ;;  %v11623_v24 = vld [vmem:[%s16378_s1 + $0x74] ss:$8 sps:$4 sm:$0xff]  }
 0x302   :  { %v4204_v17 = vmax.f32 %v1998_v7, %v2008_v6  ;;  %v4206_v10 = vmax.f32 %v2271_v21, %v2281_v39  ;;  %v2010_v29 = vpop.f32.mrb[207].mxu0  ;;  %v2283_v25 = vpop.f32.mrb[207].mxu1  ;;  %v13561_v6 = vld [vmem:[%s16377_s0 + $0x13c] ss:$112 sps:$4 sm:$0x3f]  }
 0x303   :  { %v5050_v34 = vmax.f32 %v4180_v32, %v4181_v30  ;;  %v5134_v18 = vmax.f32 %v4182_v49, %v4183_v58  ;;  %v4205_v15 = vmax.f32 %v2000_v9, %v2010_v29  ;;  %v4207_v61 = vmax.f32 %v2273_v2, %v2283_v25  ;;  %v11624_v39 = vld [vmem:[%s16378_s1 + $0x70] ss:$8 sps:$4 sm:$0xff]   ;;  %10170 = vmatprep.subr.msk.bf16.mxu1 %vm425_vm0, %v13561_v6 }
 0x304   :  { %2579 = vmatmul.mubr.bf16.gmra.mrb[56].mxu0 %v11622_v51  ;;  %2852 = vmatmul.mubr.bf16.gmra.mrb[56].mxu1 %v11622_v51 }
 0x305   :  { %v5074_v37 = vadd.f32 %v5050_v34, %v12711_v38  ;;  %v5158_v13 = vadd.f32 %v5134_v18, %v12711_v38  ;;  %v5051_v23 = vmax.f32 %v4204_v17, %v4205_v15  ;;  %v5135_v43 = vmax.f32 %v4206_v10, %v4207_v61  ;;  %10091 = vmatprep.mubr.msk.bf16.mxu0 %vm775_vm1, %v11623_v24  ;;  %v11625_v10 = vld [vmem:[%s16378_s1 + $0x84] ss:$8 sps:$4 sm:$0xff]  }
 0x306   :  { %10120 = vmatprep.mubr.msk.bf16.mxu1 %vm775_vm1, %v11623_v24  ;;  %v13568_v17 = vsel %vm425_vm0, %v13495_v16, 0 }
 0x307   :  { %v5075_v7 = vadd.f32 %v5051_v23, %v12726_v27  ;;  %v5159_v21 = vadd.f32 %v5135_v43, %v12726_v27  ;;  %v2014_v9 = vpop.f32.mrb[208].mxu0  ;;  %v2287_v2 = vpop.f32.mrb[208].mxu1  ;;  %v5098_v62 = vmax.f32 %v5074_v37, 0.0  ;;  %v5182_v18 = vmax.f32 %v5158_v13, 0.0  ;;  %3324 = vmatpush1.bf16.msra.mxu1 %v13568_v17 }
 0x308   :  { %v2016_v19 = vpop.f32.mrb[209].mxu0  ;;  %v2289_v34 = vpop.f32.mrb[209].mxu1  ;;  %3851 = vmatprep.subr.bf16.mxu1 %v13528_v57 }
 0x309   :  { %v5099_v15 = vmax.f32 %v5075_v7, 0.0  ;;  %v5183_v61 = vmax.f32 %v5159_v21, 0.0  ;;  %v2018_v32 = vpop.f32.mrb[210].mxu0  ;;  %v2291_v49 = vpop.f32.mrb[210].mxu1 }
 0x30a   :  { %v2020_v1 = vpop.f32.mrb[211].mxu0  ;;  %v2293_v36 = vpop.f32.mrb[211].mxu1 }
 0x30b   :  { %v13554_v30 = vpack.c.bf16 %v5099_v15, %v5098_v62  ;;  %v13556_v58 = vpack.c.bf16 %v5183_v61, %v5182_v18 }
 0x30c   :  { %2589 = vmatmul.mubr.bf16.gmra.mrb[60].mxu0 %v11624_v39  ;;  %2862 = vmatmul.mubr.bf16.gmra.mrb[60].mxu1 %v11624_v39 }
 0x30d   :  { %16746 = vst [vmem:[#allocation43_spill] sm:$0xff] %v13554_v30  ;;  %16747 = vst [vmem:[#allocation44_spill] sm:$0xff] %v13556_v58  ;;  %10092 = vmatprep.mubr.msk.bf16.mxu0 %vm775_vm1, %v11625_v10  ;;  %10121 = vmatprep.mubr.msk.bf16.mxu1 %vm775_vm1, %v11625_v10 }
 0x30f   :  { %v2024_v29 = vpop.f32.mrb[212].mxu0  ;;  %v2297_v25 = vpop.f32.mrb[212].mxu1 }
 0x310   :  { %v4228_v51 = vmax.f32 %v2014_v9, %v2024_v29  ;;  %v4230_v37 = vmax.f32 %v2287_v2, %v2297_v25  ;;  %v2026_v13 = vpop.f32.mrb[213].mxu0  ;;  %v2299_v16 = vpop.f32.mrb[213].mxu1  ;;  %v11626_v9 = vld [vmem:[%s16378_s1 + $0x80] ss:$8 sps:$4 sm:$0xff]  }
 0x311   :  { %v4229_v23 = vmax.f32 %v2016_v19, %v2026_v13  ;;  %v4231_v43 = vmax.f32 %v2289_v34, %v2299_v16  ;;  %v2028_v24 = vpop.f32.mrb[214].mxu0  ;;  %v2301_v7 = vpop.f32.mrb[214].mxu1 }
 0x312   :  { %v4252_v21 = vmax.f32 %v2018_v32, %v2028_v24  ;;  %v4254_v62 = vmax.f32 %v2291_v49, %v2301_v7  ;;  %v2030_v18 = vpop.f32.mrb[215].mxu0  ;;  %v2303_v15 = vpop.f32.mrb[215].mxu1  ;;  %v11627_v32 = vld [vmem:[%s16378_s1 + $0x94] ss:$8 sps:$4 sm:$0xff]  }
 0x313   :  { %v5052_v61 = vmax.f32 %v4228_v51, %v4229_v23  ;;  %v5136_v39 = vmax.f32 %v4230_v37, %v4231_v43  ;;  %v4253_v10 = vmax.f32 %v2020_v1, %v2030_v18  ;;  %v4255_v58 = vmax.f32 %v2293_v36, %v2303_v15  ;;  %v11628_v15 = vld [vmem:[%s16378_s1 + $0x90] ss:$8 sps:$4 sm:$0xff]  }
 0x314   :  { %2599 = vmatmul.mubr.bf16.gmra.mrb[64].mxu0 %v11626_v9  ;;  %2872 = vmatmul.mubr.bf16.gmra.mrb[64].mxu1 %v11626_v9 }
 0x315   :  { %v5076_v2 = vadd.f32 %v5052_v61, %v12711_v38  ;;  %v5160_v19 = vadd.f32 %v5136_v39, %v12711_v38  ;;  %v5053_v34 = vmax.f32 %v4252_v21, %v4253_v10  ;;  %v5137_v29 = vmax.f32 %v4254_v62, %v4255_v58  ;;  %10093 = vmatprep.mubr.msk.bf16.mxu0 %vm775_vm1, %v11627_v32  ;;  %v11629_v61 = vld [vmem:[%s16378_s1 + $0xa4] ss:$8 sps:$4 sm:$0xff]  }
 0x316   :  { %10122 = vmatprep.mubr.msk.bf16.mxu1 %vm775_vm1, %v11627_v32 }
 0x317   :  { %v5077_v49 = vadd.f32 %v5053_v34, %v12726_v27  ;;  %v5161_v1 = vadd.f32 %v5137_v29, %v12726_v27  ;;  %v2034_v36 = vpop.f32.mrb[216].mxu0  ;;  %v2307_v25 = vpop.f32.mrb[216].mxu1  ;;  %v5100_v13 = vmax.f32 %v5076_v2, 0.0  ;;  %v5184_v16 = vmax.f32 %v5160_v19, 0.0 }
 0x318   :  { %v2036_v51 = vpop.f32.mrb[217].mxu0  ;;  %v2309_v37 = vpop.f32.mrb[217].mxu1 }
 0x319   :  { %v5101_v23 = vmax.f32 %v5077_v49, 0.0  ;;  %v5185_v58 = vmax.f32 %v5161_v1, 0.0  ;;  %v2038_v43 = vpop.f32.mrb[218].mxu0  ;;  %v2311_v24 = vpop.f32.mrb[218].mxu1 }
 0x31a   :  { %v2040_v7 = vpop.f32.mrb[219].mxu0  ;;  %v2313_v21 = vpop.f32.mrb[219].mxu1 }
 0x31b   :  { %v13591_v62 = vpack.c.bf16 %v5101_v23, %v5100_v13  ;;  %v13593_v18 = vpack.c.bf16 %v5185_v58, %v5184_v16 }
 0x31c   :  { %2609 = vmatmul.mubr.bf16.gmra.mrb[68].mxu0 %v11628_v15  ;;  %2882 = vmatmul.mubr.bf16.gmra.mrb[68].mxu1 %v11628_v15 }
 0x31d   :  { %16748 = vst [vmem:[#allocation45_spill] sm:$0xff] %v13591_v62  ;;  %16749 = vst [vmem:[#allocation46_spill] sm:$0xff] %v13593_v18  ;;  %10094 = vmatprep.mubr.msk.bf16.mxu0 %vm775_vm1, %v11629_v61  ;;  %10123 = vmatprep.mubr.msk.bf16.mxu1 %vm775_vm1, %v11629_v61  ;;  %v11630_v61 = vld [vmem:[%s16378_s1 + $0xa0] ss:$8 sps:$4 sm:$0xff]  }
 0x31f   :  { %v2044_v39 = vpop.f32.mrb[220].mxu0  ;;  %v2317_v10 = vpop.f32.mrb[220].mxu1 }
 0x320   :  { %v4276_v9 = vmax.f32 %v2034_v36, %v2044_v39  ;;  %v4278_v2 = vmax.f32 %v2307_v25, %v2317_v10  ;;  %v2046_v19 = vpop.f32.mrb[221].mxu0  ;;  %v2319_v34 = vpop.f32.mrb[221].mxu1 }
 0x321   :  { %v4277_v29 = vmax.f32 %v2036_v51, %v2046_v19  ;;  %v4279_v32 = vmax.f32 %v2309_v37, %v2319_v34  ;;  %v2048_v49 = vpop.f32.mrb[222].mxu0  ;;  %v2321_v1 = vpop.f32.mrb[222].mxu1 }
 0x322   :  { %v4300_v13 = vmax.f32 %v2038_v43, %v2048_v49  ;;  %v4302_v16 = vmax.f32 %v2311_v24, %v2321_v1  ;;  %v2050_v23 = vpop.f32.mrb[223].mxu0  ;;  %v2323_v58 = vpop.f32.mrb[223].mxu1  ;;  %v11631_v43 = vld [vmem:[%s16378_s1 + $0xb4] ss:$8 sps:$4 sm:$0xff]  }
 0x323   :  { %v5054_v15 = vmax.f32 %v4276_v9, %v4277_v29  ;;  %v5138_v18 = vmax.f32 %v4278_v2, %v4279_v32  ;;  %v4301_v62 = vmax.f32 %v2040_v7, %v2050_v23  ;;  %v4303_v30 = vmax.f32 %v2313_v21, %v2323_v58 }
 0x324   :  { %2619 = vmatmul.mubr.bf16.gmra.mrb[72].mxu0 %v11630_v61  ;;  %2892 = vmatmul.mubr.bf16.gmra.mrb[72].mxu1 %v11630_v61 }
 0x325   :  { %v5078_v36 = vadd.f32 %v5054_v15, %v12711_v38  ;;  %v5162_v25 = vadd.f32 %v5138_v18, %v12711_v38  ;;  %v5055_v51 = vmax.f32 %v4300_v13, %v4301_v62  ;;  %v5139_v37 = vmax.f32 %v4302_v16, %v4303_v30  ;;  %10095 = vmatprep.mubr.msk.bf16.mxu0 %vm775_vm1, %v11631_v43  ;;  %v11632_v13 = vld [vmem:[%s16378_s1 + $0xb0] ss:$8 sps:$4 sm:$0xff]   ;;  %v11633_v16 = vld [vmem:[%s16378_s1 + $0xc4] ss:$8 sps:$4 sm:$0xff]  }
 0x326   :  { %10124 = vmatprep.mubr.msk.bf16.mxu1 %vm775_vm1, %v11631_v43 }
 0x327   :  { %v5079_v24 = vadd.f32 %v5055_v51, %v12726_v27  ;;  %v5163_v7 = vadd.f32 %v5139_v37, %v12726_v27  ;;  %v2054_v21 = vpop.f32.mrb[224].mxu0  ;;  %v2327_v39 = vpop.f32.mrb[224].mxu1  ;;  %v5102_v2 = vmax.f32 %v5078_v36, 0.0  ;;  %v5186_v18 = vmax.f32 %v5162_v25, 0.0 }
 0x328   :  { %v2056_v10 = vpop.f32.mrb[225].mxu0  ;;  %v2329_v9 = vpop.f32.mrb[225].mxu1 }
 0x329   :  { %v5103_v62 = vmax.f32 %v5079_v24, 0.0  ;;  %v5187_v30 = vmax.f32 %v5163_v7, 0.0  ;;  %v2058_v19 = vpop.f32.mrb[226].mxu0  ;;  %v2331_v34 = vpop.f32.mrb[226].mxu1 }
 0x32a   :  { %v2060_v29 = vpop.f32.mrb[227].mxu0  ;;  %v2333_v32 = vpop.f32.mrb[227].mxu1 }
 0x32b   :  { %v13615_v49 = vpack.c.bf16 %v5103_v62, %v5102_v2  ;;  %v13617_v1 = vpack.c.bf16 %v5187_v30, %v5186_v18 }
 0x32c   :  { %2629 = vmatmul.mubr.bf16.gmra.mrb[76].mxu0 %v11632_v13  ;;  %2902 = vmatmul.mubr.bf16.gmra.mrb[76].mxu1 %v11632_v13 }
 0x32d   :  { %16750 = vst [vmem:[#allocation47_spill] sm:$0xff] %v13615_v49  ;;  %16751 = vst [vmem:[#allocation48_spill] sm:$0xff] %v13617_v1  ;;  %10096 = vmatprep.mubr.msk.bf16.mxu0 %vm775_vm1, %v11633_v16  ;;  %10125 = vmatprep.mubr.msk.bf16.mxu1 %vm775_vm1, %v11633_v16  ;;  %v11634_v16 = vld [vmem:[%s16378_s1 + $0xc0] ss:$8 sps:$4 sm:$0xff]  }
 0x32f   :  { %v2064_v23 = vpop.f32.mrb[228].mxu0  ;;  %v2337_v58 = vpop.f32.mrb[228].mxu1 }
 0x330   :  { %v4324_v15 = vmax.f32 %v2054_v21, %v2064_v23  ;;  %v4326_v61 = vmax.f32 %v2327_v39, %v2337_v58  ;;  %v2066_v36 = vpop.f32.mrb[229].mxu0  ;;  %v2339_v25 = vpop.f32.mrb[229].mxu1 }
 0x331   :  { %v4325_v51 = vmax.f32 %v2056_v10, %v2066_v36  ;;  %v4327_v37 = vmax.f32 %v2329_v9, %v2339_v25  ;;  %v2068_v43 = vpop.f32.mrb[230].mxu0  ;;  %v2341_v24 = vpop.f32.mrb[230].mxu1 }
 0x332   :  { %v4348_v7 = vmax.f32 %v2058_v19, %v2068_v43  ;;  %v4350_v2 = vmax.f32 %v2331_v34, %v2341_v24  ;;  %v2070_v18 = vpop.f32.mrb[231].mxu0  ;;  %v2343_v62 = vpop.f32.mrb[231].mxu1  ;;  %v11635_v19 = vld [vmem:[%s16378_s1 + $0xd4] ss:$8 sps:$4 sm:$0xff]  }
 0x333   :  { %v5056_v30 = vmax.f32 %v4324_v15, %v4325_v51  ;;  %v5140_v13 = vmax.f32 %v4326_v61, %v4327_v37  ;;  %v4349_v1 = vmax.f32 %v2060_v29, %v2070_v18  ;;  %v4351_v49 = vmax.f32 %v2333_v32, %v2343_v62  ;;  %v11637_v18 = vld [vmem:[%s16378_s1 + $0xe4] ss:$8 sps:$4 sm:$0xff]  }
 0x334   :  { %2639 = vmatmul.mubr.bf16.gmra.mrb[80].mxu0 %v11634_v16  ;;  %2912 = vmatmul.mubr.bf16.gmra.mrb[80].mxu1 %v11634_v16 }
 0x335   :  { %v5080_v21 = vadd.f32 %v5056_v30, %v12711_v38  ;;  %v5164_v39 = vadd.f32 %v5140_v13, %v12711_v38  ;;  %v5057_v10 = vmax.f32 %v4348_v7, %v4349_v1  ;;  %v5141_v9 = vmax.f32 %v4350_v2, %v4351_v49  ;;  %10097 = vmatprep.mubr.msk.bf16.mxu0 %vm775_vm1, %v11635_v19  ;;  %v11636_v2 = vld [vmem:[%s16378_s1 + $0xd0] ss:$8 sps:$4 sm:$0xff]  }
 0x336   :  { %10126 = vmatprep.mubr.msk.bf16.mxu1 %vm775_vm1, %v11635_v19 }
 0x337   :  { %v5081_v34 = vadd.f32 %v5057_v10, %v12726_v27  ;;  %v5165_v29 = vadd.f32 %v5141_v9, %v12726_v27  ;;  %v2074_v32 = vpop.f32.mrb[232].mxu0  ;;  %v2347_v23 = vpop.f32.mrb[232].mxu1  ;;  %v5104_v61 = vmax.f32 %v5080_v21, 0.0  ;;  %v5188_v36 = vmax.f32 %v5164_v39, 0.0 }
 0x338   :  { %v2076_v58 = vpop.f32.mrb[233].mxu0  ;;  %v2349_v15 = vpop.f32.mrb[233].mxu1 }
 0x339   :  { %v5105_v1 = vmax.f32 %v5081_v34, 0.0  ;;  %v5189_v49 = vmax.f32 %v5165_v29, 0.0  ;;  %v2078_v25 = vpop.f32.mrb[234].mxu0  ;;  %v2351_v51 = vpop.f32.mrb[234].mxu1 }
 0x33a   :  { %v2080_v37 = vpop.f32.mrb[235].mxu0  ;;  %v2353_v43 = vpop.f32.mrb[235].mxu1 }
 0x33b   :  { %v13639_v24 = vpack.c.bf16 %v5105_v1, %v5104_v61  ;;  %v13641_v7 = vpack.c.bf16 %v5189_v49, %v5188_v36 }
 0x33c   :  { %2649 = vmatmul.mubr.bf16.gmra.mrb[84].mxu0 %v11636_v2  ;;  %2922 = vmatmul.mubr.bf16.gmra.mrb[84].mxu1 %v11636_v2 }
 0x33d   :  { %16752 = vst [vmem:[#allocation49_spill] sm:$0xff] %v13639_v24  ;;  %16753 = vst [vmem:[#allocation50_spill] sm:$0xff] %v13641_v7  ;;  %10098 = vmatprep.mubr.msk.bf16.mxu0 %vm775_vm1, %v11637_v18  ;;  %10127 = vmatprep.mubr.msk.bf16.mxu1 %vm775_vm1, %v11637_v18  ;;  %v11638_v18 = vld [vmem:[%s16378_s1 + $0xe0] ss:$8 sps:$4 sm:$0xff]  }
 0x33f   :  { %v2084_v62 = vpop.f32.mrb[236].mxu0  ;;  %v2357_v30 = vpop.f32.mrb[236].mxu1 }
 0x340   :  { %v4372_v13 = vmax.f32 %v2074_v32, %v2084_v62  ;;  %v4374_v16 = vmax.f32 %v2347_v23, %v2357_v30  ;;  %v2086_v21 = vpop.f32.mrb[237].mxu0  ;;  %v2359_v39 = vpop.f32.mrb[237].mxu1  ;;  %v8867_v30 = vld [vmem:[#allocation4 + $0x10] sm:$0xff] }
 0x341   :  { %v4373_v10 = vmax.f32 %v2076_v58, %v2086_v21  ;;  %v4375_v9 = vmax.f32 %v2349_v15, %v2359_v39  ;;  %v2088_v19 = vpop.f32.mrb[238].mxu0  ;;  %v2361_v34 = vpop.f32.mrb[238].mxu1  ;;  %8892 = vperm.xlu0 %11382, %v8867_v30  }
 0x342   :  { %v4396_v29 = vmax.f32 %v2078_v25, %v2088_v19  ;;  %v4398_v61 = vmax.f32 %v2351_v51, %v2361_v34  ;;  %v2090_v36 = vpop.f32.mrb[239].mxu0  ;;  %v2363_v1 = vpop.f32.mrb[239].mxu1  ;;  %v11639_v25 = vld [vmem:[%s16378_s1 + $0xf4] ss:$8 sps:$4 sm:$0xff]  }
 0x343   :  { %v5058_v49 = vmax.f32 %v4372_v13, %v4373_v10  ;;  %v5142_v2 = vmax.f32 %v4374_v16, %v4375_v9  ;;  %v4397_v7 = vmax.f32 %v2080_v37, %v2090_v36  ;;  %v4399_v24 = vmax.f32 %v2353_v43, %v2363_v1  ;;  %v9606_v36 = vld [vmem:[#allocation7 + $0x8] sm:$0xff] }
 0x344   :  { %2659 = vmatmul.mubr.bf16.gmra.mrb[88].mxu0 %v11638_v18  ;;  %2932 = vmatmul.mubr.bf16.gmra.mrb[88].mxu1 %v11638_v18  ;;  %v11640_v1 = vld [vmem:[%s16378_s1 + $0xf0] ss:$8 sps:$4 sm:$0xff]  }
 0x345   :  { %v5082_v32 = vadd.f32 %v5058_v49, %v12711_v38  ;;  %v5166_v23 = vadd.f32 %v5142_v2, %v12711_v38  ;;  %v5059_v58 = vmax.f32 %v4396_v29, %v4397_v7  ;;  %v5143_v15 = vmax.f32 %v4398_v61, %v4399_v24  ;;  %10099 = vmatprep.mubr.msk.bf16.mxu0 %vm775_vm1, %v11639_v25  ;;  %v11641_v49 = vld [vmem:[%s16378_s1 + $0x104] ss:$8 sps:$4 sm:$0xff]  }
 0x346   :  { %10128 = vmatprep.mubr.msk.bf16.mxu1 %vm775_vm1, %v11639_v25  ;;  %9619 = vperm.xlu0 %11382, %v9606_v36  }
 0x347   :  { %v5083_v51 = vadd.f32 %v5059_v58, %v12726_v27  ;;  %v5167_v37 = vadd.f32 %v5143_v15, %v12726_v27  ;;  %v2094_v43 = vpop.f32.mrb[240].mxu0  ;;  %v2367_v62 = vpop.f32.mrb[240].mxu1  ;;  %v5106_v7 = vmax.f32 %v5082_v32, 0.0  ;;  %v5190_v24 = vmax.f32 %v5166_v23, 0.0  ;;  %v9608_v32 = vld [vmem:[#allocation7 + $0x18] sm:$0xff] }
 0x348   :  { %v2096_v13 = vpop.f32.mrb[241].mxu0  ;;  %v2369_v16 = vpop.f32.mrb[241].mxu1 }
 0x349   :  { %v5107_v21 = vmax.f32 %v5083_v51, 0.0  ;;  %v5191_v39 = vmax.f32 %v5167_v37, 0.0  ;;  %v2098_v10 = vpop.f32.mrb[242].mxu0  ;;  %v2371_v9 = vpop.f32.mrb[242].mxu1 }
 0x34a   :  { %v2100_v19 = vpop.f32.mrb[243].mxu0  ;;  %v2373_v34 = vpop.f32.mrb[243].mxu1  ;;  %9629 = vperm.xlu0 %11382, %v9608_v32  }
 0x34b   :  { %v13663_v29 = vpack.c.bf16 %v5107_v21, %v5106_v7  ;;  %v13665_v61 = vpack.c.bf16 %v5191_v39, %v5190_v24 }
 0x34c   :  { %2669 = vmatmul.mubr.bf16.gmra.mrb[92].mxu0 %v11640_v1  ;;  %2942 = vmatmul.mubr.bf16.gmra.mrb[92].mxu1 %v11640_v1 }
 0x34d   :  { %16754 = vst [vmem:[#allocation51_spill] sm:$0xff] %v13663_v29  ;;  %16755 = vst [vmem:[#allocation52_spill] sm:$0xff] %v13665_v61  ;;  %10100 = vmatprep.mubr.msk.bf16.mxu0 %vm775_vm1, %v11641_v49  ;;  %10129 = vmatprep.mubr.msk.bf16.mxu1 %vm775_vm1, %v11641_v49 }
 0x34e   :  { %9639 = vperm.xlu0 %11382, %v9610_v33  }
 0x34f   :  { %v2104_v2 = vpop.f32.mrb[244].mxu0  ;;  %v2377_v18 = vpop.f32.mrb[244].mxu1 }
 0x350   :  { %v4420_v23 = vmax.f32 %v2094_v43, %v2104_v2  ;;  %v4422_v58 = vmax.f32 %v2367_v62, %v2377_v18  ;;  %v2106_v15 = vpop.f32.mrb[245].mxu0  ;;  %v2379_v25 = vpop.f32.mrb[245].mxu1  ;;  %v11642_v43 = vld [vmem:[%s16378_s1 + $0x100] ss:$8 sps:$4 sm:$0xff]  }
 0x351   :  { %v4421_v51 = vmax.f32 %v2096_v13, %v2106_v15  ;;  %v4423_v37 = vmax.f32 %v2369_v16, %v2379_v25  ;;  %v2108_v30 = vpop.f32.mrb[246].mxu0  ;;  %v2381_v7 = vpop.f32.mrb[246].mxu1 }
 0x352   :  { %v4444_v24 = vmax.f32 %v2098_v10, %v2108_v30  ;;  %v4446_v21 = vmax.f32 %v2371_v9, %v2381_v7  ;;  %v2110_v39 = vpop.f32.mrb[247].mxu0  ;;  %v2383_v1 = vpop.f32.mrb[247].mxu1  ;;  %v11643_v9 = vld [vmem:[%s16378_s1 + $0x114] ss:$8 sps:$4 sm:$0xff]  }
 0x353   :  { %v5060_v61 = vmax.f32 %v4420_v23, %v4421_v51  ;;  %v5144_v29 = vmax.f32 %v4422_v58, %v4423_v37  ;;  %v4445_v49 = vmax.f32 %v2100_v19, %v2110_v39  ;;  %v4447_v36 = vmax.f32 %v2373_v34, %v2383_v1  ;;  %v11645_v39 = vld [vmem:[%s16378_s1 + $0x124] ss:$8 sps:$4 sm:$0xff]  }
 0x354   :  { %2679 = vmatmul.mubr.bf16.gmra.mrb[96].mxu0 %v11642_v43  ;;  %2952 = vmatmul.mubr.bf16.gmra.mrb[96].mxu1 %v11642_v43 }
 0x355   :  { %v5084_v62 = vadd.f32 %v5060_v61, %v12711_v38  ;;  %v5168_v13 = vadd.f32 %v5144_v29, %v12711_v38  ;;  %v5061_v16 = vmax.f32 %v4444_v24, %v4445_v49  ;;  %v5145_v10 = vmax.f32 %v4446_v21, %v4447_v36  ;;  %10101 = vmatprep.mubr.msk.bf16.mxu0 %vm775_vm1, %v11643_v9  ;;  %v9664_v61 = vld [vmem:[#allocation10 + $0x8] sm:$0x3] }
 0x356   :  { %10130 = vmatprep.mubr.msk.bf16.mxu1 %vm775_vm1, %v11643_v9  ;;  %9672 = vperm.xlu0 %11382, %v9664_v61   ;;  %v11644_v21 = vld [vmem:[%s16378_s1 + $0x110] ss:$8 sps:$4 sm:$0xff]  }
 0x357   :  { %v5085_v19 = vadd.f32 %v5061_v16, %v12726_v27  ;;  %v5169_v34 = vadd.f32 %v5145_v10, %v12726_v27  ;;  %v2114_v2 = vpop.f32.mrb[248].mxu0  ;;  %v2387_v18 = vpop.f32.mrb[248].mxu1  ;;  %v5108_v23 = vmax.f32 %v5084_v62, 0.0  ;;  %v5192_v58 = vmax.f32 %v5168_v13, 0.0 }
 0x358   :  { %v2116_v32 = vpop.f32.mrb[249].mxu0  ;;  %v2389_v29 = vpop.f32.mrb[249].mxu1 }
 0x359   :  { %v5109_v15 = vmax.f32 %v5085_v19, 0.0  ;;  %v5193_v25 = vmax.f32 %v5169_v34, 0.0  ;;  %v2118_v51 = vpop.f32.mrb[250].mxu0  ;;  %v2391_v37 = vpop.f32.mrb[250].mxu1 }
 0x35a   :  { %v2120_v30 = vpop.f32.mrb[251].mxu0  ;;  %v2393_v7 = vpop.f32.mrb[251].mxu1 }
 0x35b   :  { %v13687_v24 = vpack.c.bf16 %v5109_v15, %v5108_v23  ;;  %v13689_v33 = vpack.c.bf16 %v5193_v25, %v5192_v58 }
 0x35c   :  { %2689 = vmatmul.mubr.bf16.gmra.mrb[100].mxu0 %v11644_v21  ;;  %2962 = vmatmul.mubr.bf16.gmra.mrb[100].mxu1 %v11644_v21 }
 0x35d   :  { %16756 = vst [vmem:[#allocation53_spill] sm:$0xff] %v13687_v24  ;;  %16757 = vst [vmem:[#allocation54_spill] sm:$0xff] %v13689_v33  ;;  %10102 = vmatprep.mubr.msk.bf16.mxu0 %vm775_vm1, %v11645_v39  ;;  %10131 = vmatprep.mubr.msk.bf16.mxu1 %vm775_vm1, %v11645_v39  ;;  %v11646_v39 = vld [vmem:[%s16378_s1 + $0x120] ss:$8 sps:$4 sm:$0xff]  }
 0x35f   :  { %v2124_v1 = vpop.f32.mrb[252].mxu0  ;;  %v2397_v49 = vpop.f32.mrb[252].mxu1 }
 0x360   :  { %v4468_v36 = vmax.f32 %v2114_v2, %v2124_v1  ;;  %v4470_v43 = vmax.f32 %v2387_v18, %v2397_v49  ;;  %v2126_v62 = vpop.f32.mrb[253].mxu0  ;;  %v2399_v13 = vpop.f32.mrb[253].mxu1 }
 0x361   :  { %v4469_v16 = vmax.f32 %v2116_v32, %v2126_v62  ;;  %v4471_v10 = vmax.f32 %v2389_v29, %v2399_v13  ;;  %v2128_v9 = vpop.f32.mrb[254].mxu0  ;;  %v2401_v19 = vpop.f32.mrb[254].mxu1 }
 0x362   :  { %v4492_v34 = vmax.f32 %v2118_v51, %v2128_v9  ;;  %v4494_v61 = vmax.f32 %v2391_v37, %v2401_v19  ;;  %v2130_v23 = vpop.f32.mrb[255].mxu0  ;;  %v2403_v58 = vpop.f32.mrb[255].mxu1  ;;  %v11647_v51 = vld [vmem:[%s16378_s1 + $0x134] ss:$8 sps:$4 sm:$0xff]  }
 0x363   :  { %v5062_v15 = vmax.f32 %v4468_v36, %v4469_v16  ;;  %v5146_v25 = vmax.f32 %v4470_v43, %v4471_v10  ;;  %v4493_v21 = vmax.f32 %v2120_v30, %v2130_v23  ;;  %v4495_v33 = vmax.f32 %v2393_v7, %v2403_v58  ;;  %v11648_v23 = vld [vmem:[%s16378_s1 + $0x130] ss:$8 sps:$4 sm:$0xff]   ;;  %v11649_v58 = vld [vmem:[%s16378_s1 + $0x144] ss:$8 sps:$4 sm:$0xff]  }
 0x364   :  { %2699 = vmatmul.mubr.bf16.gmra.mrb[104].mxu0 %v11646_v39  ;;  %2972 = vmatmul.mubr.bf16.gmra.mrb[104].mxu1 %v11646_v39 }
 0x365   :  { %v5086_v2 = vadd.f32 %v5062_v15, %v12711_v38  ;;  %v5170_v18 = vadd.f32 %v5146_v25, %v12711_v38  ;;  %v5063_v32 = vmax.f32 %v4492_v34, %v4493_v21  ;;  %v5147_v29 = vmax.f32 %v4494_v61, %v4495_v33  ;;  %10103 = vmatprep.mubr.msk.bf16.mxu0 %vm775_vm1, %v11647_v51 }
 0x366   :  { %10132 = vmatprep.mubr.msk.bf16.mxu1 %vm775_vm1, %v11647_v51 }
 0x367   :  { %v5087_v37 = vadd.f32 %v5063_v32, %v12726_v27  ;;  %v5171_v30 = vadd.f32 %v5147_v29, %v12726_v27  ;;  %v2134_v7 = vpop.f32.mrb[0].mxu0  ;;  %v2407_v1 = vpop.f32.mrb[0].mxu1  ;;  %v5110_v43 = vmax.f32 %v5086_v2, 0.0  ;;  %v5194_v62 = vmax.f32 %v5170_v18, 0.0 }
 0x368   :  { %v2136_v49 = vpop.f32.mrb[1].mxu0  ;;  %v2409_v36 = vpop.f32.mrb[1].mxu1 }
 0x369   :  { %v5111_v13 = vmax.f32 %v5087_v37, 0.0  ;;  %v5195_v33 = vmax.f32 %v5171_v30, 0.0  ;;  %v2138_v16 = vpop.f32.mrb[2].mxu0  ;;  %v2411_v10 = vpop.f32.mrb[2].mxu1 }
 0x36a   :  { %v2140_v9 = vpop.f32.mrb[3].mxu0  ;;  %v2413_v19 = vpop.f32.mrb[3].mxu1 }
 0x36b   :  { %v13711_v34 = vpack.c.bf16 %v5111_v13, %v5110_v43  ;;  %v13713_v61 = vpack.c.bf16 %v5195_v33, %v5194_v62 }
 0x36c   :  { %2709 = vmatmul.mubr.bf16.gmra.mrb[108].mxu0 %v11648_v23  ;;  %2982 = vmatmul.mubr.bf16.gmra.mrb[108].mxu1 %v11648_v23 }
 0x36d   :  { %16758 = vst [vmem:[#allocation55_spill] sm:$0xff] %v13711_v34  ;;  %16759 = vst [vmem:[#allocation56_spill] sm:$0xff] %v13713_v61  ;;  %10104 = vmatprep.mubr.msk.bf16.mxu0 %vm775_vm1, %v11649_v58  ;;  %10133 = vmatprep.mubr.msk.bf16.mxu1 %vm775_vm1, %v11649_v58  ;;  %v11650_v58 = vld [vmem:[%s16378_s1 + $0x140] ss:$8 sps:$4 sm:$0xff]  }
 0x36f   :  { %v2144_v15 = vpop.f32.mrb[4].mxu0  ;;  %v2417_v25 = vpop.f32.mrb[4].mxu1 }
 0x370   :  { %v4516_v21 = vmax.f32 %v2134_v7, %v2144_v15  ;;  %v4518_v39 = vmax.f32 %v2407_v1, %v2417_v25  ;;  %v2146_v2 = vpop.f32.mrb[5].mxu0  ;;  %v2419_v18 = vpop.f32.mrb[5].mxu1 }
 0x371   :  { %v4517_v32 = vmax.f32 %v2136_v49, %v2146_v2  ;;  %v4519_v29 = vmax.f32 %v2409_v36, %v2419_v18  ;;  %v2148_v51 = vpop.f32.mrb[6].mxu0  ;;  %v2421_v37 = vpop.f32.mrb[6].mxu1 }
 0x372   :  { %v4540_v30 = vmax.f32 %v2138_v16, %v2148_v51  ;;  %v4542_v43 = vmax.f32 %v2411_v10, %v2421_v37  ;;  %v2150_v62 = vpop.f32.mrb[7].mxu0  ;;  %v2423_v13 = vpop.f32.mrb[7].mxu1  ;;  %v11651_v16 = vld [vmem:[%s16378_s1 + $0x154] ss:$8 sps:$4 sm:$0xff]  }
 0x373   :  { %v5064_v33 = vmax.f32 %v4516_v21, %v4517_v32  ;;  %v5148_v23 = vmax.f32 %v4518_v39, %v4519_v29  ;;  %v4541_v61 = vmax.f32 %v2140_v9, %v2150_v62  ;;  %v4543_v34 = vmax.f32 %v2413_v19, %v2423_v13  ;;  %v11653_v62 = vld [vmem:[%s16378_s1 + $0x164] ss:$8 sps:$4 sm:$0xff]  }
 0x374   :  { %2719 = vmatmul.mubr.bf16.gmra.mrb[112].mxu0 %v11650_v58  ;;  %2992 = vmatmul.mubr.bf16.gmra.mrb[112].mxu1 %v11650_v58 }
 0x375   :  { %v5088_v7 = vadd.f32 %v5064_v33, %v12711_v38  ;;  %v5172_v1 = vadd.f32 %v5148_v23, %v12711_v38  ;;  %v5065_v49 = vmax.f32 %v4540_v30, %v4541_v61  ;;  %v5149_v36 = vmax.f32 %v4542_v43, %v4543_v34  ;;  %10105 = vmatprep.mubr.msk.bf16.mxu0 %vm775_vm1, %v11651_v16  ;;  %v11652_v43 = vld [vmem:[%s16378_s1 + $0x150] ss:$8 sps:$4 sm:$0xff]  }
 0x376   :  { %10134 = vmatprep.mubr.msk.bf16.mxu1 %vm775_vm1, %v11651_v16 }
 0x377   :  { %v5089_v10 = vadd.f32 %v5065_v49, %v12726_v27  ;;  %v5173_v9 = vadd.f32 %v5149_v36, %v12726_v27  ;;  %v2154_v19 = vpop.f32.mrb[8].mxu0  ;;  %v2427_v15 = vpop.f32.mrb[8].mxu1  ;;  %v5112_v39 = vmax.f32 %v5088_v7, 0.0  ;;  %v5196_v2 = vmax.f32 %v5172_v1, 0.0 }
 0x378   :  { %v2156_v25 = vpop.f32.mrb[9].mxu0  ;;  %v2429_v21 = vpop.f32.mrb[9].mxu1 }
 0x379   :  { %v5113_v61 = vmax.f32 %v5089_v10, 0.0  ;;  %v5197_v34 = vmax.f32 %v5173_v9, 0.0  ;;  %v2158_v18 = vpop.f32.mrb[10].mxu0  ;;  %v2431_v32 = vpop.f32.mrb[10].mxu1 }
 0x37a   :  { %v2160_v29 = vpop.f32.mrb[11].mxu0  ;;  %v2433_v51 = vpop.f32.mrb[11].mxu1 }
 0x37b   :  { %v13735_v37 = vpack.c.bf16 %v5113_v61, %v5112_v39  ;;  %v13737_v30 = vpack.c.bf16 %v5197_v34, %v5196_v2 }
 0x37c   :  { %2729 = vmatmul.mubr.bf16.gmra.mrb[116].mxu0 %v11652_v43  ;;  %3002 = vmatmul.mubr.bf16.gmra.mrb[116].mxu1 %v11652_v43 }
 0x37d   :  { %16760 = vst [vmem:[#allocation57_spill] sm:$0xff] %v13735_v37  ;;  %16761 = vst [vmem:[#allocation58_spill] sm:$0xff] %v13737_v30  ;;  %10106 = vmatprep.mubr.msk.bf16.mxu0 %vm775_vm1, %v11653_v62  ;;  %10135 = vmatprep.mubr.msk.bf16.mxu1 %vm775_vm1, %v11653_v62  ;;  %v11654_v62 = vld [vmem:[%s16378_s1 + $0x160] ss:$8 sps:$4 sm:$0xff]  }
 0x37f   :  { %v2164_v13 = vpop.f32.mrb[12].mxu0  ;;  %v2437_v33 = vpop.f32.mrb[12].mxu1 }
 0x380   :  { %v4564_v23 = vmax.f32 %v2154_v19, %v2164_v13  ;;  %v4566_v58 = vmax.f32 %v2427_v15, %v2437_v33  ;;  %v2166_v7 = vpop.f32.mrb[13].mxu0  ;;  %v2439_v1 = vpop.f32.mrb[13].mxu1 }
 0x381   :  { %v4565_v49 = vmax.f32 %v2156_v25, %v2166_v7  ;;  %v4567_v36 = vmax.f32 %v2429_v21, %v2439_v1  ;;  %v2168_v16 = vpop.f32.mrb[14].mxu0  ;;  %v2441_v10 = vpop.f32.mrb[14].mxu1 }
 0x382   :  { %v4588_v9 = vmax.f32 %v2158_v18, %v2168_v16  ;;  %v4590_v39 = vmax.f32 %v2431_v32, %v2441_v10  ;;  %v2170_v2 = vpop.f32.mrb[15].mxu0  ;;  %v2443_v61 = vpop.f32.mrb[15].mxu1  ;;  %v11655_v18 = vld [vmem:[%s16378_s1 + $0x174] ss:$8 sps:$4 sm:$0xff]  }
 0x383   :  { %v5066_v34 = vmax.f32 %v4564_v23, %v4565_v49  ;;  %v5150_v43 = vmax.f32 %v4566_v58, %v4567_v36  ;;  %v4589_v30 = vmax.f32 %v2160_v29, %v2170_v2  ;;  %v4591_v37 = vmax.f32 %v2433_v51, %v2443_v61  ;;  %v11657_v2 = vld [vmem:[%s16378_s1 + $0x4] ss:$8 sps:$4 sm:$0xff]  }
 0x384   :  { %2739 = vmatmul.mubr.bf16.gmra.mrb[120].mxu0 %v11654_v62  ;;  %3012 = vmatmul.mubr.bf16.gmra.mrb[120].mxu1 %v11654_v62 }
 0x385   :  { %v5090_v19 = vadd.f32 %v5066_v34, %v12711_v38  ;;  %v5174_v15 = vadd.f32 %v5150_v43, %v12711_v38  ;;  %v5067_v25 = vmax.f32 %v4588_v9, %v4589_v30  ;;  %v5151_v21 = vmax.f32 %v4590_v39, %v4591_v37  ;;  %10107 = vmatprep.mubr.msk.bf16.mxu0 %vm775_vm1, %v11655_v18  ;;  %v11656_v39 = vld [vmem:[%s16378_s1 + $0x170] ss:$8 sps:$4 sm:$0xff]  }
 0x386   :  { %10136 = vmatprep.mubr.msk.bf16.mxu1 %vm775_vm1, %v11655_v18 }
 0x387   :  { %v5091_v32 = vadd.f32 %v5067_v25, %v12726_v27  ;;  %v5175_v29 = vadd.f32 %v5151_v21, %v12726_v27  ;;  %v2174_v51 = vpop.f32.mrb[16].mxu0  ;;  %v2447_v13 = vpop.f32.mrb[16].mxu1  ;;  %v5114_v58 = vmax.f32 %v5090_v19, 0.0  ;;  %v5198_v7 = vmax.f32 %v5174_v15, 0.0 }
 0x388   :  { %v2176_v33 = vpop.f32.mrb[17].mxu0  ;;  %v2449_v23 = vpop.f32.mrb[17].mxu1 }
 0x389   :  { %v5115_v30 = vmax.f32 %v5091_v32, 0.0  ;;  %v5199_v37 = vmax.f32 %v5175_v29, 0.0  ;;  %v2178_v1 = vpop.f32.mrb[18].mxu0  ;;  %v2451_v49 = vpop.f32.mrb[18].mxu1 }
 0x38a   :  { %v2180_v36 = vpop.f32.mrb[19].mxu0  ;;  %v2453_v16 = vpop.f32.mrb[19].mxu1 }
 0x38b   :  { %v13759_v10 = vpack.c.bf16 %v5115_v30, %v5114_v58  ;;  %v13761_v9 = vpack.c.bf16 %v5199_v37, %v5198_v7 }
 0x38c   :  { %2749 = vmatmul.mubr.bf16.gmra.mrb[124].mxu0 %v11656_v39  ;;  %3022 = vmatmul.mubr.bf16.gmra.mrb[124].mxu1 %v11656_v39 }
 0x38d   :  { %16762 = vst [vmem:[#allocation59_spill] sm:$0xff] %v13759_v10  ;;  %16763 = vst [vmem:[#allocation60_spill] sm:$0xff] %v13761_v9  ;;  %10142 = vmatprep.mubr.msk.bf16.mxu0 %vm775_vm1, %v11657_v2  ;;  %10171 = vmatprep.mubr.msk.bf16.mxu1 %vm775_vm1, %v11657_v2  ;;  %v11658_v2 = vld [vmem:[%s16378_s1] ss:$8 sps:$4 sm:$0xff]  }
 0x38f   :  { %v2184_v61 = vpop.f32.mrb[20].mxu0  ;;  %v2457_v34 = vpop.f32.mrb[20].mxu1 }
 0x390   :  { %v4612_v43 = vmax.f32 %v2174_v51, %v2184_v61  ;;  %v4614_v62 = vmax.f32 %v2447_v13, %v2457_v34  ;;  %v2186_v19 = vpop.f32.mrb[21].mxu0  ;;  %v2459_v15 = vpop.f32.mrb[21].mxu1  ;;  %v11662_v34 = vld [vmem:[%s16378_s1 + $0x14] ss:$8 sps:$4 sm:$0xff]  }
 0x391   :  { %v4613_v25 = vmax.f32 %v2176_v33, %v2186_v19  ;;  %v4615_v21 = vmax.f32 %v2449_v23, %v2459_v15  ;;  %v2188_v18 = vpop.f32.mrb[22].mxu0  ;;  %v2461_v32 = vpop.f32.mrb[22].mxu1 }
 0x392   :  { %v4636_v29 = vmax.f32 %v2178_v1, %v2188_v18  ;;  %v4638_v58 = vmax.f32 %v2451_v49, %v2461_v32  ;;  %v2190_v7 = vpop.f32.mrb[23].mxu0  ;;  %v2463_v30 = vpop.f32.mrb[23].mxu1  ;;  %v11659_v1 = vld [vmem:[%s16377_s0 + $0x50] ss:$112 sps:$4 sm:$0xff]   ;;  %v13782_v49 = vld [vmem:[%s16377_s0 + $0x58] ss:$112 sps:$4 sm:$0xff]  }
 0x393   :  { %v5068_v37 = vmax.f32 %v4612_v43, %v4613_v25  ;;  %v5152_v39 = vmax.f32 %v4614_v62, %v4615_v21  ;;  %v4637_v9 = vmax.f32 %v2180_v36, %v2190_v7  ;;  %v4639_v10 = vmax.f32 %v2453_v16, %v2463_v30  ;;  %v11661_v36 = vld [vmem:[%s16377_s0 + $0x134] ss:$112 sps:$4 sm:$0x3f]   ;;  %v13800_v43 = vld [vmem:[%s16377_s0 + $0x60] ss:$112 sps:$4 sm:$0xff]  }
 0x394   :  { %3065 = vmatmul.mubr.bf16.vlgmr.msra.gmra.mrb[128].mxu0 %v11658_v2  ;;  %3338 = vmatmul.mubr.bf16.vlgmr.msra.gmra.mrb[128].mxu1 %v11658_v2  ;;  %v11664_v2 = vld [vmem:[%s16377_s0 + $0x54] ss:$112 sps:$4 sm:$0xff]  }
 0x395   :  { %v5092_v51 = vadd.f32 %v5068_v37, %v12711_v38  ;;  %v5176_v13 = vadd.f32 %v5152_v39, %v12711_v38  ;;  %v5069_v33 = vmax.f32 %v4636_v29, %v4637_v9  ;;  %v5153_v23 = vmax.f32 %v4638_v58, %v4639_v10  ;;  %3579 = vmatpush1.bf16.msra.mxu0 %v11659_v1  ;;  %v13814_v39 = vld [vmem:[%s16377_s0 + $0x140] ss:$112 sps:$4 sm:$0x3f]  }
 0x396   :  { %3852 = vmatpush1.bf16.msra.mxu1 %v13782_v49  ;;  %10195 = vmatprep.subr.msk.bf16.mxu0 %vm425_vm0, %v11661_v36  ;;  %v13835_v1 = vsel %vm425_vm0, %v13561_v6, 0 }
 0x397   :  { %v5093_v16 = vadd.f32 %v5069_v33, %v12726_v27  ;;  %v5177_v10 = vadd.f32 %v5153_v23, %v12726_v27  ;;  %v2194_v9 = vpop.f32.mrb[24].mxu0  ;;  %v2467_v61 = vpop.f32.mrb[24].mxu1  ;;  %10224 = vmatprep.subr.msk.bf16.mxu1 %vm425_vm0, %v13561_v6  ;;  %10143 = vmatprep.mubr.msk.bf16.mxu0 %vm775_vm1, %v11662_v34  ;;  %v5116_v15 = vmax.f32 %v5092_v51, 0.0  ;;  %v5200_v25 = vmax.f32 %v5176_v13, 0.0  ;;  %v11665_v51 = vld [vmem:[%s16378_s1 + $0x24] ss:$8 sps:$4 sm:$0xff]  }
 0x398   :  { %v2196_v62 = vpop.f32.mrb[25].mxu0  ;;  %v2469_v19 = vpop.f32.mrb[25].mxu1  ;;  %10172 = vmatprep.mubr.msk.bf16.mxu1 %vm775_vm1, %v11662_v34  ;;  %v11666_v13 = vld [vmem:[%s16377_s0 + $0x138] ss:$112 sps:$4 sm:$0x3f]  }
 0x399   :  { %v5117_v21 = vmax.f32 %v5093_v16, 0.0  ;;  %v5201_v18 = vmax.f32 %v5177_v10, 0.0  ;;  %3581 = vmatpush1.bf16.msra.mxu0 %v13467_v3  ;;  %v2198_v32 = vpop.f32.mrb[26].mxu0  ;;  %v2471_v29 = vpop.f32.mrb[26].mxu1  ;;  %v11663_v3 = vld [vmem:[%s16378_s1 + $0x10] ss:$8 sps:$4 sm:$0xff]  }
 0x39a   :  { %3854 = vmatpush1.bf16.msra.mxu1 %v13568_v17  ;;  %v2200_v58 = vpop.f32.mrb[27].mxu0  ;;  %v2473_v7 = vpop.f32.mrb[27].mxu1  ;;  %3582 = vmatprep.subr.bf16.mxu0 %v13782_v49 }
 0x39b   :  { %v13806_v30 = vpack.c.bf16 %v5117_v21, %v5116_v15  ;;  %v13808_v37 = vpack.c.bf16 %v5201_v18, %v5200_v25  ;;  %3855 = vmatprep.subr.bf16.mxu1 %v13800_v43 }
 0x39c   :  { %3075 = vmatmul.mubr.bf16.gmra.mrb[132].mxu0 %v11663_v3  ;;  %3348 = vmatmul.mubr.bf16.gmra.mrb[132].mxu1 %v11663_v3 }
 0x39d   :  { %16764 = vst [vmem:[#allocation61_spill] sm:$0xff] %v13806_v30  ;;  %16765 = vst [vmem:[#allocation62_spill] sm:$0xff] %v13808_v37  ;;  %3583 = vmatpush1.bf16.msra.mxu0 %v11664_v2  ;;  %10144 = vmatprep.mubr.msk.bf16.mxu0 %vm775_vm1, %v11665_v51  ;;  %v11667_v37 = vld [vmem:[%s16377_s0 + $0x5c] ss:$112 sps:$4 sm:$0xff]  }
 0x39e   :  { %3856 = vmatpush1.bf16.msra.mxu1 %v13528_v57  ;;  %10196 = vmatprep.subr.msk.bf16.mxu0 %vm425_vm0, %v11666_v13  ;;  %v13841_v57 = vld [vmem:[%s16377_s0 + $0x64] ss:$112 sps:$4 sm:$0xff]  }
 0x39f   :  { %v2204_v33 = vpop.f32.mrb[28].mxu0  ;;  %v2477_v23 = vpop.f32.mrb[28].mxu1  ;;  %10225 = vmatprep.subr.msk.bf16.mxu1 %vm425_vm0, %v13814_v39  ;;  %10173 = vmatprep.mubr.msk.bf16.mxu1 %vm775_vm1, %v11665_v51 }
 0x3a0   :  { %v4660_v36 = vmax.f32 %v2194_v9, %v2204_v33  ;;  %v4662_v16 = vmax.f32 %v2467_v61, %v2477_v23  ;;  %v2206_v10 = vpop.f32.mrb[29].mxu0  ;;  %v2479_v34 = vpop.f32.mrb[29].mxu1 }
 0x3a1   :  { %v4661_v15 = vmax.f32 %v2196_v62, %v2206_v10  ;;  %v4663_v25 = vmax.f32 %v2469_v19, %v2479_v34  ;;  %3585 = vmatpush1.bf16.msra.mxu0 %v13503_v63  ;;  %v2208_v21 = vpop.f32.mrb[30].mxu0  ;;  %v2481_v18 = vpop.f32.mrb[30].mxu1  ;;  %v13852_v63 = vld [vmem:[%s16377_s0 + $0x144] ss:$112 sps:$4 sm:$0x3f]   ;;  %v13869_v34 = vsel %vm425_vm0, %v13814_v39, 0 }
 0x3a2   :  { %3858 = vmatpush1.bf16.msra.mxu1 %v13835_v1  ;;  %v4684_v3 = vmax.f32 %v2198_v32, %v2208_v21  ;;  %v4686_v2 = vmax.f32 %v2471_v29, %v2481_v18  ;;  %v2210_v51 = vpop.f32.mrb[31].mxu0  ;;  %v2483_v13 = vpop.f32.mrb[31].mxu1  ;;  %3586 = vmatprep.subr.bf16.mxu0 %v11667_v37  ;;  %v11668_v19 = vld [vmem:[%s16378_s1 + $0x20] ss:$8 sps:$4 sm:$0xff]  }
 0x3a3   :  { %v5070_v9 = vmax.f32 %v4660_v36, %v4661_v15  ;;  %v5154_v61 = vmax.f32 %v4662_v16, %v4663_v25  ;;  %v4685_v33 = vmax.f32 %v2200_v58, %v2210_v51  ;;  %v4687_v62 = vmax.f32 %v2473_v7, %v2483_v13  ;;  %3859 = vmatprep.subr.bf16.mxu1 %v13841_v57 }
 0x3a4   :  { %3085 = vmatmul.mubr.bf16.gmra.mrb[136].mxu0 %v11668_v19  ;;  %3358 = vmatmul.mubr.bf16.gmra.mrb[136].mxu1 %v11668_v19  ;;  %v11536_v19 = vld [vmem:[%s16377_s0 + $0x148] ss:$112 sps:$4 sm:$0x3f]  }
 0x3a5   :  { %v5094_v32 = vadd.f32 %v5070_v9, %v12711_v38  ;;  %v5178_v29 = vadd.f32 %v5154_v61, %v12711_v38  ;;  %v5071_v23 = vmax.f32 %v4684_v3, %v4685_v33  ;;  %v5155_v58 = vmax.f32 %v4686_v2, %v4687_v62  ;;  %3587 = vmatpush1.bf16.msra.mxu0 %v13782_v49  ;;  %v11669_v49 = vld [vmem:[%s16378_s1 + $0x34] ss:$8 sps:$4 sm:$0xff]  }
 0x3a6   :  { %3860 = vmatpush1.bf16.msra.mxu1 %v13800_v43  ;;  %10197 = vmatprep.subr.msk.bf16.mxu0 %vm425_vm0, %v13561_v6  ;;  %v11534_v6 = vld [vmem:[%s16377_s0 + $0x68] ss:$112 sps:$4 sm:$0xff]  }
 0x3a7   :  { %v5095_v7 = vadd.f32 %v5071_v23, %v12726_v27  ;;  %v5179_v36 = vadd.f32 %v5155_v58, %v12726_v27  ;;  %v2520_v16 = vpop.f32.mrb[32].mxu0  ;;  %v2793_v10 = vpop.f32.mrb[32].mxu1  ;;  %10226 = vmatprep.subr.msk.bf16.mxu1 %vm425_vm0, %v13852_v63  ;;  %10145 = vmatprep.mubr.msk.bf16.mxu0 %vm775_vm1, %v11669_v49  ;;  %v5118_v21 = vmax.f32 %v5094_v32, 0.0  ;;  %v5202_v18 = vmax.f32 %v5178_v29, 0.0  ;;  %v11671_v32 = vld [vmem:[%s16378_s1 + $0x44] ss:$8 sps:$4 sm:$0xff]  }
 0x3a8   :  { %v2522_v15 = vpop.f32.mrb[33].mxu0  ;;  %v2795_v25 = vpop.f32.mrb[33].mxu1  ;;  %10174 = vmatprep.mubr.msk.bf16.mxu1 %vm775_vm1, %v11669_v49  ;;  %v503_v58 = vsel %vm425_vm0, %v13852_v63, 0 }
 0x3a9   :  { %v5119_v3 = vmax.f32 %v5095_v7, 0.0  ;;  %v5203_v2 = vmax.f32 %v5179_v36, 0.0  ;;  %3589 = vmatpush1.bf16.msra.mxu0 %v13568_v17  ;;  %v2524_v51 = vpop.f32.mrb[34].mxu0  ;;  %v2797_v13 = vpop.f32.mrb[34].mxu1  ;;  %v11670_v17 = vld [vmem:[%s16378_s1 + $0x30] ss:$8 sps:$4 sm:$0xff]  }
 0x3aa   :  { %3862 = vmatpush1.bf16.msra.mxu1 %v13869_v34  ;;  %v2526_v9 = vpop.f32.mrb[35].mxu0  ;;  %v2799_v61 = vpop.f32.mrb[35].mxu1  ;;  %3590 = vmatprep.subr.bf16.mxu0 %v13800_v43 }
 0x3ab   :  { %v13882_v33 = vpack.c.bf16 %v5119_v3, %v5118_v21  ;;  %v13884_v62 = vpack.c.bf16 %v5203_v2, %v5202_v18  ;;  %3863 = vmatprep.subr.bf16.mxu1 %v11534_v6 }
 0x3ac   :  { %3095 = vmatmul.mubr.bf16.gmra.mrb[140].mxu0 %v11670_v17  ;;  %3368 = vmatmul.mubr.bf16.gmra.mrb[140].mxu1 %v11670_v17 }
 0x3ad   :  { %16766 = vst [vmem:[#allocation63_spill] sm:$0xff] %v13882_v33  ;;  %16767 = vst [vmem:[#allocation64_spill] sm:$0xff] %v13884_v62  ;;  %3591 = vmatpush1.bf16.msra.mxu0 %v11667_v37  ;;  %10146 = vmatprep.mubr.msk.bf16.mxu0 %vm775_vm1, %v11671_v32  ;;  %v11538_v37 = vld [vmem:[%s16377_s0 + $0x6c] ss:$112 sps:$4 sm:$0xff]  }
 0x3ae   :  { %3864 = vmatpush1.bf16.msra.mxu1 %v13841_v57  ;;  %10198 = vmatprep.subr.msk.bf16.mxu0 %vm425_vm0, %v13814_v39 }
 0x3af   :  { %v2530_v29 = vpop.f32.mrb[36].mxu0  ;;  %v2803_v23 = vpop.f32.mrb[36].mxu1  ;;  %10227 = vmatprep.subr.msk.bf16.mxu1 %vm425_vm0, %v11536_v19  ;;  %10175 = vmatprep.mubr.msk.bf16.mxu1 %vm775_vm1, %v11671_v32 }
 0x3b0   :  { %v4136_v7 = vmax.f32 %v2520_v16, %v2530_v29  ;;  %v4138_v36 = vmax.f32 %v2793_v10, %v2803_v23  ;;  %v2532_v49 = vpop.f32.mrb[37].mxu0  ;;  %v2805_v21 = vpop.f32.mrb[37].mxu1  ;;  %v11539_v10 = vld [vmem:[%s16377_s0 + $0x14c] ss:$112 sps:$4 sm:$0x3f]  }
 0x3b1   :  { %v4137_v18 = vmax.f32 %v2522_v15, %v2532_v49  ;;  %v4139_v3 = vmax.f32 %v2795_v25, %v2805_v21  ;;  %3593 = vmatpush1.bf16.msra.mxu0 %v13835_v1  ;;  %v2534_v39 = vpop.f32.mrb[38].mxu0  ;;  %v2807_v2 = vpop.f32.mrb[38].mxu1  ;;  %v11672_v1 = vld [vmem:[%s16378_s1 + $0x40] ss:$8 sps:$4 sm:$0xff]   ;;  %v11674_v49 = vld [vmem:[%s16378_s1 + $0x50] ss:$8 sps:$4 sm:$0xff]  }
 0x3b2   :  { %3866 = vmatpush1.bf16.msra.mxu1 %v503_v58  ;;  %v4160_v17 = vmax.f32 %v2524_v51, %v2534_v39  ;;  %v4162_v62 = vmax.f32 %v2797_v13, %v2807_v2  ;;  %v2536_v33 = vpop.f32.mrb[39].mxu0  ;;  %v2809_v30 = vpop.f32.mrb[39].mxu1  ;;  %3594 = vmatprep.subr.bf16.mxu0 %v13841_v57 }
 0x3b3   :  { %v5216_v32 = vmax.f32 %v4136_v7, %v4137_v18  ;;  %v5300_v24 = vmax.f32 %v4138_v36, %v4139_v3  ;;  %v4161_v35 = vmax.f32 %v2526_v9, %v2536_v33  ;;  %v4163_v16 = vmax.f32 %v2799_v61, %v2809_v30  ;;  %3867 = vmatprep.subr.bf16.mxu1 %v11538_v37 }
 0x3b4   :  { %3105 = vmatmul.mubr.bf16.gmra.mrb[144].mxu0 %v11672_v1  ;;  %3378 = vmatmul.mubr.bf16.gmra.mrb[144].mxu1 %v11672_v1  ;;  %v506_v33 = vsel %vm425_vm0, %v11536_v19, 0 }
 0x3b5   :  { %v5240_v15 = vadd.f32 %v5216_v32, %v12711_v38  ;;  %v5324_v25 = vadd.f32 %v5300_v24, %v12711_v38  ;;  %v5217_v57 = vmax.f32 %v4160_v17, %v4161_v35  ;;  %v5301_v51 = vmax.f32 %v4162_v62, %v4163_v16  ;;  %3595 = vmatpush1.bf16.msra.mxu0 %v13800_v43  ;;  %v11673_v35 = vld [vmem:[%s16378_s1 + $0x54] ss:$8 sps:$4 sm:$0xff]  }
 0x3b6   :  { %3868 = vmatpush1.bf16.msra.mxu1 %v11534_v6  ;;  %10199 = vmatprep.subr.msk.bf16.mxu0 %vm425_vm0, %v13852_v63 }
 0x3b7   :  { %v5241_v30 = vadd.f32 %v5217_v57, %v12726_v27  ;;  %v5325_v13 = vadd.f32 %v5301_v51, %v12726_v27  ;;  %v2540_v9 = vpop.f32.mrb[40].mxu0  ;;  %v2813_v61 = vpop.f32.mrb[40].mxu1  ;;  %10228 = vmatprep.subr.msk.bf16.mxu1 %vm425_vm0, %v11539_v10  ;;  %10147 = vmatprep.mubr.msk.bf16.mxu0 %vm775_vm1, %v11673_v35  ;;  %v5264_v63 = vmax.f32 %v5240_v15, 0.0  ;;  %v5348_v6 = vmax.f32 %v5324_v25, 0.0 }
 0x3b8   :  { %v2542_v24 = vpop.f32.mrb[41].mxu0  ;;  %v2815_v43 = vpop.f32.mrb[41].mxu1  ;;  %10176 = vmatprep.mubr.msk.bf16.mxu1 %vm775_vm1, %v11673_v35 }
 0x3b9   :  { %v5265_v62 = vmax.f32 %v5241_v30, 0.0  ;;  %v5349_v29 = vmax.f32 %v5325_v13, 0.0  ;;  %3597 = vmatpush1.bf16.msra.mxu0 %v13869_v34  ;;  %v2544_v23 = vpop.f32.mrb[42].mxu0  ;;  %v2817_v58 = vpop.f32.mrb[42].mxu1  ;;  %v11675_v34 = vld [vmem:[%s16378_s1 + $0x64] ss:$8 sps:$4 sm:$0xff]  }
 0x3ba   :  { %3870 = vmatpush1.bf16.msra.mxu1 %v506_v33  ;;  %6321 = vmatprep.subr.bf16.mxu0 %v12747_v26  ;;  %v2546_v19 = vpop.f32.mrb[43].mxu0  ;;  %v2819_v37 = vpop.f32.mrb[43].mxu1 }
 0x3bb   :  { %v13930_v7 = vpack.c.bf16 %v5265_v62, %v5264_v63  ;;  %v13932_v36 = vpack.c.bf16 %v5349_v29, %v5348_v6  ;;  %6933 = vmatprep.subr.bf16.mxu1 %v13120_v45  ;;  %v11676_v63 = vld [vmem:[%s16378_s1 + $0x60] ss:$8 sps:$4 sm:$0xff]   ;;  %v11677_v6 = vld [vmem:[%s16378_s1 + $0x74] ss:$8 sps:$4 sm:$0xff]  }
 0x3bc   :  { %3115 = vmatmul.mubr.bf16.gmra.mrb[148].mxu0 %v11674_v49  ;;  %3388 = vmatmul.mubr.bf16.gmra.mrb[148].mxu1 %v11674_v49 }
 0x3bd   :  { %16768 = vst [vmem:[#allocation65_spill] sm:$0xff] %v13930_v7  ;;  %16769 = vst [vmem:[#allocation66_spill] sm:$0xff] %v13932_v36  ;;  %10148 = vmatprep.mubr.msk.bf16.mxu0 %vm775_vm1, %v11675_v34  ;;  %10177 = vmatprep.mubr.msk.bf16.mxu1 %vm775_vm1, %v11675_v34 }
 0x3bf   :  { %v2550_v21 = vpop.f32.mrb[44].mxu0  ;;  %v2823_v18 = vpop.f32.mrb[44].mxu1 }
 0x3c0   :  { %v4184_v3 = vmax.f32 %v2540_v9, %v2550_v21  ;;  %v4186_v39 = vmax.f32 %v2813_v61, %v2823_v18  ;;  %v2552_v2 = vpop.f32.mrb[45].mxu0  ;;  %v2825_v17 = vpop.f32.mrb[45].mxu1 }
 0x3c1   :  { %v4185_v32 = vmax.f32 %v2542_v24, %v2552_v2  ;;  %v4187_v16 = vmax.f32 %v2815_v43, %v2825_v17  ;;  %v2554_v10 = vpop.f32.mrb[46].mxu0  ;;  %v2827_v1 = vpop.f32.mrb[46].mxu1 }
 0x3c2   :  { %v4208_v15 = vmax.f32 %v2544_v23, %v2554_v10  ;;  %v4210_v25 = vmax.f32 %v2817_v58, %v2827_v1  ;;  %v2556_v57 = vpop.f32.mrb[47].mxu0  ;;  %v2829_v51 = vpop.f32.mrb[47].mxu1  ;;  %v11678_v10 = vld [vmem:[%s16378_s1 + $0x70] ss:$8 sps:$4 sm:$0xff]   ;;  %v11679_v1 = vld [vmem:[%s16378_s1 + $0x84] ss:$8 sps:$4 sm:$0xff]  }
 0x3c3   :  { %v5218_v30 = vmax.f32 %v4184_v3, %v4185_v32  ;;  %v5302_v13 = vmax.f32 %v4186_v39, %v4187_v16  ;;  %v4209_v33 = vmax.f32 %v2546_v19, %v2556_v57  ;;  %v4211_v35 = vmax.f32 %v2819_v37, %v2829_v51 }
 0x3c4   :  { %3125 = vmatmul.mubr.bf16.gmra.mrb[152].mxu0 %v11676_v63  ;;  %3398 = vmatmul.mubr.bf16.gmra.mrb[152].mxu1 %v11676_v63 }
 0x3c5   :  { %v5242_v9 = vadd.f32 %v5218_v30, %v12711_v38  ;;  %v5326_v61 = vadd.f32 %v5302_v13, %v12711_v38  ;;  %v5219_v24 = vmax.f32 %v4208_v15, %v4209_v33  ;;  %v5303_v43 = vmax.f32 %v4210_v25, %v4211_v35  ;;  %10149 = vmatprep.mubr.msk.bf16.mxu0 %vm775_vm1, %v11677_v6 }
 0x3c6   :  { %10178 = vmatprep.mubr.msk.bf16.mxu1 %vm775_vm1, %v11677_v6 }
 0x3c7   :  { %v5243_v62 = vadd.f32 %v5219_v24, %v12726_v27  ;;  %v5327_v29 = vadd.f32 %v5303_v43, %v12726_v27  ;;  %v2560_v23 = vpop.f32.mrb[48].mxu0  ;;  %v2833_v58 = vpop.f32.mrb[48].mxu1  ;;  %v5266_v49 = vmax.f32 %v5242_v9, 0.0  ;;  %v5350_v34 = vmax.f32 %v5326_v61, 0.0 }
 0x3c8   :  { %v2562_v19 = vpop.f32.mrb[49].mxu0  ;;  %v2835_v37 = vpop.f32.mrb[49].mxu1 }
 0x3c9   :  { %v5267_v21 = vmax.f32 %v5243_v62, 0.0  ;;  %v5351_v18 = vmax.f32 %v5327_v29, 0.0  ;;  %v2564_v3 = vpop.f32.mrb[50].mxu0  ;;  %v2837_v39 = vpop.f32.mrb[50].mxu1 }
 0x3ca   :  { %v2566_v2 = vpop.f32.mrb[51].mxu0  ;;  %v2839_v17 = vpop.f32.mrb[51].mxu1 }
 0x3cb   :  { %v13955_v32 = vpack.c.bf16 %v5267_v21, %v5266_v49  ;;  %v13957_v16 = vpack.c.bf16 %v5351_v18, %v5350_v34  ;;  %v11680_v21 = vld [vmem:[%s16378_s1 + $0x80] ss:$8 sps:$4 sm:$0xff]   ;;  %v11681_v18 = vld [vmem:[%s16378_s1 + $0x94] ss:$8 sps:$4 sm:$0xff]  }
 0x3cc   :  { %3135 = vmatmul.mubr.bf16.gmra.mrb[156].mxu0 %v11678_v10  ;;  %3408 = vmatmul.mubr.bf16.gmra.mrb[156].mxu1 %v11678_v10 }
 0x3cd   :  { %16770 = vst [vmem:[#allocation67_spill] sm:$0xff] %v13955_v32  ;;  %16771 = vst [vmem:[#allocation68_spill] sm:$0xff] %v13957_v16  ;;  %10150 = vmatprep.mubr.msk.bf16.mxu0 %vm775_vm1, %v11679_v1  ;;  %10179 = vmatprep.mubr.msk.bf16.mxu1 %vm775_vm1, %v11679_v1 }
 0x3cf   :  { %v2570_v15 = vpop.f32.mrb[52].mxu0  ;;  %v2843_v25 = vpop.f32.mrb[52].mxu1 }
 0x3d0   :  { %v4232_v57 = vmax.f32 %v2560_v23, %v2570_v15  ;;  %v4234_v51 = vmax.f32 %v2833_v58, %v2843_v25  ;;  %v2572_v30 = vpop.f32.mrb[53].mxu0  ;;  %v2845_v13 = vpop.f32.mrb[53].mxu1 }
 0x3d1   :  { %v4233_v33 = vmax.f32 %v2562_v19, %v2572_v30  ;;  %v4235_v35 = vmax.f32 %v2835_v37, %v2845_v13  ;;  %v2574_v63 = vpop.f32.mrb[54].mxu0  ;;  %v2847_v9 = vpop.f32.mrb[54].mxu1 }
 0x3d2   :  { %v4256_v61 = vmax.f32 %v2564_v3, %v2574_v63  ;;  %v4258_v24 = vmax.f32 %v2837_v39, %v2847_v9  ;;  %v2576_v43 = vpop.f32.mrb[55].mxu0  ;;  %v2849_v6 = vpop.f32.mrb[55].mxu1 }
 0x3d3   :  { %v5220_v62 = vmax.f32 %v4232_v57, %v4233_v33  ;;  %v5304_v29 = vmax.f32 %v4234_v51, %v4235_v35  ;;  %v4257_v49 = vmax.f32 %v2566_v2, %v2576_v43  ;;  %v4259_v34 = vmax.f32 %v2839_v17, %v2849_v6 }
 0x3d4   :  { %3145 = vmatmul.mubr.bf16.gmra.mrb[160].mxu0 %v11680_v21  ;;  %3418 = vmatmul.mubr.bf16.gmra.mrb[160].mxu1 %v11680_v21 }
 0x3d5   :  { %v5244_v23 = vadd.f32 %v5220_v62, %v12711_v38  ;;  %v5328_v58 = vadd.f32 %v5304_v29, %v12711_v38  ;;  %v5221_v19 = vmax.f32 %v4256_v61, %v4257_v49  ;;  %v5305_v37 = vmax.f32 %v4258_v24, %v4259_v34  ;;  %10151 = vmatprep.mubr.msk.bf16.mxu0 %vm775_vm1, %v11681_v18  ;;  %v11682_v61 = vld [vmem:[%s16378_s1 + $0x90] ss:$8 sps:$4 sm:$0xff]   ;;  %v11683_v24 = vld [vmem:[%s16378_s1 + $0xa4] ss:$8 sps:$4 sm:$0xff]  }
 0x3d6   :  { %10180 = vmatprep.mubr.msk.bf16.mxu1 %vm775_vm1, %v11681_v18 }
 0x3d7   :  { %v5245_v3 = vadd.f32 %v5221_v19, %v12726_v27  ;;  %v5329_v39 = vadd.f32 %v5305_v37, %v12726_v27  ;;  %v2580_v2 = vpop.f32.mrb[56].mxu0  ;;  %v2853_v17 = vpop.f32.mrb[56].mxu1  ;;  %v5268_v15 = vmax.f32 %v5244_v23, 0.0  ;;  %v5352_v25 = vmax.f32 %v5328_v58, 0.0 }
 0x3d8   :  { %v2582_v10 = vpop.f32.mrb[57].mxu0  ;;  %v2855_v1 = vpop.f32.mrb[57].mxu1 }
 0x3d9   :  { %v5269_v57 = vmax.f32 %v5245_v3, 0.0  ;;  %v5353_v51 = vmax.f32 %v5329_v39, 0.0  ;;  %v2584_v30 = vpop.f32.mrb[58].mxu0  ;;  %v2857_v13 = vpop.f32.mrb[58].mxu1 }
 0x3da   :  { %v2586_v33 = vpop.f32.mrb[59].mxu0  ;;  %v2859_v35 = vpop.f32.mrb[59].mxu1 }
 0x3db   :  { %v13979_v63 = vpack.c.bf16 %v5269_v57, %v5268_v15  ;;  %v13981_v9 = vpack.c.bf16 %v5353_v51, %v5352_v25 }
 0x3dc   :  { %3155 = vmatmul.mubr.bf16.gmra.mrb[164].mxu0 %v11682_v61  ;;  %3428 = vmatmul.mubr.bf16.gmra.mrb[164].mxu1 %v11682_v61  ;;  %v11684_v61 = vld [vmem:[%s16378_s1 + $0xa0] ss:$8 sps:$4 sm:$0xff]  }
 0x3dd   :  { %16772 = vst [vmem:[#allocation69_spill] sm:$0xff] %v13979_v63  ;;  %16773 = vst [vmem:[#allocation70_spill] sm:$0xff] %v13981_v9  ;;  %10152 = vmatprep.mubr.msk.bf16.mxu0 %vm775_vm1, %v11683_v24  ;;  %10181 = vmatprep.mubr.msk.bf16.mxu1 %vm775_vm1, %v11683_v24 }
 0x3df   :  { %v2590_v43 = vpop.f32.mrb[60].mxu0  ;;  %v2863_v6 = vpop.f32.mrb[60].mxu1 }
 0x3e0   :  { %v4280_v62 = vmax.f32 %v2580_v2, %v2590_v43  ;;  %v4282_v29 = vmax.f32 %v2853_v17, %v2863_v6  ;;  %v2592_v49 = vpop.f32.mrb[61].mxu0  ;;  %v2865_v34 = vpop.f32.mrb[61].mxu1 }
 0x3e1   :  { %v4281_v21 = vmax.f32 %v2582_v10, %v2592_v49  ;;  %v4283_v23 = vmax.f32 %v2855_v1, %v2865_v34  ;;  %v2594_v58 = vpop.f32.mrb[62].mxu0  ;;  %v2867_v19 = vpop.f32.mrb[62].mxu1 }
 0x3e2   :  { %v4304_v37 = vmax.f32 %v2584_v30, %v2594_v58  ;;  %v4306_v18 = vmax.f32 %v2857_v13, %v2867_v19  ;;  %v2596_v3 = vpop.f32.mrb[63].mxu0  ;;  %v2869_v39 = vpop.f32.mrb[63].mxu1  ;;  %v11685_v30 = vld [vmem:[%s16378_s1 + $0xb4] ss:$8 sps:$4 sm:$0xff]  }
 0x3e3   :  { %v5222_v15 = vmax.f32 %v4280_v62, %v4281_v21  ;;  %v5306_v25 = vmax.f32 %v4282_v29, %v4283_v23  ;;  %v4305_v57 = vmax.f32 %v2586_v33, %v2596_v3  ;;  %v4307_v51 = vmax.f32 %v2859_v35, %v2869_v39  ;;  %v11686_v3 = vld [vmem:[%s16378_s1 + $0xb0] ss:$8 sps:$4 sm:$0xff]   ;;  %v11687_v39 = vld [vmem:[%s16378_s1 + $0xc4] ss:$8 sps:$4 sm:$0xff]  }
 0x3e4   :  { %3165 = vmatmul.mubr.bf16.gmra.mrb[168].mxu0 %v11684_v61  ;;  %3438 = vmatmul.mubr.bf16.gmra.mrb[168].mxu1 %v11684_v61 }
 0x3e5   :  { %v5246_v2 = vadd.f32 %v5222_v15, %v12711_v38  ;;  %v5330_v17 = vadd.f32 %v5306_v25, %v12711_v38  ;;  %v5223_v10 = vmax.f32 %v4304_v37, %v4305_v57  ;;  %v5307_v1 = vmax.f32 %v4306_v18, %v4307_v51  ;;  %10153 = vmatprep.mubr.msk.bf16.mxu0 %vm775_vm1, %v11685_v30 }
 0x3e6   :  { %10182 = vmatprep.mubr.msk.bf16.mxu1 %vm775_vm1, %v11685_v30 }
 0x3e7   :  { %v5247_v13 = vadd.f32 %v5223_v10, %v12726_v27  ;;  %v5331_v33 = vadd.f32 %v5307_v1, %v12726_v27  ;;  %v2600_v35 = vpop.f32.mrb[64].mxu0  ;;  %v2873_v24 = vpop.f32.mrb[64].mxu1  ;;  %v5270_v62 = vmax.f32 %v5246_v2, 0.0  ;;  %v5354_v29 = vmax.f32 %v5330_v17, 0.0 }
 0x3e8   :  { %v2602_v43 = vpop.f32.mrb[65].mxu0  ;;  %v2875_v6 = vpop.f32.mrb[65].mxu1 }
 0x3e9   :  { %v5271_v49 = vmax.f32 %v5247_v13, 0.0  ;;  %v5355_v34 = vmax.f32 %v5331_v33, 0.0  ;;  %v2604_v21 = vpop.f32.mrb[66].mxu0  ;;  %v2877_v23 = vpop.f32.mrb[66].mxu1 }
 0x3ea   :  { %v2606_v58 = vpop.f32.mrb[67].mxu0  ;;  %v2879_v19 = vpop.f32.mrb[67].mxu1 }
 0x3eb   :  { %v14003_v37 = vpack.c.bf16 %v5271_v49, %v5270_v62  ;;  %v14005_v18 = vpack.c.bf16 %v5355_v34, %v5354_v29 }
 0x3ec   :  { %3175 = vmatmul.mubr.bf16.gmra.mrb[172].mxu0 %v11686_v3  ;;  %3448 = vmatmul.mubr.bf16.gmra.mrb[172].mxu1 %v11686_v3 }
 0x3ed   :  { %16774 = vst [vmem:[#allocation71_spill] sm:$0xff] %v14003_v37  ;;  %16775 = vst [vmem:[#allocation72_spill] sm:$0xff] %v14005_v18  ;;  %10154 = vmatprep.mubr.msk.bf16.mxu0 %vm775_vm1, %v11687_v39  ;;  %10183 = vmatprep.mubr.msk.bf16.mxu1 %vm775_vm1, %v11687_v39  ;;  %v11688_v39 = vld [vmem:[%s16378_s1 + $0xc0] ss:$8 sps:$4 sm:$0xff]  }
 0x3ef   :  { %v2610_v15 = vpop.f32.mrb[68].mxu0  ;;  %v2883_v25 = vpop.f32.mrb[68].mxu1 }
 0x3f0   :  { %v4328_v57 = vmax.f32 %v2600_v35, %v2610_v15  ;;  %v4330_v51 = vmax.f32 %v2873_v24, %v2883_v25  ;;  %v2612_v61 = vpop.f32.mrb[69].mxu0  ;;  %v2885_v2 = vpop.f32.mrb[69].mxu1 }
 0x3f1   :  { %v4329_v17 = vmax.f32 %v2602_v43, %v2612_v61  ;;  %v4331_v10 = vmax.f32 %v2875_v6, %v2885_v2  ;;  %v2614_v1 = vpop.f32.mrb[70].mxu0  ;;  %v2887_v30 = vpop.f32.mrb[70].mxu1  ;;  %v11689_v43 = vld [vmem:[%s16378_s1 + $0xd4] ss:$8 sps:$4 sm:$0xff]  }
 0x3f2   :  { %v4352_v13 = vmax.f32 %v2604_v21, %v2614_v1  ;;  %v4354_v33 = vmax.f32 %v2877_v23, %v2887_v30  ;;  %v2616_v62 = vpop.f32.mrb[71].mxu0  ;;  %v2889_v29 = vpop.f32.mrb[71].mxu1 }
 0x3f3   :  { %v5224_v49 = vmax.f32 %v4328_v57, %v4329_v17  ;;  %v5308_v34 = vmax.f32 %v4330_v51, %v4331_v10  ;;  %v4353_v3 = vmax.f32 %v2606_v58, %v2616_v62  ;;  %v4355_v18 = vmax.f32 %v2879_v19, %v2889_v29  ;;  %v11690_v62 = vld [vmem:[%s16378_s1 + $0xd0] ss:$8 sps:$4 sm:$0xff]   ;;  %v11691_v29 = vld [vmem:[%s16378_s1 + $0xe4] ss:$8 sps:$4 sm:$0xff]  }
 0x3f4   :  { %3185 = vmatmul.mubr.bf16.gmra.mrb[176].mxu0 %v11688_v39  ;;  %3458 = vmatmul.mubr.bf16.gmra.mrb[176].mxu1 %v11688_v39 }
 0x3f5   :  { %v5225_v35 = vmax.f32 %v4352_v13, %v4353_v3  ;;  %v5309_v24 = vmax.f32 %v4354_v33, %v4355_v18  ;;  %10155 = vmatprep.mubr.msk.bf16.mxu0 %vm775_vm1, %v11689_v43  ;;  %10184 = vmatprep.mubr.msk.bf16.mxu1 %vm775_vm1, %v11689_v43  ;;  %v5248_v6 = vadd.f32 %v5224_v49, %v12711_v38 }
 0x3f6   :  { %v5332_v21 = vadd.f32 %v5308_v34, %v12711_v38 }
 0x3f7   :  { %v2620_v23 = vpop.f32.mrb[72].mxu0  ;;  %v2893_v58 = vpop.f32.mrb[72].mxu1  ;;  %v5249_v19 = vadd.f32 %v5225_v35, %v12726_v27  ;;  %v5333_v15 = vadd.f32 %v5309_v24, %v12726_v27  ;;  %v5272_v61 = vmax.f32 %v5248_v6, 0.0 }
 0x3f8   :  { %v2622_v25 = vpop.f32.mrb[73].mxu0  ;;  %v2895_v18 = vpop.f32.mrb[73].mxu1  ;;  %v5356_v17 = vmax.f32 %v5332_v21, 0.0 }
 0x3f9   :  { %v2624_v57 = vpop.f32.mrb[74].mxu0  ;;  %v2897_v51 = vpop.f32.mrb[74].mxu1  ;;  %v5273_v2 = vmax.f32 %v5249_v19, 0.0  ;;  %v5357_v10 = vmax.f32 %v5333_v15, 0.0 }
 0x3fa   :  { %v2626_v1 = vpop.f32.mrb[75].mxu0  ;;  %v2899_v30 = vpop.f32.mrb[75].mxu1 }
 0x3fb   :  { %v14027_v13 = vpack.c.bf16 %v5273_v2, %v5272_v61  ;;  %v14029_v33 = vpack.c.bf16 %v5357_v10, %v5356_v17 }
 0x3fc   :  { %3195 = vmatmul.mubr.bf16.gmra.mrb[180].mxu0 %v11690_v62  ;;  %3468 = vmatmul.mubr.bf16.gmra.mrb[180].mxu1 %v11690_v62 }
 0x3fd   :  { %16776 = vst [vmem:[#allocation73_spill] sm:$0xff] %v14027_v13  ;;  %16777 = vst [vmem:[#allocation74_spill] sm:$0xff] %v14029_v33  ;;  %10156 = vmatprep.mubr.msk.bf16.mxu0 %vm775_vm1, %v11691_v29  ;;  %10185 = vmatprep.mubr.msk.bf16.mxu1 %vm775_vm1, %v11691_v29  ;;  %v11692_v29 = vld [vmem:[%s16378_s1 + $0xe0] ss:$8 sps:$4 sm:$0xff]  }
 0x3fe   :  { %v16814_v13 = vld [vmem:[#allocation41_spill] sm:$0xff] }
 0x3ff   :  { %v2630_v49 = vpop.f32.mrb[76].mxu0  ;;  %v2903_v34 = vpop.f32.mrb[76].mxu1 }
 0x400   :  { %v4376_v3 = vmax.f32 %v2620_v23, %v2630_v49  ;;  %v4378_v39 = vmax.f32 %v2893_v58, %v2903_v34  ;;  %v2632_v35 = vpop.f32.mrb[77].mxu0  ;;  %v2905_v24 = vpop.f32.mrb[77].mxu1 }
 0x401   :  { %v4377_v43 = vmax.f32 %v2622_v25, %v2632_v35  ;;  %v4379_v6 = vmax.f32 %v2895_v18, %v2905_v24  ;;  %v2634_v21 = vpop.f32.mrb[78].mxu0  ;;  %v2907_v19 = vpop.f32.mrb[78].mxu1  ;;  %v11693_v25 = vld [vmem:[%s16378_s1 + $0xf4] ss:$8 sps:$4 sm:$0xff]  }
 0x402   :  { %v4400_v15 = vmax.f32 %v2624_v57, %v2634_v21  ;;  %v4402_v61 = vmax.f32 %v2897_v51, %v2907_v19  ;;  %v2636_v2 = vpop.f32.mrb[79].mxu0  ;;  %v2909_v17 = vpop.f32.mrb[79].mxu1 }
 0x403   :  { %v5226_v10 = vmax.f32 %v4376_v3, %v4377_v43  ;;  %v5310_v62 = vmax.f32 %v4378_v39, %v4379_v6  ;;  %v4401_v33 = vmax.f32 %v2626_v1, %v2636_v2  ;;  %v4403_v9 = vmax.f32 %v2899_v30, %v2909_v17  ;;  %v11695_v2 = vld [vmem:[%s16378_s1 + $0x104] ss:$8 sps:$4 sm:$0xff]  }
 0x404   :  { %3205 = vmatmul.mubr.bf16.gmra.mrb[184].mxu0 %v11692_v29  ;;  %3478 = vmatmul.mubr.bf16.gmra.mrb[184].mxu1 %v11692_v29 }
 0x405   :  { %v5227_v23 = vmax.f32 %v4400_v15, %v4401_v33  ;;  %v5311_v58 = vmax.f32 %v4402_v61, %v4403_v9  ;;  %10157 = vmatprep.mubr.msk.bf16.mxu0 %vm775_vm1, %v11693_v25  ;;  %10186 = vmatprep.mubr.msk.bf16.mxu1 %vm775_vm1, %v11693_v25  ;;  %v5250_v18 = vadd.f32 %v5226_v10, %v12711_v38  ;;  %v11694_v61 = vld [vmem:[%s16378_s1 + $0xf0] ss:$8 sps:$4 sm:$0xff]  }
 0x406   :  { %v5334_v57 = vadd.f32 %v5310_v62, %v12711_v38 }
 0x407   :  { %v2640_v51 = vpop.f32.mrb[80].mxu0  ;;  %v2913_v1 = vpop.f32.mrb[80].mxu1  ;;  %v5251_v30 = vadd.f32 %v5227_v23, %v12726_v27  ;;  %v5335_v49 = vadd.f32 %v5311_v58, %v12726_v27  ;;  %v5274_v39 = vmax.f32 %v5250_v18, 0.0 }
 0x408   :  { %v2642_v33 = vpop.f32.mrb[81].mxu0  ;;  %v2915_v9 = vpop.f32.mrb[81].mxu1  ;;  %v5358_v24 = vmax.f32 %v5334_v57, 0.0 }
 0x409   :  { %v2644_v34 = vpop.f32.mrb[82].mxu0  ;;  %v2917_v3 = vpop.f32.mrb[82].mxu1  ;;  %v5275_v35 = vmax.f32 %v5251_v30, 0.0  ;;  %v5359_v43 = vmax.f32 %v5335_v49, 0.0 }
 0x40a   :  { %v2646_v6 = vpop.f32.mrb[83].mxu0  ;;  %v2919_v21 = vpop.f32.mrb[83].mxu1 }
 0x40b   :  { %v14051_v19 = vpack.c.bf16 %v5275_v35, %v5274_v39  ;;  %v14053_v15 = vpack.c.bf16 %v5359_v43, %v5358_v24 }
 0x40c   :  { %3215 = vmatmul.mubr.bf16.gmra.mrb[188].mxu0 %v11694_v61  ;;  %3488 = vmatmul.mubr.bf16.gmra.mrb[188].mxu1 %v11694_v61 }
 0x40d   :  { %16778 = vst [vmem:[#allocation75_spill] sm:$0xff] %v14051_v19  ;;  %16779 = vst [vmem:[#allocation76_spill] sm:$0xff] %v14053_v15  ;;  %10158 = vmatprep.mubr.msk.bf16.mxu0 %vm775_vm1, %v11695_v2  ;;  %10187 = vmatprep.mubr.msk.bf16.mxu1 %vm775_vm1, %v11695_v2  ;;  %v11696_v2 = vld [vmem:[%s16378_s1 + $0x100] ss:$8 sps:$4 sm:$0xff]  }
 0x40f   :  { %v2650_v17 = vpop.f32.mrb[84].mxu0  ;;  %v2923_v10 = vpop.f32.mrb[84].mxu1 }
 0x410   :  { %v4424_v62 = vmax.f32 %v2640_v51, %v2650_v17  ;;  %v4426_v29 = vmax.f32 %v2913_v1, %v2923_v10  ;;  %v2652_v23 = vpop.f32.mrb[85].mxu0  ;;  %v2925_v58 = vpop.f32.mrb[85].mxu1 }
 0x411   :  { %v4425_v25 = vmax.f32 %v2642_v33, %v2652_v23  ;;  %v4427_v18 = vmax.f32 %v2915_v9, %v2925_v58  ;;  %v2654_v57 = vpop.f32.mrb[86].mxu0  ;;  %v2927_v30 = vpop.f32.mrb[86].mxu1  ;;  %v11697_v33 = vld [vmem:[%s16378_s1 + $0x114] ss:$8 sps:$4 sm:$0xff]  }
 0x412   :  { %v4448_v49 = vmax.f32 %v2644_v34, %v2654_v57  ;;  %v4450_v39 = vmax.f32 %v2917_v3, %v2927_v30  ;;  %v2656_v35 = vpop.f32.mrb[87].mxu0  ;;  %v2929_v24 = vpop.f32.mrb[87].mxu1 }
 0x413   :  { %v5228_v43 = vmax.f32 %v4424_v62, %v4425_v25  ;;  %v5312_v61 = vmax.f32 %v4426_v29, %v4427_v18  ;;  %v4449_v15 = vmax.f32 %v2646_v6, %v2656_v35  ;;  %v4451_v16 = vmax.f32 %v2919_v21, %v2929_v24  ;;  %v11699_v35 = vld [vmem:[%s16378_s1 + $0x124] ss:$8 sps:$4 sm:$0xff]  }
 0x414   :  { %3225 = vmatmul.mubr.bf16.gmra.mrb[192].mxu0 %v11696_v2  ;;  %3498 = vmatmul.mubr.bf16.gmra.mrb[192].mxu1 %v11696_v2 }
 0x415   :  { %v5229_v51 = vmax.f32 %v4448_v49, %v4449_v15  ;;  %v5313_v1 = vmax.f32 %v4450_v39, %v4451_v16  ;;  %10159 = vmatprep.mubr.msk.bf16.mxu0 %vm775_vm1, %v11697_v33  ;;  %10188 = vmatprep.mubr.msk.bf16.mxu1 %vm775_vm1, %v11697_v33  ;;  %v5252_v9 = vadd.f32 %v5228_v43, %v12711_v38  ;;  %v11698_v39 = vld [vmem:[%s16378_s1 + $0x110] ss:$8 sps:$4 sm:$0xff]  }
 0x416   :  { %v5336_v34 = vadd.f32 %v5312_v61, %v12711_v38 }
 0x417   :  { %v2660_v3 = vpop.f32.mrb[88].mxu0  ;;  %v2933_v6 = vpop.f32.mrb[88].mxu1  ;;  %v5253_v21 = vadd.f32 %v5229_v51, %v12726_v27  ;;  %v5337_v17 = vadd.f32 %v5313_v1, %v12726_v27  ;;  %v5276_v29 = vmax.f32 %v5252_v9, 0.0 }
 0x418   :  { %v2662_v15 = vpop.f32.mrb[89].mxu0  ;;  %v2935_v16 = vpop.f32.mrb[89].mxu1  ;;  %v5360_v58 = vmax.f32 %v5336_v34, 0.0 }
 0x419   :  { %v2664_v10 = vpop.f32.mrb[90].mxu0  ;;  %v2937_v62 = vpop.f32.mrb[90].mxu1  ;;  %v5277_v23 = vmax.f32 %v5253_v21, 0.0  ;;  %v5361_v25 = vmax.f32 %v5337_v17, 0.0 }
 0x41a   :  { %v2666_v18 = vpop.f32.mrb[91].mxu0  ;;  %v2939_v57 = vpop.f32.mrb[91].mxu1 }
 0x41b   :  { %v14075_v30 = vpack.c.bf16 %v5277_v23, %v5276_v29  ;;  %v14077_v49 = vpack.c.bf16 %v5361_v25, %v5360_v58 }
 0x41c   :  { %3235 = vmatmul.mubr.bf16.gmra.mrb[196].mxu0 %v11698_v39  ;;  %3508 = vmatmul.mubr.bf16.gmra.mrb[196].mxu1 %v11698_v39 }
 0x41d   :  { %16780 = vst [vmem:[#allocation77_spill] sm:$0xff] %v14075_v30  ;;  %16781 = vst [vmem:[#allocation78_spill] sm:$0xff] %v14077_v49  ;;  %10160 = vmatprep.mubr.msk.bf16.mxu0 %vm775_vm1, %v11699_v35  ;;  %10189 = vmatprep.mubr.msk.bf16.mxu1 %vm775_vm1, %v11699_v35  ;;  %v11700_v35 = vld [vmem:[%s16378_s1 + $0x120] ss:$8 sps:$4 sm:$0xff]  }
 0x41f   :  { %v2670_v24 = vpop.f32.mrb[92].mxu0  ;;  %v2943_v43 = vpop.f32.mrb[92].mxu1 }
 0x420   :  { %v4472_v61 = vmax.f32 %v2660_v3, %v2670_v24  ;;  %v4474_v2 = vmax.f32 %v2933_v6, %v2943_v43  ;;  %v2672_v51 = vpop.f32.mrb[93].mxu0  ;;  %v2945_v1 = vpop.f32.mrb[93].mxu1 }
 0x421   :  { %v4473_v33 = vmax.f32 %v2662_v15, %v2672_v51  ;;  %v4475_v9 = vmax.f32 %v2935_v16, %v2945_v1  ;;  %v2674_v34 = vpop.f32.mrb[94].mxu0  ;;  %v2947_v21 = vpop.f32.mrb[94].mxu1  ;;  %v11701_v15 = vld [vmem:[%s16378_s1 + $0x134] ss:$8 sps:$4 sm:$0xff]  }
 0x422   :  { %v4496_v17 = vmax.f32 %v2664_v10, %v2674_v34  ;;  %v4498_v29 = vmax.f32 %v2937_v62, %v2947_v21  ;;  %v2676_v23 = vpop.f32.mrb[95].mxu0  ;;  %v2949_v58 = vpop.f32.mrb[95].mxu1 }
 0x423   :  { %v5230_v25 = vmax.f32 %v4472_v61, %v4473_v33  ;;  %v5314_v39 = vmax.f32 %v4474_v2, %v4475_v9  ;;  %v4497_v49 = vmax.f32 %v2666_v18, %v2676_v23  ;;  %v4499_v36 = vmax.f32 %v2939_v57, %v2949_v58  ;;  %v11703_v23 = vld [vmem:[%s16378_s1 + $0x144] ss:$8 sps:$4 sm:$0xff]  }
 0x424   :  { %3245 = vmatmul.mubr.bf16.gmra.mrb[200].mxu0 %v11700_v35  ;;  %3518 = vmatmul.mubr.bf16.gmra.mrb[200].mxu1 %v11700_v35 }
 0x425   :  { %v5231_v3 = vmax.f32 %v4496_v17, %v4497_v49  ;;  %v5315_v6 = vmax.f32 %v4498_v29, %v4499_v36  ;;  %10161 = vmatprep.mubr.msk.bf16.mxu0 %vm775_vm1, %v11701_v15  ;;  %10190 = vmatprep.mubr.msk.bf16.mxu1 %vm775_vm1, %v11701_v15  ;;  %v5254_v16 = vadd.f32 %v5230_v25, %v12711_v38  ;;  %v11702_v29 = vld [vmem:[%s16378_s1 + $0x130] ss:$8 sps:$4 sm:$0xff]  }
 0x426   :  { %v5338_v10 = vadd.f32 %v5314_v39, %v12711_v38 }
 0x427   :  { %v2680_v62 = vpop.f32.mrb[96].mxu0  ;;  %v2953_v18 = vpop.f32.mrb[96].mxu1  ;;  %v5255_v57 = vadd.f32 %v5231_v3, %v12726_v27  ;;  %v5339_v24 = vadd.f32 %v5315_v6, %v12726_v27  ;;  %v5278_v2 = vmax.f32 %v5254_v16, 0.0 }
 0x428   :  { %v2682_v49 = vpop.f32.mrb[97].mxu0  ;;  %v2955_v36 = vpop.f32.mrb[97].mxu1  ;;  %v5362_v1 = vmax.f32 %v5338_v10, 0.0 }
 0x429   :  { %v2684_v43 = vpop.f32.mrb[98].mxu0  ;;  %v2957_v61 = vpop.f32.mrb[98].mxu1  ;;  %v5279_v51 = vmax.f32 %v5255_v57, 0.0  ;;  %v5363_v33 = vmax.f32 %v5339_v24, 0.0 }
 0x42a   :  { %v2686_v9 = vpop.f32.mrb[99].mxu0  ;;  %v2959_v34 = vpop.f32.mrb[99].mxu1 }
 0x42b   :  { %v14099_v21 = vpack.c.bf16 %v5279_v51, %v5278_v2  ;;  %v14101_v17 = vpack.c.bf16 %v5363_v33, %v5362_v1 }
 0x42c   :  { %3255 = vmatmul.mubr.bf16.gmra.mrb[204].mxu0 %v11702_v29  ;;  %3528 = vmatmul.mubr.bf16.gmra.mrb[204].mxu1 %v11702_v29 }
 0x42d   :  { %16782 = vst [vmem:[#allocation79_spill] sm:$0xff] %v14099_v21  ;;  %16783 = vst [vmem:[#allocation80_spill] sm:$0xff] %v14101_v17  ;;  %10162 = vmatprep.mubr.msk.bf16.mxu0 %vm775_vm1, %v11703_v23  ;;  %10191 = vmatprep.mubr.msk.bf16.mxu1 %vm775_vm1, %v11703_v23  ;;  %v11704_v23 = vld [vmem:[%s16378_s1 + $0x140] ss:$8 sps:$4 sm:$0xff]  }
 0x42f   :  { %v2690_v58 = vpop.f32.mrb[100].mxu0  ;;  %v2963_v25 = vpop.f32.mrb[100].mxu1 }
 0x430   :  { %v4520_v39 = vmax.f32 %v2680_v62, %v2690_v58  ;;  %v4522_v35 = vmax.f32 %v2953_v18, %v2963_v25  ;;  %v2692_v3 = vpop.f32.mrb[101].mxu0  ;;  %v2965_v6 = vpop.f32.mrb[101].mxu1 }
 0x431   :  { %v4521_v15 = vmax.f32 %v2682_v49, %v2692_v3  ;;  %v4523_v16 = vmax.f32 %v2955_v36, %v2965_v6  ;;  %v2694_v10 = vpop.f32.mrb[102].mxu0  ;;  %v2967_v57 = vpop.f32.mrb[102].mxu1  ;;  %v11705_v49 = vld [vmem:[%s16378_s1 + $0x154] ss:$8 sps:$4 sm:$0xff]  }
 0x432   :  { %v4544_v24 = vmax.f32 %v2684_v43, %v2694_v10  ;;  %v4546_v2 = vmax.f32 %v2957_v61, %v2967_v57  ;;  %v2696_v51 = vpop.f32.mrb[103].mxu0  ;;  %v2969_v1 = vpop.f32.mrb[103].mxu1 }
 0x433   :  { %v5232_v33 = vmax.f32 %v4520_v39, %v4521_v15  ;;  %v5316_v29 = vmax.f32 %v4522_v35, %v4523_v16  ;;  %v4545_v17 = vmax.f32 %v2686_v9, %v2696_v51  ;;  %v4547_v21 = vmax.f32 %v2959_v34, %v2969_v1  ;;  %v11707_v51 = vld [vmem:[%s16378_s1 + $0x164] ss:$8 sps:$4 sm:$0xff]  }
 0x434   :  { %3265 = vmatmul.mubr.bf16.gmra.mrb[208].mxu0 %v11704_v23  ;;  %3538 = vmatmul.mubr.bf16.gmra.mrb[208].mxu1 %v11704_v23 }
 0x435   :  { %v5233_v62 = vmax.f32 %v4544_v24, %v4545_v17  ;;  %v5317_v18 = vmax.f32 %v4546_v2, %v4547_v21  ;;  %10163 = vmatprep.mubr.msk.bf16.mxu0 %vm775_vm1, %v11705_v49  ;;  %10192 = vmatprep.mubr.msk.bf16.mxu1 %vm775_vm1, %v11705_v49  ;;  %v5256_v36 = vadd.f32 %v5232_v33, %v12711_v38  ;;  %v11706_v2 = vld [vmem:[%s16378_s1 + $0x150] ss:$8 sps:$4 sm:$0xff]  }
 0x436   :  { %v5340_v43 = vadd.f32 %v5316_v29, %v12711_v38 }
 0x437   :  { %v2700_v61 = vpop.f32.mrb[104].mxu0  ;;  %v2973_v9 = vpop.f32.mrb[104].mxu1  ;;  %v5257_v34 = vadd.f32 %v5233_v62, %v12726_v27  ;;  %v5341_v58 = vadd.f32 %v5317_v18, %v12726_v27  ;;  %v5280_v35 = vmax.f32 %v5256_v36, 0.0 }
 0x438   :  { %v2702_v17 = vpop.f32.mrb[105].mxu0  ;;  %v2975_v21 = vpop.f32.mrb[105].mxu1  ;;  %v5364_v6 = vmax.f32 %v5340_v43, 0.0 }
 0x439   :  { %v2704_v25 = vpop.f32.mrb[106].mxu0  ;;  %v2977_v39 = vpop.f32.mrb[106].mxu1  ;;  %v5281_v3 = vmax.f32 %v5257_v34, 0.0  ;;  %v5365_v15 = vmax.f32 %v5341_v58, 0.0 }
 0x43a   :  { %v2706_v16 = vpop.f32.mrb[107].mxu0  ;;  %v2979_v10 = vpop.f32.mrb[107].mxu1 }
 0x43b   :  { %v14123_v57 = vpack.c.bf16 %v5281_v3, %v5280_v35  ;;  %v14125_v24 = vpack.c.bf16 %v5365_v15, %v5364_v6 }
 0x43c   :  { %3275 = vmatmul.mubr.bf16.gmra.mrb[212].mxu0 %v11706_v2  ;;  %3548 = vmatmul.mubr.bf16.gmra.mrb[212].mxu1 %v11706_v2 }
 0x43d   :  { %16784 = vst [vmem:[#allocation81_spill] sm:$0xff] %v14123_v57  ;;  %16785 = vst [vmem:[#allocation82_spill] sm:$0xff] %v14125_v24  ;;  %10164 = vmatprep.mubr.msk.bf16.mxu0 %vm775_vm1, %v11707_v51  ;;  %10193 = vmatprep.mubr.msk.bf16.mxu1 %vm775_vm1, %v11707_v51  ;;  %v11708_v51 = vld [vmem:[%s16378_s1 + $0x160] ss:$8 sps:$4 sm:$0xff]  }
 0x43f   :  { %v2710_v1 = vpop.f32.mrb[108].mxu0  ;;  %v2983_v33 = vpop.f32.mrb[108].mxu1 }
 0x440   :  { %v4568_v29 = vmax.f32 %v2700_v61, %v2710_v1  ;;  %v4570_v23 = vmax.f32 %v2973_v9, %v2983_v33  ;;  %v2712_v62 = vpop.f32.mrb[109].mxu0  ;;  %v2985_v18 = vpop.f32.mrb[109].mxu1 }
 0x441   :  { %v4569_v49 = vmax.f32 %v2702_v17, %v2712_v62  ;;  %v4571_v36 = vmax.f32 %v2975_v21, %v2985_v18  ;;  %v2714_v43 = vpop.f32.mrb[110].mxu0  ;;  %v2987_v34 = vpop.f32.mrb[110].mxu1  ;;  %v11709_v17 = vld [vmem:[%s16378_s1 + $0x174] ss:$8 sps:$4 sm:$0xff]  }
 0x442   :  { %v4592_v58 = vmax.f32 %v2704_v25, %v2714_v43  ;;  %v4594_v35 = vmax.f32 %v2977_v39, %v2987_v34  ;;  %v2716_v3 = vpop.f32.mrb[111].mxu0  ;;  %v2989_v6 = vpop.f32.mrb[111].mxu1 }
 0x443   :  { %v5234_v15 = vmax.f32 %v4568_v29, %v4569_v49  ;;  %v5318_v2 = vmax.f32 %v4570_v23, %v4571_v36  ;;  %v4593_v24 = vmax.f32 %v2706_v16, %v2716_v3  ;;  %v4595_v57 = vmax.f32 %v2979_v10, %v2989_v6  ;;  %v11711_v3 = vld [vmem:[%s16378_s1 + $0x4] ss:$8 sps:$4 sm:$0xff]  }
 0x444   :  { %3285 = vmatmul.mubr.bf16.gmra.mrb[216].mxu0 %v11708_v51  ;;  %3558 = vmatmul.mubr.bf16.gmra.mrb[216].mxu1 %v11708_v51 }
 0x445   :  { %v5235_v61 = vmax.f32 %v4592_v58, %v4593_v24  ;;  %v5319_v9 = vmax.f32 %v4594_v35, %v4595_v57  ;;  %10165 = vmatprep.mubr.msk.bf16.mxu0 %vm775_vm1, %v11709_v17  ;;  %10194 = vmatprep.mubr.msk.bf16.mxu1 %vm775_vm1, %v11709_v17  ;;  %v5258_v21 = vadd.f32 %v5234_v15, %v12711_v38  ;;  %v11710_v35 = vld [vmem:[%s16378_s1 + $0x170] ss:$8 sps:$4 sm:$0xff]  }
 0x446   :  { %v5342_v25 = vadd.f32 %v5318_v2, %v12711_v38 }
 0x447   :  { %v2720_v39 = vpop.f32.mrb[112].mxu0  ;;  %v2993_v16 = vpop.f32.mrb[112].mxu1  ;;  %v5259_v10 = vadd.f32 %v5235_v61, %v12726_v27  ;;  %v5343_v1 = vadd.f32 %v5319_v9, %v12726_v27  ;;  %v5282_v23 = vmax.f32 %v5258_v21, 0.0 }
 0x448   :  { %v2722_v24 = vpop.f32.mrb[113].mxu0  ;;  %v2995_v57 = vpop.f32.mrb[113].mxu1  ;;  %v5366_v18 = vmax.f32 %v5342_v25, 0.0 }
 0x449   :  { %v2724_v33 = vpop.f32.mrb[114].mxu0  ;;  %v2997_v29 = vpop.f32.mrb[114].mxu1  ;;  %v5283_v62 = vmax.f32 %v5259_v10, 0.0  ;;  %v5367_v49 = vmax.f32 %v5343_v1, 0.0 }
 0x44a   :  { %v2726_v36 = vpop.f32.mrb[115].mxu0  ;;  %v2999_v43 = vpop.f32.mrb[115].mxu1 }
 0x44b   :  { %v14147_v34 = vpack.c.bf16 %v5283_v62, %v5282_v23  ;;  %v14149_v58 = vpack.c.bf16 %v5367_v49, %v5366_v18 }
 0x44c   :  { %3295 = vmatmul.mubr.bf16.gmra.mrb[220].mxu0 %v11710_v35  ;;  %3568 = vmatmul.mubr.bf16.gmra.mrb[220].mxu1 %v11710_v35 }
 0x44d   :  { %16786 = vst [vmem:[#allocation83_spill] sm:$0xff] %v14147_v34  ;;  %16787 = vst [vmem:[#allocation84_spill] sm:$0xff] %v14149_v58  ;;  %10200 = vmatprep.mubr.msk.bf16.mxu0 %vm775_vm1, %v11711_v3  ;;  %10229 = vmatprep.mubr.msk.bf16.mxu1 %vm775_vm1, %v11711_v3  ;;  %v11712_v3 = vld [vmem:[%s16378_s1] ss:$8 sps:$4 sm:$0xff]  }
 0x44f   :  { %v2730_v6 = vpop.f32.mrb[116].mxu0  ;;  %v3003_v15 = vpop.f32.mrb[116].mxu1 }
 0x450   :  { %v4616_v2 = vmax.f32 %v2720_v39, %v2730_v6  ;;  %v4618_v51 = vmax.f32 %v2993_v16, %v3003_v15  ;;  %v2732_v61 = vpop.f32.mrb[117].mxu0  ;;  %v3005_v9 = vpop.f32.mrb[117].mxu1 }
 0x451   :  { %v4617_v17 = vmax.f32 %v2722_v24, %v2732_v61  ;;  %v4619_v21 = vmax.f32 %v2995_v57, %v3005_v9  ;;  %v2734_v25 = vpop.f32.mrb[118].mxu0  ;;  %v3007_v10 = vpop.f32.mrb[118].mxu1 }
 0x452   :  { %v4640_v1 = vmax.f32 %v2724_v33, %v2734_v25  ;;  %v4642_v23 = vmax.f32 %v2997_v29, %v3007_v10  ;;  %v2736_v62 = vpop.f32.mrb[119].mxu0  ;;  %v3009_v18 = vpop.f32.mrb[119].mxu1 }
 0x453   :  { %v5236_v49 = vmax.f32 %v4616_v2, %v4617_v17  ;;  %v5320_v35 = vmax.f32 %v4618_v51, %v4619_v21  ;;  %v4641_v58 = vmax.f32 %v2726_v36, %v2736_v62  ;;  %v4643_v34 = vmax.f32 %v2999_v43, %v3009_v18  ;;  %v11713_v36 = vld [vmem:[%s16378_s1 + $0x14] ss:$8 sps:$4 sm:$0xff]   ;;  %v11715_v62 = vld [vmem:[%s16378_s1 + $0x24] ss:$8 sps:$4 sm:$0xff]  }
 0x454   :  { %3611 = vmatmul.mubr.bf16.vlgmr.msra.gmra.mrb[224].mxu0 %v11712_v3  ;;  %3884 = vmatmul.mubr.bf16.vlgmr.msra.gmra.mrb[224].mxu1 %v11712_v3 }
 0x455   :  { %v5237_v39 = vmax.f32 %v4640_v1, %v4641_v58  ;;  %v5321_v16 = vmax.f32 %v4642_v23, %v4643_v34  ;;  %6322 = vmatpush1.bf16.msra.mxu0 %v12749_v42  ;;  %6934 = vmatpush1.bf16.msra.mxu1 %v13122_v55  ;;  %v5260_v24 = vadd.f32 %v5236_v49, %v12711_v38 }
 0x456   :  { %6323 = vmatprep.subr.bf16.mxu0 %v12773_v54  ;;  %6935 = vmatprep.subr.bf16.mxu1 %v13151_v44  ;;  %v5344_v57 = vadd.f32 %v5320_v35, %v12711_v38 }
 0x457   :  { %v2740_v33 = vpop.f32.mrb[120].mxu0  ;;  %v3013_v29 = vpop.f32.mrb[120].mxu1  ;;  %10201 = vmatprep.mubr.msk.bf16.mxu0 %vm775_vm1, %v11713_v36  ;;  %10230 = vmatprep.mubr.msk.bf16.mxu1 %vm775_vm1, %v11713_v36  ;;  %v5261_v42 = vadd.f32 %v5237_v39, %v12726_v27  ;;  %v5345_v43 = vadd.f32 %v5321_v16, %v12726_v27  ;;  %v5284_v2 = vmax.f32 %v5260_v24, 0.0 }
 0x458   :  { %v2742_v34 = vpop.f32.mrb[121].mxu0  ;;  %v3015_v58 = vpop.f32.mrb[121].mxu1  ;;  %v5368_v61 = vmax.f32 %v5344_v57, 0.0 }
 0x459   :  { %6324 = vmatpush1.bf16.msra.mxu0 %v12775_v20  ;;  %6936 = vmatpush1.bf16.msra.mxu1 %v13153_v12  ;;  %v2744_v6 = vpop.f32.mrb[122].mxu0  ;;  %v3017_v15 = vpop.f32.mrb[122].mxu1  ;;  %v5285_v51 = vmax.f32 %v5261_v42, 0.0  ;;  %v5369_v9 = vmax.f32 %v5345_v43, 0.0  ;;  %v11714_v20 = vld [vmem:[%s16378_s1 + $0x10] ss:$8 sps:$4 sm:$0xff]  }
 0x45a   :  { %6325 = vmatprep.subr.bf16.mxu0 %v12801_v28  ;;  %6937 = vmatprep.subr.bf16.mxu1 %v13183_v5  ;;  %v2746_v17 = vpop.f32.mrb[123].mxu0  ;;  %v3019_v21 = vpop.f32.mrb[123].mxu1 }
 0x45b   :  { %v14179_v25 = vpack.c.bf16 %v5285_v51, %v5284_v2  ;;  %v14181_v10 = vpack.c.bf16 %v5369_v9, %v5368_v61 }
 0x45c   :  { %3621 = vmatmul.mubr.bf16.gmra.mrb[228].mxu0 %v11714_v20  ;;  %3894 = vmatmul.mubr.bf16.gmra.mrb[228].mxu1 %v11714_v20 }
 0x45d   :  { %16788 = vst [vmem:[#allocation85_spill] sm:$0xff] %v14179_v25  ;;  %16789 = vst [vmem:[#allocation86_spill] sm:$0xff] %v14181_v10  ;;  %6326 = vmatpush1.bf16.msra.mxu0 %v12803_v56  ;;  %6938 = vmatpush1.bf16.msra.mxu1 %v13185_v14 }
 0x45e   :  { %6327 = vmatprep.subr.bf16.mxu0 %v12821_v47  ;;  %6939 = vmatprep.subr.bf16.mxu1 %v13207_v22 }
 0x45f   :  { %v2750_v1 = vpop.f32.mrb[124].mxu0  ;;  %v3023_v23 = vpop.f32.mrb[124].mxu1  ;;  %10202 = vmatprep.mubr.msk.bf16.mxu0 %vm775_vm1, %v11715_v62  ;;  %10231 = vmatprep.mubr.msk.bf16.mxu1 %vm775_vm1, %v11715_v62 }
 0x460   :  { %v4664_v18 = vmax.f32 %v2740_v33, %v2750_v1  ;;  %v4666_v49 = vmax.f32 %v3013_v29, %v3023_v23  ;;  %v2752_v35 = vpop.f32.mrb[125].mxu0  ;;  %v3025_v56 = vpop.f32.mrb[125].mxu1 }
 0x461   :  { %v4665_v3 = vmax.f32 %v2742_v34, %v2752_v35  ;;  %v4667_v39 = vmax.f32 %v3015_v58, %v3025_v56  ;;  %6328 = vmatpush1.bf16.msra.mxu0 %v12823_v60  ;;  %6940 = vmatpush1.bf16.msra.mxu1 %v13209_v31  ;;  %v2754_v16 = vpop.f32.mrb[126].mxu0  ;;  %v3027_v24 = vpop.f32.mrb[126].mxu1  ;;  %v11716_v60 = vld [vmem:[%s16378_s1 + $0x20] ss:$8 sps:$4 sm:$0xff]  }
 0x462   :  { %v4688_v57 = vmax.f32 %v2744_v6, %v2754_v16  ;;  %v4690_v36 = vmax.f32 %v3017_v15, %v3027_v24  ;;  %6329 = vmatprep.subr.bf16.mxu0 %v12841_v52  ;;  %6941 = vmatprep.subr.bf16.mxu1 %v13231_v50  ;;  %v2756_v42 = vpop.f32.mrb[127].mxu0  ;;  %v3029_v43 = vpop.f32.mrb[127].mxu1 }
 0x463   :  { %v5238_v33 = vmax.f32 %v4664_v18, %v4665_v3  ;;  %v5322_v29 = vmax.f32 %v4666_v49, %v4667_v39  ;;  %v4689_v2 = vmax.f32 %v2746_v17, %v2756_v42  ;;  %v4691_v51 = vmax.f32 %v3019_v21, %v3029_v43  ;;  %v11717_v17 = vld [vmem:[%s16378_s1 + $0x34] ss:$8 sps:$4 sm:$0xff]  }
 0x464   :  { %3631 = vmatmul.mubr.bf16.gmra.mrb[232].mxu0 %v11716_v60  ;;  %3904 = vmatmul.mubr.bf16.gmra.mrb[232].mxu1 %v11716_v60 }
 0x465   :  { %v5239_v34 = vmax.f32 %v4688_v57, %v4689_v2  ;;  %v5323_v58 = vmax.f32 %v4690_v36, %v4691_v51  ;;  %6330 = vmatpush1.bf16.msra.mxu0 %v12843_v0  ;;  %6942 = vmatpush1.bf16.msra.mxu1 %v13233_v11  ;;  %v5262_v6 = vadd.f32 %v5238_v33, %v12711_v38  ;;  %v16792_v57 = vld [vmem:[#allocation16_spill] sm:$0xff]  ;;  %v16793_v36 = vld [vmem:[#allocation31_spill] sm:$0xff] }
 0x466   :  { %6331 = vmatprep.subr.bf16.mxu0 %v12861_v46  ;;  %6943 = vmatprep.subr.bf16.mxu1 %v13255_v40  ;;  %v5346_v15 = vadd.f32 %v5322_v29, %v12711_v38  ;;  %v11719_v33 = vld [vmem:[%s16378_s1 + $0x44] ss:$8 sps:$4 sm:$0xff]  }
 0x467   :  { %v3066_v61 = vpop.f32.mrb[128].mxu0  ;;  %v3339_v9 = vpop.f32.mrb[128].mxu1  ;;  %10203 = vmatprep.mubr.msk.bf16.mxu0 %vm775_vm1, %v11717_v17  ;;  %10232 = vmatprep.mubr.msk.bf16.mxu1 %vm775_vm1, %v11717_v17  ;;  %v5263_v0 = vadd.f32 %v5239_v34, %v12726_v27  ;;  %v5347_v21 = vadd.f32 %v5323_v58, %v12726_v27  ;;  %v5286_v18 = vmax.f32 %v5262_v6, 0.0  ;;  %v16794_v34 = vld [vmem:[#allocation23_spill] sm:$0xff]  ;;  %v16795_v58 = vld [vmem:[#allocation32_spill] sm:$0xff] }
 0x468   :  { %v3068_v20 = vpop.f32.mrb[129].mxu0  ;;  %v3341_v1 = vpop.f32.mrb[129].mxu1  ;;  %v5370_v35 = vmax.f32 %v5346_v15, 0.0 }
 0x469   :  { %6332 = vmatpush1.bf16.msra.mxu0 %v12863_v4  ;;  %6944 = vmatpush1.bf16.msra.mxu1 %v13257_v41  ;;  %v3070_v23 = vpop.f32.mrb[130].mxu0  ;;  %v3343_v62 = vpop.f32.mrb[130].mxu1  ;;  %v5287_v49 = vmax.f32 %v5263_v0, 0.0  ;;  %v5371_v56 = vmax.f32 %v5347_v21, 0.0  ;;  %v11718_v4 = vld [vmem:[%s16378_s1 + $0x30] ss:$8 sps:$4 sm:$0xff]  }
 0x46a   :  { %6333 = vmatprep.subr.bf16.mxu0 %v12885_v8  ;;  %6945 = vmatprep.subr.bf16.mxu1 %v13279_v53  ;;  %v3072_v3 = vpop.f32.mrb[131].mxu0  ;;  %v3345_v39 = vpop.f32.mrb[131].mxu1  ;;  %v16796_v21 = vld [vmem:[#allocation17_spill] sm:$0xff] }
 0x46b   :  { %v14219_v16 = vpack.c.bf16 %v5287_v49, %v5286_v18  ;;  %v14221_v24 = vpack.c.bf16 %v5371_v56, %v5370_v35  ;;  %v16797_v18 = vld [vmem:[#allocation33_spill] sm:$0xff] }
 0x46c   :  { %3641 = vmatmul.mubr.bf16.gmra.mrb[236].mxu0 %v11718_v4  ;;  %3914 = vmatmul.mubr.bf16.gmra.mrb[236].mxu1 %v11718_v4 }
 0x46d   :  { %16790 = vst [vmem:[#allocation87_spill] sm:$0xff] %v14219_v16  ;;  %16791 = vst [vmem:[#allocation88_spill] sm:$0xff] %v14221_v24  ;;  %6334 = vmatpush1.bf16.msra.mxu0 %v12881_v59  ;;  %6946 = vmatpush1.bf16.msra.mxu1 %v13281_v48 }
 0x46e   :  { %6335 = vmatprep.subr.bf16.mxu0 %v16792_v57  ;;  %6947 = vmatprep.subr.bf16.mxu1 %v16793_v36 }
 0x46f   :  { %v3076_v42 = vpop.f32.mrb[132].mxu0  ;;  %v3349_v43 = vpop.f32.mrb[132].mxu1  ;;  %10204 = vmatprep.mubr.msk.bf16.mxu0 %vm775_vm1, %v11719_v33  ;;  %10233 = vmatprep.mubr.msk.bf16.mxu1 %vm775_vm1, %v11719_v33 }
 0x470   :  { %v4140_v29 = vmax.f32 %v3066_v61, %v3076_v42  ;;  %v3078_v2 = vpop.f32.mrb[133].mxu0  ;;  %v3351_v51 = vpop.f32.mrb[133].mxu1  ;;  %v4142_v59 = vmax.f32 %v3339_v9, %v3349_v43  ;;  %v16798_v43 = vld [vmem:[#allocation18_spill] sm:$0xff] }
 0x471   :  { %v4141_v60 = vmax.f32 %v3068_v20, %v3078_v2  ;;  %6336 = vmatpush1.bf16.msra.mxu0 %v16794_v34  ;;  %6948 = vmatpush1.bf16.msra.mxu1 %v16795_v58  ;;  %v3080_v6 = vpop.f32.mrb[134].mxu0  ;;  %v3353_v15 = vpop.f32.mrb[134].mxu1  ;;  %v4143_v17 = vmax.f32 %v3341_v1, %v3351_v51  ;;  %v11720_v20 = vld [vmem:[%s16378_s1 + $0x40] ss:$8 sps:$4 sm:$0xff]   ;;  %v16799_v1 = vld [vmem:[#allocation34_spill] sm:$0xff]  ;;  %v16800_v51 = vld [vmem:[#allocation19_spill] sm:$0xff] }
 0x472   :  { %v4164_v0 = vmax.f32 %v3070_v23, %v3080_v6  ;;  %6337 = vmatprep.subr.bf16.mxu0 %v16796_v21  ;;  %6949 = vmatprep.subr.bf16.mxu1 %v16797_v18  ;;  %v3082_v49 = vpop.f32.mrb[135].mxu0  ;;  %v3355_v35 = vpop.f32.mrb[135].mxu1  ;;  %v4166_v56 = vmax.f32 %v3343_v62, %v3353_v15  ;;  %v16801_v62 = vld [vmem:[#allocation35_spill] sm:$0xff] }
 0x473   :  { %v4165_v61 = vmax.f32 %v3072_v3, %v3082_v49  ;;  %v5384_v4 = vmax.f32 %v4140_v29, %v4141_v60  ;;  %v4167_v42 = vmax.f32 %v3345_v39, %v3355_v35  ;;  %v5468_v9 = vmax.f32 %v4142_v59, %v4143_v17  ;;  %v11721_v59 = vld [vmem:[%s16378_s1 + $0x54] ss:$8 sps:$4 sm:$0xff]   ;;  %v16802_v17 = vld [vmem:[#allocation20_spill] sm:$0xff] }
 0x474   :  { %3651 = vmatmul.mubr.bf16.gmra.mrb[240].mxu0 %v11720_v20  ;;  %3924 = vmatmul.mubr.bf16.gmra.mrb[240].mxu1 %v11720_v20  ;;  %v16805_v20 = vld [vmem:[#allocation37_spill] sm:$0xff] }
 0x475   :  { %6338 = vmatpush1.bf16.msra.mxu0 %v16798_v43  ;;  %6950 = vmatpush1.bf16.msra.mxu1 %v16799_v1  ;;  %v5385_v23 = vmax.f32 %v4164_v0, %v4165_v61  ;;  %v5408_v33 = vadd.f32 %v5384_v4, %v12711_v38  ;;  %v5469_v2 = vmax.f32 %v4166_v56, %v4167_v42  ;;  %v16803_v0 = vld [vmem:[#allocation36_spill] sm:$0xff] }
 0x476   :  { %6339 = vmatprep.subr.bf16.mxu0 %v16800_v51  ;;  %6951 = vmatprep.subr.bf16.mxu1 %v16801_v62  ;;  %v5492_v3 = vadd.f32 %v5468_v9, %v12711_v38  ;;  %v16804_v9 = vld [vmem:[#allocation21_spill] sm:$0xff] }
 0x477   :  { %v3086_v39 = vpop.f32.mrb[136].mxu0  ;;  %v3359_v29 = vpop.f32.mrb[136].mxu1  ;;  %10205 = vmatprep.mubr.msk.bf16.mxu0 %vm775_vm1, %v11721_v59  ;;  %10234 = vmatprep.mubr.msk.bf16.mxu1 %vm775_vm1, %v11721_v59  ;;  %v5409_v60 = vadd.f32 %v5385_v23, %v12726_v27  ;;  %v5493_v34 = vadd.f32 %v5469_v2, %v12726_v27  ;;  %v5432_v56 = vmax.f32 %v5408_v33, 0.0  ;;  %v16808_v33 = vld [vmem:[#allocation22_spill] sm:$0xff] }
 0x478   :  { %v3088_v6 = vpop.f32.mrb[137].mxu0  ;;  %v3361_v15 = vpop.f32.mrb[137].mxu1  ;;  %v5516_v4 = vmax.f32 %v5492_v3, 0.0  ;;  %v16809_v3 = vld [vmem:[#allocation38_spill] sm:$0xff] }
 0x479   :  { %6340 = vmatpush1.bf16.msra.mxu0 %v16802_v17  ;;  %6952 = vmatpush1.bf16.msra.mxu1 %v16803_v0  ;;  %v3090_v49 = vpop.f32.mrb[138].mxu0  ;;  %v3363_v35 = vpop.f32.mrb[138].mxu1  ;;  %v5433_v61 = vmax.f32 %v5409_v60, 0.0  ;;  %v5517_v42 = vmax.f32 %v5493_v34, 0.0  ;;  %v11722_v17 = vld [vmem:[%s16378_s1 + $0x50] ss:$8 sps:$4 sm:$0xff]  }
 0x47a   :  { %6341 = vmatprep.subr.bf16.mxu0 %v16804_v9  ;;  %6953 = vmatprep.subr.bf16.mxu1 %v16805_v20  ;;  %v3092_v43 = vpop.f32.mrb[139].mxu0  ;;  %v3365_v23 = vpop.f32.mrb[139].mxu1  ;;  %v16810_v60 = vld [vmem:[#allocation25_spill] sm:$0xff]  ;;  %v16811_v34 = vld [vmem:[#allocation39_spill] sm:$0xff] }
 0x47b   :  { %v14259_v59 = vpack.c.bf16 %v5433_v61, %v5432_v56  ;;  %v14261_v2 = vpack.c.bf16 %v5517_v42, %v5516_v4  ;;  %v11723_v56 = vld [vmem:[%s16378_s1 + $0x64] ss:$8 sps:$4 sm:$0xff]  }
 0x47c   :  { %3661 = vmatmul.mubr.bf16.gmra.mrb[244].mxu0 %v11722_v17  ;;  %3934 = vmatmul.mubr.bf16.gmra.mrb[244].mxu1 %v11722_v17 }
 0x47d   :  { %16806 = vst [vmem:[#allocation16_spill] sm:$0xff] %v14259_v59  ;;  %16807 = vst [vmem:[#allocation23_spill] sm:$0xff] %v14261_v2  ;;  %6342 = vmatpush1.bf16.msra.mxu0 %v16808_v33  ;;  %6954 = vmatpush1.bf16.msra.mxu1 %v16809_v3  ;;  %v16812_v2 = vld [vmem:[#allocation24_spill] sm:$0xff] }
 0x47e   :  { %6343 = vmatprep.subr.bf16.mxu0 %v16810_v60  ;;  %6955 = vmatprep.subr.bf16.mxu1 %v16811_v34  ;;  %v16813_v59 = vld [vmem:[#allocation40_spill] sm:$0xff] }
 0x47f   :  { %v3096_v24 = vpop.f32.mrb[140].mxu0  ;;  %v3369_v10 = vpop.f32.mrb[140].mxu1  ;;  %10206 = vmatprep.mubr.msk.bf16.mxu0 %vm775_vm1, %v11723_v56  ;;  %10235 = vmatprep.mubr.msk.bf16.mxu1 %vm775_vm1, %v11723_v56 }
 0x480   :  { %v4188_v61 = vmax.f32 %v3086_v39, %v3096_v24  ;;  %v3098_v4 = vpop.f32.mrb[141].mxu0  ;;  %v3371_v42 = vpop.f32.mrb[141].mxu1  ;;  %v4190_v17 = vmax.f32 %v3359_v29, %v3369_v10  ;;  %v11724_v29 = vld [vmem:[%s16378_s1 + $0x60] ss:$8 sps:$4 sm:$0xff]  }
 0x481   :  { %v4189_v33 = vmax.f32 %v3088_v6, %v3098_v4  ;;  %6344 = vmatpush1.bf16.msra.mxu0 %v16812_v2  ;;  %6956 = vmatpush1.bf16.msra.mxu1 %v16813_v59  ;;  %v3100_v16 = vpop.f32.mrb[142].mxu0  ;;  %v3373_v25 = vpop.f32.mrb[142].mxu1  ;;  %v4191_v30 = vmax.f32 %v3361_v15, %v3371_v42 }
 0x482   :  { %v4212_v19 = vmax.f32 %v3090_v49, %v3100_v16  ;;  %6345 = vmatprep.subr.bf16.mxu0 %v13122_v55  ;;  %6957 = vmatprep.subr.bf16.mxu1 %v16814_v13  ;;  %v3102_v37 = vpop.f32.mrb[143].mxu0  ;;  %v3375_v63 = vpop.f32.mrb[143].mxu1  ;;  %v4214_v56 = vmax.f32 %v3363_v35, %v3373_v25  ;;  %v11725_v49 = vld [vmem:[%s16378_s1 + $0x74] ss:$8 sps:$4 sm:$0xff]  }
 0x483   :  { %v4213_v24 = vmax.f32 %v3092_v43, %v3102_v37  ;;  %v5386_v39 = vmax.f32 %v4188_v61, %v4189_v33  ;;  %v4215_v32 = vmax.f32 %v3365_v23, %v3375_v63  ;;  %v5470_v10 = vmax.f32 %v4190_v17, %v4191_v30  ;;  %v16815_v37 = vld [vmem:[#allocation43_spill] sm:$0xff]  ;;  %v16816_v17 = vld [vmem:[#allocation45_spill] sm:$0xff] }
 0x484   :  { %3671 = vmatmul.mubr.bf16.gmra.mrb[248].mxu0 %v11724_v29  ;;  %3944 = vmatmul.mubr.bf16.gmra.mrb[248].mxu1 %v11724_v29 }
 0x485   :  { %6346 = vmatpush1.bf16.msra.mxu0 %v12747_v26  ;;  %6958 = vmatpush1.bf16.msra.mxu1 %v13120_v45  ;;  %v5387_v16 = vmax.f32 %v4212_v19, %v4213_v24  ;;  %v5410_v6 = vadd.f32 %v5386_v39, %v12711_v38  ;;  %v5471_v15 = vmax.f32 %v4214_v56, %v4215_v32 }
 0x486   :  { %6347 = vmatprep.subr.bf16.mxu0 %v13153_v12  ;;  %6959 = vmatprep.subr.bf16.mxu1 %v16815_v37  ;;  %v5494_v63 = vadd.f32 %v5470_v10, %v12711_v38  ;;  %v16819_v10 = vld [vmem:[#allocation47_spill] sm:$0xff] }
 0x487   :  { %v3106_v30 = vpop.f32.mrb[144].mxu0  ;;  %v3379_v25 = vpop.f32.mrb[144].mxu1  ;;  %10207 = vmatprep.mubr.msk.bf16.mxu0 %vm775_vm1, %v11725_v49  ;;  %10236 = vmatprep.mubr.msk.bf16.mxu1 %vm775_vm1, %v11725_v49  ;;  %v5411_v26 = vadd.f32 %v5387_v16, %v12726_v27  ;;  %v5495_v32 = vadd.f32 %v5471_v15, %v12726_v27  ;;  %v5434_v2 = vmax.f32 %v5410_v6, 0.0  ;;  %v11727_v6 = vld [vmem:[%s16378_s1 + $0x84] ss:$8 sps:$4 sm:$0xff]  }
 0x488   :  { %v3108_v19 = vpop.f32.mrb[145].mxu0  ;;  %v3381_v35 = vpop.f32.mrb[145].mxu1  ;;  %v5518_v4 = vmax.f32 %v5494_v63, 0.0 }
 0x489   :  { %6348 = vmatpush1.bf16.msra.mxu0 %v12773_v54  ;;  %6960 = vmatpush1.bf16.msra.mxu1 %v13151_v44  ;;  %v3110_v43 = vpop.f32.mrb[146].mxu0  ;;  %v3383_v23 = vpop.f32.mrb[146].mxu1  ;;  %v5435_v61 = vmax.f32 %v5411_v26, 0.0  ;;  %v5519_v42 = vmax.f32 %v5495_v32, 0.0  ;;  %v11726_v54 = vld [vmem:[%s16378_s1 + $0x70] ss:$8 sps:$4 sm:$0xff]  }
 0x48a   :  { %6349 = vmatprep.subr.bf16.mxu0 %v13185_v14  ;;  %6961 = vmatprep.subr.bf16.mxu1 %v16816_v17  ;;  %v3112_v33 = vpop.f32.mrb[147].mxu0  ;;  %v3385_v56 = vpop.f32.mrb[147].mxu1 }
 0x48b   :  { %v14299_v24 = vpack.c.bf16 %v5435_v61, %v5434_v2  ;;  %v14301_v39 = vpack.c.bf16 %v5519_v42, %v5518_v4  ;;  %v16820_v42 = vld [vmem:[#allocation49_spill] sm:$0xff] }
 0x48c   :  { %3681 = vmatmul.mubr.bf16.gmra.mrb[252].mxu0 %v11726_v54  ;;  %3954 = vmatmul.mubr.bf16.gmra.mrb[252].mxu1 %v11726_v54 }
 0x48d   :  { %16817 = vst [vmem:[#allocation32_spill] sm:$0xff] %v14299_v24  ;;  %16818 = vst [vmem:[#allocation17_spill] sm:$0xff] %v14301_v39  ;;  %6350 = vmatpush1.bf16.msra.mxu0 %v12801_v28  ;;  %6962 = vmatpush1.bf16.msra.mxu1 %v13183_v5 }
 0x48e   :  { %6351 = vmatprep.subr.bf16.mxu0 %v13209_v31  ;;  %6963 = vmatprep.subr.bf16.mxu1 %v16819_v10 }
 0x48f   :  { %v3116_v29 = vpop.f32.mrb[148].mxu0  ;;  %v3389_v16 = vpop.f32.mrb[148].mxu1  ;;  %10208 = vmatprep.mubr.msk.bf16.mxu0 %vm775_vm1, %v11727_v6  ;;  %10237 = vmatprep.mubr.msk.bf16.mxu1 %vm775_vm1, %v11727_v6 }
 0x490   :  { %v4236_v15 = vmax.f32 %v3106_v30, %v3116_v29  ;;  %v3118_v63 = vpop.f32.mrb[149].mxu0  ;;  %v3391_v49 = vpop.f32.mrb[149].mxu1  ;;  %v4238_v28 = vmax.f32 %v3379_v25, %v3389_v16 }
 0x491   :  { %v4237_v26 = vmax.f32 %v3108_v19, %v3118_v63  ;;  %6352 = vmatpush1.bf16.msra.mxu0 %v12821_v47  ;;  %6964 = vmatpush1.bf16.msra.mxu1 %v13207_v22  ;;  %v3120_v32 = vpop.f32.mrb[150].mxu0  ;;  %v3393_v2 = vpop.f32.mrb[150].mxu1  ;;  %v4239_v61 = vmax.f32 %v3381_v35, %v3391_v49  ;;  %v11728_v47 = vld [vmem:[%s16378_s1 + $0x80] ss:$8 sps:$4 sm:$0xff]   ;;  %v11729_v19 = vld [vmem:[%s16378_s1 + $0x94] ss:$8 sps:$4 sm:$0xff]  }
 0x492   :  { %v4260_v4 = vmax.f32 %v3110_v43, %v3120_v32  ;;  %6474 = vmatprep.subr.bf16.mxu0 %v13233_v11  ;;  %7086 = vmatprep.subr.bf16.mxu1 %v16820_v42  ;;  %v3122_v54 = vpop.f32.mrb[151].mxu0  ;;  %v3395_v39 = vpop.f32.mrb[151].mxu1  ;;  %v4262_v6 = vmax.f32 %v3383_v23, %v3393_v2 }
 0x493   :  { %v4261_v30 = vmax.f32 %v3112_v33, %v3122_v54  ;;  %v5388_v29 = vmax.f32 %v4236_v15, %v4237_v26  ;;  %v4263_v24 = vmax.f32 %v3385_v56, %v3395_v39  ;;  %v5472_v25 = vmax.f32 %v4238_v28, %v4239_v61 }
 0x494   :  { %3691 = vmatmul.mubr.bf16.gmra.mrb[0].mxu0 %v11728_v47  ;;  %3964 = vmatmul.mubr.bf16.gmra.mrb[0].mxu1 %v11728_v47  ;;  %v11731_v47 = vld [vmem:[%s16378_s1 + $0xa4] ss:$8 sps:$4 sm:$0xff]  }
 0x495   :  { %10209 = vmatprep.mubr.msk.bf16.mxu0 %vm775_vm1, %v11729_v19  ;;  %10238 = vmatprep.mubr.msk.bf16.mxu1 %vm775_vm1, %v11729_v19  ;;  %v5389_v35 = vmax.f32 %v4260_v4, %v4261_v30  ;;  %v5412_v43 = vadd.f32 %v5388_v29, %v12711_v38  ;;  %v5473_v23 = vmax.f32 %v4262_v6, %v4263_v24  ;;  %v11730_v6 = vld [vmem:[%s16378_s1 + $0x90] ss:$8 sps:$4 sm:$0xff]  }
 0x496   :  { %v5496_v33 = vadd.f32 %v5472_v25, %v12711_v38 }
 0x497   :  { %v3126_v56 = vpop.f32.mrb[152].mxu0  ;;  %v3399_v39 = vpop.f32.mrb[152].mxu1  ;;  %v5413_v16 = vadd.f32 %v5389_v35, %v12726_v27  ;;  %v5497_v15 = vadd.f32 %v5473_v23, %v12726_v27  ;;  %v5436_v32 = vmax.f32 %v5412_v43, 0.0 }
 0x498   :  { %v3128_v63 = vpop.f32.mrb[153].mxu0  ;;  %v3401_v49 = vpop.f32.mrb[153].mxu1  ;;  %v5520_v61 = vmax.f32 %v5496_v33, 0.0 }
 0x499   :  { %v3130_v28 = vpop.f32.mrb[154].mxu0  ;;  %v3403_v26 = vpop.f32.mrb[154].mxu1  ;;  %v5437_v2 = vmax.f32 %v5413_v16, 0.0  ;;  %v5521_v54 = vmax.f32 %v5497_v15, 0.0 }
 0x49a   :  { %v3132_v4 = vpop.f32.mrb[155].mxu0  ;;  %v3405_v30 = vpop.f32.mrb[155].mxu1 }
 0x49b   :  { %v14331_v29 = vpack.c.bf16 %v5437_v2, %v5436_v32  ;;  %v14333_v24 = vpack.c.bf16 %v5521_v54, %v5520_v61 }
 0x49c   :  { %3701 = vmatmul.mubr.bf16.gmra.mrb[4].mxu0 %v11730_v6  ;;  %3974 = vmatmul.mubr.bf16.gmra.mrb[4].mxu1 %v11730_v6 }
 0x49d   :  { %16821 = vst [vmem:[#allocation18_spill] sm:$0xff] %v14331_v29  ;;  %16822 = vst [vmem:[#allocation34_spill] sm:$0xff] %v14333_v24  ;;  %10210 = vmatprep.mubr.msk.bf16.mxu0 %vm775_vm1, %v11731_v47  ;;  %10239 = vmatprep.mubr.msk.bf16.mxu1 %vm775_vm1, %v11731_v47  ;;  %v11732_v47 = vld [vmem:[%s16378_s1 + $0xa0] ss:$8 sps:$4 sm:$0xff]  }
 0x49f   :  { %v3136_v25 = vpop.f32.mrb[156].mxu0  ;;  %v3409_v19 = vpop.f32.mrb[156].mxu1 }
 0x4a0   :  { %v4284_v35 = vmax.f32 %v3126_v56, %v3136_v25  ;;  %v3138_v43 = vpop.f32.mrb[157].mxu0  ;;  %v3411_v23 = vpop.f32.mrb[157].mxu1  ;;  %v4286_v33 = vmax.f32 %v3399_v39, %v3409_v19  ;;  %v11733_v39 = vld [vmem:[%s16378_s1 + $0xb4] ss:$8 sps:$4 sm:$0xff]  }
 0x4a1   :  { %v4285_v16 = vmax.f32 %v3128_v63, %v3138_v43  ;;  %v3140_v15 = vpop.f32.mrb[158].mxu0  ;;  %v3413_v32 = vpop.f32.mrb[158].mxu1  ;;  %v4287_v2 = vmax.f32 %v3401_v49, %v3411_v23 }
 0x4a2   :  { %v4308_v61 = vmax.f32 %v3130_v28, %v3140_v15  ;;  %v3142_v54 = vpop.f32.mrb[159].mxu0  ;;  %v3415_v6 = vpop.f32.mrb[159].mxu1  ;;  %v4310_v24 = vmax.f32 %v3403_v26, %v3413_v32 }
 0x4a3   :  { %v4309_v29 = vmax.f32 %v3132_v4, %v3142_v54  ;;  %v5390_v7 = vmax.f32 %v4284_v35, %v4285_v16  ;;  %v4311_v42 = vmax.f32 %v3405_v30, %v3415_v6  ;;  %v5474_v56 = vmax.f32 %v4286_v33, %v4287_v2  ;;  %v11735_v54 = vld [vmem:[%s16378_s1 + $0xc4] ss:$8 sps:$4 sm:$0xff]  }
 0x4a4   :  { %3711 = vmatmul.mubr.bf16.gmra.mrb[8].mxu0 %v11732_v47  ;;  %3984 = vmatmul.mubr.bf16.gmra.mrb[8].mxu1 %v11732_v47 }
 0x4a5   :  { %10211 = vmatprep.mubr.msk.bf16.mxu0 %vm775_vm1, %v11733_v39  ;;  %10240 = vmatprep.mubr.msk.bf16.mxu1 %vm775_vm1, %v11733_v39  ;;  %v5391_v63 = vmax.f32 %v4308_v61, %v4309_v29  ;;  %v5414_v49 = vadd.f32 %v5390_v7, %v12711_v38  ;;  %v5475_v28 = vmax.f32 %v4310_v24, %v4311_v42  ;;  %v11734_v24 = vld [vmem:[%s16378_s1 + $0xb0] ss:$8 sps:$4 sm:$0xff]  }
 0x4a6   :  { %v5498_v26 = vadd.f32 %v5474_v56, %v12711_v38 }
 0x4a7   :  { %v3146_v4 = vpop.f32.mrb[160].mxu0  ;;  %v3419_v30 = vpop.f32.mrb[160].mxu1  ;;  %v5415_v25 = vadd.f32 %v5391_v63, %v12726_v27  ;;  %v5499_v19 = vadd.f32 %v5475_v28, %v12726_v27  ;;  %v5438_v16 = vmax.f32 %v5414_v49, 0.0 }
 0x4a8   :  { %v3148_v35 = vpop.f32.mrb[161].mxu0  ;;  %v3421_v43 = vpop.f32.mrb[161].mxu1  ;;  %v5522_v32 = vmax.f32 %v5498_v26, 0.0 }
 0x4a9   :  { %v3150_v23 = vpop.f32.mrb[162].mxu0  ;;  %v3423_v33 = vpop.f32.mrb[162].mxu1  ;;  %v5439_v15 = vmax.f32 %v5415_v25, 0.0  ;;  %v5523_v2 = vmax.f32 %v5499_v19, 0.0 }
 0x4aa   :  { %v3152_v29 = vpop.f32.mrb[163].mxu0  ;;  %v3425_v61 = vpop.f32.mrb[163].mxu1 }
 0x4ab   :  { %v14355_v7 = vpack.c.bf16 %v5439_v15, %v5438_v16  ;;  %v14357_v42 = vpack.c.bf16 %v5523_v2, %v5522_v32 }
 0x4ac   :  { %3721 = vmatmul.mubr.bf16.gmra.mrb[12].mxu0 %v11734_v24  ;;  %3994 = vmatmul.mubr.bf16.gmra.mrb[12].mxu1 %v11734_v24 }
 0x4ad   :  { %16823 = vst [vmem:[#allocation19_spill] sm:$0xff] %v14355_v7  ;;  %16824 = vst [vmem:[#allocation35_spill] sm:$0xff] %v14357_v42  ;;  %10212 = vmatprep.mubr.msk.bf16.mxu0 %vm775_vm1, %v11735_v54  ;;  %10241 = vmatprep.mubr.msk.bf16.mxu1 %vm775_vm1, %v11735_v54  ;;  %v11736_v54 = vld [vmem:[%s16378_s1 + $0xc0] ss:$8 sps:$4 sm:$0xff]  }
 0x4af   :  { %v3156_v6 = vpop.f32.mrb[164].mxu0  ;;  %v3429_v47 = vpop.f32.mrb[164].mxu1 }
 0x4b0   :  { %v4332_v56 = vmax.f32 %v3146_v4, %v3156_v6  ;;  %v4334_v39 = vmax.f32 %v3419_v30, %v3429_v47  ;;  %v3158_v63 = vpop.f32.mrb[165].mxu0  ;;  %v3431_v49 = vpop.f32.mrb[165].mxu1 }
 0x4b1   :  { %v4333_v28 = vmax.f32 %v3148_v35, %v3158_v63  ;;  %v4335_v26 = vmax.f32 %v3421_v43, %v3431_v49  ;;  %v3160_v25 = vpop.f32.mrb[166].mxu0  ;;  %v3433_v19 = vpop.f32.mrb[166].mxu1  ;;  %v11737_v43 = vld [vmem:[%s16378_s1 + $0xd4] ss:$8 sps:$4 sm:$0xff]  }
 0x4b2   :  { %v4356_v16 = vmax.f32 %v3150_v23, %v3160_v25  ;;  %v4358_v15 = vmax.f32 %v3423_v33, %v3433_v19  ;;  %v3162_v32 = vpop.f32.mrb[167].mxu0  ;;  %v3435_v2 = vpop.f32.mrb[167].mxu1 }
 0x4b3   :  { %v5392_v24 = vmax.f32 %v4332_v56, %v4333_v28  ;;  %v5476_v42 = vmax.f32 %v4334_v39, %v4335_v26  ;;  %v4357_v7 = vmax.f32 %v3152_v29, %v3162_v32  ;;  %v4359_v11 = vmax.f32 %v3425_v61, %v3435_v2 }
 0x4b4   :  { %3731 = vmatmul.mubr.bf16.gmra.mrb[16].mxu0 %v11736_v54  ;;  %4004 = vmatmul.mubr.bf16.gmra.mrb[16].mxu1 %v11736_v54 }
 0x4b5   :  { %v5416_v4 = vadd.f32 %v5392_v24, %v12711_v38  ;;  %v5393_v30 = vmax.f32 %v4356_v16, %v4357_v7  ;;  %v5477_v35 = vmax.f32 %v4358_v15, %v4359_v11  ;;  %10213 = vmatprep.mubr.msk.bf16.mxu0 %vm775_vm1, %v11737_v43  ;;  %10242 = vmatprep.mubr.msk.bf16.mxu1 %vm775_vm1, %v11737_v43  ;;  %v11739_v15 = vld [vmem:[%s16378_s1 + $0xe4] ss:$8 sps:$4 sm:$0xff]  }
 0x4b6   :  { %v5500_v23 = vadd.f32 %v5476_v42, %v12711_v38  ;;  %v11738_v42 = vld [vmem:[%s16378_s1 + $0xd0] ss:$8 sps:$4 sm:$0xff]  }
 0x4b7   :  { %v5417_v33 = vadd.f32 %v5393_v30, %v12726_v27  ;;  %v3166_v29 = vpop.f32.mrb[168].mxu0  ;;  %v3439_v61 = vpop.f32.mrb[168].mxu1  ;;  %v5501_v6 = vadd.f32 %v5477_v35, %v12726_v27  ;;  %v5440_v7 = vmax.f32 %v5416_v4, 0.0 }
 0x4b8   :  { %v3168_v47 = vpop.f32.mrb[169].mxu0  ;;  %v3441_v56 = vpop.f32.mrb[169].mxu1  ;;  %v5524_v49 = vmax.f32 %v5500_v23, 0.0 }
 0x4b9   :  { %v5441_v11 = vmax.f32 %v5417_v33, 0.0  ;;  %v3170_v39 = vpop.f32.mrb[170].mxu0  ;;  %v3443_v63 = vpop.f32.mrb[170].mxu1  ;;  %v5525_v28 = vmax.f32 %v5501_v6, 0.0 }
 0x4ba   :  { %v3172_v26 = vpop.f32.mrb[171].mxu0  ;;  %v3445_v25 = vpop.f32.mrb[171].mxu1 }
 0x4bb   :  { %v14379_v19 = vpack.c.bf16 %v5441_v11, %v5440_v7  ;;  %v14381_v16 = vpack.c.bf16 %v5525_v28, %v5524_v49 }
 0x4bc   :  { %3741 = vmatmul.mubr.bf16.gmra.mrb[20].mxu0 %v11738_v42  ;;  %4014 = vmatmul.mubr.bf16.gmra.mrb[20].mxu1 %v11738_v42 }
 0x4bd   :  { %16825 = vst [vmem:[#allocation20_spill] sm:$0xff] %v14379_v19  ;;  %16826 = vst [vmem:[#allocation36_spill] sm:$0xff] %v14381_v16  ;;  %10214 = vmatprep.mubr.msk.bf16.mxu0 %vm775_vm1, %v11739_v15  ;;  %10243 = vmatprep.mubr.msk.bf16.mxu1 %vm775_vm1, %v11739_v15  ;;  %v11740_v15 = vld [vmem:[%s16378_s1 + $0xe0] ss:$8 sps:$4 sm:$0xff]  }
 0x4bf   :  { %v3176_v32 = vpop.f32.mrb[172].mxu0  ;;  %v3449_v2 = vpop.f32.mrb[172].mxu1 }
 0x4c0   :  { %v4380_v24 = vmax.f32 %v3166_v29, %v3176_v32  ;;  %v4382_v54 = vmax.f32 %v3439_v61, %v3449_v2  ;;  %v3178_v4 = vpop.f32.mrb[173].mxu0  ;;  %v3451_v30 = vpop.f32.mrb[173].mxu1 }
 0x4c1   :  { %v4381_v35 = vmax.f32 %v3168_v47, %v3178_v4  ;;  %v4383_v43 = vmax.f32 %v3441_v56, %v3451_v30  ;;  %v3180_v23 = vpop.f32.mrb[174].mxu0  ;;  %v3453_v33 = vpop.f32.mrb[174].mxu1  ;;  %v11741_v56 = vld [vmem:[%s16378_s1 + $0xf4] ss:$8 sps:$4 sm:$0xff]  }
 0x4c2   :  { %v4404_v6 = vmax.f32 %v3170_v39, %v3180_v23  ;;  %v4406_v7 = vmax.f32 %v3443_v63, %v3453_v33  ;;  %v3182_v11 = vpop.f32.mrb[175].mxu0  ;;  %v3455_v49 = vpop.f32.mrb[175].mxu1 }
 0x4c3   :  { %v5394_v28 = vmax.f32 %v4380_v24, %v4381_v35  ;;  %v5478_v42 = vmax.f32 %v4382_v54, %v4383_v43  ;;  %v4405_v16 = vmax.f32 %v3172_v26, %v3182_v11  ;;  %v4407_v19 = vmax.f32 %v3445_v25, %v3455_v49  ;;  %v11743_v11 = vld [vmem:[%s16378_s1 + $0x104] ss:$8 sps:$4 sm:$0xff]  }
 0x4c4   :  { %3751 = vmatmul.mubr.bf16.gmra.mrb[24].mxu0 %v11740_v15  ;;  %4024 = vmatmul.mubr.bf16.gmra.mrb[24].mxu1 %v11740_v15 }
 0x4c5   :  { %v5418_v29 = vadd.f32 %v5394_v28, %v12711_v38  ;;  %v5395_v61 = vmax.f32 %v4404_v6, %v4405_v16  ;;  %v5479_v47 = vmax.f32 %v4406_v7, %v4407_v19  ;;  %10215 = vmatprep.mubr.msk.bf16.mxu0 %vm775_vm1, %v11741_v56  ;;  %10244 = vmatprep.mubr.msk.bf16.mxu1 %vm775_vm1, %v11741_v56  ;;  %v11742_v7 = vld [vmem:[%s16378_s1 + $0xf0] ss:$8 sps:$4 sm:$0xff]  }
 0x4c6   :  { %v5502_v39 = vadd.f32 %v5478_v42, %v12711_v38 }
 0x4c7   :  { %v5419_v63 = vadd.f32 %v5395_v61, %v12726_v27  ;;  %v3186_v26 = vpop.f32.mrb[176].mxu0  ;;  %v3459_v25 = vpop.f32.mrb[176].mxu1  ;;  %v5503_v32 = vadd.f32 %v5479_v47, %v12726_v27  ;;  %v5442_v16 = vmax.f32 %v5418_v29, 0.0 }
 0x4c8   :  { %v3188_v2 = vpop.f32.mrb[177].mxu0  ;;  %v3461_v24 = vpop.f32.mrb[177].mxu1  ;;  %v5526_v30 = vmax.f32 %v5502_v39, 0.0 }
 0x4c9   :  { %v5443_v19 = vmax.f32 %v5419_v63, 0.0  ;;  %v3190_v54 = vpop.f32.mrb[178].mxu0  ;;  %v3463_v4 = vpop.f32.mrb[178].mxu1  ;;  %v5527_v35 = vmax.f32 %v5503_v32, 0.0 }
 0x4ca   :  { %v3192_v43 = vpop.f32.mrb[179].mxu0  ;;  %v3465_v23 = vpop.f32.mrb[179].mxu1 }
 0x4cb   :  { %v14403_v33 = vpack.c.bf16 %v5443_v19, %v5442_v16  ;;  %v14405_v6 = vpack.c.bf16 %v5527_v35, %v5526_v30 }
 0x4cc   :  { %3761 = vmatmul.mubr.bf16.gmra.mrb[28].mxu0 %v11742_v7  ;;  %4034 = vmatmul.mubr.bf16.gmra.mrb[28].mxu1 %v11742_v7 }
 0x4cd   :  { %16827 = vst [vmem:[#allocation21_spill] sm:$0xff] %v14403_v33  ;;  %16828 = vst [vmem:[#allocation37_spill] sm:$0xff] %v14405_v6  ;;  %10216 = vmatprep.mubr.msk.bf16.mxu0 %vm775_vm1, %v11743_v11  ;;  %10245 = vmatprep.mubr.msk.bf16.mxu1 %vm775_vm1, %v11743_v11  ;;  %v11744_v11 = vld [vmem:[%s16378_s1 + $0x100] ss:$8 sps:$4 sm:$0xff]  }
 0x4cf   :  { %v3196_v49 = vpop.f32.mrb[180].mxu0  ;;  %v3469_v28 = vpop.f32.mrb[180].mxu1 }
 0x4d0   :  { %v4428_v42 = vmax.f32 %v3186_v26, %v3196_v49  ;;  %v4430_v15 = vmax.f32 %v3459_v25, %v3469_v28  ;;  %v3198_v29 = vpop.f32.mrb[181].mxu0  ;;  %v3471_v61 = vpop.f32.mrb[181].mxu1 }
 0x4d1   :  { %v4429_v47 = vmax.f32 %v3188_v2, %v3198_v29  ;;  %v4431_v56 = vmax.f32 %v3461_v24, %v3471_v61  ;;  %v3200_v39 = vpop.f32.mrb[182].mxu0  ;;  %v3473_v63 = vpop.f32.mrb[182].mxu1  ;;  %v11745_v24 = vld [vmem:[%s16378_s1 + $0x114] ss:$8 sps:$4 sm:$0xff]  }
 0x4d2   :  { %v4452_v32 = vmax.f32 %v3190_v54, %v3200_v39  ;;  %v4454_v16 = vmax.f32 %v3463_v4, %v3473_v63  ;;  %v3202_v19 = vpop.f32.mrb[183].mxu0  ;;  %v3475_v30 = vpop.f32.mrb[183].mxu1 }
 0x4d3   :  { %v5396_v35 = vmax.f32 %v4428_v42, %v4429_v47  ;;  %v5480_v7 = vmax.f32 %v4430_v15, %v4431_v56  ;;  %v4453_v6 = vmax.f32 %v3192_v43, %v3202_v19  ;;  %v4455_v33 = vmax.f32 %v3465_v23, %v3475_v30  ;;  %v11747_v19 = vld [vmem:[%s16378_s1 + $0x124] ss:$8 sps:$4 sm:$0xff]  }
 0x4d4   :  { %3771 = vmatmul.mubr.bf16.gmra.mrb[32].mxu0 %v11744_v11  ;;  %4044 = vmatmul.mubr.bf16.gmra.mrb[32].mxu1 %v11744_v11 }
 0x4d5   :  { %v5420_v26 = vadd.f32 %v5396_v35, %v12711_v38  ;;  %v5397_v25 = vmax.f32 %v4452_v32, %v4453_v6  ;;  %v5481_v2 = vmax.f32 %v4454_v16, %v4455_v33  ;;  %10217 = vmatprep.mubr.msk.bf16.mxu0 %vm775_vm1, %v11745_v24  ;;  %10246 = vmatprep.mubr.msk.bf16.mxu1 %vm775_vm1, %v11745_v24  ;;  %v11746_v16 = vld [vmem:[%s16378_s1 + $0x110] ss:$8 sps:$4 sm:$0xff]  }
 0x4d6   :  { %v5504_v54 = vadd.f32 %v5480_v7, %v12711_v38 }
 0x4d7   :  { %v5421_v4 = vadd.f32 %v5397_v25, %v12726_v27  ;;  %v3206_v43 = vpop.f32.mrb[184].mxu0  ;;  %v3479_v23 = vpop.f32.mrb[184].mxu1  ;;  %v5505_v49 = vadd.f32 %v5481_v2, %v12726_v27  ;;  %v5444_v6 = vmax.f32 %v5420_v26, 0.0 }
 0x4d8   :  { %v3208_v28 = vpop.f32.mrb[185].mxu0  ;;  %v3481_v42 = vpop.f32.mrb[185].mxu1  ;;  %v5528_v61 = vmax.f32 %v5504_v54, 0.0 }
 0x4d9   :  { %v5445_v33 = vmax.f32 %v5421_v4, 0.0  ;;  %v3210_v15 = vpop.f32.mrb[186].mxu0  ;;  %v3483_v29 = vpop.f32.mrb[186].mxu1  ;;  %v5529_v47 = vmax.f32 %v5505_v49, 0.0 }
 0x4da   :  { %v3212_v56 = vpop.f32.mrb[187].mxu0  ;;  %v3485_v39 = vpop.f32.mrb[187].mxu1 }
 0x4db   :  { %v14427_v63 = vpack.c.bf16 %v5445_v33, %v5444_v6  ;;  %v14429_v32 = vpack.c.bf16 %v5529_v47, %v5528_v61 }
 0x4dc   :  { %3781 = vmatmul.mubr.bf16.gmra.mrb[36].mxu0 %v11746_v16  ;;  %4054 = vmatmul.mubr.bf16.gmra.mrb[36].mxu1 %v11746_v16 }
 0x4dd   :  { %16829 = vst [vmem:[#allocation22_spill] sm:$0xff] %v14427_v63  ;;  %16830 = vst [vmem:[#allocation38_spill] sm:$0xff] %v14429_v32  ;;  %10218 = vmatprep.mubr.msk.bf16.mxu0 %vm775_vm1, %v11747_v19  ;;  %10247 = vmatprep.mubr.msk.bf16.mxu1 %vm775_vm1, %v11747_v19  ;;  %v11748_v19 = vld [vmem:[%s16378_s1 + $0x120] ss:$8 sps:$4 sm:$0xff]  }
 0x4df   :  { %v3216_v30 = vpop.f32.mrb[188].mxu0  ;;  %v3489_v35 = vpop.f32.mrb[188].mxu1 }
 0x4e0   :  { %v4476_v7 = vmax.f32 %v3206_v43, %v3216_v30  ;;  %v4478_v11 = vmax.f32 %v3479_v23, %v3489_v35  ;;  %v3218_v26 = vpop.f32.mrb[189].mxu0  ;;  %v3491_v25 = vpop.f32.mrb[189].mxu1 }
 0x4e1   :  { %v4477_v2 = vmax.f32 %v3208_v28, %v3218_v26  ;;  %v4479_v24 = vmax.f32 %v3481_v42, %v3491_v25  ;;  %v3220_v54 = vpop.f32.mrb[190].mxu0  ;;  %v3493_v4 = vpop.f32.mrb[190].mxu1 }
 0x4e2   :  { %v4500_v49 = vmax.f32 %v3210_v15, %v3220_v54  ;;  %v4502_v6 = vmax.f32 %v3483_v29, %v3493_v4  ;;  %v3222_v33 = vpop.f32.mrb[191].mxu0  ;;  %v3495_v61 = vpop.f32.mrb[191].mxu1  ;;  %v11749_v15 = vld [vmem:[%s16378_s1 + $0x134] ss:$8 sps:$4 sm:$0xff]  }
 0x4e3   :  { %v5398_v47 = vmax.f32 %v4476_v7, %v4477_v2  ;;  %v5482_v16 = vmax.f32 %v4478_v11, %v4479_v24  ;;  %v4501_v32 = vmax.f32 %v3212_v56, %v3222_v33  ;;  %v4503_v63 = vmax.f32 %v3485_v39, %v3495_v61  ;;  %v11751_v33 = vld [vmem:[%s16378_s1 + $0x144] ss:$8 sps:$4 sm:$0xff]  }
 0x4e4   :  { %3791 = vmatmul.mubr.bf16.gmra.mrb[40].mxu0 %v11748_v19  ;;  %4064 = vmatmul.mubr.bf16.gmra.mrb[40].mxu1 %v11748_v19 }
 0x4e5   :  { %v5422_v43 = vadd.f32 %v5398_v47, %v12711_v38  ;;  %v5506_v23 = vadd.f32 %v5482_v16, %v12711_v38  ;;  %v5399_v28 = vmax.f32 %v4500_v49, %v4501_v32  ;;  %v5483_v42 = vmax.f32 %v4502_v6, %v4503_v63  ;;  %10219 = vmatprep.mubr.msk.bf16.mxu0 %vm775_vm1, %v11749_v15  ;;  %v11750_v6 = vld [vmem:[%s16378_s1 + $0x130] ss:$8 sps:$4 sm:$0xff]  }
 0x4e6   :  { %10248 = vmatprep.mubr.msk.bf16.mxu1 %vm775_vm1, %v11749_v15 }
 0x4e7   :  { %v5423_v29 = vadd.f32 %v5399_v28, %v12726_v27  ;;  %v5507_v56 = vadd.f32 %v5483_v42, %v12726_v27  ;;  %v3226_v39 = vpop.f32.mrb[192].mxu0  ;;  %v3499_v30 = vpop.f32.mrb[192].mxu1  ;;  %v5446_v11 = vmax.f32 %v5422_v43, 0.0  ;;  %v5530_v26 = vmax.f32 %v5506_v23, 0.0 }
 0x4e8   :  { %v3228_v35 = vpop.f32.mrb[193].mxu0  ;;  %v3501_v7 = vpop.f32.mrb[193].mxu1 }
 0x4e9   :  { %v5447_v32 = vmax.f32 %v5423_v29, 0.0  ;;  %v5531_v63 = vmax.f32 %v5507_v56, 0.0  ;;  %v3230_v25 = vpop.f32.mrb[194].mxu0  ;;  %v3503_v2 = vpop.f32.mrb[194].mxu1 }
 0x4ea   :  { %v3232_v24 = vpop.f32.mrb[195].mxu0  ;;  %v3505_v54 = vpop.f32.mrb[195].mxu1 }
 0x4eb   :  { %v14451_v4 = vpack.c.bf16 %v5447_v32, %v5446_v11  ;;  %v14453_v49 = vpack.c.bf16 %v5531_v63, %v5530_v26 }
 0x4ec   :  { %3801 = vmatmul.mubr.bf16.gmra.mrb[44].mxu0 %v11750_v6  ;;  %4074 = vmatmul.mubr.bf16.gmra.mrb[44].mxu1 %v11750_v6 }
 0x4ed   :  { %16831 = vst [vmem:[#allocation25_spill] sm:$0xff] %v14451_v4  ;;  %16832 = vst [vmem:[#allocation39_spill] sm:$0xff] %v14453_v49  ;;  %10220 = vmatprep.mubr.msk.bf16.mxu0 %vm775_vm1, %v11751_v33  ;;  %10249 = vmatprep.mubr.msk.bf16.mxu1 %vm775_vm1, %v11751_v33  ;;  %v11752_v33 = vld [vmem:[%s16378_s1 + $0x140] ss:$8 sps:$4 sm:$0xff]  }
 0x4ef   :  { %v3236_v61 = vpop.f32.mrb[196].mxu0  ;;  %v3509_v47 = vpop.f32.mrb[196].mxu1 }
 0x4f0   :  { %v4524_v16 = vmax.f32 %v3226_v39, %v3236_v61  ;;  %v4526_v19 = vmax.f32 %v3499_v30, %v3509_v47  ;;  %v3238_v43 = vpop.f32.mrb[197].mxu0  ;;  %v3511_v23 = vpop.f32.mrb[197].mxu1 }
 0x4f1   :  { %v4525_v28 = vmax.f32 %v3228_v35, %v3238_v43  ;;  %v4527_v42 = vmax.f32 %v3501_v7, %v3511_v23  ;;  %v3240_v15 = vpop.f32.mrb[198].mxu0  ;;  %v3513_v29 = vpop.f32.mrb[198].mxu1 }
 0x4f2   :  { %v4548_v56 = vmax.f32 %v3230_v25, %v3240_v15  ;;  %v4550_v11 = vmax.f32 %v3503_v2, %v3513_v29  ;;  %v3242_v26 = vpop.f32.mrb[199].mxu0  ;;  %v3515_v32 = vpop.f32.mrb[199].mxu1  ;;  %v11753_v25 = vld [vmem:[%s16378_s1 + $0x154] ss:$8 sps:$4 sm:$0xff]  }
 0x4f3   :  { %v5400_v63 = vmax.f32 %v4524_v16, %v4525_v28  ;;  %v5484_v6 = vmax.f32 %v4526_v19, %v4527_v42  ;;  %v4549_v49 = vmax.f32 %v3232_v24, %v3242_v26  ;;  %v4551_v4 = vmax.f32 %v3505_v54, %v3515_v32  ;;  %v11755_v26 = vld [vmem:[%s16378_s1 + $0x164] ss:$8 sps:$4 sm:$0xff]  }
 0x4f4   :  { %3811 = vmatmul.mubr.bf16.gmra.mrb[48].mxu0 %v11752_v33  ;;  %4084 = vmatmul.mubr.bf16.gmra.mrb[48].mxu1 %v11752_v33 }
 0x4f5   :  { %v5424_v39 = vadd.f32 %v5400_v63, %v12711_v38  ;;  %v5508_v30 = vadd.f32 %v5484_v6, %v12711_v38  ;;  %v5401_v35 = vmax.f32 %v4548_v56, %v4549_v49  ;;  %v5485_v7 = vmax.f32 %v4550_v11, %v4551_v4  ;;  %10221 = vmatprep.mubr.msk.bf16.mxu0 %vm775_vm1, %v11753_v25  ;;  %v11754_v11 = vld [vmem:[%s16378_s1 + $0x150] ss:$8 sps:$4 sm:$0xff]  }
 0x4f6   :  { %10250 = vmatprep.mubr.msk.bf16.mxu1 %vm775_vm1, %v11753_v25 }
 0x4f7   :  { %v5425_v2 = vadd.f32 %v5401_v35, %v12726_v27  ;;  %v5509_v24 = vadd.f32 %v5485_v7, %v12726_v27  ;;  %v3246_v54 = vpop.f32.mrb[200].mxu0  ;;  %v3519_v61 = vpop.f32.mrb[200].mxu1  ;;  %v5448_v19 = vmax.f32 %v5424_v39, 0.0  ;;  %v5532_v43 = vmax.f32 %v5508_v30, 0.0 }
 0x4f8   :  { %v3248_v47 = vpop.f32.mrb[201].mxu0  ;;  %v3521_v16 = vpop.f32.mrb[201].mxu1 }
 0x4f9   :  { %v5449_v49 = vmax.f32 %v5425_v2, 0.0  ;;  %v5533_v4 = vmax.f32 %v5509_v24, 0.0  ;;  %v3250_v23 = vpop.f32.mrb[202].mxu0  ;;  %v3523_v28 = vpop.f32.mrb[202].mxu1 }
 0x4fa   :  { %v3252_v42 = vpop.f32.mrb[203].mxu0  ;;  %v3525_v15 = vpop.f32.mrb[203].mxu1 }
 0x4fb   :  { %v14475_v29 = vpack.c.bf16 %v5449_v49, %v5448_v19  ;;  %v14477_v56 = vpack.c.bf16 %v5533_v4, %v5532_v43 }
 0x4fc   :  { %3821 = vmatmul.mubr.bf16.gmra.mrb[52].mxu0 %v11754_v11  ;;  %4094 = vmatmul.mubr.bf16.gmra.mrb[52].mxu1 %v11754_v11 }
 0x4fd   :  { %16833 = vst [vmem:[#allocation24_spill] sm:$0xff] %v14475_v29  ;;  %16834 = vst [vmem:[#allocation40_spill] sm:$0xff] %v14477_v56  ;;  %10222 = vmatprep.mubr.msk.bf16.mxu0 %vm775_vm1, %v11755_v26  ;;  %10251 = vmatprep.mubr.msk.bf16.mxu1 %vm775_vm1, %v11755_v26  ;;  %v11756_v26 = vld [vmem:[%s16378_s1 + $0x160] ss:$8 sps:$4 sm:$0xff]  }
 0x4ff   :  { %v3256_v32 = vpop.f32.mrb[204].mxu0  ;;  %v3529_v63 = vpop.f32.mrb[204].mxu1 }
 0x500   :  { %v4572_v6 = vmax.f32 %v3246_v54, %v3256_v32  ;;  %v4574_v33 = vmax.f32 %v3519_v61, %v3529_v63  ;;  %v3258_v39 = vpop.f32.mrb[205].mxu0  ;;  %v3531_v30 = vpop.f32.mrb[205].mxu1 }
 0x501   :  { %v4573_v35 = vmax.f32 %v3248_v47, %v3258_v39  ;;  %v4575_v7 = vmax.f32 %v3521_v16, %v3531_v30  ;;  %v3260_v25 = vpop.f32.mrb[206].mxu0  ;;  %v3533_v2 = vpop.f32.mrb[206].mxu1 }
 0x502   :  { %v4596_v24 = vmax.f32 %v3250_v23, %v3260_v25  ;;  %v4598_v19 = vmax.f32 %v3523_v28, %v3533_v2  ;;  %v3262_v43 = vpop.f32.mrb[207].mxu0  ;;  %v3535_v49 = vpop.f32.mrb[207].mxu1  ;;  %v11757_v23 = vld [vmem:[%s16378_s1 + $0x174] ss:$8 sps:$4 sm:$0xff]   ;;  %v5720_v28 = vld [vmem:[%s16380_s3] sm:$0xff] }
 0x503   :  { %v5402_v4 = vmax.f32 %v4572_v6, %v4573_v35  ;;  %v5486_v11 = vmax.f32 %v4574_v33, %v4575_v7  ;;  %v4597_v56 = vmax.f32 %v3252_v42, %v3262_v43  ;;  %v4599_v29 = vmax.f32 %v3525_v15, %v3535_v49  ;;  %v5724_v42 = vld [vmem:[%s16380_s3 + $0x20] sm:$0xff] }
 0x504   :  { %3831 = vmatmul.mubr.bf16.gmra.mrb[56].mxu0 %v11756_v26  ;;  %4104 = vmatmul.mubr.bf16.gmra.mrb[56].mxu1 %v11756_v26  ;;  %v14505_v33 = vcombine.high %v5720_v28, %v5724_v42 }
 0x505   :  { %v5426_v54 = vadd.f32 %v5402_v4, %v12711_v38  ;;  %v5510_v61 = vadd.f32 %v5486_v11, %v12711_v38  ;;  %v5403_v47 = vmax.f32 %v4596_v24, %v4597_v56  ;;  %v5487_v16 = vmax.f32 %v4598_v19, %v4599_v29  ;;  %10223 = vmatprep.mubr.msk.bf16.mxu0 %vm775_vm1, %v11757_v23  ;;  %v11758_v4 = vld [vmem:[%s16378_s1 + $0x170] ss:$8 sps:$4 sm:$0xff]  }
 0x506   :  { %10252 = vmatprep.mubr.msk.bf16.mxu1 %vm775_vm1, %v11757_v23  ;;  %16835 = vst [vmem:[#allocation41_spill] sm:$0xff] %v14505_v33 }
 0x507   :  { %v5427_v15 = vadd.f32 %v5403_v47, %v12726_v27  ;;  %v5511_v29 = vadd.f32 %v5487_v16, %v12726_v27  ;;  %v3266_v56 = vpop.f32.mrb[208].mxu0  ;;  %v3539_v32 = vpop.f32.mrb[208].mxu1  ;;  %v5450_v39 = vmax.f32 %v5426_v54, 0.0  ;;  %v5534_v30 = vmax.f32 %v5510_v61, 0.0  ;;  %v5728_v54 = vld [vmem:[%s16380_s3 + $0x40] sm:$0xff] }
 0x508   :  { %v3268_v63 = vpop.f32.mrb[209].mxu0  ;;  %v3541_v6 = vpop.f32.mrb[209].mxu1  ;;  %v5732_v61 = vld [vmem:[%s16380_s3 + $0x60] sm:$0xff] }
 0x509   :  { %v5451_v35 = vmax.f32 %v5427_v15, 0.0  ;;  %v5535_v7 = vmax.f32 %v5511_v29, 0.0  ;;  %v3270_v25 = vpop.f32.mrb[210].mxu0  ;;  %v3543_v2 = vpop.f32.mrb[210].mxu1  ;;  %v14522_v29 = vcombine.low %v5720_v28, %v5724_v42  ;;  %v14524_v10 = vcombine.high %v5728_v54, %v5732_v61 }
 0x50a   :  { %v3272_v24 = vpop.f32.mrb[211].mxu0  ;;  %v3545_v19 = vpop.f32.mrb[211].mxu1 }
 0x50b   :  { %v14507_v43 = vpack.c.bf16 %v5451_v35, %v5450_v39  ;;  %v14509_v49 = vpack.c.bf16 %v5535_v7, %v5534_v30  ;;  %16838 = vst [vmem:[#allocation90_spill] sm:$0xff] %v14522_v29  ;;  %16839 = vst [vmem:[#allocation91_spill] sm:$0xff] %v14524_v10 }
 0x50c   :  { %3841 = vmatmul.mubr.bf16.gmra.mrb[60].mxu0 %v11758_v4  ;;  %4114 = vmatmul.mubr.bf16.gmra.mrb[60].mxu1 %v11758_v4 }
 0x50d   :  { %16836 = vst [vmem:[#allocation43_spill] sm:$0xff] %v14507_v43  ;;  %16837 = vst [vmem:[#allocation89_spill] sm:$0xff] %v14509_v49  ;;  %6353 = vmatprep.mubr.bf16.mxu0 %v14505_v33  ;;  %6965 = vmatprep.mubr.bf16.mxu1 %v14505_v33 }
 0x50f   :  { %v3276_v11 = vpop.f32.mrb[212].mxu0  ;;  %v3549_v26 = vpop.f32.mrb[212].mxu1 }
 0x510   :  { %v4620_v47 = vmax.f32 %v3266_v56, %v3276_v11  ;;  %v4622_v16 = vmax.f32 %v3539_v32, %v3549_v26  ;;  %v3278_v23 = vpop.f32.mrb[213].mxu0  ;;  %v3551_v15 = vpop.f32.mrb[213].mxu1 }
 0x511   :  { %v4621_v39 = vmax.f32 %v3268_v63, %v3278_v23  ;;  %v4623_v30 = vmax.f32 %v3541_v6, %v3551_v15  ;;  %v3280_v35 = vpop.f32.mrb[214].mxu0  ;;  %v3553_v7 = vpop.f32.mrb[214].mxu1  ;;  %v5736_v63 = vld [vmem:[%s16380_s3 + $0x80] sm:$0xff] }
 0x512   :  { %v4644_v4 = vmax.f32 %v3270_v25, %v3280_v35  ;;  %v4646_v49 = vmax.f32 %v3543_v2, %v3553_v7  ;;  %v3282_v43 = vpop.f32.mrb[215].mxu0  ;;  %v3555_v33 = vpop.f32.mrb[215].mxu1  ;;  %v5740_v6 = vld [vmem:[%s16380_s3 + $0xa0] sm:$0xff]  ;;  %v14543_v2 = vcombine.low %v5728_v54, %v5732_v61  ;;  %v16844_v61 = vld [vmem:[#allocation53_spill] sm:$0xff] }
 0x513   :  { %v5404_v31 = vmax.f32 %v4620_v47, %v4621_v39  ;;  %v5488_v22 = vmax.f32 %v4622_v16, %v4623_v30  ;;  %v4645_v17 = vmax.f32 %v3272_v24, %v3282_v43  ;;  %v4647_v14 = vmax.f32 %v3545_v19, %v3555_v33  ;;  %v5744_v35 = vld [vmem:[%s16380_s3 + $0xc0] sm:$0xff] }
 0x514   :  { %6354 = vmatmul.mubr.bf16.vlgmr.msra.gmra.mrb[64].mxu0 %v14522_v29  ;;  %6966 = vmatmul.mubr.bf16.vlgmr.msra.gmra.mrb[64].mxu1 %v14522_v29  ;;  %v14546_v24 = vcombine.high %v5736_v63, %v5740_v6 }
 0x515   :  { %v5428_v28 = vadd.f32 %v5404_v31, %v12711_v38  ;;  %v5512_v42 = vadd.f32 %v5488_v22, %v12711_v38  ;;  %v5405_v56 = vmax.f32 %v4644_v4, %v4645_v17  ;;  %v5489_v32 = vmax.f32 %v4646_v49, %v4647_v14  ;;  %6475 = vmatpush1.bf16.msra.mxu0 %v12841_v52  ;;  %v16840_v17 = vld [vmem:[#allocation51_spill] sm:$0xff] }
 0x516   :  { %7087 = vmatpush1.bf16.msra.mxu1 %v13231_v50  ;;  %6476 = vmatprep.subr.bf16.mxu0 %v13257_v41  ;;  %16841 = vst [vmem:[#allocation51_spill] sm:$0xff] %v14543_v2  ;;  %16842 = vst [vmem:[#allocation92_spill] sm:$0xff] %v14546_v24 }
 0x517   :  { %v5429_v31 = vadd.f32 %v5405_v56, %v12726_v27  ;;  %v5513_v22 = vadd.f32 %v5489_v32, %v12726_v27  ;;  %7088 = vmatprep.subr.bf16.mxu1 %v16840_v17  ;;  %v3286_v14 = vpop.f32.mrb[216].mxu0  ;;  %v3559_v52 = vpop.f32.mrb[216].mxu1  ;;  %6363 = vmatprep.mubr.bf16.mxu0 %v14524_v10  ;;  %v5452_v19 = vmax.f32 %v5428_v28, 0.0  ;;  %v5536_v43 = vmax.f32 %v5512_v42, 0.0 }
 0x518   :  { %v3288_v33 = vpop.f32.mrb[217].mxu0  ;;  %v3561_v25 = vpop.f32.mrb[217].mxu1  ;;  %6975 = vmatprep.mubr.bf16.mxu1 %v14524_v10  ;;  %v14570_v56 = vcombine.low %v5736_v63, %v5740_v6  ;;  %v16849_v63 = vld [vmem:[#allocation57_spill] sm:$0xff] }
 0x519   :  { %v5453_v49 = vmax.f32 %v5429_v31, 0.0  ;;  %v5537_v11 = vmax.f32 %v5513_v22, 0.0  ;;  %6477 = vmatpush1.bf16.msra.mxu0 %v12861_v46  ;;  %v3290_v26 = vpop.f32.mrb[218].mxu0  ;;  %v3563_v47 = vpop.f32.mrb[218].mxu1  ;;  %v16846_v46 = vld [vmem:[#allocation55_spill] sm:$0xff] }
 0x51a   :  { %7089 = vmatpush1.bf16.msra.mxu1 %v13255_v40  ;;  %6478 = vmatprep.subr.bf16.mxu0 %v13281_v48  ;;  %v3292_v16 = vpop.f32.mrb[219].mxu0  ;;  %v3565_v23 = vpop.f32.mrb[219].mxu1  ;;  %16847 = vst [vmem:[#allocation94_spill] sm:$0xff] %v14570_v56 }
 0x51b   :  { %v14551_v54 = vpack.c.bf16 %v5453_v49, %v5452_v19  ;;  %7090 = vmatprep.subr.bf16.mxu1 %v16844_v61  ;;  %v14554_v15 = vpack.c.bf16 %v5537_v11, %v5536_v43 }
 0x51c   :  { %6364 = vmatmul.mubr.bf16.gmra.mrb[68].mxu0 %v14543_v2  ;;  %6976 = vmatmul.mubr.bf16.gmra.mrb[68].mxu1 %v14543_v2 }
 0x51d   :  { %16843 = vst [vmem:[#allocation93_spill] sm:$0xff] %v14551_v54  ;;  %16845 = vst [vmem:[#allocation53_spill] sm:$0xff] %v14554_v15  ;;  %6479 = vmatpush1.bf16.msra.mxu0 %v12885_v8  ;;  %6373 = vmatprep.mubr.bf16.mxu0 %v14546_v24  ;;  %v5748_v8 = vld [vmem:[%s16380_s3 + $0xe0] sm:$0xff] }
 0x51e   :  { %7091 = vmatpush1.bf16.msra.mxu1 %v13279_v53  ;;  %6480 = vmatprep.subr.bf16.mxu0 %v16795_v58 }
 0x51f   :  { %7092 = vmatprep.subr.bf16.mxu1 %v16846_v46  ;;  %v3296_v39 = vpop.f32.mrb[220].mxu0  ;;  %v3569_v30 = vpop.f32.mrb[220].mxu1  ;;  %6985 = vmatprep.mubr.bf16.mxu1 %v14546_v24 }
 0x520   :  { %v4668_v7 = vmax.f32 %v3286_v14, %v3296_v39  ;;  %v4670_v4 = vmax.f32 %v3559_v52, %v3569_v30  ;;  %v3298_v28 = vpop.f32.mrb[221].mxu0  ;;  %v3571_v42 = vpop.f32.mrb[221].mxu1  ;;  %v14575_v14 = vcombine.high %v5744_v35, %v5748_v8  ;;  %v5752_v30 = vld [vmem:[%s16380_s3 + $0x100] sm:$0xff] }
 0x521   :  { %v4669_v32 = vmax.f32 %v3288_v33, %v3298_v28  ;;  %v4671_v31 = vmax.f32 %v3561_v25, %v3571_v42  ;;  %6481 = vmatpush1.bf16.msra.mxu0 %v16792_v57  ;;  %v3300_v22 = vpop.f32.mrb[222].mxu0  ;;  %v3573_v19 = vpop.f32.mrb[222].mxu1 }
 0x522   :  { %7093 = vmatpush1.bf16.msra.mxu1 %v16793_v36  ;;  %v4692_v43 = vmax.f32 %v3290_v26, %v3300_v22  ;;  %v4694_v49 = vmax.f32 %v3563_v47, %v3573_v19  ;;  %6482 = vmatprep.subr.bf16.mxu0 %v16799_v1  ;;  %v3302_v11 = vpop.f32.mrb[223].mxu0  ;;  %v3575_v15 = vpop.f32.mrb[223].mxu1  ;;  %16848 = vst [vmem:[#allocation95_spill] sm:$0xff] %v14575_v14 }
 0x523   :  { %v5406_v52 = vmax.f32 %v4668_v7, %v4669_v32  ;;  %v5490_v39 = vmax.f32 %v4670_v4, %v4671_v31  ;;  %7094 = vmatprep.subr.bf16.mxu1 %v16849_v63  ;;  %v4693_v6 = vmax.f32 %v3292_v16, %v3302_v11  ;;  %v4695_v33 = vmax.f32 %v3565_v23, %v3575_v15  ;;  %v5756_v16 = vld [vmem:[%s16380_s3 + $0x120] sm:$0xff]  ;;  %v16850_v7 = vld [vmem:[#allocation59_spill] sm:$0xff] }
 0x524   :  { %6374 = vmatmul.mubr.bf16.gmra.mrb[72].mxu0 %v14570_v56  ;;  %6986 = vmatmul.mubr.bf16.gmra.mrb[72].mxu1 %v14570_v56  ;;  %v14595_v32 = vcombine.low %v5744_v35, %v5748_v8  ;;  %v14598_v31 = vcombine.high %v5752_v30, %v5756_v16  ;;  %v16854_v8 = vld [vmem:[#allocation61_spill] sm:$0xff]  ;;  %v16872_v56 = vld [vmem:[#allocation47_spill] sm:$0xff] }
 0x525   :  { %v5430_v57 = vadd.f32 %v5406_v52, %v12711_v38  ;;  %v5514_v25 = vadd.f32 %v5490_v39, %v12711_v38  ;;  %v5407_v26 = vmax.f32 %v4692_v43, %v4693_v6  ;;  %v5491_v47 = vmax.f32 %v4694_v49, %v4695_v33  ;;  %6483 = vmatpush1.bf16.msra.mxu0 %v16796_v21 }
 0x526   :  { %7095 = vmatpush1.bf16.msra.mxu1 %v16797_v18  ;;  %6484 = vmatprep.subr.bf16.mxu0 %v16803_v0  ;;  %16851 = vst [vmem:[#allocation57_spill] sm:$0xff] %v14595_v32  ;;  %16852 = vst [vmem:[#allocation59_spill] sm:$0xff] %v14598_v31 }
 0x527   :  { %v5431_v23 = vadd.f32 %v5407_v26, %v12726_v27  ;;  %v5515_v15 = vadd.f32 %v5491_v47, %v12726_v27  ;;  %7096 = vmatprep.subr.bf16.mxu1 %v16850_v7  ;;  %v3612_v4 = vpop.f32.mrb[224].mxu0  ;;  %v3885_v21 = vpop.f32.mrb[224].mxu1  ;;  %6383 = vmatprep.mubr.bf16.mxu0 %v14575_v14  ;;  %v5454_v22 = vmax.f32 %v5430_v57, 0.0  ;;  %v5538_v19 = vmax.f32 %v5514_v25, 0.0  ;;  %v5760_v26 = vld [vmem:[%s16380_s3 + $0x140] sm:$0xff] }
 0x528   :  { %v3614_v28 = vpop.f32.mrb[225].mxu0  ;;  %v3887_v42 = vpop.f32.mrb[225].mxu1  ;;  %6995 = vmatprep.mubr.bf16.mxu1 %v14575_v14 }
 0x529   :  { %v5455_v43 = vmax.f32 %v5431_v23, 0.0  ;;  %v5539_v49 = vmax.f32 %v5515_v15, 0.0  ;;  %6485 = vmatpush1.bf16.msra.mxu0 %v16800_v51  ;;  %v3616_v11 = vpop.f32.mrb[226].mxu0  ;;  %v3889_v52 = vpop.f32.mrb[226].mxu1  ;;  %v16856_v51 = vld [vmem:[#allocation63_spill] sm:$0xff] }
 0x52a   :  { %7097 = vmatpush1.bf16.msra.mxu1 %v16801_v62  ;;  %6486 = vmatprep.subr.bf16.mxu0 %v16809_v3  ;;  %v3618_v39 = vpop.f32.mrb[227].mxu0  ;;  %v3891_v6 = vpop.f32.mrb[227].mxu1 }
 0x52b   :  { %v14603_v35 = vpack.c.bf16 %v5455_v43, %v5454_v22  ;;  %7098 = vmatprep.subr.bf16.mxu1 %v16854_v8  ;;  %v14606_v33 = vpack.c.bf16 %v5539_v49, %v5538_v19  ;;  %v14622_v19 = vcombine.low %v5752_v30, %v5756_v16  ;;  %v16859_v30 = vld [vmem:[#allocation42_spill] sm:$0xff] }
 0x52c   :  { %6384 = vmatmul.mubr.bf16.gmra.mrb[76].mxu0 %v14595_v32  ;;  %6996 = vmatmul.mubr.bf16.gmra.mrb[76].mxu1 %v14595_v32 }
 0x52d   :  { %16853 = vst [vmem:[#allocation96_spill] sm:$0xff] %v14603_v35  ;;  %16855 = vst [vmem:[#allocation97_spill] sm:$0xff] %v14606_v33  ;;  %6487 = vmatpush1.bf16.msra.mxu0 %v16804_v9  ;;  %6393 = vmatprep.mubr.bf16.mxu0 %v14598_v31  ;;  %v5764_v9 = vld [vmem:[%s16380_s3 + $0x160] sm:$0xff] }
 0x52e   :  { %7099 = vmatpush1.bf16.msra.mxu1 %v16805_v20  ;;  %6488 = vmatprep.subr.bf16.mxu0 %v16813_v59  ;;  %16857 = vst [vmem:[#allocation98_spill] sm:$0xff] %v14622_v19 }
 0x52f   :  { %7100 = vmatprep.subr.bf16.mxu1 %v16856_v51  ;;  %v3622_v57 = vpop.f32.mrb[228].mxu0  ;;  %v3895_v25 = vpop.f32.mrb[228].mxu1  ;;  %7005 = vmatprep.mubr.bf16.mxu1 %v14598_v31 }
 0x530   :  { %v4144_v47 = vmax.f32 %v3612_v4, %v3622_v57  ;;  %v4146_v23 = vmax.f32 %v3885_v21, %v3895_v25  ;;  %v3624_v15 = vpop.f32.mrb[229].mxu0  ;;  %v3897_v22 = vpop.f32.mrb[229].mxu1  ;;  %v14627_v4 = vcombine.high %v5760_v26, %v5764_v9  ;;  %v14647_v25 = vcombine.low %v5760_v26, %v5764_v9  ;;  %v16863_v26 = vld [vmem:[#allocation46_spill] sm:$0xff] }
 0x531   :  { %v4145_v43 = vmax.f32 %v3614_v28, %v3624_v15  ;;  %v4147_v49 = vmax.f32 %v3887_v42, %v3897_v22  ;;  %6489 = vmatpush1.bf16.msra.mxu0 %v16810_v60  ;;  %v3626_v33 = vpop.f32.mrb[230].mxu0  ;;  %v3899_v31 = vpop.f32.mrb[230].mxu1 }
 0x532   :  { %7101 = vmatpush1.bf16.msra.mxu1 %v16811_v34  ;;  %v4168_v35 = vmax.f32 %v3616_v11, %v3626_v33  ;;  %v4170_v32 = vmax.f32 %v3889_v52, %v3899_v31  ;;  %6490 = vmatprep.subr.bf16.mxu0 %v13120_v45  ;;  %v3628_v54 = vpop.f32.mrb[231].mxu0  ;;  %v3901_v14 = vpop.f32.mrb[231].mxu1  ;;  %16858 = vst [vmem:[#allocation99_spill] sm:$0xff] %v14627_v4  ;;  %v5768_v52 = vld [vmem:[%s16380_s3 + $0x180] sm:$0xff] }
 0x533   :  { %v5552_v21 = vmax.f32 %v4144_v47, %v4145_v43  ;;  %v5636_v57 = vmax.f32 %v4146_v23, %v4147_v49  ;;  %7102 = vmatprep.subr.bf16.mxu1 %v16859_v30  ;;  %v4169_v16 = vmax.f32 %v3618_v39, %v3628_v54  ;;  %v4171_v28 = vmax.f32 %v3891_v6, %v3901_v14  ;;  %v5772_v54 = vld [vmem:[%s16380_s3 + $0x1a0] sm:$0xff] }
 0x534   :  { %6394 = vmatmul.mubr.bf16.gmra.mrb[80].mxu0 %v14622_v19  ;;  %7006 = vmatmul.mubr.bf16.gmra.mrb[80].mxu1 %v14622_v19  ;;  %v16860_v6 = vld [vmem:[#allocation44_spill] sm:$0xff]  ;;  %v14650_v47 = vcombine.high %v5768_v52, %v5772_v54 }
 0x535   :  { %v5576_v60 = vadd.f32 %v5552_v21, %v12711_v38  ;;  %v5660_v42 = vadd.f32 %v5636_v57, %v12711_v38  ;;  %v5553_v31 = vmax.f32 %v4168_v35, %v4169_v16  ;;  %v5637_v11 = vmax.f32 %v4170_v32, %v4171_v28  ;;  %6491 = vmatpush1.bf16.msra.mxu0 %v13122_v55 }
 0x536   :  { %7103 = vmatpush1.bf16.msra.mxu1 %v16814_v13  ;;  %6492 = vmatprep.subr.bf16.mxu0 %v13151_v44  ;;  %16861 = vst [vmem:[#allocation44_spill] sm:$0xff] %v14647_v25  ;;  %16862 = vst [vmem:[#allocation100_spill] sm:$0xff] %v14650_v47 }
 0x537   :  { %v5577_v14 = vadd.f32 %v5553_v31, %v12726_v27  ;;  %v5661_v39 = vadd.f32 %v5637_v11, %v12726_v27  ;;  %7104 = vmatprep.subr.bf16.mxu1 %v16860_v6  ;;  %v3632_v32 = vpop.f32.mrb[232].mxu0  ;;  %v3905_v55 = vpop.f32.mrb[232].mxu1  ;;  %6403 = vmatprep.mubr.bf16.mxu0 %v14627_v4  ;;  %v5600_v23 = vmax.f32 %v5576_v60, 0.0  ;;  %v5684_v15 = vmax.f32 %v5660_v42, 0.0  ;;  %v16866_v60 = vld [vmem:[#allocation26_spill] sm:$0xff]  ;;  %v16868_v42 = vld [vmem:[#allocation27_spill] sm:$0xff] }
 0x538   :  { %v3634_v35 = vpop.f32.mrb[233].mxu0  ;;  %v3907_v33 = vpop.f32.mrb[233].mxu1  ;;  %7015 = vmatprep.mubr.bf16.mxu1 %v14627_v4  ;;  %v16869_v31 = vld [vmem:[#allocation48_spill] sm:$0xff] }
 0x539   :  { %v5601_v22 = vmax.f32 %v5577_v14, 0.0  ;;  %v5685_v43 = vmax.f32 %v5661_v39, 0.0  ;;  %6493 = vmatpush1.bf16.msra.mxu0 %v13153_v12  ;;  %v3636_v49 = vpop.f32.mrb[234].mxu0  ;;  %v3909_v21 = vpop.f32.mrb[234].mxu1  ;;  %v16867_v12 = vld [vmem:[#allocation45_spill] sm:$0xff]  ;;  %v5776_v39 = vld [vmem:[%s16380_s3 + $0x1c0] sm:$0xff] }
 0x53a   :  { %7105 = vmatpush1.bf16.msra.mxu1 %v16815_v37  ;;  %6494 = vmatprep.subr.bf16.mxu0 %v13183_v5  ;;  %v3638_v57 = vpop.f32.mrb[235].mxu0  ;;  %v3911_v16 = vpop.f32.mrb[235].mxu1  ;;  %v16871_v4 = vld [vmem:[#allocation28_spill] sm:$0xff] }
 0x53b   :  { %7106 = vmatprep.subr.bf16.mxu1 %v16863_v26  ;;  %v14656_v9 = vpack.c.bf16 %v5601_v22, %v5600_v23  ;;  %v14658_v28 = vpack.c.bf16 %v5685_v43, %v5684_v15  ;;  %v5780_v23 = vld [vmem:[%s16380_s3 + $0x1e0] sm:$0xff] }
 0x53c   :  { %6404 = vmatmul.mubr.bf16.gmra.mrb[84].mxu0 %v14647_v25  ;;  %7016 = vmatmul.mubr.bf16.gmra.mrb[84].mxu1 %v14647_v25 }
 0x53d   :  { %16864 = vst [vmem:[#allocation46_spill] sm:$0xff] %v14656_v9  ;;  %16865 = vst [vmem:[#allocation101_spill] sm:$0xff] %v14658_v28  ;;  %6495 = vmatpush1.bf16.msra.mxu0 %v16866_v60  ;;  %6413 = vmatprep.mubr.bf16.mxu0 %v14650_v47  ;;  %v14674_v28 = vcombine.low %v5768_v52, %v5772_v54  ;;  %v16874_v52 = vld [vmem:[#allocation50_spill] sm:$0xff] }
 0x53e   :  { %7107 = vmatpush1.bf16.msra.mxu1 %v16867_v12  ;;  %6496 = vmatprep.subr.bf16.mxu0 %v16868_v42 }
 0x53f   :  { %7108 = vmatprep.subr.bf16.mxu1 %v16869_v31  ;;  %v3642_v11 = vpop.f32.mrb[236].mxu0  ;;  %v3915_v14 = vpop.f32.mrb[236].mxu1  ;;  %7025 = vmatprep.mubr.bf16.mxu1 %v14650_v47  ;;  %16870 = vst [vmem:[#allocation26_spill] sm:$0xff] %v14674_v28 }
 0x540   :  { %v4192_v15 = vmax.f32 %v3632_v32, %v3642_v11  ;;  %v4194_v22 = vmax.f32 %v3905_v55, %v3915_v14  ;;  %v3644_v43 = vpop.f32.mrb[237].mxu0  ;;  %v3917_v60 = vpop.f32.mrb[237].mxu1  ;;  %v14679_v32 = vcombine.high %v5776_v39, %v5780_v23 }
 0x541   :  { %v4193_v9 = vmax.f32 %v3634_v35, %v3644_v43  ;;  %v4195_v25 = vmax.f32 %v3907_v33, %v3917_v60  ;;  %6497 = vmatpush1.bf16.msra.mxu0 %v16871_v4  ;;  %v3646_v19 = vpop.f32.mrb[238].mxu0  ;;  %v3919_v47 = vpop.f32.mrb[238].mxu1 }
 0x542   :  { %7109 = vmatpush1.bf16.msra.mxu1 %v16872_v56  ;;  %v4216_v24 = vmax.f32 %v3636_v49, %v3646_v19  ;;  %v4218_v2 = vmax.f32 %v3909_v21, %v3919_v47  ;;  %6498 = vmatprep.subr.bf16.mxu0 %v13231_v50  ;;  %v3648_v10 = vpop.f32.mrb[239].mxu0  ;;  %v3921_v29 = vpop.f32.mrb[239].mxu1  ;;  %16873 = vst [vmem:[#allocation45_spill] sm:$0xff] %v14679_v32  ;;  %v16875_v49 = vld [vmem:[#allocation29_spill] sm:$0xff] }
 0x543   :  { %v5554_v55 = vmax.f32 %v4192_v15, %v4193_v9  ;;  %v5638_v11 = vmax.f32 %v4194_v22, %v4195_v25  ;;  %7110 = vmatprep.subr.bf16.mxu1 %v16874_v52  ;;  %v4217_v54 = vmax.f32 %v3638_v57, %v3648_v10  ;;  %v4219_v35 = vmax.f32 %v3911_v16, %v3921_v29  ;;  %v5784_v25 = vld [vmem:[%s16380_s3 + $0x200] sm:$0xff]  ;;  %v16876_v29 = vld [vmem:[#allocation49_spill] sm:$0xff] }
 0x544   :  { %6414 = vmatmul.mubr.bf16.gmra.mrb[88].mxu0 %v14674_v28  ;;  %7026 = vmatmul.mubr.bf16.gmra.mrb[88].mxu1 %v14674_v28  ;;  %v5788_v10 = vld [vmem:[%s16380_s3 + $0x220] sm:$0xff]  ;;  %v14699_v15 = vcombine.low %v5776_v39, %v5780_v23  ;;  %v16880_v39 = vld [vmem:[#allocation54_spill] sm:$0xff] }
 0x545   :  { %v5578_v4 = vadd.f32 %v5554_v55, %v12711_v38  ;;  %v5662_v19 = vadd.f32 %v5638_v11, %v12711_v38  ;;  %v5555_v33 = vmax.f32 %v4216_v24, %v4217_v54  ;;  %v5639_v47 = vmax.f32 %v4218_v2, %v4219_v35  ;;  %6499 = vmatpush1.bf16.msra.mxu0 %v16875_v49  ;;  %v16877_v24 = vld [vmem:[#allocation52_spill] sm:$0xff] }
 0x546   :  { %7111 = vmatpush1.bf16.msra.mxu1 %v16876_v29  ;;  %6500 = vmatprep.subr.bf16.mxu0 %v13255_v40  ;;  %16878 = vst [vmem:[#allocation27_spill] sm:$0xff] %v14699_v15  ;;  %v14702_v22 = vcombine.high %v5784_v25, %v5788_v10 }
 0x547   :  { %v5579_v21 = vadd.f32 %v5555_v33, %v12726_v27  ;;  %v5663_v57 = vadd.f32 %v5639_v47, %v12726_v27  ;;  %7112 = vmatprep.subr.bf16.mxu1 %v16877_v24  ;;  %v3652_v2 = vpop.f32.mrb[240].mxu0  ;;  %v3925_v16 = vpop.f32.mrb[240].mxu1  ;;  %6423 = vmatprep.mubr.bf16.mxu0 %v14679_v32  ;;  %v5602_v43 = vmax.f32 %v5578_v4, 0.0  ;;  %v5686_v60 = vmax.f32 %v5662_v19, 0.0  ;;  %v5796_v4 = vld [vmem:[%s16380_s3 + $0x260] sm:$0xff] }
 0x548   :  { %v3654_v9 = vpop.f32.mrb[241].mxu0  ;;  %v3927_v14 = vpop.f32.mrb[241].mxu1  ;;  %7035 = vmatprep.mubr.bf16.mxu1 %v14679_v32  ;;  %16879 = vst [vmem:[#allocation48_spill] sm:$0xff] %v14702_v22  ;;  %v16883_v19 = vld [vmem:[#allocation56_spill] sm:$0xff] }
 0x549   :  { %v5603_v55 = vmax.f32 %v5579_v21, 0.0  ;;  %v5687_v11 = vmax.f32 %v5663_v57, 0.0  ;;  %6501 = vmatpush1.bf16.msra.mxu0 %v13257_v41  ;;  %v3656_v54 = vpop.f32.mrb[242].mxu0  ;;  %v3929_v35 = vpop.f32.mrb[242].mxu1  ;;  %v5792_v41 = vld [vmem:[%s16380_s3 + $0x240] sm:$0xff] }
 0x54a   :  { %7113 = vmatpush1.bf16.msra.mxu1 %v16840_v17  ;;  %6502 = vmatprep.subr.bf16.mxu0 %v13279_v53  ;;  %v3658_v33 = vpop.f32.mrb[243].mxu0  ;;  %v3931_v47 = vpop.f32.mrb[243].mxu1  ;;  %v14729_v28 = vcombine.high %v5792_v41, %v5796_v4 }
 0x54b   :  { %7114 = vmatprep.subr.bf16.mxu1 %v16880_v39  ;;  %v14708_v23 = vpack.c.bf16 %v5603_v55, %v5602_v43  ;;  %v14710_v49 = vpack.c.bf16 %v5687_v11, %v5686_v60  ;;  %v14726_v11 = vcombine.low %v5784_v25, %v5788_v10  ;;  %v16886_v25 = vld [vmem:[#allocation58_spill] sm:$0xff] }
 0x54c   :  { %6424 = vmatmul.mubr.bf16.gmra.mrb[92].mxu0 %v14699_v15  ;;  %7036 = vmatmul.mubr.bf16.gmra.mrb[92].mxu1 %v14699_v15  ;;  %16885 = vst [vmem:[#allocation29_spill] sm:$0xff] %v14729_v28 }
 0x54d   :  { %16881 = vst [vmem:[#allocation28_spill] sm:$0xff] %v14708_v23  ;;  %16882 = vst [vmem:[#allocation47_spill] sm:$0xff] %v14710_v49  ;;  %6503 = vmatpush1.bf16.msra.mxu0 %v13281_v48  ;;  %6433 = vmatprep.mubr.bf16.mxu0 %v14702_v22 }
 0x54e   :  { %7115 = vmatpush1.bf16.msra.mxu1 %v16844_v61  ;;  %6504 = vmatprep.subr.bf16.mxu0 %v16793_v36  ;;  %16884 = vst [vmem:[#allocation50_spill] sm:$0xff] %v14726_v11 }
 0x54f   :  { %7116 = vmatprep.subr.bf16.mxu1 %v16883_v19  ;;  %v3662_v21 = vpop.f32.mrb[244].mxu0  ;;  %v3935_v57 = vpop.f32.mrb[244].mxu1  ;;  %7045 = vmatprep.mubr.bf16.mxu1 %v14702_v22 }
 0x550   :  { %v4240_v48 = vmax.f32 %v3652_v2, %v3662_v21  ;;  %v4242_v43 = vmax.f32 %v3925_v16, %v3935_v57  ;;  %v3664_v60 = vpop.f32.mrb[245].mxu0  ;;  %v3937_v55 = vpop.f32.mrb[245].mxu1 }
 0x551   :  { %v4241_v49 = vmax.f32 %v3654_v9, %v3664_v60  ;;  %v4243_v23 = vmax.f32 %v3927_v14, %v3937_v55  ;;  %6505 = vmatpush1.bf16.msra.mxu0 %v16795_v58  ;;  %v3666_v15 = vpop.f32.mrb[246].mxu0  ;;  %v3939_v32 = vpop.f32.mrb[246].mxu1 }
 0x552   :  { %7117 = vmatpush1.bf16.msra.mxu1 %v16846_v46  ;;  %v4264_v19 = vmax.f32 %v3656_v54, %v3666_v15  ;;  %v4266_v36 = vmax.f32 %v3929_v35, %v3939_v32  ;;  %6627 = vmatprep.subr.bf16.mxu0 %v16797_v18  ;;  %v3668_v2 = vpop.f32.mrb[247].mxu0  ;;  %v3941_v16 = vpop.f32.mrb[247].mxu1  ;;  %v5800_v54 = vld [vmem:[%s16380_s3 + $0x280] sm:$0xff] }
 0x553   :  { %v5556_v21 = vmax.f32 %v4240_v48, %v4241_v49  ;;  %v5640_v57 = vmax.f32 %v4242_v43, %v4243_v23  ;;  %7239 = vmatprep.subr.bf16.mxu1 %v16886_v25  ;;  %v4265_v10 = vmax.f32 %v3658_v33, %v3668_v2  ;;  %v4267_v9 = vmax.f32 %v3931_v47, %v3941_v16  ;;  %v5804_v35 = vld [vmem:[%s16380_s3 + $0x2a0] sm:$0xff] }
 0x554   :  { %6434 = vmatmul.mubr.bf16.gmra.mrb[96].mxu0 %v14726_v11  ;;  %7046 = vmatmul.mubr.bf16.gmra.mrb[96].mxu1 %v14726_v11  ;;  %v14748_v48 = vcombine.low %v5792_v41, %v5796_v4  ;;  %v14750_v43 = vcombine.high %v5800_v54, %v5804_v35  ;;  %v5808_v41 = vld [vmem:[%s16380_s3 + $0x2c0] sm:$0xff] }
 0x555   :  { %v5580_v58 = vadd.f32 %v5556_v21, %v12711_v38  ;;  %v5664_v14 = vadd.f32 %v5640_v57, %v12711_v38  ;;  %v5557_v15 = vmax.f32 %v4264_v19, %v4265_v10  ;;  %v5641_v32 = vmax.f32 %v4266_v36, %v4267_v9  ;;  %6443 = vmatprep.mubr.bf16.mxu0 %v14729_v28  ;;  %v5812_v4 = vld [vmem:[%s16380_s3 + $0x2e0] sm:$0xff] }
 0x556   :  { %7055 = vmatprep.mubr.bf16.mxu1 %v14729_v28  ;;  %16887 = vst [vmem:[#allocation49_spill] sm:$0xff] %v14748_v48  ;;  %16888 = vst [vmem:[#allocation52_spill] sm:$0xff] %v14750_v43 }
 0x557   :  { %v5581_v33 = vadd.f32 %v5557_v15, %v12726_v27  ;;  %v5665_v47 = vadd.f32 %v5641_v32, %v12726_v27  ;;  %v3672_v23 = vpop.f32.mrb[248].mxu0  ;;  %v3945_v49 = vpop.f32.mrb[248].mxu1  ;;  %v5604_v60 = vmax.f32 %v5580_v58, 0.0  ;;  %v5688_v55 = vmax.f32 %v5664_v14, 0.0 }
 0x558   :  { %v3674_v19 = vpop.f32.mrb[249].mxu0  ;;  %v3947_v36 = vpop.f32.mrb[249].mxu1 }
 0x559   :  { %v5605_v2 = vmax.f32 %v5581_v33, 0.0  ;;  %v5689_v16 = vmax.f32 %v5665_v47, 0.0  ;;  %v3676_v21 = vpop.f32.mrb[250].mxu0  ;;  %v3949_v57 = vpop.f32.mrb[250].mxu1 }
 0x55a   :  { %v3678_v10 = vpop.f32.mrb[251].mxu0  ;;  %v3951_v9 = vpop.f32.mrb[251].mxu1 }
 0x55b   :  { %v14752_v28 = vpack.c.bf16 %v5605_v2, %v5604_v60  ;;  %v14754_v15 = vpack.c.bf16 %v5689_v16, %v5688_v55  ;;  %v14766_v55 = vcombine.low %v5800_v54, %v5804_v35 }
 0x55c   :  { %6444 = vmatmul.mubr.bf16.gmra.mrb[100].mxu0 %v14748_v48  ;;  %7056 = vmatmul.mubr.bf16.gmra.mrb[100].mxu1 %v14748_v48 }
 0x55d   :  { %16889 = vst [vmem:[#allocation102_spill] sm:$0xff] %v14752_v28  ;;  %16890 = vst [vmem:[#allocation103_spill] sm:$0xff] %v14754_v15  ;;  %6453 = vmatprep.mubr.bf16.mxu0 %v14750_v43  ;;  %7065 = vmatprep.mubr.bf16.mxu1 %v14750_v43  ;;  %v14768_v43 = vcombine.high %v5808_v41, %v5812_v4 }
 0x55e   :  { %16891 = vst [vmem:[#allocation104_spill] sm:$0xff] %v14766_v55 }
 0x55f   :  { %v3682_v58 = vpop.f32.mrb[252].mxu0  ;;  %v3955_v14 = vpop.f32.mrb[252].mxu1  ;;  %16892 = vst [vmem:[#allocation105_spill] sm:$0xff] %v14768_v43 }
 0x560   :  { %v4288_v32 = vmax.f32 %v3672_v23, %v3682_v58  ;;  %v4290_v33 = vmax.f32 %v3945_v49, %v3955_v14  ;;  %v3684_v47 = vpop.f32.mrb[253].mxu0  ;;  %v3957_v60 = vpop.f32.mrb[253].mxu1 }
 0x561   :  { %v4289_v2 = vmax.f32 %v3674_v19, %v3684_v47  ;;  %v4291_v16 = vmax.f32 %v3947_v36, %v3957_v60  ;;  %v3686_v15 = vpop.f32.mrb[254].mxu0  ;;  %v3959_v28 = vpop.f32.mrb[254].mxu1  ;;  %v5729_v47 = vld [vmem:[%s16380_s3 + $0x48] sm:$0xff] }
 0x562   :  { %v4312_v48 = vmax.f32 %v3676_v21, %v3686_v15  ;;  %v4314_v11 = vmax.f32 %v3949_v57, %v3959_v28  ;;  %v3688_v22 = vpop.f32.mrb[255].mxu0  ;;  %v3961_v25 = vpop.f32.mrb[255].mxu1  ;;  %v5721_v28 = vld [vmem:[%s16380_s3 + $0x8] sm:$0xff] }
 0x563   :  { %v5558_v18 = vmax.f32 %v4288_v32, %v4289_v2  ;;  %v5642_v46 = vmax.f32 %v4290_v33, %v4291_v16  ;;  %v4313_v39 = vmax.f32 %v3678_v10, %v3688_v22  ;;  %v4315_v53 = vmax.f32 %v3951_v9, %v3961_v25  ;;  %v5725_v22 = vld [vmem:[%s16380_s3 + $0x28] sm:$0xff] }
 0x564   :  { %6454 = vmatmul.mubr.bf16.gmra.mrb[104].mxu0 %v14766_v55  ;;  %7066 = vmatmul.mubr.bf16.gmra.mrb[104].mxu1 %v14766_v55  ;;  %v14786_v36 = vcombine.high %v5721_v28, %v5725_v22  ;;  %v5733_v60 = vld [vmem:[%s16380_s3 + $0x68] sm:$0xff] }
 0x565   :  { %v5582_v54 = vadd.f32 %v5558_v18, %v12711_v38  ;;  %v5666_v35 = vadd.f32 %v5642_v46, %v12711_v38  ;;  %v5559_v23 = vmax.f32 %v4312_v48, %v4313_v39  ;;  %v5643_v49 = vmax.f32 %v4314_v11, %v4315_v53  ;;  %6463 = vmatprep.mubr.bf16.mxu0 %v14768_v43 }
 0x566   :  { %7075 = vmatprep.mubr.bf16.mxu1 %v14768_v43  ;;  %v14784_v11 = vcombine.low %v5808_v41, %v5812_v4  ;;  %16894 = vst [vmem:[#allocation107_spill] sm:$0xff] %v14786_v36 }
 0x567   :  { %v5583_v25 = vadd.f32 %v5559_v23, %v12726_v27  ;;  %v5667_v18 = vadd.f32 %v5643_v49, %v12726_v27  ;;  %v3692_v19 = vpop.f32.mrb[0].mxu0  ;;  %v3965_v46 = vpop.f32.mrb[0].mxu1  ;;  %v5606_v48 = vmax.f32 %v5582_v54, 0.0  ;;  %v5690_v21 = vmax.f32 %v5666_v35, 0.0 }
 0x568   :  { %v3694_v39 = vpop.f32.mrb[1].mxu0  ;;  %v3967_v53 = vpop.f32.mrb[1].mxu1  ;;  %16893 = vst [vmem:[#allocation106_spill] sm:$0xff] %v14784_v11  ;;  %v14802_v23 = vcombine.low %v5721_v28, %v5725_v22 }
 0x569   :  { %v5607_v57 = vmax.f32 %v5583_v25, 0.0  ;;  %v5691_v10 = vmax.f32 %v5667_v18, 0.0  ;;  %v3696_v9 = vpop.f32.mrb[2].mxu0  ;;  %v3969_v15 = vpop.f32.mrb[2].mxu1 }
 0x56a   :  { %v3698_v58 = vpop.f32.mrb[3].mxu0  ;;  %v3971_v14 = vpop.f32.mrb[3].mxu1  ;;  %16897 = vst [vmem:[#allocation110_spill] sm:$0xff] %v14802_v23 }
 0x56b   :  { %v14788_v32 = vpack.c.bf16 %v5607_v57, %v5606_v48  ;;  %v14790_v33 = vpack.c.bf16 %v5691_v10, %v5690_v21 }
 0x56c   :  { %6464 = vmatmul.mubr.bf16.gmra.mrb[108].mxu0 %v14784_v11  ;;  %7076 = vmatmul.mubr.bf16.gmra.mrb[108].mxu1 %v14784_v11 }
 0x56d   :  { %16895 = vst [vmem:[#allocation108_spill] sm:$0xff] %v14788_v32  ;;  %16896 = vst [vmem:[#allocation109_spill] sm:$0xff] %v14790_v33  ;;  %6506 = vmatprep.mubr.bf16.mxu0 %v14786_v36  ;;  %7118 = vmatprep.mubr.bf16.mxu1 %v14786_v36  ;;  %v14804_v32 = vcombine.high %v5729_v47, %v5733_v60 }
 0x56f   :  { %v3702_v41 = vpop.f32.mrb[4].mxu0  ;;  %v3975_v4 = vpop.f32.mrb[4].mxu1  ;;  %16898 = vst [vmem:[#allocation111_spill] sm:$0xff] %v14804_v32 }
 0x570   :  { %v4336_v2 = vmax.f32 %v3692_v19, %v3702_v41  ;;  %v4338_v16 = vmax.f32 %v3965_v46, %v3975_v4  ;;  %v3704_v54 = vpop.f32.mrb[5].mxu0  ;;  %v3977_v35 = vpop.f32.mrb[5].mxu1 }
 0x571   :  { %v4337_v49 = vmax.f32 %v3694_v39, %v3704_v54  ;;  %v4339_v25 = vmax.f32 %v3967_v53, %v3977_v35  ;;  %v3706_v18 = vpop.f32.mrb[6].mxu0  ;;  %v3979_v48 = vpop.f32.mrb[6].mxu1  ;;  %v5737_v39 = vld [vmem:[%s16380_s3 + $0x88] sm:$0xff] }
 0x572   :  { %v4360_v21 = vmax.f32 %v3696_v9, %v3706_v18  ;;  %v4362_v57 = vmax.f32 %v3969_v15, %v3979_v48  ;;  %v3708_v10 = vpop.f32.mrb[7].mxu0  ;;  %v3981_v33 = vpop.f32.mrb[7].mxu1  ;;  %v5741_v53 = vld [vmem:[%s16380_s3 + $0xa8] sm:$0xff] }
 0x573   :  { %v5560_v36 = vmax.f32 %v4336_v2, %v4337_v49  ;;  %v5644_v11 = vmax.f32 %v4338_v16, %v4339_v25  ;;  %v4361_v43 = vmax.f32 %v3698_v58, %v3708_v10  ;;  %v4363_v55 = vmax.f32 %v3971_v14, %v3981_v33 }
 0x574   :  { %6507 = vmatmul.mubr.bf16.vlgmr.msra.gmra.mrb[64].mxu0 %v14802_v23  ;;  %7119 = vmatmul.mubr.bf16.vlgmr.msra.gmra.mrb[64].mxu1 %v14802_v23  ;;  %v14823_v58 = vcombine.low %v5729_v47, %v5733_v60  ;;  %v14826_v14 = vcombine.high %v5737_v39, %v5741_v53  ;;  %v16902_v47 = vld [vmem:[#allocation62_spill] sm:$0xff] }
 0x575   :  { %v5584_v28 = vadd.f32 %v5560_v36, %v12711_v38  ;;  %v5668_v22 = vadd.f32 %v5644_v11, %v12711_v38  ;;  %v5561_v19 = vmax.f32 %v4360_v21, %v4361_v43  ;;  %v5645_v46 = vmax.f32 %v4362_v57, %v4363_v55  ;;  %6628 = vmatpush1.bf16.msra.mxu0 %v16799_v1  ;;  %v16899_v43 = vld [vmem:[#allocation60_spill] sm:$0xff]  ;;  %v5745_v21 = vld [vmem:[%s16380_s3 + $0xc8] sm:$0xff] }
 0x576   :  { %7240 = vmatpush1.bf16.msra.mxu1 %v16849_v63  ;;  %6629 = vmatprep.subr.bf16.mxu0 %v16801_v62  ;;  %16900 = vst [vmem:[#allocation60_spill] sm:$0xff] %v14823_v58  ;;  %16901 = vst [vmem:[#allocation112_spill] sm:$0xff] %v14826_v14 }
 0x577   :  { %v5585_v36 = vadd.f32 %v5561_v19, %v12726_v27  ;;  %v5669_v11 = vadd.f32 %v5645_v46, %v12726_v27  ;;  %7241 = vmatprep.subr.bf16.mxu1 %v16899_v43  ;;  %v3712_v55 = vpop.f32.mrb[8].mxu0  ;;  %v3985_v1 = vpop.f32.mrb[8].mxu1  ;;  %6516 = vmatprep.mubr.bf16.mxu0 %v14804_v32  ;;  %v5608_v33 = vmax.f32 %v5584_v28, 0.0  ;;  %v5692_v41 = vmax.f32 %v5668_v22, 0.0 }
 0x578   :  { %v3714_v9 = vpop.f32.mrb[9].mxu0  ;;  %v3987_v15 = vpop.f32.mrb[9].mxu1  ;;  %7128 = vmatprep.mubr.bf16.mxu1 %v14804_v32  ;;  %v14850_v19 = vcombine.low %v5737_v39, %v5741_v53  ;;  %v16908_v39 = vld [vmem:[#allocation65_spill] sm:$0xff] }
 0x579   :  { %v5609_v4 = vmax.f32 %v5585_v36, 0.0  ;;  %v5693_v2 = vmax.f32 %v5669_v11, 0.0  ;;  %6630 = vmatpush1.bf16.msra.mxu0 %v16803_v0  ;;  %v3716_v16 = vpop.f32.mrb[10].mxu0  ;;  %v3989_v54 = vpop.f32.mrb[10].mxu1  ;;  %v16905_v0 = vld [vmem:[#allocation64_spill] sm:$0xff] }
 0x57a   :  { %7242 = vmatpush1.bf16.msra.mxu1 %v16850_v7  ;;  %6631 = vmatprep.subr.bf16.mxu0 %v16805_v20  ;;  %v3718_v35 = vpop.f32.mrb[11].mxu0  ;;  %v3991_v49 = vpop.f32.mrb[11].mxu1  ;;  %16906 = vst [vmem:[#allocation114_spill] sm:$0xff] %v14850_v19 }
 0x57b   :  { %7243 = vmatprep.subr.bf16.mxu1 %v16902_v47  ;;  %v14832_v60 = vpack.c.bf16 %v5609_v4, %v5608_v33  ;;  %v14834_v25 = vpack.c.bf16 %v5693_v2, %v5692_v41 }
 0x57c   :  { %6517 = vmatmul.mubr.bf16.gmra.mrb[68].mxu0 %v14823_v58  ;;  %7129 = vmatmul.mubr.bf16.gmra.mrb[68].mxu1 %v14823_v58 }
 0x57d   :  { %16903 = vst [vmem:[#allocation62_spill] sm:$0xff] %v14832_v60  ;;  %16904 = vst [vmem:[#allocation113_spill] sm:$0xff] %v14834_v25  ;;  %6632 = vmatpush1.bf16.msra.mxu0 %v16809_v3  ;;  %6526 = vmatprep.mubr.bf16.mxu0 %v14826_v14  ;;  %v5749_v3 = vld [vmem:[%s16380_s3 + $0xe8] sm:$0xff] }
 0x57e   :  { %7244 = vmatpush1.bf16.msra.mxu1 %v16854_v8  ;;  %6633 = vmatprep.subr.bf16.mxu0 %v16811_v34 }
 0x57f   :  { %7245 = vmatprep.subr.bf16.mxu1 %v16905_v0  ;;  %v3722_v18 = vpop.f32.mrb[12].mxu0  ;;  %v3995_v48 = vpop.f32.mrb[12].mxu1  ;;  %7138 = vmatprep.mubr.bf16.mxu1 %v14826_v14 }
 0x580   :  { %v4384_v57 = vmax.f32 %v3712_v55, %v3722_v18  ;;  %v4386_v10 = vmax.f32 %v3985_v1, %v3995_v48  ;;  %v3724_v28 = vpop.f32.mrb[13].mxu0  ;;  %v3997_v22 = vpop.f32.mrb[13].mxu1  ;;  %v14855_v55 = vcombine.high %v5745_v21, %v5749_v3  ;;  %v5753_v48 = vld [vmem:[%s16380_s3 + $0x108] sm:$0xff] }
 0x581   :  { %v4385_v46 = vmax.f32 %v3714_v9, %v3724_v28  ;;  %v4387_v36 = vmax.f32 %v3987_v15, %v3997_v22  ;;  %6634 = vmatpush1.bf16.msra.mxu0 %v16813_v59  ;;  %v3726_v11 = vpop.f32.mrb[14].mxu0  ;;  %v3999_v33 = vpop.f32.mrb[14].mxu1 }
 0x582   :  { %7246 = vmatpush1.bf16.msra.mxu1 %v16856_v51  ;;  %v4408_v41 = vmax.f32 %v3716_v16, %v3726_v11  ;;  %v4410_v4 = vmax.f32 %v3989_v54, %v3999_v33  ;;  %6635 = vmatprep.subr.bf16.mxu0 %v16814_v13  ;;  %v3728_v2 = vpop.f32.mrb[15].mxu0  ;;  %v4001_v25 = vpop.f32.mrb[15].mxu1  ;;  %16907 = vst [vmem:[#allocation115_spill] sm:$0xff] %v14855_v55 }
 0x583   :  { %v5562_v1 = vmax.f32 %v4384_v57, %v4385_v46  ;;  %v5646_v18 = vmax.f32 %v4386_v10, %v4387_v36  ;;  %7247 = vmatprep.subr.bf16.mxu1 %v16908_v39  ;;  %v4409_v53 = vmax.f32 %v3718_v35, %v3728_v2  ;;  %v4411_v9 = vmax.f32 %v3991_v49, %v4001_v25  ;;  %v5757_v35 = vld [vmem:[%s16380_s3 + $0x128] sm:$0xff]  ;;  %v16909_v57 = vld [vmem:[#allocation67_spill] sm:$0xff] }
 0x584   :  { %6527 = vmatmul.mubr.bf16.gmra.mrb[72].mxu0 %v14850_v19  ;;  %7139 = vmatmul.mubr.bf16.gmra.mrb[72].mxu1 %v14850_v19  ;;  %v14875_v46 = vcombine.low %v5745_v21, %v5749_v3  ;;  %v14878_v36 = vcombine.high %v5753_v48, %v5757_v35  ;;  %v16912_v21 = vld [vmem:[#allocation69_spill] sm:$0xff]  ;;  %v16931_v19 = vld [vmem:[#allocation56_spill] sm:$0xff] }
 0x585   :  { %v5586_v59 = vadd.f32 %v5562_v1, %v12711_v38  ;;  %v5670_v15 = vadd.f32 %v5646_v18, %v12711_v38  ;;  %v5563_v16 = vmax.f32 %v4408_v41, %v4409_v53  ;;  %v5647_v54 = vmax.f32 %v4410_v4, %v4411_v9  ;;  %6636 = vmatpush1.bf16.msra.mxu0 %v13120_v45 }
 0x586   :  { %7248 = vmatpush1.bf16.msra.mxu1 %v16859_v30  ;;  %6637 = vmatprep.subr.bf16.mxu0 %v16815_v37  ;;  %16910 = vst [vmem:[#allocation65_spill] sm:$0xff] %v14875_v46  ;;  %16911 = vst [vmem:[#allocation67_spill] sm:$0xff] %v14878_v36 }
 0x587   :  { %v5587_v49 = vadd.f32 %v5563_v16, %v12726_v27  ;;  %v5671_v25 = vadd.f32 %v5647_v54, %v12726_v27  ;;  %7249 = vmatprep.subr.bf16.mxu1 %v16909_v57  ;;  %v3732_v10 = vpop.f32.mrb[16].mxu0  ;;  %v4005_v45 = vpop.f32.mrb[16].mxu1  ;;  %6536 = vmatprep.mubr.bf16.mxu0 %v14855_v55  ;;  %v5610_v11 = vmax.f32 %v5586_v59, 0.0  ;;  %v5694_v33 = vmax.f32 %v5670_v15, 0.0  ;;  %v5761_v16 = vld [vmem:[%s16380_s3 + $0x148] sm:$0xff] }
 0x588   :  { %v3734_v28 = vpop.f32.mrb[17].mxu0  ;;  %v4007_v22 = vpop.f32.mrb[17].mxu1  ;;  %7148 = vmatprep.mubr.bf16.mxu1 %v14855_v55 }
 0x589   :  { %v5611_v41 = vmax.f32 %v5587_v49, 0.0  ;;  %v5695_v4 = vmax.f32 %v5671_v25, 0.0  ;;  %6638 = vmatpush1.bf16.msra.mxu0 %v13151_v44  ;;  %v3736_v2 = vpop.f32.mrb[18].mxu0  ;;  %v4009_v1 = vpop.f32.mrb[18].mxu1  ;;  %v16915_v44 = vld [vmem:[#allocation71_spill] sm:$0xff] }
 0x58a   :  { %7250 = vmatpush1.bf16.msra.mxu1 %v16860_v6  ;;  %6639 = vmatprep.subr.bf16.mxu0 %v16867_v12  ;;  %v3738_v18 = vpop.f32.mrb[19].mxu0  ;;  %v4011_v53 = vpop.f32.mrb[19].mxu1 }
 0x58b   :  { %7251 = vmatprep.subr.bf16.mxu1 %v16912_v21  ;;  %v14884_v3 = vpack.c.bf16 %v5611_v41, %v5610_v11  ;;  %v14886_v9 = vpack.c.bf16 %v5695_v4, %v5694_v33  ;;  %v14902_v33 = vcombine.low %v5753_v48, %v5757_v35  ;;  %v16918_v48 = vld [vmem:[#allocation73_spill] sm:$0xff] }
 0x58c   :  { %6537 = vmatmul.mubr.bf16.gmra.mrb[76].mxu0 %v14875_v46  ;;  %7149 = vmatmul.mubr.bf16.gmra.mrb[76].mxu1 %v14875_v46 }
 0x58d   :  { %16913 = vst [vmem:[#allocation69_spill] sm:$0xff] %v14884_v3  ;;  %16914 = vst [vmem:[#allocation116_spill] sm:$0xff] %v14886_v9  ;;  %6640 = vmatpush1.bf16.msra.mxu0 %v13183_v5  ;;  %6546 = vmatprep.mubr.bf16.mxu0 %v14878_v36  ;;  %v5765_v5 = vld [vmem:[%s16380_s3 + $0x168] sm:$0xff] }
 0x58e   :  { %7252 = vmatpush1.bf16.msra.mxu1 %v16863_v26  ;;  %6641 = vmatprep.subr.bf16.mxu0 %v16872_v56  ;;  %16916 = vst [vmem:[#allocation71_spill] sm:$0xff] %v14902_v33 }
 0x58f   :  { %7253 = vmatprep.subr.bf16.mxu1 %v16915_v44  ;;  %v3742_v59 = vpop.f32.mrb[20].mxu0  ;;  %v4015_v15 = vpop.f32.mrb[20].mxu1  ;;  %7158 = vmatprep.mubr.bf16.mxu1 %v14878_v36 }
 0x590   :  { %v4432_v54 = vmax.f32 %v3732_v10, %v3742_v59  ;;  %v4434_v49 = vmax.f32 %v4005_v45, %v4015_v15  ;;  %v3744_v25 = vpop.f32.mrb[21].mxu0  ;;  %v4017_v11 = vpop.f32.mrb[21].mxu1  ;;  %v14907_v10 = vcombine.high %v5761_v16, %v5765_v5  ;;  %v14927_v15 = vcombine.low %v5761_v16, %v5765_v5  ;;  %v16922_v16 = vld [vmem:[#allocation77_spill] sm:$0xff] }
 0x591   :  { %v4433_v41 = vmax.f32 %v3734_v28, %v3744_v25  ;;  %v4435_v4 = vmax.f32 %v4007_v22, %v4017_v11  ;;  %6642 = vmatpush1.bf16.msra.mxu0 %v16868_v42  ;;  %v3746_v9 = vpop.f32.mrb[22].mxu0  ;;  %v4019_v3 = vpop.f32.mrb[22].mxu1 }
 0x592   :  { %7254 = vmatpush1.bf16.msra.mxu1 %v16869_v31  ;;  %v4456_v60 = vmax.f32 %v3736_v2, %v3746_v9  ;;  %v4458_v36 = vmax.f32 %v4009_v1, %v4019_v3  ;;  %6643 = vmatprep.subr.bf16.mxu0 %v16876_v29  ;;  %v3748_v46 = vpop.f32.mrb[23].mxu0  ;;  %v4021_v55 = vpop.f32.mrb[23].mxu1  ;;  %16917 = vst [vmem:[#allocation117_spill] sm:$0xff] %v14907_v10  ;;  %v5769_v3 = vld [vmem:[%s16380_s3 + $0x188] sm:$0xff]  ;;  %16920 = vst [vmem:[#allocation73_spill] sm:$0xff] %v14927_v15 }
 0x593   :  { %v5564_v45 = vmax.f32 %v4432_v54, %v4433_v41  ;;  %v5648_v59 = vmax.f32 %v4434_v49, %v4435_v4  ;;  %7255 = vmatprep.subr.bf16.mxu1 %v16918_v48  ;;  %v4457_v35 = vmax.f32 %v3738_v18, %v3748_v46  ;;  %v4459_v28 = vmax.f32 %v4011_v53, %v4021_v55  ;;  %v5773_v55 = vld [vmem:[%s16380_s3 + $0x1a8] sm:$0xff] }
 0x594   :  { %6547 = vmatmul.mubr.bf16.gmra.mrb[80].mxu0 %v14902_v33  ;;  %7159 = vmatmul.mubr.bf16.gmra.mrb[80].mxu1 %v14902_v33  ;;  %v14930_v54 = vcombine.high %v5769_v3, %v5773_v55 }
 0x595   :  { %v5588_v42 = vadd.f32 %v5564_v45, %v12711_v38  ;;  %v5672_v22 = vadd.f32 %v5648_v59, %v12711_v38  ;;  %v5565_v2 = vmax.f32 %v4456_v60, %v4457_v35  ;;  %v5649_v1 = vmax.f32 %v4458_v36, %v4459_v28  ;;  %6644 = vmatpush1.bf16.msra.mxu0 %v13231_v50  ;;  %v16919_v60 = vld [vmem:[#allocation75_spill] sm:$0xff] }
 0x596   :  { %7256 = vmatpush1.bf16.msra.mxu1 %v16874_v52  ;;  %6645 = vmatprep.subr.bf16.mxu0 %v16840_v17  ;;  %16921 = vst [vmem:[#allocation75_spill] sm:$0xff] %v14930_v54 }
 0x597   :  { %v5589_v46 = vadd.f32 %v5565_v2, %v12726_v27  ;;  %v5673_v18 = vadd.f32 %v5649_v1, %v12726_v27  ;;  %7257 = vmatprep.subr.bf16.mxu1 %v16919_v60  ;;  %v3752_v36 = vpop.f32.mrb[24].mxu0  ;;  %v4025_v50 = vpop.f32.mrb[24].mxu1  ;;  %6556 = vmatprep.mubr.bf16.mxu0 %v14907_v10  ;;  %v5612_v49 = vmax.f32 %v5588_v42, 0.0  ;;  %v5696_v25 = vmax.f32 %v5672_v22, 0.0  ;;  %v16925_v42 = vld [vmem:[#allocation30_spill] sm:$0xff]  ;;  %v16927_v22 = vld [vmem:[#allocation55_spill] sm:$0xff] }
 0x598   :  { %v3754_v53 = vpop.f32.mrb[25].mxu0  ;;  %v4027_v9 = vpop.f32.mrb[25].mxu1  ;;  %7168 = vmatprep.mubr.bf16.mxu1 %v14907_v10  ;;  %v16928_v2 = vld [vmem:[#allocation79_spill] sm:$0xff] }
 0x599   :  { %v5613_v11 = vmax.f32 %v5589_v46, 0.0  ;;  %v5697_v41 = vmax.f32 %v5673_v18, 0.0  ;;  %6646 = vmatpush1.bf16.msra.mxu0 %v13255_v40  ;;  %v3756_v4 = vpop.f32.mrb[26].mxu0  ;;  %v4029_v45 = vpop.f32.mrb[26].mxu1  ;;  %v16926_v40 = vld [vmem:[#allocation54_spill] sm:$0xff]  ;;  %v5777_v18 = vld [vmem:[%s16380_s3 + $0x1c8] sm:$0xff] }
 0x59a   :  { %7258 = vmatpush1.bf16.msra.mxu1 %v16877_v24  ;;  %6647 = vmatprep.subr.bf16.mxu0 %v16844_v61  ;;  %v3758_v59 = vpop.f32.mrb[27].mxu0  ;;  %v4031_v35 = vpop.f32.mrb[27].mxu1  ;;  %v16930_v10 = vld [vmem:[#allocation31_spill] sm:$0xff] }
 0x59b   :  { %7259 = vmatprep.subr.bf16.mxu1 %v16922_v16  ;;  %v14936_v5 = vpack.c.bf16 %v5613_v11, %v5612_v49  ;;  %v14938_v28 = vpack.c.bf16 %v5697_v41, %v5696_v25  ;;  %v5781_v49 = vld [vmem:[%s16380_s3 + $0x1e8] sm:$0xff] }
 0x59c   :  { %6557 = vmatmul.mubr.bf16.gmra.mrb[84].mxu0 %v14927_v15  ;;  %7169 = vmatmul.mubr.bf16.gmra.mrb[84].mxu1 %v14927_v15 }
 0x59d   :  { %16923 = vst [vmem:[#allocation77_spill] sm:$0xff] %v14936_v5  ;;  %16924 = vst [vmem:[#allocation118_spill] sm:$0xff] %v14938_v28  ;;  %6648 = vmatpush1.bf16.msra.mxu0 %v16925_v42  ;;  %6566 = vmatprep.mubr.bf16.mxu0 %v14930_v54  ;;  %v14954_v28 = vcombine.low %v5769_v3, %v5773_v55  ;;  %v16933_v3 = vld [vmem:[#allocation81_spill] sm:$0xff] }
 0x59e   :  { %7260 = vmatpush1.bf16.msra.mxu1 %v16926_v40  ;;  %6649 = vmatprep.subr.bf16.mxu0 %v16927_v22 }
 0x59f   :  { %7261 = vmatprep.subr.bf16.mxu1 %v16928_v2  ;;  %v3762_v1 = vpop.f32.mrb[28].mxu0  ;;  %v4035_v46 = vpop.f32.mrb[28].mxu1  ;;  %7178 = vmatprep.mubr.bf16.mxu1 %v14930_v54  ;;  %16929 = vst [vmem:[#allocation30_spill] sm:$0xff] %v14954_v28 }
 0x5a0   :  { %v4480_v25 = vmax.f32 %v3752_v36, %v3762_v1  ;;  %v4482_v11 = vmax.f32 %v4025_v50, %v4035_v46  ;;  %v3764_v41 = vpop.f32.mrb[29].mxu0  ;;  %v4037_v42 = vpop.f32.mrb[29].mxu1  ;;  %v14959_v36 = vcombine.high %v5777_v18, %v5781_v49 }
 0x5a1   :  { %v4481_v15 = vmax.f32 %v3754_v53, %v3764_v41  ;;  %v4483_v5 = vmax.f32 %v4027_v9, %v4037_v42  ;;  %6650 = vmatpush1.bf16.msra.mxu0 %v16930_v10  ;;  %v3766_v33 = vpop.f32.mrb[30].mxu0  ;;  %v4039_v54 = vpop.f32.mrb[30].mxu1 }
 0x5a2   :  { %7262 = vmatpush1.bf16.msra.mxu1 %v16931_v19  ;;  %v4504_v14 = vmax.f32 %v3756_v4, %v3766_v33  ;;  %v4506_v58 = vmax.f32 %v4029_v45, %v4039_v54  ;;  %6651 = vmatprep.subr.bf16.mxu0 %v16849_v63  ;;  %v3768_v32 = vpop.f32.mrb[31].mxu0  ;;  %v4041_v23 = vpop.f32.mrb[31].mxu1  ;;  %16932 = vst [vmem:[#allocation54_spill] sm:$0xff] %v14959_v36  ;;  %v16934_v4 = vld [vmem:[#allocation33_spill] sm:$0xff] }
 0x5a3   :  { %v5566_v50 = vmax.f32 %v4480_v25, %v4481_v15  ;;  %v5650_v1 = vmax.f32 %v4482_v11, %v4483_v5  ;;  %7263 = vmatprep.subr.bf16.mxu1 %v16933_v3  ;;  %v4505_v55 = vmax.f32 %v3758_v59, %v3768_v32  ;;  %v4507_v53 = vmax.f32 %v4031_v35, %v4041_v23  ;;  %v5785_v15 = vld [vmem:[%s16380_s3 + $0x208] sm:$0xff]  ;;  %v16935_v23 = vld [vmem:[#allocation58_spill] sm:$0xff] }
 0x5a4   :  { %6567 = vmatmul.mubr.bf16.gmra.mrb[88].mxu0 %v14954_v28  ;;  %7179 = vmatmul.mubr.bf16.gmra.mrb[88].mxu1 %v14954_v28  ;;  %v5789_v32 = vld [vmem:[%s16380_s3 + $0x228] sm:$0xff]  ;;  %v14979_v25 = vcombine.low %v5777_v18, %v5781_v49 }
 0x5a5   :  { %v5590_v10 = vadd.f32 %v5566_v50, %v12711_v38  ;;  %v5674_v33 = vadd.f32 %v5650_v1, %v12711_v38  ;;  %v5567_v9 = vmax.f32 %v4504_v14, %v4505_v55  ;;  %v5651_v54 = vmax.f32 %v4506_v58, %v4507_v53  ;;  %6652 = vmatpush1.bf16.msra.mxu0 %v16934_v4  ;;  %v16936_v14 = vld [vmem:[#allocation83_spill] sm:$0xff]  ;;  %v16939_v18 = vld [vmem:[#allocation85_spill] sm:$0xff] }
 0x5a6   :  { %7264 = vmatpush1.bf16.msra.mxu1 %v16935_v23  ;;  %6653 = vmatprep.subr.bf16.mxu0 %v16850_v7  ;;  %16937 = vst [vmem:[#allocation55_spill] sm:$0xff] %v14979_v25  ;;  %v14982_v11 = vcombine.high %v5785_v15, %v5789_v32 }
 0x5a7   :  { %v5591_v45 = vadd.f32 %v5567_v9, %v12726_v27  ;;  %v5675_v59 = vadd.f32 %v5651_v54, %v12726_v27  ;;  %7265 = vmatprep.subr.bf16.mxu1 %v16936_v14  ;;  %v3772_v58 = vpop.f32.mrb[32].mxu0  ;;  %v4045_v35 = vpop.f32.mrb[32].mxu1  ;;  %6576 = vmatprep.mubr.bf16.mxu0 %v14959_v36  ;;  %v5614_v41 = vmax.f32 %v5590_v10, 0.0  ;;  %v5698_v42 = vmax.f32 %v5674_v33, 0.0  ;;  %v5797_v10 = vld [vmem:[%s16380_s3 + $0x268] sm:$0xff]  ;;  %v16942_v33 = vld [vmem:[#allocation87_spill] sm:$0xff] }
 0x5a8   :  { %v3774_v5 = vpop.f32.mrb[33].mxu0  ;;  %v4047_v46 = vpop.f32.mrb[33].mxu1  ;;  %7188 = vmatprep.mubr.bf16.mxu1 %v14959_v36  ;;  %16938 = vst [vmem:[#allocation79_spill] sm:$0xff] %v14982_v11 }
 0x5a9   :  { %v5615_v50 = vmax.f32 %v5591_v45, 0.0  ;;  %v5699_v1 = vmax.f32 %v5675_v59, 0.0  ;;  %6654 = vmatpush1.bf16.msra.mxu0 %v16801_v62  ;;  %v3776_v55 = vpop.f32.mrb[34].mxu0  ;;  %v4049_v53 = vpop.f32.mrb[34].mxu1  ;;  %v5793_v62 = vld [vmem:[%s16380_s3 + $0x248] sm:$0xff] }
 0x5aa   :  { %7266 = vmatpush1.bf16.msra.mxu1 %v16899_v43  ;;  %6655 = vmatprep.subr.bf16.mxu0 %v16854_v8  ;;  %v3778_v9 = vpop.f32.mrb[35].mxu0  ;;  %v4051_v54 = vpop.f32.mrb[35].mxu1 }
 0x5ab   :  { %7267 = vmatprep.subr.bf16.mxu1 %v16939_v18  ;;  %v14988_v49 = vpack.c.bf16 %v5615_v50, %v5614_v41  ;;  %v14990_v4 = vpack.c.bf16 %v5699_v1, %v5698_v42  ;;  %v15006_v1 = vcombine.low %v5785_v15, %v5789_v32  ;;  %v16945_v15 = vld [vmem:[#allocation66_spill] sm:$0xff] }
 0x5ac   :  { %6577 = vmatmul.mubr.bf16.gmra.mrb[92].mxu0 %v14979_v25  ;;  %7189 = vmatmul.mubr.bf16.gmra.mrb[92].mxu1 %v14979_v25 }
 0x5ad   :  { %16940 = vst [vmem:[#allocation31_spill] sm:$0xff] %v14988_v49  ;;  %16941 = vst [vmem:[#allocation56_spill] sm:$0xff] %v14990_v4  ;;  %6656 = vmatpush1.bf16.msra.mxu0 %v16805_v20  ;;  %6586 = vmatprep.mubr.bf16.mxu0 %v14982_v11  ;;  %v15009_v49 = vcombine.high %v5793_v62, %v5797_v10 }
 0x5ae   :  { %7268 = vmatpush1.bf16.msra.mxu1 %v16902_v47  ;;  %6657 = vmatprep.subr.bf16.mxu0 %v16856_v51  ;;  %16943 = vst [vmem:[#allocation81_spill] sm:$0xff] %v15006_v1 }
 0x5af   :  { %7269 = vmatprep.subr.bf16.mxu1 %v16942_v33  ;;  %v3782_v45 = vpop.f32.mrb[36].mxu0  ;;  %v4055_v59 = vpop.f32.mrb[36].mxu1  ;;  %7198 = vmatprep.mubr.bf16.mxu1 %v14982_v11  ;;  %16944 = vst [vmem:[#allocation33_spill] sm:$0xff] %v15009_v49 }
 0x5b0   :  { %v4528_v20 = vmax.f32 %v3772_v58, %v3782_v45  ;;  %v4530_v41 = vmax.f32 %v4045_v35, %v4055_v59  ;;  %v3784_v42 = vpop.f32.mrb[37].mxu0  ;;  %v4057_v50 = vpop.f32.mrb[37].mxu1 }
 0x5b1   :  { %v4529_v4 = vmax.f32 %v3774_v5, %v3784_v42  ;;  %v4531_v25 = vmax.f32 %v4047_v46, %v4057_v50  ;;  %6658 = vmatpush1.bf16.msra.mxu0 %v16811_v34  ;;  %v3786_v36 = vpop.f32.mrb[38].mxu0  ;;  %v4059_v28 = vpop.f32.mrb[38].mxu1 }
 0x5b2   :  { %7270 = vmatpush1.bf16.msra.mxu1 %v16905_v0  ;;  %v4552_v33 = vmax.f32 %v3776_v55, %v3786_v36  ;;  %v4554_v51 = vmax.f32 %v4049_v53, %v4059_v28  ;;  %6780 = vmatprep.subr.bf16.mxu0 %v16859_v30  ;;  %v3788_v58 = vpop.f32.mrb[39].mxu0  ;;  %v4061_v35 = vpop.f32.mrb[39].mxu1  ;;  %v5805_v55 = vld [vmem:[%s16380_s3 + $0x2a8] sm:$0xff] }
 0x5b3   :  { %v5568_v45 = vmax.f32 %v4528_v20, %v4529_v4  ;;  %v5652_v59 = vmax.f32 %v4530_v41, %v4531_v25  ;;  %7392 = vmatprep.subr.bf16.mxu1 %v16945_v15  ;;  %v4553_v32 = vmax.f32 %v3778_v9, %v3788_v58  ;;  %v4555_v5 = vmax.f32 %v4051_v54, %v4061_v35  ;;  %v5801_v25 = vld [vmem:[%s16380_s3 + $0x288] sm:$0xff] }
 0x5b4   :  { %6587 = vmatmul.mubr.bf16.gmra.mrb[96].mxu0 %v15006_v1  ;;  %7199 = vmatmul.mubr.bf16.gmra.mrb[96].mxu1 %v15006_v1  ;;  %v15028_v20 = vcombine.low %v5793_v62, %v5797_v10  ;;  %v15030_v41 = vcombine.high %v5801_v25, %v5805_v55  ;;  %v5809_v62 = vld [vmem:[%s16380_s3 + $0x2c8] sm:$0xff] }
 0x5b5   :  { %v5592_v34 = vadd.f32 %v5568_v45, %v12711_v38  ;;  %v5676_v46 = vadd.f32 %v5652_v59, %v12711_v38  ;;  %v5569_v36 = vmax.f32 %v4552_v33, %v4553_v32  ;;  %v5653_v28 = vmax.f32 %v4554_v51, %v4555_v5  ;;  %6596 = vmatprep.mubr.bf16.mxu0 %v15009_v49  ;;  %v5813_v10 = vld [vmem:[%s16380_s3 + $0x2e8] sm:$0xff] }
 0x5b6   :  { %7208 = vmatprep.mubr.bf16.mxu1 %v15009_v49  ;;  %16946 = vst [vmem:[#allocation58_spill] sm:$0xff] %v15028_v20  ;;  %16947 = vst [vmem:[#allocation83_spill] sm:$0xff] %v15030_v41 }
 0x5b7   :  { %v5593_v53 = vadd.f32 %v5569_v36, %v12726_v27  ;;  %v5677_v9 = vadd.f32 %v5653_v28, %v12726_v27  ;;  %v3792_v54 = vpop.f32.mrb[40].mxu0  ;;  %v4065_v4 = vpop.f32.mrb[40].mxu1  ;;  %v5616_v42 = vmax.f32 %v5592_v34, 0.0  ;;  %v5700_v50 = vmax.f32 %v5676_v46, 0.0 }
 0x5b8   :  { %v3794_v33 = vpop.f32.mrb[41].mxu0  ;;  %v4067_v51 = vpop.f32.mrb[41].mxu1 }
 0x5b9   :  { %v5617_v58 = vmax.f32 %v5593_v53, 0.0  ;;  %v5701_v35 = vmax.f32 %v5677_v9, 0.0  ;;  %v3796_v45 = vpop.f32.mrb[42].mxu0  ;;  %v4069_v59 = vpop.f32.mrb[42].mxu1 }
 0x5ba   :  { %v3798_v32 = vpop.f32.mrb[43].mxu0  ;;  %v4071_v5 = vpop.f32.mrb[43].mxu1 }
 0x5bb   :  { %v15032_v49 = vpack.c.bf16 %v5617_v58, %v5616_v42  ;;  %v15034_v36 = vpack.c.bf16 %v5701_v35, %v5700_v50  ;;  %v15046_v50 = vcombine.low %v5801_v25, %v5805_v55 }
 0x5bc   :  { %6597 = vmatmul.mubr.bf16.gmra.mrb[100].mxu0 %v15028_v20  ;;  %7209 = vmatmul.mubr.bf16.gmra.mrb[100].mxu1 %v15028_v20  ;;  %v15048_v20 = vcombine.high %v5809_v62, %v5813_v10 }
 0x5bd   :  { %16948 = vst [vmem:[#allocation119_spill] sm:$0xff] %v15032_v49  ;;  %16949 = vst [vmem:[#allocation120_spill] sm:$0xff] %v15034_v36  ;;  %6606 = vmatprep.mubr.bf16.mxu0 %v15030_v41  ;;  %7218 = vmatprep.mubr.bf16.mxu1 %v15030_v41 }
 0x5be   :  { %16950 = vst [vmem:[#allocation121_spill] sm:$0xff] %v15046_v50  ;;  %16951 = vst [vmem:[#allocation122_spill] sm:$0xff] %v15048_v20 }
 0x5bf   :  { %v3802_v34 = vpop.f32.mrb[44].mxu0  ;;  %v4075_v46 = vpop.f32.mrb[44].mxu1 }
 0x5c0   :  { %v4576_v28 = vmax.f32 %v3792_v54, %v3802_v34  ;;  %v4578_v53 = vmax.f32 %v4065_v4, %v4075_v46  ;;  %v3804_v9 = vpop.f32.mrb[45].mxu0  ;;  %v4077_v42 = vpop.f32.mrb[45].mxu1 }
 0x5c1   :  { %v4577_v58 = vmax.f32 %v3794_v33, %v3804_v9  ;;  %v4579_v35 = vmax.f32 %v4067_v51, %v4077_v42  ;;  %v3806_v36 = vpop.f32.mrb[46].mxu0  ;;  %v4079_v41 = vpop.f32.mrb[46].mxu1  ;;  %v5722_v33 = vld [vmem:[%s16380_s3 + $0x10] sm:$0xff] }
 0x5c2   :  { %v4600_v1 = vmax.f32 %v3796_v45, %v3806_v36  ;;  %v4602_v11 = vmax.f32 %v4069_v59, %v4079_v41  ;;  %v3808_v49 = vpop.f32.mrb[47].mxu0  ;;  %v4081_v15 = vpop.f32.mrb[47].mxu1  ;;  %v5730_v9 = vld [vmem:[%s16380_s3 + $0x50] sm:$0xff] }
 0x5c3   :  { %v5570_v30 = vmax.f32 %v4576_v28, %v4577_v58  ;;  %v5654_v0 = vmax.f32 %v4578_v53, %v4579_v35  ;;  %v4601_v18 = vmax.f32 %v3798_v32, %v3808_v49  ;;  %v4603_v8 = vmax.f32 %v4071_v5, %v4081_v15  ;;  %v5726_v49 = vld [vmem:[%s16380_s3 + $0x30] sm:$0xff] }
 0x5c4   :  { %6607 = vmatmul.mubr.bf16.gmra.mrb[104].mxu0 %v15046_v50  ;;  %7219 = vmatmul.mubr.bf16.gmra.mrb[104].mxu1 %v15046_v50  ;;  %v5734_v42 = vld [vmem:[%s16380_s3 + $0x70] sm:$0xff] }
 0x5c5   :  { %v5594_v25 = vadd.f32 %v5570_v30, %v12711_v38  ;;  %v5678_v55 = vadd.f32 %v5654_v0, %v12711_v38  ;;  %v5571_v54 = vmax.f32 %v4600_v1, %v4601_v18  ;;  %v5655_v4 = vmax.f32 %v4602_v11, %v4603_v8  ;;  %6616 = vmatprep.mubr.bf16.mxu0 %v15048_v20 }
 0x5c6   :  { %7228 = vmatprep.mubr.bf16.mxu1 %v15048_v20  ;;  %v15064_v11 = vcombine.low %v5809_v62, %v5813_v10  ;;  %v15066_v1 = vcombine.high %v5722_v33, %v5726_v49 }
 0x5c7   :  { %v5595_v15 = vadd.f32 %v5571_v54, %v12726_v27  ;;  %v5679_v30 = vadd.f32 %v5655_v4, %v12726_v27  ;;  %v3812_v51 = vpop.f32.mrb[48].mxu0  ;;  %v4085_v0 = vpop.f32.mrb[48].mxu1  ;;  %v5618_v41 = vmax.f32 %v5594_v25, 0.0  ;;  %v5702_v45 = vmax.f32 %v5678_v55, 0.0 }
 0x5c8   :  { %v3814_v18 = vpop.f32.mrb[49].mxu0  ;;  %v4087_v8 = vpop.f32.mrb[49].mxu1  ;;  %16952 = vst [vmem:[#allocation123_spill] sm:$0xff] %v15064_v11  ;;  %16953 = vst [vmem:[#allocation124_spill] sm:$0xff] %v15066_v1  ;;  %v15082_v54 = vcombine.low %v5722_v33, %v5726_v49 }
 0x5c9   :  { %v5619_v59 = vmax.f32 %v5595_v15, 0.0  ;;  %v5703_v32 = vmax.f32 %v5679_v30, 0.0  ;;  %v3816_v5 = vpop.f32.mrb[50].mxu0  ;;  %v4089_v36 = vpop.f32.mrb[50].mxu1 }
 0x5ca   :  { %v3818_v34 = vpop.f32.mrb[51].mxu0  ;;  %v4091_v46 = vpop.f32.mrb[51].mxu1 }
 0x5cb   :  { %v15068_v28 = vpack.c.bf16 %v5619_v59, %v5618_v41  ;;  %v15070_v53 = vpack.c.bf16 %v5703_v32, %v5702_v45 }
 0x5cc   :  { %6617 = vmatmul.mubr.bf16.gmra.mrb[108].mxu0 %v15064_v11  ;;  %7229 = vmatmul.mubr.bf16.gmra.mrb[108].mxu1 %v15064_v11 }
 0x5cd   :  { %16954 = vst [vmem:[#allocation125_spill] sm:$0xff] %v15068_v28  ;;  %16955 = vst [vmem:[#allocation126_spill] sm:$0xff] %v15070_v53  ;;  %6659 = vmatprep.mubr.bf16.mxu0 %v15066_v1  ;;  %7271 = vmatprep.mubr.bf16.mxu1 %v15066_v1  ;;  %v15084_v1 = vcombine.high %v5730_v9, %v5734_v42 }
 0x5cf   :  { %v3822_v62 = vpop.f32.mrb[52].mxu0  ;;  %v4095_v10 = vpop.f32.mrb[52].mxu1  ;;  %16956 = vst [vmem:[#allocation127_spill] sm:$0xff] %v15084_v1 }
 0x5d0   :  { %v4624_v58 = vmax.f32 %v3812_v51, %v3822_v62  ;;  %v4626_v35 = vmax.f32 %v4085_v0, %v4095_v10  ;;  %v3824_v25 = vpop.f32.mrb[53].mxu0  ;;  %v4097_v55 = vpop.f32.mrb[53].mxu1 }
 0x5d1   :  { %v4625_v4 = vmax.f32 %v3814_v18, %v3824_v25  ;;  %v4627_v15 = vmax.f32 %v4087_v8, %v4097_v55  ;;  %v3826_v30 = vpop.f32.mrb[54].mxu0  ;;  %v4099_v41 = vpop.f32.mrb[54].mxu1  ;;  %v5738_v18 = vld [vmem:[%s16380_s3 + $0x90] sm:$0xff] }
 0x5d2   :  { %v4648_v45 = vmax.f32 %v3816_v5, %v3826_v30  ;;  %v4650_v59 = vmax.f32 %v4089_v36, %v4099_v41  ;;  %v3828_v32 = vpop.f32.mrb[55].mxu0  ;;  %v4101_v53 = vpop.f32.mrb[55].mxu1  ;;  %v5742_v8 = vld [vmem:[%s16380_s3 + $0xb0] sm:$0xff]  ;;  %v16962_v41 = vld [vmem:[#allocation72_spill] sm:$0xff] }
 0x5d3   :  { %v5572_v11 = vmax.f32 %v4624_v58, %v4625_v4  ;;  %v5656_v20 = vmax.f32 %v4626_v35, %v4627_v15  ;;  %v4649_v50 = vmax.f32 %v3818_v34, %v3828_v32  ;;  %v4651_v28 = vmax.f32 %v4091_v46, %v4101_v53  ;;  %v5746_v32 = vld [vmem:[%s16380_s3 + $0xd0] sm:$0xff] }
 0x5d4   :  { %6660 = vmatmul.mubr.bf16.vlgmr.msra.gmra.mrb[64].mxu0 %v15082_v54  ;;  %7272 = vmatmul.mubr.bf16.vlgmr.msra.gmra.mrb[64].mxu1 %v15082_v54  ;;  %v15106_v53 = vcombine.high %v5738_v18, %v5742_v8 }
 0x5d5   :  { %v5596_v33 = vadd.f32 %v5572_v11, %v12711_v38  ;;  %v5680_v49 = vadd.f32 %v5656_v20, %v12711_v38  ;;  %v5573_v51 = vmax.f32 %v4648_v45, %v4649_v50  ;;  %v5657_v0 = vmax.f32 %v4650_v59, %v4651_v28  ;;  %6781 = vmatpush1.bf16.msra.mxu0 %v16814_v13  ;;  %v16957_v50 = vld [vmem:[#allocation68_spill] sm:$0xff] }
 0x5d6   :  { %7393 = vmatpush1.bf16.msra.mxu1 %v16908_v39  ;;  %6782 = vmatprep.subr.bf16.mxu0 %v16860_v6  ;;  %v15103_v28 = vcombine.low %v5730_v9, %v5734_v42  ;;  %16959 = vst [vmem:[#allocation128_spill] sm:$0xff] %v15106_v53  ;;  %v16960_v9 = vld [vmem:[#allocation70_spill] sm:$0xff] }
 0x5d7   :  { %v5597_v11 = vadd.f32 %v5573_v51, %v12726_v27  ;;  %v5681_v20 = vadd.f32 %v5657_v0, %v12726_v27  ;;  %7394 = vmatprep.subr.bf16.mxu1 %v16957_v50  ;;  %v3832_v5 = vpop.f32.mrb[56].mxu0  ;;  %v4105_v36 = vpop.f32.mrb[56].mxu1  ;;  %6669 = vmatprep.mubr.bf16.mxu0 %v15084_v1  ;;  %v5620_v62 = vmax.f32 %v5596_v33, 0.0  ;;  %v5704_v10 = vmax.f32 %v5680_v49, 0.0  ;;  %v5750_v33 = vld [vmem:[%s16380_s3 + $0xf0] sm:$0xff] }
 0x5d8   :  { %v3834_v34 = vpop.f32.mrb[57].mxu0  ;;  %v4107_v46 = vpop.f32.mrb[57].mxu1  ;;  %16958 = vst [vmem:[#allocation68_spill] sm:$0xff] %v15103_v28  ;;  %7281 = vmatprep.mubr.bf16.mxu1 %v15084_v1 }
 0x5d9   :  { %v5621_v58 = vmax.f32 %v5597_v11, 0.0  ;;  %v5705_v35 = vmax.f32 %v5681_v20, 0.0  ;;  %6783 = vmatpush1.bf16.msra.mxu0 %v16815_v37  ;;  %v3836_v25 = vpop.f32.mrb[58].mxu0  ;;  %v4109_v55 = vpop.f32.mrb[58].mxu1  ;;  %v15130_v20 = vcombine.low %v5738_v18, %v5742_v8  ;;  %v16965_v18 = vld [vmem:[#allocation74_spill] sm:$0xff] }
 0x5da   :  { %7395 = vmatpush1.bf16.msra.mxu1 %v16909_v57  ;;  %6784 = vmatprep.subr.bf16.mxu0 %v16863_v26  ;;  %v3838_v4 = vpop.f32.mrb[59].mxu0  ;;  %v4111_v15 = vpop.f32.mrb[59].mxu1 }
 0x5db   :  { %7396 = vmatprep.subr.bf16.mxu1 %v16960_v9  ;;  %v15112_v42 = vpack.c.bf16 %v5621_v58, %v5620_v62  ;;  %v15114_v30 = vpack.c.bf16 %v5705_v35, %v5704_v10  ;;  %16963 = vst [vmem:[#allocation72_spill] sm:$0xff] %v15130_v20 }
 0x5dc   :  { %6670 = vmatmul.mubr.bf16.gmra.mrb[68].mxu0 %v15103_v28  ;;  %7282 = vmatmul.mubr.bf16.gmra.mrb[68].mxu1 %v15103_v28 }
 0x5dd   :  { %16961 = vst [vmem:[#allocation70_spill] sm:$0xff] %v15114_v30  ;;  %6785 = vmatpush1.bf16.msra.mxu0 %v16867_v12  ;;  %6679 = vmatprep.mubr.bf16.mxu0 %v15106_v53 }
 0x5de   :  { %7397 = vmatpush1.bf16.msra.mxu1 %v16912_v21  ;;  %6786 = vmatprep.subr.bf16.mxu0 %v16869_v31 }
 0x5df   :  { %7398 = vmatprep.subr.bf16.mxu1 %v16962_v41  ;;  %v3842_v45 = vpop.f32.mrb[60].mxu0  ;;  %v4115_v59 = vpop.f32.mrb[60].mxu1  ;;  %7291 = vmatprep.mubr.bf16.mxu1 %v15106_v53 }
 0x5e0   :  { %v4672_v49 = vmax.f32 %v3832_v5, %v3842_v45  ;;  %v4674_v51 = vmax.f32 %v4105_v36, %v4115_v59  ;;  %v3844_v0 = vpop.f32.mrb[61].mxu0  ;;  %v4117_v11 = vpop.f32.mrb[61].mxu1  ;;  %v15135_v5 = vcombine.high %v5746_v32, %v5750_v33 }
 0x5e1   :  { %v4673_v62 = vmax.f32 %v3834_v34, %v3844_v0  ;;  %v4675_v10 = vmax.f32 %v4107_v46, %v4117_v11  ;;  %6787 = vmatpush1.bf16.msra.mxu0 %v16872_v56  ;;  %v3846_v58 = vpop.f32.mrb[62].mxu0  ;;  %v4119_v35 = vpop.f32.mrb[62].mxu1 }
 0x5e2   :  { %7399 = vmatpush1.bf16.msra.mxu1 %v16915_v44  ;;  %v4696_v30 = vmax.f32 %v3836_v25, %v3846_v58  ;;  %v4698_v53 = vmax.f32 %v4109_v55, %v4119_v35  ;;  %6788 = vmatprep.subr.bf16.mxu0 %v16874_v52  ;;  %v3848_v28 = vpop.f32.mrb[63].mxu0  ;;  %v4121_v1 = vpop.f32.mrb[63].mxu1  ;;  %16964 = vst [vmem:[#allocation129_spill] sm:$0xff] %v15135_v5  ;;  %v16971_v58 = vld [vmem:[#allocation80_spill] sm:$0xff] }
 0x5e3   :  { %v5574_v36 = vmax.f32 %v4672_v49, %v4673_v62  ;;  %v5658_v45 = vmax.f32 %v4674_v51, %v4675_v10  ;;  %7400 = vmatprep.subr.bf16.mxu1 %v16965_v18  ;;  %v4697_v8 = vmax.f32 %v3838_v4, %v3848_v28  ;;  %v4699_v34 = vmax.f32 %v4111_v15, %v4121_v1  ;;  %v5754_v49 = vld [vmem:[%s16380_s3 + $0x110] sm:$0xff]  ;;  %v16966_v4 = vld [vmem:[#allocation76_spill] sm:$0xff] }
 0x5e4   :  { %6680 = vmatmul.mubr.bf16.gmra.mrb[72].mxu0 %v15130_v20  ;;  %7292 = vmatmul.mubr.bf16.gmra.mrb[72].mxu1 %v15130_v20  ;;  %v5758_v1 = vld [vmem:[%s16380_s3 + $0x130] sm:$0xff]  ;;  %v17084_v20 = vld [vmem:[#allocation71_spill] sm:$0xff] }
 0x5e5   :  { %v5598_v46 = vadd.f32 %v5574_v36, %v12711_v38  ;;  %v5682_v25 = vadd.f32 %v5658_v45, %v12711_v38  ;;  %v5575_v55 = vmax.f32 %v4696_v30, %v4697_v8  ;;  %v5659_v59 = vmax.f32 %v4698_v53, %v4699_v34  ;;  %6789 = vmatpush1.bf16.msra.mxu0 %v16876_v29  ;;  %v5766_v10 = vld [vmem:[%s16380_s3 + $0x170] sm:$0xff] }
 0x5e6   :  { %7401 = vmatpush1.bf16.msra.mxu1 %v16918_v48  ;;  %6790 = vmatprep.subr.bf16.mxu0 %v16877_v24  ;;  %v15155_v53 = vcombine.low %v5746_v32, %v5750_v33  ;;  %v15158_v15 = vcombine.high %v5754_v49, %v5758_v1  ;;  %v5762_v33 = vld [vmem:[%s16380_s3 + $0x150] sm:$0xff]  ;;  %v15182_v35 = vcombine.low %v5754_v49, %v5758_v1  ;;  %v16979_v49 = vld [vmem:[#allocation61_spill] sm:$0xff] }
 0x5e7   :  { %v5599_v28 = vadd.f32 %v5575_v55, %v12726_v27  ;;  %v5683_v38 = vadd.f32 %v5659_v59, %v12726_v27  ;;  %7402 = vmatprep.subr.bf16.mxu1 %v16966_v4  ;;  %6689 = vmatprep.mubr.bf16.mxu0 %v15135_v5  ;;  %v5622_v30 = vmax.f32 %v5598_v46, 0.0  ;;  %v5706_v51 = vmax.f32 %v5682_v25, 0.0  ;;  %v16969_v27 = vld [vmem:[#allocation78_spill] sm:$0xff]  ;;  %v16975_v46 = vld [vmem:[#allocation84_spill] sm:$0xff]  ;;  %v16980_v1 = vld [vmem:[#allocation85_spill] sm:$0xff] }
 0x5e8   :  { %16967 = vst [vmem:[#allocation74_spill] sm:$0xff] %v15155_v53  ;;  %7301 = vmatprep.mubr.bf16.mxu1 %v15135_v5  ;;  %16968 = vst [vmem:[#allocation76_spill] sm:$0xff] %v15158_v15  ;;  %v15185_v36 = vcombine.high %v5762_v33, %v5766_v10  ;;  %v16974_v45 = vld [vmem:[#allocation82_spill] sm:$0xff]  ;;  %v15204_v25 = vcombine.low %v5762_v33, %v5766_v10  ;;  %v16986_v10 = vld [vmem:[#allocation87_spill] sm:$0xff] }
 0x5e9   :  { %v5623_v0 = vmax.f32 %v5599_v28, 0.0  ;;  %v5707_v11 = vmax.f32 %v5683_v38, 0.0  ;;  %6791 = vmatpush1.bf16.msra.mxu0 %v16840_v17  ;;  %16972 = vst [vmem:[#allocation80_spill] sm:$0xff] %v15182_v35  ;;  %v5770_v8 = vld [vmem:[%s16380_s3 + $0x190] sm:$0xff]  ;;  %v16981_v28 = vld [vmem:[#allocation64_spill] sm:$0xff] }
 0x5ea   :  { %7403 = vmatpush1.bf16.msra.mxu1 %v16919_v60  ;;  %6792 = vmatprep.subr.bf16.mxu0 %v16926_v40  ;;  %16973 = vst [vmem:[#allocation130_spill] sm:$0xff] %v15185_v36  ;;  %v5774_v34 = vld [vmem:[%s16380_s3 + $0x1b0] sm:$0xff]  ;;  %16976 = vst [vmem:[#allocation82_spill] sm:$0xff] %v15204_v25 }
 0x5eb   :  { %7404 = vmatprep.subr.bf16.mxu1 %v16969_v27  ;;  %v15164_v62 = vpack.c.bf16 %v5623_v0, %v5622_v30  ;;  %v15166_v32 = vpack.c.bf16 %v5707_v11, %v5706_v51  ;;  %v15207_v55 = vcombine.high %v5770_v8, %v5774_v34  ;;  %v16978_v59 = vld [vmem:[#allocation86_spill] sm:$0xff]  ;;  %v16982_v51 = vld [vmem:[#allocation88_spill] sm:$0xff]  ;;  %v15226_v0 = vcombine.low %v5770_v8, %v5774_v34  ;;  %v16984_v11 = vld [vmem:[#allocation63_spill] sm:$0xff] }
 0x5ec   :  { %6690 = vmatmul.mubr.bf16.gmra.mrb[76].mxu0 %v15155_v53  ;;  %7302 = vmatmul.mubr.bf16.gmra.mrb[76].mxu1 %v15155_v53  ;;  %v5778_v38 = vld [vmem:[%s16380_s3 + $0x1d0] sm:$0xff] }
 0x5ed   :  { %16970 = vst [vmem:[#allocation78_spill] sm:$0xff] %v15166_v32  ;;  %6793 = vmatpush1.bf16.msra.mxu0 %v16844_v61  ;;  %6699 = vmatprep.mubr.bf16.mxu0 %v15158_v15  ;;  %16977 = vst [vmem:[#allocation84_spill] sm:$0xff] %v15207_v55  ;;  %v5782_v30 = vld [vmem:[%s16380_s3 + $0x1f0] sm:$0xff] }
 0x5ee   :  { %7405 = vmatpush1.bf16.msra.mxu1 %v16922_v16  ;;  %6794 = vmatprep.subr.bf16.mxu0 %v16931_v19  ;;  %16983 = vst [vmem:[#allocation86_spill] sm:$0xff] %v15226_v0  ;;  %v15229_v33 = vcombine.high %v5778_v38, %v5782_v30  ;;  %v16987_v32 = vld [vmem:[#allocation42_spill] sm:$0xff] }
 0x5ef   :  { %7406 = vmatprep.subr.bf16.mxu1 %v16971_v58  ;;  %7311 = vmatprep.mubr.bf16.mxu1 %v15158_v15  ;;  %v5786_v8 = vld [vmem:[%s16380_s3 + $0x210] sm:$0xff] }
 0x5f0   :  { %16985 = vst [vmem:[#allocation61_spill] sm:$0xff] %v15229_v33  ;;  %v5790_v34 = vld [vmem:[%s16380_s3 + $0x230] sm:$0xff] }
 0x5f1   :  { %6795 = vmatpush1.bf16.msra.mxu0 %v16927_v22 }
 0x5f2   :  { %7407 = vmatpush1.bf16.msra.mxu1 %v16928_v2  ;;  %6796 = vmatprep.subr.bf16.mxu0 %v16935_v23 }
 0x5f3   :  { %7408 = vmatprep.subr.bf16.mxu1 %v16974_v45 }
 0x5f4   :  { %6700 = vmatmul.mubr.bf16.gmra.mrb[80].mxu0 %v15182_v35  ;;  %7312 = vmatmul.mubr.bf16.gmra.mrb[80].mxu1 %v15182_v35 }
 0x5f5   :  { %6797 = vmatpush1.bf16.msra.mxu0 %v16849_v63  ;;  %6709 = vmatprep.mubr.bf16.mxu0 %v15185_v36 }
 0x5f6   :  { %7409 = vmatpush1.bf16.msra.mxu1 %v16933_v3  ;;  %6798 = vmatprep.subr.bf16.mxu0 %v16899_v43 }
 0x5f7   :  { %7410 = vmatprep.subr.bf16.mxu1 %v16975_v46  ;;  %7321 = vmatprep.mubr.bf16.mxu1 %v15185_v36  ;;  %v15246_v36 = vcombine.high %v5786_v8, %v5790_v34 }
 0x5f9   :  { %6799 = vmatpush1.bf16.msra.mxu0 %v16850_v7  ;;  %16990 = vst [vmem:[#allocation64_spill] sm:$0xff] %v15246_v36 }
 0x5fa   :  { %7411 = vmatpush1.bf16.msra.mxu1 %v16936_v14  ;;  %6800 = vmatprep.subr.bf16.mxu0 %v16902_v47 }
 0x5fb   :  { %7412 = vmatprep.subr.bf16.mxu1 %v16978_v59 }
 0x5fc   :  { %6710 = vmatmul.mubr.bf16.gmra.mrb[84].mxu0 %v15204_v25  ;;  %7322 = vmatmul.mubr.bf16.gmra.mrb[84].mxu1 %v15204_v25  ;;  %v16988_v25 = vld [vmem:[#allocation66_spill] sm:$0xff] }
 0x5fd   :  { %6801 = vmatpush1.bf16.msra.mxu0 %v16979_v49  ;;  %6719 = vmatprep.mubr.bf16.mxu0 %v15207_v55 }
 0x5fe   :  { %7413 = vmatpush1.bf16.msra.mxu1 %v16980_v1  ;;  %6802 = vmatprep.subr.bf16.mxu0 %v16981_v28 }
 0x5ff   :  { %7414 = vmatprep.subr.bf16.mxu1 %v16982_v51  ;;  %7331 = vmatprep.mubr.bf16.mxu1 %v15207_v55  ;;  %v15244_v55 = vcombine.low %v5778_v38, %v5782_v30  ;;  %v15258_v38 = vcombine.low %v5786_v8, %v5790_v34  ;;  %v8865_v8 = vld [vmem:[#allocation4] sm:$0xff] }
 0x600   :  { %8882 = vperm.xlu1 %11383, %v8865_v8  }
 0x601   :  { %6803 = vmatpush1.bf16.msra.mxu0 %v16984_v11  ;;  %16989 = vst [vmem:[#allocation85_spill] sm:$0xff] %v15244_v55  ;;  %16991 = vst [vmem:[#allocation88_spill] sm:$0xff] %v15258_v38 }
 0x602   :  { %7415 = vmatpush1.bf16.msra.mxu1 %v16986_v10  ;;  %7545 = vmatprep.subr.bf16.mxu0 %v16987_v32 }
 0x603   :  { %8157 = vmatprep.subr.bf16.mxu1 %v16988_v25 }
 0x604   :  { %6720 = vmatmul.mubr.bf16.gmra.mrb[88].mxu0 %v15226_v0  ;;  %7332 = vmatmul.mubr.bf16.gmra.mrb[88].mxu1 %v15226_v0  ;;  %v5798_v0 = vld [vmem:[%s16380_s3 + $0x270] sm:$0xff] }
 0x605   :  { %6729 = vmatprep.mubr.bf16.mxu0 %v15229_v33  ;;  %7341 = vmatprep.mubr.bf16.mxu1 %v15229_v33  ;;  %v5794_v33 = vld [vmem:[%s16380_s3 + $0x250] sm:$0xff] }
 0x606   :  { %v15260_v30 = vcombine.high %v5794_v33, %v5798_v0  ;;  %v15272_v34 = vcombine.low %v5794_v33, %v5798_v0  ;;  %v5814_v0 = vld [vmem:[%s16380_s3 + $0x2f0] sm:$0xff] }
 0x608   :  { %16992 = vst [vmem:[#allocation63_spill] sm:$0xff] %v15260_v30  ;;  %16993 = vst [vmem:[#allocation87_spill] sm:$0xff] %v15272_v34 }
 0x60c   :  { %6730 = vmatmul.mubr.bf16.gmra.mrb[92].mxu0 %v15244_v55  ;;  %7342 = vmatmul.mubr.bf16.gmra.mrb[92].mxu1 %v15244_v55  ;;  %v5806_v55 = vld [vmem:[%s16380_s3 + $0x2b0] sm:$0xff] }
 0x60d   :  { %6739 = vmatprep.mubr.bf16.mxu0 %v15246_v36  ;;  %7351 = vmatprep.mubr.bf16.mxu1 %v15246_v36  ;;  %v5802_v36 = vld [vmem:[%s16380_s3 + $0x290] sm:$0xff] }
 0x60e   :  { %v15274_v35 = vcombine.high %v5802_v36, %v5806_v55  ;;  %v15286_v33 = vcombine.low %v5802_v36, %v5806_v55 }
 0x610   :  { %16994 = vst [vmem:[#allocation42_spill] sm:$0xff] %v15274_v35  ;;  %16995 = vst [vmem:[#allocation66_spill] sm:$0xff] %v15286_v33 }
 0x614   :  { %6740 = vmatmul.mubr.bf16.gmra.mrb[96].mxu0 %v15258_v38  ;;  %7352 = vmatmul.mubr.bf16.gmra.mrb[96].mxu1 %v15258_v38  ;;  %v5810_v38 = vld [vmem:[%s16380_s3 + $0x2d0] sm:$0xff] }
 0x615   :  { %6749 = vmatprep.mubr.bf16.mxu0 %v15260_v30  ;;  %7361 = vmatprep.mubr.bf16.mxu1 %v15260_v30  ;;  %v8866_v30 = vld [vmem:[#allocation4 + $0x8] sm:$0xff]  ;;  %v15288_v8 = vcombine.high %v5810_v38, %v5814_v0  ;;  %v15300_v36 = vcombine.low %v5810_v38, %v5814_v0 }
 0x616   :  { %8887 = vperm.xlu1 %11383, %v8866_v30   ;;  %v5727_v30 = vld [vmem:[%s16380_s3 + $0x38] sm:$0xff] }
 0x617   :  { %16996 = vst [vmem:[#allocation131_spill] sm:$0xff] %v15288_v8  ;;  %16997 = vst [vmem:[#allocation132_spill] sm:$0xff] %v15300_v36  ;;  %v5731_v38 = vld [vmem:[%s16380_s3 + $0x58] sm:$0xff] }
 0x618   :  { %v5735_v0 = vld [vmem:[%s16380_s3 + $0x78] sm:$0xff] }
 0x61c   :  { %6750 = vmatmul.mubr.bf16.gmra.mrb[100].mxu0 %v15272_v34  ;;  %7362 = vmatmul.mubr.bf16.gmra.mrb[100].mxu1 %v15272_v34 }
 0x61d   :  { %6759 = vmatprep.mubr.bf16.mxu0 %v15274_v35  ;;  %7371 = vmatprep.mubr.bf16.mxu1 %v15274_v35  ;;  %v5723_v35 = vld [vmem:[%s16380_s3 + $0x18] sm:$0xff] }
 0x61e   :  { %v15302_v55 = vcombine.high %v5723_v35, %v5727_v30 }
 0x620   :  { %16998 = vst [vmem:[#allocation133_spill] sm:$0xff] %v15302_v55 }
 0x624   :  { %6760 = vmatmul.mubr.bf16.gmra.mrb[104].mxu0 %v15286_v33  ;;  %7372 = vmatmul.mubr.bf16.gmra.mrb[104].mxu1 %v15286_v33  ;;  %v15318_v33 = vcombine.high %v5731_v38, %v5735_v0 }
 0x625   :  { %6769 = vmatprep.mubr.bf16.mxu0 %v15288_v8  ;;  %7381 = vmatprep.mubr.bf16.mxu1 %v15288_v8  ;;  %v15310_v8 = vcombine.low %v5723_v35, %v5727_v30  ;;  %v15330_v35 = vcombine.low %v5731_v38, %v5735_v0  ;;  %v5739_v30 = vld [vmem:[%s16380_s3 + $0x98] sm:$0xff] }
 0x626   :  { %17000 = vst [vmem:[#allocation135_spill] sm:$0xff] %v15318_v33  ;;  %v5747_v38 = vld [vmem:[%s16380_s3 + $0xd8] sm:$0xff] }
 0x627   :  { %16999 = vst [vmem:[#allocation134_spill] sm:$0xff] %v15310_v8  ;;  %17001 = vst [vmem:[#allocation136_spill] sm:$0xff] %v15330_v35 }
 0x62c   :  { %6770 = vmatmul.mubr.bf16.gmra.mrb[108].mxu0 %v15300_v36  ;;  %7382 = vmatmul.mubr.bf16.gmra.mrb[108].mxu1 %v15300_v36  ;;  %v17083_v36 = vld [vmem:[#allocation62_spill] sm:$0xff] }
 0x62d   :  { %10349 = vmatprep.mubr.msk.bf16.mxu0 %vm6284_vm2, %v15302_v55  ;;  %10361 = vmatprep.mubr.msk.bf16.mxu1 %vm6284_vm2, %v15302_v55 }
 0x634   :  { %6813 = vmatmul.mubr.bf16.vlgmr.msra.gmra.mrb[64].mxu0 %v15310_v8  ;;  %7425 = vmatmul.mubr.bf16.vlgmr.msra.gmra.mrb[64].mxu1 %v15310_v8 }
 0x635   :  { %7546 = vmatpush1.bf16.msra.mxu0 %v16814_v13  ;;  %8158 = vmatpush1.bf16.msra.mxu1 %v16908_v39  ;;  %v5743_v13 = vld [vmem:[%s16380_s3 + $0xb8] sm:$0xff] }
 0x636   :  { %7547 = vmatprep.subr.bf16.mxu0 %v16860_v6  ;;  %8159 = vmatprep.subr.bf16.mxu1 %v16957_v50  ;;  %v15342_v8 = vcombine.high %v5739_v30, %v5743_v13 }
 0x637   :  { %10350 = vmatprep.mubr.msk.bf16.mxu0 %vm6284_vm2, %v15318_v33  ;;  %10362 = vmatprep.mubr.msk.bf16.mxu1 %vm6284_vm2, %v15318_v33 }
 0x638   :  { %17002 = vst [vmem:[#allocation137_spill] sm:$0xff] %v15342_v8 }
 0x639   :  { %7548 = vmatpush1.bf16.msra.mxu0 %v16815_v37  ;;  %8160 = vmatpush1.bf16.msra.mxu1 %v16909_v57  ;;  %v15354_v37 = vcombine.low %v5739_v30, %v5743_v13  ;;  %v5755_v30 = vld [vmem:[%s16380_s3 + $0x118] sm:$0xff] }
 0x63a   :  { %7549 = vmatprep.subr.bf16.mxu0 %v16863_v26  ;;  %8161 = vmatprep.subr.bf16.mxu1 %v16960_v9 }
 0x63b   :  { %17003 = vst [vmem:[#allocation138_spill] sm:$0xff] %v15354_v37 }
 0x63c   :  { %6823 = vmatmul.mubr.bf16.gmra.mrb[68].mxu0 %v15330_v35  ;;  %7435 = vmatmul.mubr.bf16.gmra.mrb[68].mxu1 %v15330_v35 }
 0x63d   :  { %7550 = vmatpush1.bf16.msra.mxu0 %v16867_v12  ;;  %8162 = vmatpush1.bf16.msra.mxu1 %v16912_v21  ;;  %v5751_v12 = vld [vmem:[%s16380_s3 + $0xf8] sm:$0xff] }
 0x63e   :  { %7551 = vmatprep.subr.bf16.mxu0 %v16869_v31  ;;  %8163 = vmatprep.subr.bf16.mxu1 %v16962_v41  ;;  %v15366_v0 = vcombine.high %v5747_v38, %v5751_v12 }
 0x63f   :  { %10351 = vmatprep.mubr.msk.bf16.mxu0 %vm6284_vm2, %v15342_v8  ;;  %10363 = vmatprep.mubr.msk.bf16.mxu1 %vm6284_vm2, %v15342_v8 }
 0x640   :  { %17004 = vst [vmem:[#allocation139_spill] sm:$0xff] %v15366_v0 }
 0x641   :  { %7552 = vmatpush1.bf16.msra.mxu0 %v16872_v56  ;;  %8164 = vmatpush1.bf16.msra.mxu1 %v16915_v44  ;;  %v15378_v56 = vcombine.low %v5747_v38, %v5751_v12  ;;  %v5763_v38 = vld [vmem:[%s16380_s3 + $0x158] sm:$0xff] }
 0x642   :  { %7553 = vmatprep.subr.bf16.mxu0 %v16874_v52  ;;  %8165 = vmatprep.subr.bf16.mxu1 %v16965_v18 }
 0x643   :  { %17005 = vst [vmem:[#allocation140_spill] sm:$0xff] %v15378_v56 }
 0x644   :  { %6833 = vmatmul.mubr.bf16.gmra.mrb[72].mxu0 %v15354_v37  ;;  %7445 = vmatmul.mubr.bf16.gmra.mrb[72].mxu1 %v15354_v37  ;;  %v17082_v37 = vld [vmem:[#allocation67_spill] sm:$0xff] }
 0x645   :  { %7554 = vmatpush1.bf16.msra.mxu0 %v16876_v29  ;;  %8166 = vmatpush1.bf16.msra.mxu1 %v16918_v48  ;;  %v5759_v29 = vld [vmem:[%s16380_s3 + $0x138] sm:$0xff] }
 0x646   :  { %7555 = vmatprep.subr.bf16.mxu0 %v16877_v24  ;;  %8167 = vmatprep.subr.bf16.mxu1 %v16966_v4  ;;  %v15390_v13 = vcombine.high %v5755_v30, %v5759_v29 }
 0x647   :  { %10352 = vmatprep.mubr.msk.bf16.mxu0 %vm6284_vm2, %v15366_v0  ;;  %10364 = vmatprep.mubr.msk.bf16.mxu1 %vm6284_vm2, %v15366_v0 }
 0x648   :  { %17006 = vst [vmem:[#allocation141_spill] sm:$0xff] %v15390_v13 }
 0x649   :  { %7556 = vmatpush1.bf16.msra.mxu0 %v16840_v17  ;;  %8168 = vmatpush1.bf16.msra.mxu1 %v16919_v60  ;;  %v15402_v17 = vcombine.low %v5755_v30, %v5759_v29  ;;  %v5771_v30 = vld [vmem:[%s16380_s3 + $0x198] sm:$0xff] }
 0x64a   :  { %7557 = vmatprep.subr.bf16.mxu0 %v16926_v40  ;;  %8169 = vmatprep.subr.bf16.mxu1 %v16969_v27 }
 0x64b   :  { %17007 = vst [vmem:[#allocation142_spill] sm:$0xff] %v15402_v17 }
 0x64c   :  { %6843 = vmatmul.mubr.bf16.gmra.mrb[76].mxu0 %v15378_v56  ;;  %7455 = vmatmul.mubr.bf16.gmra.mrb[76].mxu1 %v15378_v56 }
 0x64d   :  { %7558 = vmatpush1.bf16.msra.mxu0 %v16844_v61  ;;  %8170 = vmatpush1.bf16.msra.mxu1 %v16922_v16  ;;  %v5767_v61 = vld [vmem:[%s16380_s3 + $0x178] sm:$0xff] }
 0x64e   :  { %7559 = vmatprep.subr.bf16.mxu0 %v16931_v19  ;;  %8171 = vmatprep.subr.bf16.mxu1 %v16971_v58  ;;  %v15414_v12 = vcombine.high %v5763_v38, %v5767_v61 }
 0x64f   :  { %10353 = vmatprep.mubr.msk.bf16.mxu0 %vm6284_vm2, %v15390_v13  ;;  %10365 = vmatprep.mubr.msk.bf16.mxu1 %vm6284_vm2, %v15390_v13  ;;  %v17080_v13 = vld [vmem:[#allocation65_spill] sm:$0xff] }
 0x650   :  { %17008 = vst [vmem:[#allocation143_spill] sm:$0xff] %v15414_v12 }
 0x651   :  { %7560 = vmatpush1.bf16.msra.mxu0 %v16927_v22  ;;  %8172 = vmatpush1.bf16.msra.mxu1 %v16928_v2  ;;  %v15426_v22 = vcombine.low %v5763_v38, %v5767_v61  ;;  %v5779_v38 = vld [vmem:[%s16380_s3 + $0x1d8] sm:$0xff]  ;;  %v17012_v61 = vld [vmem:[#allocation16_spill] sm:$0xff] }
 0x652   :  { %7561 = vmatprep.subr.bf16.mxu0 %v16935_v23  ;;  %8173 = vmatprep.subr.bf16.mxu1 %v16974_v45 }
 0x653   :  { %17009 = vst [vmem:[#allocation144_spill] sm:$0xff] %v15426_v22 }
 0x654   :  { %6853 = vmatmul.mubr.bf16.gmra.mrb[80].mxu0 %v15402_v17  ;;  %7465 = vmatmul.mubr.bf16.gmra.mrb[80].mxu1 %v15402_v17 }
 0x655   :  { %7562 = vmatpush1.bf16.msra.mxu0 %v16849_v63  ;;  %8174 = vmatpush1.bf16.msra.mxu1 %v16933_v3  ;;  %v5775_v63 = vld [vmem:[%s16380_s3 + $0x1b8] sm:$0xff] }
 0x656   :  { %7563 = vmatprep.subr.bf16.mxu0 %v16899_v43  ;;  %8175 = vmatprep.subr.bf16.mxu1 %v16975_v46  ;;  %v15438_v29 = vcombine.high %v5771_v30, %v5775_v63 }
 0x657   :  { %10354 = vmatprep.mubr.msk.bf16.mxu0 %vm6284_vm2, %v15414_v12  ;;  %10366 = vmatprep.mubr.msk.bf16.mxu1 %vm6284_vm2, %v15414_v12 }
 0x658   :  { %17010 = vst [vmem:[#allocation145_spill] sm:$0xff] %v15438_v29 }
 0x659   :  { %7564 = vmatpush1.bf16.msra.mxu0 %v16850_v7  ;;  %8176 = vmatpush1.bf16.msra.mxu1 %v16936_v14  ;;  %v15450_v7 = vcombine.low %v5771_v30, %v5775_v63  ;;  %v17014_v30 = vld [vmem:[#allocation32_spill] sm:$0xff]  ;;  %v5787_v63 = vld [vmem:[%s16380_s3 + $0x218] sm:$0xff] }
 0x65a   :  { %7565 = vmatprep.subr.bf16.mxu0 %v16902_v47  ;;  %8177 = vmatprep.subr.bf16.mxu1 %v16978_v59 }
 0x65b   :  { %17011 = vst [vmem:[#allocation146_spill] sm:$0xff] %v15450_v7 }
 0x65c   :  { %6863 = vmatmul.mubr.bf16.gmra.mrb[84].mxu0 %v15426_v22  ;;  %7475 = vmatmul.mubr.bf16.gmra.mrb[84].mxu1 %v15426_v22 }
 0x65d   :  { %7566 = vmatpush1.bf16.msra.mxu0 %v16979_v49  ;;  %8178 = vmatpush1.bf16.msra.mxu1 %v16980_v1  ;;  %v5783_v49 = vld [vmem:[%s16380_s3 + $0x1f8] sm:$0xff] }
 0x65e   :  { %7567 = vmatprep.subr.bf16.mxu0 %v16981_v28  ;;  %8179 = vmatprep.subr.bf16.mxu1 %v16982_v51  ;;  %v15462_v22 = vcombine.high %v5779_v38, %v5783_v49 }
 0x65f   :  { %10355 = vmatprep.mubr.msk.bf16.mxu0 %vm6284_vm2, %v15438_v29  ;;  %10367 = vmatprep.mubr.msk.bf16.mxu1 %vm6284_vm2, %v15438_v29 }
 0x660   :  { %17013 = vst [vmem:[#allocation16_spill] sm:$0xff] %v15462_v22 }
 0x661   :  { %7568 = vmatpush1.bf16.msra.mxu0 %v16984_v11  ;;  %8180 = vmatpush1.bf16.msra.mxu1 %v16986_v10  ;;  %v15474_v11 = vcombine.low %v5779_v38, %v5783_v49  ;;  %v17018_v38 = vld [vmem:[#allocation19_spill] sm:$0xff] }
 0x662   :  { %7569 = vmatprep.subr.bf16.mxu0 %v16908_v39  ;;  %8181 = vmatprep.subr.bf16.mxu1 %v17012_v61  ;;  %v5799_v49 = vld [vmem:[%s16380_s3 + $0x278] sm:$0xff] }
 0x663   :  { %17015 = vst [vmem:[#allocation32_spill] sm:$0xff] %v15474_v11 }
 0x664   :  { %6873 = vmatmul.mubr.bf16.gmra.mrb[88].mxu0 %v15450_v7  ;;  %7485 = vmatmul.mubr.bf16.gmra.mrb[88].mxu1 %v15450_v7  ;;  %v17016_v7 = vld [vmem:[#allocation18_spill] sm:$0xff] }
 0x665   :  { %7570 = vmatpush1.bf16.msra.mxu0 %v16987_v32  ;;  %8182 = vmatpush1.bf16.msra.mxu1 %v16988_v25  ;;  %v5791_v32 = vld [vmem:[%s16380_s3 + $0x238] sm:$0xff] }
 0x666   :  { %7571 = vmatprep.subr.bf16.mxu0 %v16909_v57  ;;  %8183 = vmatprep.subr.bf16.mxu1 %v17014_v30  ;;  %v15486_v29 = vcombine.high %v5787_v63, %v5791_v32 }
 0x667   :  { %10356 = vmatprep.mubr.msk.bf16.mxu0 %vm6284_vm2, %v15462_v22  ;;  %10368 = vmatprep.mubr.msk.bf16.mxu1 %vm6284_vm2, %v15462_v22  ;;  %v17021_v22 = vld [vmem:[#allocation20_spill] sm:$0xff] }
 0x668   :  { %17017 = vst [vmem:[#allocation18_spill] sm:$0xff] %v15486_v29 }
 0x669   :  { %7572 = vmatpush1.bf16.msra.mxu0 %v16860_v6  ;;  %8184 = vmatpush1.bf16.msra.mxu1 %v16957_v50  ;;  %v5795_v6 = vld [vmem:[%s16380_s3 + $0x258] sm:$0xff] }
 0x66a   :  { %7573 = vmatprep.subr.bf16.mxu0 %v16912_v21  ;;  %8185 = vmatprep.subr.bf16.mxu1 %v17016_v7 }
 0x66c   :  { %6883 = vmatmul.mubr.bf16.gmra.mrb[92].mxu0 %v15474_v11  ;;  %7495 = vmatmul.mubr.bf16.gmra.mrb[92].mxu1 %v15474_v11  ;;  %v15508_v11 = vcombine.high %v5795_v6, %v5799_v49 }
 0x66d   :  { %7574 = vmatpush1.bf16.msra.mxu0 %v16863_v26  ;;  %8186 = vmatpush1.bf16.msra.mxu1 %v16960_v9  ;;  %v15504_v26 = vcombine.low %v5787_v63, %v5791_v32  ;;  %v5807_v63 = vld [vmem:[%s16380_s3 + $0x2b8] sm:$0xff]  ;;  %v15524_v32 = vcombine.low %v5795_v6, %v5799_v49 }
 0x66e   :  { %7575 = vmatprep.subr.bf16.mxu0 %v16915_v44  ;;  %8187 = vmatprep.subr.bf16.mxu1 %v17018_v38  ;;  %17020 = vst [vmem:[#allocation147_spill] sm:$0xff] %v15508_v11  ;;  %v5815_v6 = vld [vmem:[%s16380_s3 + $0x2f8] sm:$0xff] }
 0x66f   :  { %10357 = vmatprep.mubr.msk.bf16.mxu0 %vm6284_vm2, %v15486_v29  ;;  %10369 = vmatprep.mubr.msk.bf16.mxu1 %vm6284_vm2, %v15486_v29  ;;  %17019 = vst [vmem:[#allocation19_spill] sm:$0xff] %v15504_v26  ;;  %17022 = vst [vmem:[#allocation20_spill] sm:$0xff] %v15524_v32 }
 0x671   :  { %7576 = vmatpush1.bf16.msra.mxu0 %v16869_v31  ;;  %8188 = vmatpush1.bf16.msra.mxu1 %v16962_v41  ;;  %v5803_v31 = vld [vmem:[%s16380_s3 + $0x298] sm:$0xff] }
 0x672   :  { %7698 = vmatprep.subr.bf16.mxu0 %v16918_v48  ;;  %8310 = vmatprep.subr.bf16.mxu1 %v17021_v22  ;;  %v15526_v29 = vcombine.high %v5803_v31, %v5807_v63  ;;  %v15540_v49 = vcombine.low %v5803_v31, %v5807_v63  ;;  %v17027_v31 = vld [vmem:[#allocation41_spill] sm:$0xff]  ;;  %v17028_v63 = vld [vmem:[#allocation90_spill] sm:$0xff] }
 0x674   :  { %6893 = vmatmul.mubr.bf16.gmra.mrb[96].mxu0 %v15504_v26  ;;  %7505 = vmatmul.mubr.bf16.gmra.mrb[96].mxu1 %v15504_v26  ;;  %17023 = vst [vmem:[#allocation148_spill] sm:$0xff] %v15526_v29  ;;  %17024 = vst [vmem:[#allocation149_spill] sm:$0xff] %v15540_v49 }
 0x675   :  { %10358 = vmatprep.mubr.msk.bf16.mxu0 %vm6284_vm2, %v15508_v11  ;;  %10370 = vmatprep.mubr.msk.bf16.mxu1 %vm6284_vm2, %v15508_v11  ;;  %v5811_v11 = vld [vmem:[%s16380_s3 + $0x2d8] sm:$0xff] }
 0x676   :  { %v15542_v26 = vcombine.high %v5811_v11, %v5815_v6 }
 0x678   :  { %17025 = vst [vmem:[#allocation150_spill] sm:$0xff] %v15542_v26 }
 0x67c   :  { %6903 = vmatmul.mubr.bf16.gmra.mrb[100].mxu0 %v15524_v32  ;;  %7515 = vmatmul.mubr.bf16.gmra.mrb[100].mxu1 %v15524_v32  ;;  %v17079_v32 = vld [vmem:[#allocation102_spill] sm:$0xff] }
 0x67d   :  { %10359 = vmatprep.mubr.msk.bf16.mxu0 %vm6284_vm2, %v15526_v29  ;;  %10371 = vmatprep.mubr.msk.bf16.mxu1 %vm6284_vm2, %v15526_v29  ;;  %v15550_v29 = vcombine.low %v5811_v11, %v5815_v6  ;;  %v17029_v11 = vld [vmem:[#allocation21_spill] sm:$0xff]  ;;  %v17030_v6 = vld [vmem:[#allocation91_spill] sm:$0xff] }
 0x67f   :  { %17026 = vst [vmem:[#allocation151_spill] sm:$0xff] %v15550_v29 }
 0x684   :  { %6913 = vmatmul.mubr.bf16.gmra.mrb[104].mxu0 %v15540_v49  ;;  %7525 = vmatmul.mubr.bf16.gmra.mrb[104].mxu1 %v15540_v49 }
 0x685   :  { %10360 = vmatprep.mubr.msk.bf16.mxu0 %vm6284_vm2, %v15542_v26  ;;  %10372 = vmatprep.mubr.msk.bf16.mxu1 %vm6284_vm2, %v15542_v26  ;;  %v17065_v26 = vld [vmem:[#allocation105_spill] sm:$0xff] }
 0x68c   :  { %6923 = vmatmul.mubr.bf16.gmra.mrb[108].mxu0 %v15550_v29  ;;  %7535 = vmatmul.mubr.bf16.gmra.mrb[108].mxu1 %v15550_v29  ;;  %v17062_v29 = vld [vmem:[#allocation49_spill] sm:$0xff] }
 0x68d   :  { %7577 = vmatprep.mubr.bf16.mxu0 %v17027_v31  ;;  %8189 = vmatprep.mubr.bf16.mxu1 %v17027_v31  ;;  %v17031_v31 = vld [vmem:[#allocation22_spill] sm:$0xff] }
 0x694   :  { %7578 = vmatmul.mubr.bf16.vlgmr.msra.gmra.mrb[112].mxu0 %v17028_v63  ;;  %8190 = vmatmul.mubr.bf16.vlgmr.msra.gmra.mrb[112].mxu1 %v17028_v63  ;;  %v17032_v63 = vld [vmem:[#allocation51_spill] sm:$0xff] }
 0x695   :  { %7699 = vmatpush1.bf16.msra.mxu0 %v16874_v52  ;;  %8311 = vmatpush1.bf16.msra.mxu1 %v16965_v18  ;;  %v17033_v52 = vld [vmem:[#allocation25_spill] sm:$0xff] }
 0x696   :  { %7700 = vmatprep.subr.bf16.mxu0 %v16919_v60  ;;  %8312 = vmatprep.subr.bf16.mxu1 %v17029_v11 }
 0x697   :  { %7587 = vmatprep.mubr.bf16.mxu0 %v17030_v6  ;;  %8199 = vmatprep.mubr.bf16.mxu1 %v17030_v6  ;;  %v17034_v6 = vld [vmem:[#allocation92_spill] sm:$0xff] }
 0x699   :  { %7701 = vmatpush1.bf16.msra.mxu0 %v16877_v24  ;;  %8313 = vmatpush1.bf16.msra.mxu1 %v16966_v4  ;;  %v17035_v24 = vld [vmem:[#allocation24_spill] sm:$0xff] }
 0x69a   :  { %7702 = vmatprep.subr.bf16.mxu0 %v16922_v16  ;;  %8314 = vmatprep.subr.bf16.mxu1 %v17031_v31 }
 0x69c   :  { %7588 = vmatmul.mubr.bf16.gmra.mrb[116].mxu0 %v17032_v63  ;;  %8200 = vmatmul.mubr.bf16.gmra.mrb[116].mxu1 %v17032_v63  ;;  %v17036_v63 = vld [vmem:[#allocation94_spill] sm:$0xff] }
 0x69d   :  { %7703 = vmatpush1.bf16.msra.mxu0 %v16926_v40  ;;  %8315 = vmatpush1.bf16.msra.mxu1 %v16969_v27  ;;  %v17037_v40 = vld [vmem:[#allocation43_spill] sm:$0xff] }
 0x69e   :  { %7704 = vmatprep.subr.bf16.mxu0 %v16928_v2  ;;  %8316 = vmatprep.subr.bf16.mxu1 %v17033_v52 }
 0x69f   :  { %7597 = vmatprep.mubr.bf16.mxu0 %v17034_v6  ;;  %8209 = vmatprep.mubr.bf16.mxu1 %v17034_v6  ;;  %v17038_v6 = vld [vmem:[#allocation95_spill] sm:$0xff] }
 0x6a1   :  { %7705 = vmatpush1.bf16.msra.mxu0 %v16931_v19  ;;  %8317 = vmatpush1.bf16.msra.mxu1 %v16971_v58  ;;  %v17039_v19 = vld [vmem:[#allocation93_spill] sm:$0xff] }
 0x6a2   :  { %7706 = vmatprep.subr.bf16.mxu0 %v16933_v3  ;;  %8318 = vmatprep.subr.bf16.mxu1 %v17035_v24 }
 0x6a4   :  { %7598 = vmatmul.mubr.bf16.gmra.mrb[120].mxu0 %v17036_v63  ;;  %8210 = vmatmul.mubr.bf16.gmra.mrb[120].mxu1 %v17036_v63  ;;  %v17040_v63 = vld [vmem:[#allocation57_spill] sm:$0xff] }
 0x6a5   :  { %7707 = vmatpush1.bf16.msra.mxu0 %v16935_v23  ;;  %8319 = vmatpush1.bf16.msra.mxu1 %v16974_v45  ;;  %v17041_v23 = vld [vmem:[#allocation96_spill] sm:$0xff] }
 0x6a6   :  { %7708 = vmatprep.subr.bf16.mxu0 %v16936_v14  ;;  %8320 = vmatprep.subr.bf16.mxu1 %v17037_v40 }
 0x6a7   :  { %7607 = vmatprep.mubr.bf16.mxu0 %v17038_v6  ;;  %8219 = vmatprep.mubr.bf16.mxu1 %v17038_v6  ;;  %v17042_v6 = vld [vmem:[#allocation59_spill] sm:$0xff] }
 0x6a9   :  { %7709 = vmatpush1.bf16.msra.mxu0 %v16899_v43  ;;  %8321 = vmatpush1.bf16.msra.mxu1 %v16975_v46  ;;  %v17043_v43 = vld [vmem:[#allocation23_spill] sm:$0xff] }
 0x6aa   :  { %7710 = vmatprep.subr.bf16.mxu0 %v16980_v1  ;;  %8322 = vmatprep.subr.bf16.mxu1 %v17039_v19 }
 0x6ac   :  { %7608 = vmatmul.mubr.bf16.gmra.mrb[124].mxu0 %v17040_v63  ;;  %8220 = vmatmul.mubr.bf16.gmra.mrb[124].mxu1 %v17040_v63  ;;  %v17044_v63 = vld [vmem:[#allocation98_spill] sm:$0xff] }
 0x6ad   :  { %7711 = vmatpush1.bf16.msra.mxu0 %v16902_v47  ;;  %8323 = vmatpush1.bf16.msra.mxu1 %v16978_v59  ;;  %v17045_v47 = vld [vmem:[#allocation17_spill] sm:$0xff] }
 0x6ae   :  { %7712 = vmatprep.subr.bf16.mxu0 %v16986_v10  ;;  %8324 = vmatprep.subr.bf16.mxu1 %v17041_v23 }
 0x6af   :  { %7617 = vmatprep.mubr.bf16.mxu0 %v17042_v6  ;;  %8229 = vmatprep.mubr.bf16.mxu1 %v17042_v6  ;;  %v17046_v6 = vld [vmem:[#allocation99_spill] sm:$0xff] }
 0x6b1   :  { %7713 = vmatpush1.bf16.msra.mxu0 %v16981_v28  ;;  %8325 = vmatpush1.bf16.msra.mxu1 %v16982_v51  ;;  %v17047_v28 = vld [vmem:[#allocation34_spill] sm:$0xff] }
 0x6b2   :  { %7714 = vmatprep.subr.bf16.mxu0 %v16988_v25  ;;  %8326 = vmatprep.subr.bf16.mxu1 %v17043_v43 }
 0x6b4   :  { %7618 = vmatmul.mubr.bf16.gmra.mrb[128].mxu0 %v17044_v63  ;;  %8230 = vmatmul.mubr.bf16.gmra.mrb[128].mxu1 %v17044_v63  ;;  %v17048_v63 = vld [vmem:[#allocation44_spill] sm:$0xff] }
 0x6b5   :  { %7715 = vmatpush1.bf16.msra.mxu0 %v16908_v39  ;;  %8327 = vmatpush1.bf16.msra.mxu1 %v17012_v61  ;;  %v17049_v39 = vld [vmem:[#allocation35_spill] sm:$0xff] }
 0x6b6   :  { %7716 = vmatprep.subr.bf16.mxu0 %v16957_v50  ;;  %8328 = vmatprep.subr.bf16.mxu1 %v17045_v47 }
 0x6b7   :  { %7627 = vmatprep.mubr.bf16.mxu0 %v17046_v6  ;;  %8239 = vmatprep.mubr.bf16.mxu1 %v17046_v6  ;;  %v17050_v6 = vld [vmem:[#allocation100_spill] sm:$0xff] }
 0x6b9   :  { %7717 = vmatpush1.bf16.msra.mxu0 %v16909_v57  ;;  %8329 = vmatpush1.bf16.msra.mxu1 %v17014_v30  ;;  %v17051_v57 = vld [vmem:[#allocation36_spill] sm:$0xff] }
 0x6ba   :  { %7718 = vmatprep.subr.bf16.mxu0 %v16960_v9  ;;  %8330 = vmatprep.subr.bf16.mxu1 %v17047_v28 }
 0x6bc   :  { %7628 = vmatmul.mubr.bf16.gmra.mrb[132].mxu0 %v17048_v63  ;;  %8240 = vmatmul.mubr.bf16.gmra.mrb[132].mxu1 %v17048_v63  ;;  %v17052_v63 = vld [vmem:[#allocation26_spill] sm:$0xff] }
 0x6bd   :  { %7719 = vmatpush1.bf16.msra.mxu0 %v16912_v21  ;;  %8331 = vmatpush1.bf16.msra.mxu1 %v17016_v7  ;;  %v17053_v21 = vld [vmem:[#allocation37_spill] sm:$0xff] }
 0x6be   :  { %7720 = vmatprep.subr.bf16.mxu0 %v16962_v41  ;;  %8332 = vmatprep.subr.bf16.mxu1 %v17049_v39 }
 0x6bf   :  { %7637 = vmatprep.mubr.bf16.mxu0 %v17050_v6  ;;  %8249 = vmatprep.mubr.bf16.mxu1 %v17050_v6  ;;  %v17054_v6 = vld [vmem:[#allocation45_spill] sm:$0xff] }
 0x6c1   :  { %7721 = vmatpush1.bf16.msra.mxu0 %v16915_v44  ;;  %8333 = vmatpush1.bf16.msra.mxu1 %v17018_v38  ;;  %v17055_v44 = vld [vmem:[#allocation38_spill] sm:$0xff] }
 0x6c2   :  { %7722 = vmatprep.subr.bf16.mxu0 %v16965_v18  ;;  %8334 = vmatprep.subr.bf16.mxu1 %v17051_v57 }
 0x6c4   :  { %7638 = vmatmul.mubr.bf16.gmra.mrb[136].mxu0 %v17052_v63  ;;  %8250 = vmatmul.mubr.bf16.gmra.mrb[136].mxu1 %v17052_v63  ;;  %v17056_v63 = vld [vmem:[#allocation27_spill] sm:$0xff] }
 0x6c5   :  { %7723 = vmatpush1.bf16.msra.mxu0 %v16918_v48  ;;  %8335 = vmatpush1.bf16.msra.mxu1 %v17021_v22  ;;  %v17057_v48 = vld [vmem:[#allocation39_spill] sm:$0xff] }
 0x6c6   :  { %7724 = vmatprep.subr.bf16.mxu0 %v16966_v4  ;;  %8336 = vmatprep.subr.bf16.mxu1 %v17053_v21 }
 0x6c7   :  { %7647 = vmatprep.mubr.bf16.mxu0 %v17054_v6  ;;  %8259 = vmatprep.mubr.bf16.mxu1 %v17054_v6  ;;  %v17058_v6 = vld [vmem:[#allocation48_spill] sm:$0xff] }
 0x6c9   :  { %7725 = vmatpush1.bf16.msra.mxu0 %v16919_v60  ;;  %8337 = vmatpush1.bf16.msra.mxu1 %v17029_v11  ;;  %v17059_v60 = vld [vmem:[#allocation40_spill] sm:$0xff] }
 0x6ca   :  { %7726 = vmatprep.subr.bf16.mxu0 %v16969_v27  ;;  %8338 = vmatprep.subr.bf16.mxu1 %v17055_v44 }
 0x6cc   :  { %7648 = vmatmul.mubr.bf16.gmra.mrb[140].mxu0 %v17056_v63  ;;  %8260 = vmatmul.mubr.bf16.gmra.mrb[140].mxu1 %v17056_v63  ;;  %v17060_v63 = vld [vmem:[#allocation50_spill] sm:$0xff] }
 0x6cd   :  { %7727 = vmatpush1.bf16.msra.mxu0 %v16922_v16  ;;  %8339 = vmatpush1.bf16.msra.mxu1 %v17031_v31  ;;  %v17061_v16 = vld [vmem:[#allocation29_spill] sm:$0xff] }
 0x6ce   :  { %7728 = vmatprep.subr.bf16.mxu0 %v16971_v58  ;;  %8340 = vmatprep.subr.bf16.mxu1 %v17057_v48 }
 0x6cf   :  { %7657 = vmatprep.mubr.bf16.mxu0 %v17058_v6  ;;  %8269 = vmatprep.mubr.bf16.mxu1 %v17058_v6  ;;  %v17063_v6 = vld [vmem:[#allocation52_spill] sm:$0xff] }
 0x6d1   :  { %7729 = vmatpush1.bf16.msra.mxu0 %v16928_v2  ;;  %8341 = vmatpush1.bf16.msra.mxu1 %v17033_v52  ;;  %v17064_v2 = vld [vmem:[#allocation104_spill] sm:$0xff] }
 0x6d2   :  { %7851 = vmatprep.subr.bf16.mxu0 %v16974_v45  ;;  %8463 = vmatprep.subr.bf16.mxu1 %v17059_v60 }
 0x6d4   :  { %7658 = vmatmul.mubr.bf16.gmra.mrb[144].mxu0 %v17060_v63  ;;  %8270 = vmatmul.mubr.bf16.gmra.mrb[144].mxu1 %v17060_v63  ;;  %v17066_v63 = vld [vmem:[#allocation106_spill] sm:$0xff] }
 0x6d5   :  { %7667 = vmatprep.mubr.bf16.mxu0 %v17061_v16  ;;  %8279 = vmatprep.mubr.bf16.mxu1 %v17061_v16  ;;  %v17067_v16 = vld [vmem:[#allocation107_spill] sm:$0xff] }
 0x6dc   :  { %7668 = vmatmul.mubr.bf16.gmra.mrb[148].mxu0 %v17062_v29  ;;  %8280 = vmatmul.mubr.bf16.gmra.mrb[148].mxu1 %v17062_v29  ;;  %v17068_v29 = vld [vmem:[#allocation110_spill] sm:$0xff] }
 0x6dd   :  { %7677 = vmatprep.mubr.bf16.mxu0 %v17063_v6  ;;  %8289 = vmatprep.mubr.bf16.mxu1 %v17063_v6  ;;  %v17069_v6 = vld [vmem:[#allocation89_spill] sm:$0xff] }
 0x6e4   :  { %7678 = vmatmul.mubr.bf16.gmra.mrb[152].mxu0 %v17064_v2  ;;  %8290 = vmatmul.mubr.bf16.gmra.mrb[152].mxu1 %v17064_v2  ;;  %v17071_v2 = vld [vmem:[#allocation53_spill] sm:$0xff] }
 0x6e5   :  { %7687 = vmatprep.mubr.bf16.mxu0 %v17065_v26  ;;  %8299 = vmatprep.mubr.bf16.mxu1 %v17065_v26  ;;  %v17070_v26 = vld [vmem:[#allocation111_spill] sm:$0xff] }
 0x6ec   :  { %7688 = vmatmul.mubr.bf16.gmra.mrb[156].mxu0 %v17066_v63  ;;  %8300 = vmatmul.mubr.bf16.gmra.mrb[156].mxu1 %v17066_v63  ;;  %v17072_v63 = vld [vmem:[#allocation60_spill] sm:$0xff] }
 0x6ed   :  { %7730 = vmatprep.mubr.bf16.mxu0 %v17067_v16  ;;  %8342 = vmatprep.mubr.bf16.mxu1 %v17067_v16  ;;  %v17074_v16 = vld [vmem:[#allocation112_spill] sm:$0xff] }
 0x6f4   :  { %7731 = vmatmul.mubr.bf16.vlgmr.msra.gmra.mrb[112].mxu0 %v17068_v29  ;;  %8343 = vmatmul.mubr.bf16.vlgmr.msra.gmra.mrb[112].mxu1 %v17068_v29  ;;  %v17076_v29 = vld [vmem:[#allocation114_spill] sm:$0xff] }
 0x6f5   :  { %7852 = vmatpush1.bf16.msra.mxu0 %v16933_v3  ;;  %8464 = vmatpush1.bf16.msra.mxu1 %v17035_v24  ;;  %v17073_v3 = vld [vmem:[#allocation97_spill] sm:$0xff] }
 0x6f6   :  { %7853 = vmatprep.subr.bf16.mxu0 %v16975_v46  ;;  %8465 = vmatprep.subr.bf16.mxu1 %v17069_v6 }
 0x6f7   :  { %7740 = vmatprep.mubr.bf16.mxu0 %v17070_v26  ;;  %8352 = vmatprep.mubr.bf16.mxu1 %v17070_v26 }
 0x6f9   :  { %7854 = vmatpush1.bf16.msra.mxu0 %v16936_v14  ;;  %8466 = vmatpush1.bf16.msra.mxu1 %v17037_v40  ;;  %v17075_v14 = vld [vmem:[#allocation46_spill] sm:$0xff] }
 0x6fa   :  { %7855 = vmatprep.subr.bf16.mxu0 %v16978_v59  ;;  %8467 = vmatprep.subr.bf16.mxu1 %v17071_v2 }
 0x6fc   :  { %7741 = vmatmul.mubr.bf16.gmra.mrb[116].mxu0 %v17072_v63  ;;  %8353 = vmatmul.mubr.bf16.gmra.mrb[116].mxu1 %v17072_v63  ;;  %v17078_v63 = vld [vmem:[#allocation115_spill] sm:$0xff] }
 0x6fd   :  { %7856 = vmatpush1.bf16.msra.mxu0 %v16980_v1  ;;  %8468 = vmatpush1.bf16.msra.mxu1 %v17039_v19  ;;  %v17077_v1 = vld [vmem:[#allocation28_spill] sm:$0xff] }
 0x6fe   :  { %7857 = vmatprep.subr.bf16.mxu0 %v16982_v51  ;;  %8469 = vmatprep.subr.bf16.mxu1 %v17073_v3 }
 0x6ff   :  { %7750 = vmatprep.mubr.bf16.mxu0 %v17074_v16  ;;  %8362 = vmatprep.mubr.bf16.mxu1 %v17074_v16 }
 0x701   :  { %7858 = vmatpush1.bf16.msra.mxu0 %v16986_v10  ;;  %8470 = vmatpush1.bf16.msra.mxu1 %v17041_v23 }
 0x702   :  { %7859 = vmatprep.subr.bf16.mxu0 %v17012_v61  ;;  %8471 = vmatprep.subr.bf16.mxu1 %v17075_v14 }
 0x704   :  { %7751 = vmatmul.mubr.bf16.gmra.mrb[120].mxu0 %v17076_v29  ;;  %8363 = vmatmul.mubr.bf16.gmra.mrb[120].mxu1 %v17076_v29 }
 0x705   :  { %7860 = vmatpush1.bf16.msra.mxu0 %v16988_v25  ;;  %8472 = vmatpush1.bf16.msra.mxu1 %v17043_v43 }
 0x706   :  { %7861 = vmatprep.subr.bf16.mxu0 %v17014_v30  ;;  %8473 = vmatprep.subr.bf16.mxu1 %v17077_v1 }
 0x707   :  { %v6814_v26 = vpop.f32.mrb[64].mxu0  ;;  %v7426_v10 = vpop.f32.mrb[64].mxu1  ;;  %7760 = vmatprep.mubr.bf16.mxu0 %v17078_v63  ;;  %8372 = vmatprep.mubr.bf16.mxu1 %v17078_v63 }
 0x708   :  { %v6816_v16 = vpop.f32.mrb[65].mxu0  ;;  %v7428_v49 = vpop.f32.mrb[65].mxu1 }
 0x709   :  { %7862 = vmatpush1.bf16.msra.mxu0 %v16957_v50  ;;  %8474 = vmatpush1.bf16.msra.mxu1 %v17045_v47  ;;  %v15702_v29 = vpop.f32.mrb[66].mxu0  ;;  %v15704_v25 = vpop.f32.mrb[66].mxu1  ;;  %v17081_v50 = vld [vmem:[#allocation108_spill] sm:$0xff] }
 0x70a   :  { %7863 = vmatprep.subr.bf16.mxu0 %v17016_v7  ;;  %8475 = vmatprep.subr.bf16.mxu1 %v17079_v32  ;;  %v6820_v12 = vpop.f32.mrb[67].mxu0  ;;  %v7432_v17 = vpop.f32.mrb[67].mxu1 }
 0x70b   :  { %v15714_v63 = vpop.permute.xlu1 %8882 }
 0x70c   :  { %7761 = vmatmul.mubr.bf16.gmra.mrb[124].mxu0 %v17080_v13  ;;  %8373 = vmatmul.mubr.bf16.gmra.mrb[124].mxu1 %v17080_v13 }
 0x70d   :  { %7864 = vmatpush1.bf16.msra.mxu0 %v16960_v9  ;;  %8476 = vmatpush1.bf16.msra.mxu1 %v17047_v28 }
 0x70e   :  { %7865 = vmatprep.subr.bf16.mxu0 %v17018_v38  ;;  %8477 = vmatprep.subr.bf16.mxu1 %v17081_v50 }
 0x70f   :  { %v6824_v56 = vpop.f32.mrb[68].mxu0  ;;  %v7436_v0 = vpop.f32.mrb[68].mxu1  ;;  %7770 = vmatprep.mubr.bf16.mxu0 %v17082_v37  ;;  %8382 = vmatprep.mubr.bf16.mxu1 %v17082_v37 }
 0x710   :  { %v6826_v8 = vpop.f32.mrb[69].mxu0  ;;  %v7438_v35 = vpop.f32.mrb[69].mxu1 }
 0x711   :  { %7866 = vmatpush1.bf16.msra.mxu0 %v16962_v41  ;;  %8478 = vmatpush1.bf16.msra.mxu1 %v17049_v39  ;;  %v6828_v9 = vpop.f32.mrb[70].mxu0  ;;  %v7440_v13 = vpop.f32.mrb[70].mxu1 }
 0x712   :  { %v8769_v33 = vmax.f32 %v6814_v26, %v6828_v9  ;;  %v8771_v55 = vmax.f32 %v7426_v10, %v7440_v13  ;;  %7867 = vmatprep.subr.bf16.mxu0 %v17021_v22  ;;  %8479 = vmatprep.subr.bf16.mxu1 %v17083_v36  ;;  %v6830_v34 = vpop.f32.mrb[71].mxu0  ;;  %v7442_v15 = vpop.f32.mrb[71].mxu1  ;;  %v17085_v26 = vld [vmem:[#allocation69_spill] sm:$0xff] }
 0x713   :  { %v8770_v53 = vmax.f32 %v6816_v16, %v6830_v34  ;;  %v8772_v5 = vmax.f32 %v7428_v49, %v7442_v15  ;;  %v15728_v10 = vpop.permute.xlu1 %8887  ;;  %v17086_v34 = vld [vmem:[#allocation117_spill] sm:$0xff] }
 0x714   :  { %7771 = vmatmul.mubr.bf16.gmra.mrb[128].mxu0 %v17084_v20  ;;  %8383 = vmatmul.mubr.bf16.gmra.mrb[128].mxu1 %v17084_v20 }
 0x715   :  { %v8868_v37 = vmax.f32 %v8769_v33, %v8770_v53  ;;  %v8919_v41 = vmax.f32 %v8771_v55, %v8772_v5  ;;  %7868 = vmatpush1.bf16.msra.mxu0 %v16965_v18  ;;  %8480 = vmatpush1.bf16.msra.mxu1 %v17051_v57 }
 0x716   :  { %7869 = vmatprep.subr.bf16.mxu0 %v17029_v11  ;;  %8481 = vmatprep.subr.bf16.mxu1 %v17085_v26 }
 0x717   :  { %v6834_v9 = vpop.f32.mrb[72].mxu0  ;;  %v7446_v13 = vpop.f32.mrb[72].mxu1  ;;  %7780 = vmatprep.mubr.bf16.mxu0 %v17086_v34  ;;  %8392 = vmatprep.mubr.bf16.mxu1 %v17086_v34  ;;  %v8931_v20 = vadd.f32 %v8919_v41, %v15714_v63  ;;  %v8895_v5 = vadd.f32 %v15714_v63, %v8868_v37  ;;  %v17087_v37 = vld [vmem:[#allocation77_spill] sm:$0xff] }
 0x718   :  { %v8777_v18 = vmax.f32 %v15702_v29, %v6834_v9  ;;  %v8779_v53 = vmax.f32 %v15704_v25, %v7446_v13  ;;  %v6836_v15 = vpop.f32.mrb[73].mxu0  ;;  %v7448_v33 = vpop.f32.mrb[73].mxu1 }
 0x719   :  { %v8778_v55 = vmax.f32 %v6820_v12, %v6836_v15  ;;  %v8780_v49 = vmax.f32 %v7432_v17, %v7448_v33  ;;  %7870 = vmatpush1.bf16.msra.mxu0 %v16966_v4  ;;  %8482 = vmatpush1.bf16.msra.mxu1 %v17053_v21  ;;  %v6838_v16 = vpop.f32.mrb[74].mxu0  ;;  %v7450_v26 = vpop.f32.mrb[74].mxu1  ;;  %v8943_v11 = vmax.f32 %v8931_v20, 0.0  ;;  %v8907_v34 = vmax.f32 %v8895_v5, 0.0  ;;  %v17088_v4 = vld [vmem:[#allocation73_spill] sm:$0xff] }
 0x71a   :  { %v8785_v36 = vmax.f32 %v6824_v56, %v6838_v16  ;;  %v8787_v41 = vmax.f32 %v7436_v0, %v7450_v26  ;;  %7871 = vmatprep.subr.bf16.mxu0 %v17031_v31  ;;  %8483 = vmatprep.subr.bf16.mxu1 %v17087_v37  ;;  %v6840_v29 = vpop.f32.mrb[75].mxu0  ;;  %v7452_v25 = vpop.f32.mrb[75].mxu1  ;;  %v17089_v26 = vld [vmem:[#allocation31_spill] sm:$0xff] }
 0x71b   :  { %v8869_v9 = vmax.f32 %v8777_v18, %v8778_v55  ;;  %v8920_v13 = vmax.f32 %v8779_v53, %v8780_v49  ;;  %v8786_v12 = vmax.f32 %v6826_v8, %v6840_v29  ;;  %v8788_v17 = vmax.f32 %v7438_v35, %v7452_v25  ;;  %9028 = vst [vmem:[%s16387_s10 + $0x8] sm:$0xff] %v8943_v11  ;;  %v15751_v35 = vpop.permute.xlu0 %8892  ;;  %v17090_v53 = vld [vmem:[#allocation75_spill] sm:$0xff] }
 0x71c   :  { %9027 = vst [vmem:[%s16387_s10] sm:$0xff] %v8907_v34  ;;  %7781 = vmatmul.mubr.bf16.gmra.mrb[132].mxu0 %v17088_v4  ;;  %8393 = vmatmul.mubr.bf16.gmra.mrb[132].mxu1 %v17088_v4 }
 0x71d   :  { %v8870_v0 = vmax.f32 %v8785_v36, %v8786_v12  ;;  %v8921_v56 = vmax.f32 %v8787_v41, %v8788_v17  ;;  %7872 = vmatpush1.bf16.msra.mxu0 %v16969_v27  ;;  %8484 = vmatpush1.bf16.msra.mxu1 %v17055_v44  ;;  %v8932_v8 = vadd.f32 %v8920_v13, %v15728_v10  ;;  %v17092_v13 = vld [vmem:[#allocation119_spill] sm:$0xff] }
 0x71e   :  { %7873 = vmatprep.subr.bf16.mxu0 %v17033_v52  ;;  %8485 = vmatprep.subr.bf16.mxu1 %v17089_v26  ;;  %v8896_v20 = vadd.f32 %v15728_v10, %v8869_v9 }
 0x71f   :  { %v15757_v5 = vadd.f32 %v15751_v35, %v8870_v0  ;;  %v15760_v36 = vadd.f32 %v8921_v56, %v15751_v35  ;;  %v6844_v18 = vpop.f32.mrb[76].mxu0  ;;  %v7456_v27 = vpop.f32.mrb[76].mxu1  ;;  %7790 = vmatprep.mubr.bf16.mxu0 %v17090_v53  ;;  %8402 = vmatprep.mubr.bf16.mxu1 %v17090_v53  ;;  %v8944_v15 = vmax.f32 %v8932_v8, 0.0  ;;  %v17096_v56 = vld [vmem:[#allocation54_spill] sm:$0xff] }
 0x720   :  { %v6846_v33 = vpop.f32.mrb[77].mxu0  ;;  %v7458_v55 = vpop.f32.mrb[77].mxu1  ;;  %v8908_v49 = vmax.f32 %v8896_v20, 0.0 }
 0x721   :  { %v16704_v16 = vmax.f32 %v15757_v5, 0.0  ;;  %v16703_v41 = vmax.f32 %v15760_v36, 0.0  ;;  %7874 = vmatpush1.bf16.msra.mxu0 %v16971_v58  ;;  %8486 = vmatpush1.bf16.msra.mxu1 %v17057_v48  ;;  %v15768_v29 = vpop.f32.mrb[78].mxu0  ;;  %v15770_v25 = vpop.f32.mrb[78].mxu1  ;;  %9032 = vst [vmem:[%s16387_s10 + $0x28] sm:$0xff] %v8944_v15  ;;  %v15775_v9 = vpack.c.bf16 %v8944_v15, %v8943_v11  ;;  %v17094_v11 = vld [vmem:[#allocation30_spill] sm:$0xff] }
 0x722   :  { %7875 = vmatprep.subr.bf16.mxu0 %v17035_v24  ;;  %8487 = vmatprep.subr.bf16.mxu1 %v17092_v13  ;;  %v15779_v12 = vpop.f32.mrb[79].mxu0  ;;  %v15781_v17 = vpop.f32.mrb[79].mxu1  ;;  %9031 = vst [vmem:[%s16387_s10 + $0x20] sm:$0xff] %v8908_v49  ;;  %v15786_v58 = vpack.c.bf16 %v8908_v49, %v8907_v34  ;;  %v17095_v34 = vld [vmem:[#allocation125_spill] sm:$0xff] }
 0x723   :  { %17091 = vst [vmem:[#allocation41_spill] sm:$0xff] %v15775_v9  ;;  %9035 = vst [vmem:[%s16387_s10 + $0x40] sm:$0xff] %v16704_v16  ;;  %v17097_v9 = vld [vmem:[#allocation55_spill] sm:$0xff] }
 0x724   :  { %17093 = vst [vmem:[#allocation90_spill] sm:$0xff] %v15786_v58  ;;  %9036 = vst [vmem:[%s16387_s10 + $0x48] sm:$0xff] %v16703_v41  ;;  %7791 = vmatmul.mubr.bf16.gmra.mrb[136].mxu0 %v17094_v11  ;;  %8403 = vmatmul.mubr.bf16.gmra.mrb[136].mxu1 %v17094_v11 }
 0x725   :  { %7876 = vmatpush1.bf16.msra.mxu0 %v16974_v45  ;;  %8488 = vmatpush1.bf16.msra.mxu1 %v17059_v60 }
 0x726   :  { %7877 = vmatprep.subr.bf16.mxu0 %v17037_v40  ;;  %8489 = vmatprep.subr.bf16.mxu1 %v17095_v34 }
 0x727   :  { %v15804_v4 = vpop.f32.mrb[80].mxu0  ;;  %v15806_v0 = vpop.f32.mrb[80].mxu1  ;;  %7800 = vmatprep.mubr.bf16.mxu0 %v17096_v56  ;;  %8412 = vmatprep.mubr.bf16.mxu1 %v17096_v56 }
 0x728   :  { %v6856_v8 = vpop.f32.mrb[81].mxu0  ;;  %v7468_v20 = vpop.f32.mrb[81].mxu1 }
 0x729   :  { %7878 = vmatpush1.bf16.msra.mxu0 %v16975_v46  ;;  %8490 = vmatpush1.bf16.msra.mxu1 %v17069_v6  ;;  %v6858_v45 = vpop.f32.mrb[82].mxu0  ;;  %v7470_v53 = vpop.f32.mrb[82].mxu1 }
 0x72a   :  { %v8793_v15 = vmax.f32 %v6844_v18, %v6858_v45  ;;  %v8795_v49 = vmax.f32 %v7456_v27, %v7470_v53  ;;  %7879 = vmatprep.subr.bf16.mxu0 %v17039_v19  ;;  %8491 = vmatprep.subr.bf16.mxu1 %v15112_v42  ;;  %v6860_v11 = vpop.f32.mrb[83].mxu0  ;;  %v7472_v41 = vpop.f32.mrb[83].mxu1 }
 0x72b   :  { %v8794_v16 = vmax.f32 %v6846_v33, %v6860_v11  ;;  %v8796_v58 = vmax.f32 %v7458_v55, %v7472_v41  ;;  %v17098_v41 = vld [vmem:[#allocation79_spill] sm:$0xff] }
 0x72c   :  { %7801 = vmatmul.mubr.bf16.gmra.mrb[140].mxu0 %v17097_v9  ;;  %8413 = vmatmul.mubr.bf16.gmra.mrb[140].mxu1 %v17097_v9 }
 0x72d   :  { %v8871_v56 = vmax.f32 %v8793_v15, %v8794_v16  ;;  %v8922_v46 = vmax.f32 %v8795_v49, %v8796_v58  ;;  %7880 = vmatpush1.bf16.msra.mxu0 %v16978_v59  ;;  %8492 = vmatpush1.bf16.msra.mxu1 %v17071_v2 }
 0x72e   :  { %7881 = vmatprep.subr.bf16.mxu0 %v17041_v23  ;;  %8493 = vmatprep.subr.bf16.mxu1 %v15164_v62 }
 0x72f   :  { %v8898_v18 = vadd.f32 %v15714_v63, %v8871_v56  ;;  %v8934_v27 = vadd.f32 %v8922_v46, %v15714_v63  ;;  %v6864_v33 = vpop.f32.mrb[84].mxu0  ;;  %v7476_v55 = vpop.f32.mrb[84].mxu1  ;;  %7810 = vmatprep.mubr.bf16.mxu0 %v17098_v41  ;;  %8422 = vmatprep.mubr.bf16.mxu1 %v17098_v41  ;;  %v17104_v41 = vld [vmem:[#allocation81_spill] sm:$0xff] }
 0x730   :  { %v8801_v16 = vmax.f32 %v15768_v29, %v6864_v33  ;;  %v8803_v59 = vmax.f32 %v15770_v25, %v7476_v55  ;;  %v6866_v9 = vpop.f32.mrb[85].mxu0  ;;  %v7478_v58 = vpop.f32.mrb[85].mxu1  ;;  %v17099_v25 = vld [vmem:[#allocation101_spill] sm:$0xff] }
 0x731   :  { %v8910_v45 = vmax.f32 %v8898_v18, 0.0  ;;  %v8946_v53 = vmax.f32 %v8934_v27, 0.0  ;;  %v8802_v15 = vmax.f32 %v15779_v12, %v6866_v9  ;;  %v8804_v49 = vmax.f32 %v15781_v17, %v7478_v58  ;;  %7882 = vmatpush1.bf16.msra.mxu0 %v16982_v51  ;;  %8494 = vmatpush1.bf16.msra.mxu1 %v17073_v3  ;;  %v6868_v11 = vpop.f32.mrb[86].mxu0  ;;  %v7480_v56 = vpop.f32.mrb[86].mxu1  ;;  %v17105_v58 = vld [vmem:[#allocation33_spill] sm:$0xff] }
 0x732   :  { %v8809_v46 = vmax.f32 %v15804_v4, %v6868_v11  ;;  %v8811_v29 = vmax.f32 %v15806_v0, %v7480_v56  ;;  %8004 = vmatprep.subr.bf16.mxu0 %v17043_v43  ;;  %8616 = vmatprep.subr.bf16.mxu1 %v17099_v25  ;;  %v6870_v18 = vpop.f32.mrb[87].mxu0  ;;  %v7482_v27 = vpop.f32.mrb[87].mxu1  ;;  %v17100_v51 = vmax.f32 %v15757_v5, 0.0  ;;  %v17102_v17 = vmax.f32 %v15760_v36, 0.0 }
 0x733   :  { %9039 = vst [vmem:[%s16387_s10 + $0x60] sm:$0xff] %v8910_v45  ;;  %9040 = vst [vmem:[%s16387_s10 + $0x68] sm:$0xff] %v8946_v53  ;;  %v8872_v43 = vmax.f32 %v8801_v16, %v8802_v15  ;;  %v8923_v0 = vmax.f32 %v8803_v59, %v8804_v49  ;;  %v8810_v33 = vmax.f32 %v6856_v8, %v6870_v18 }
 0x734   :  { %v15839_v12 = vpack.c.bf16 %v8910_v45, %v17100_v51  ;;  %v15846_v4 = vpack.c.bf16 %v8946_v53, %v17102_v17  ;;  %v8812_v55 = vmax.f32 %v7468_v20, %v7482_v27  ;;  %7811 = vmatmul.mubr.bf16.gmra.mrb[144].mxu0 %v17104_v41  ;;  %8423 = vmatmul.mubr.bf16.gmra.mrb[144].mxu1 %v17104_v41 }
 0x735   :  { %v8899_v5 = vadd.f32 %v15728_v10, %v8872_v43  ;;  %v8935_v9 = vadd.f32 %v8923_v0, %v15728_v10  ;;  %7820 = vmatprep.mubr.bf16.mxu0 %v17105_v58  ;;  %8432 = vmatprep.mubr.bf16.mxu1 %v17105_v58  ;;  %v8873_v45 = vmax.f32 %v8809_v46, %v8810_v33  ;;  %v17108_v43 = vld [vmem:[#allocation58_spill] sm:$0xff]  ;;  %v17109_v0 = vld [vmem:[#allocation83_spill] sm:$0xff] }
 0x736   :  { %17101 = vst [vmem:[#allocation91_spill] sm:$0xff] %v15839_v12  ;;  %17103 = vst [vmem:[#allocation22_spill] sm:$0xff] %v15846_v4  ;;  %v8924_v36 = vmax.f32 %v8811_v29, %v8812_v55 }
 0x737   :  { %v8911_v53 = vmax.f32 %v8899_v5, 0.0  ;;  %v8947_v11 = vmax.f32 %v8935_v9, 0.0  ;;  %v6874_v16 = vpop.f32.mrb[88].mxu0  ;;  %v7486_v59 = vpop.f32.mrb[88].mxu1  ;;  %v8900_v8 = vadd.f32 %v15751_v35, %v8873_v45 }
 0x738   :  { %v8936_v20 = vadd.f32 %v8924_v36, %v15751_v35  ;;  %v6876_v15 = vpop.f32.mrb[89].mxu0  ;;  %v7488_v49 = vpop.f32.mrb[89].mxu1 }
 0x739   :  { %9043 = vst [vmem:[%s16387_s10 + $0x80] sm:$0xff] %v8911_v53  ;;  %9044 = vst [vmem:[%s16387_s10 + $0x88] sm:$0xff] %v8947_v11  ;;  %v6878_v56 = vpop.f32.mrb[90].mxu0  ;;  %v7490_v46 = vpop.f32.mrb[90].mxu1  ;;  %v8912_v29 = vmax.f32 %v8900_v8, 0.0 }
 0x73a   :  { %v8948_v25 = vmax.f32 %v8936_v20, 0.0  ;;  %v6880_v18 = vpop.f32.mrb[91].mxu0  ;;  %v7492_v27 = vpop.f32.mrb[91].mxu1 }
 0x73b   :  { %9047 = vst [vmem:[%s16387_s10 + $0xa0] sm:$0xff] %v8912_v29  ;;  %v15865_v51 = vpack.c.bf16 %v8912_v29, %v8911_v53  ;;  %v17110_v29 = vld [vmem:[#allocation121_spill] sm:$0xff] }
 0x73c   :  { %9048 = vst [vmem:[%s16387_s10 + $0xa8] sm:$0xff] %v8948_v25  ;;  %v15870_v17 = vpack.c.bf16 %v8948_v25, %v8947_v11  ;;  %7821 = vmatmul.mubr.bf16.gmra.mrb[148].mxu0 %v17108_v43  ;;  %8433 = vmatmul.mubr.bf16.gmra.mrb[148].mxu1 %v17108_v43 }
 0x73d   :  { %17106 = vst [vmem:[#allocation51_spill] sm:$0xff] %v15865_v51  ;;  %7830 = vmatprep.mubr.bf16.mxu0 %v17109_v0  ;;  %8442 = vmatprep.mubr.bf16.mxu1 %v17109_v0  ;;  %v17111_v51 = vld [vmem:[#allocation122_spill] sm:$0xff] }
 0x73e   :  { %17107 = vst [vmem:[#allocation25_spill] sm:$0xff] %v15870_v17 }
 0x73f   :  { %v6884_v33 = vpop.f32.mrb[92].mxu0  ;;  %v7496_v55 = vpop.f32.mrb[92].mxu1 }
 0x740   :  { %v6886_v41 = vpop.f32.mrb[93].mxu0  ;;  %v7498_v5 = vpop.f32.mrb[93].mxu1 }
 0x741   :  { %v6888_v9 = vpop.f32.mrb[94].mxu0  ;;  %v7500_v58 = vpop.f32.mrb[94].mxu1 }
 0x742   :  { %v8817_v45 = vmax.f32 %v6874_v16, %v6888_v9  ;;  %v8819_v36 = vmax.f32 %v7486_v59, %v7500_v58  ;;  %v6890_v53 = vpop.f32.mrb[95].mxu0  ;;  %v7502_v8 = vpop.f32.mrb[95].mxu1 }
 0x743   :  { %v8818_v11 = vmax.f32 %v6876_v15, %v6890_v53  ;;  %v8820_v20 = vmax.f32 %v7488_v49, %v7502_v8 }
 0x744   :  { %7831 = vmatmul.mubr.bf16.gmra.mrb[152].mxu0 %v17110_v29  ;;  %8443 = vmatmul.mubr.bf16.gmra.mrb[152].mxu1 %v17110_v29 }
 0x745   :  { %v8874_v25 = vmax.f32 %v8817_v45, %v8818_v11  ;;  %v8925_v43 = vmax.f32 %v8819_v36, %v8820_v20  ;;  %7840 = vmatprep.mubr.bf16.mxu0 %v17111_v51  ;;  %8452 = vmatprep.mubr.bf16.mxu1 %v17111_v51 }
 0x747   :  { %v8901_v0 = vadd.f32 %v15714_v63, %v8874_v25  ;;  %v8937_v17 = vadd.f32 %v8925_v43, %v15714_v63  ;;  %v6894_v16 = vpop.f32.mrb[96].mxu0  ;;  %v7506_v59 = vpop.f32.mrb[96].mxu1 }
 0x748   :  { %v8825_v9 = vmax.f32 %v6878_v56, %v6894_v16  ;;  %v8827_v58 = vmax.f32 %v7490_v46, %v7506_v59  ;;  %v6896_v15 = vpop.f32.mrb[97].mxu0  ;;  %v7508_v49 = vpop.f32.mrb[97].mxu1 }
 0x749   :  { %v8913_v53 = vmax.f32 %v8901_v0, 0.0  ;;  %v8949_v8 = vmax.f32 %v8937_v17, 0.0  ;;  %v8826_v12 = vmax.f32 %v6880_v18, %v6896_v15  ;;  %v8828_v29 = vmax.f32 %v7492_v27, %v7508_v49  ;;  %v6898_v45 = vpop.f32.mrb[98].mxu0  ;;  %v7510_v36 = vpop.f32.mrb[98].mxu1  ;;  %v17112_v18 = vld [vmem:[#allocation123_spill] sm:$0xff]  ;;  %v17113_v0 = vld [vmem:[#allocation124_spill] sm:$0xff] }
 0x74a   :  { %v8833_v11 = vmax.f32 %v6884_v33, %v6898_v45  ;;  %v8835_v20 = vmax.f32 %v7496_v55, %v7510_v36  ;;  %v6900_v4 = vpop.f32.mrb[99].mxu0  ;;  %v7512_v51 = vpop.f32.mrb[99].mxu1 }
 0x74b   :  { %9051 = vst [vmem:[%s16387_s10 + $0xc0] sm:$0xff] %v8913_v53  ;;  %9052 = vst [vmem:[%s16387_s10 + $0xc8] sm:$0xff] %v8949_v8  ;;  %v8875_v56 = vmax.f32 %v8825_v9, %v8826_v12  ;;  %v8926_v46 = vmax.f32 %v8827_v58, %v8828_v29  ;;  %v8834_v25 = vmax.f32 %v6886_v41, %v6900_v4 }
 0x74c   :  { %v8836_v17 = vmax.f32 %v7498_v5, %v7512_v51  ;;  %7841 = vmatmul.mubr.bf16.gmra.mrb[156].mxu0 %v17112_v18  ;;  %8453 = vmatmul.mubr.bf16.gmra.mrb[156].mxu1 %v17112_v18  ;;  %v17116_v18 = vld [vmem:[#allocation103_spill] sm:$0xff] }
 0x74d   :  { %v8902_v27 = vadd.f32 %v15728_v10, %v8875_v56  ;;  %v8938_v33 = vadd.f32 %v8926_v46, %v15728_v10  ;;  %v8876_v55 = vmax.f32 %v8833_v11, %v8834_v25  ;;  %7883 = vmatprep.mubr.bf16.mxu0 %v17113_v0  ;;  %8495 = vmatprep.mubr.bf16.mxu1 %v17113_v0  ;;  %v17115_v46 = vld [vmem:[#allocation127_spill] sm:$0xff]  ;;  %v17117_v0 = vld [vmem:[#allocation68_spill] sm:$0xff] }
 0x74e   :  { %v8927_v43 = vmax.f32 %v8835_v20, %v8836_v17 }
 0x74f   :  { %v8914_v16 = vmax.f32 %v8902_v27, 0.0  ;;  %v8950_v59 = vmax.f32 %v8938_v33, 0.0  ;;  %v15895_v12 = vadd.f32 %v15751_v35, %v8876_v55  ;;  %v6904_v41 = vpop.f32.mrb[100].mxu0  ;;  %v7516_v5 = vpop.f32.mrb[100].mxu1 }
 0x750   :  { %v15898_v4 = vadd.f32 %v8927_v43, %v15751_v35  ;;  %v6906_v9 = vpop.f32.mrb[101].mxu0  ;;  %v7518_v58 = vpop.f32.mrb[101].mxu1 }
 0x751   :  { %9055 = vst [vmem:[%s16387_s10 + $0xe0] sm:$0xff] %v8914_v16  ;;  %v15903_v15 = vpack.c.bf16 %v8914_v16, %v8913_v53  ;;  %9056 = vst [vmem:[%s16387_s10 + $0xe8] sm:$0xff] %v8950_v59  ;;  %v15908_v49 = vpack.c.bf16 %v8950_v59, %v8949_v8  ;;  %v8915_v29 = vmax.f32 %v15895_v12, 0.0  ;;  %v15912_v36 = vpop.f32.mrb[102].mxu0  ;;  %v15914_v11 = vpop.f32.mrb[102].mxu1  ;;  %v17114_v53 = vld [vmem:[#allocation47_spill] sm:$0xff] }
 0x752   :  { %v8951_v45 = vmax.f32 %v15898_v4, 0.0  ;;  %v15916_v20 = vpop.f32.mrb[103].mxu0  ;;  %v15918_v51 = vpop.f32.mrb[103].mxu1  ;;  %v9607_v4 = vld [vmem:[#allocation7 + $0x10] sm:$0xff] }
 0x753   :  { %9059 = vst [vmem:[%s16387_s10 + $0x100] sm:$0xff] %v8915_v29 }
 0x754   :  { %9060 = vst [vmem:[%s16387_s10 + $0x108] sm:$0xff] %v8951_v45  ;;  %7884 = vmatmul.mubr.bf16.vlgmr.msra.gmra.mrb[112].mxu0 %v15082_v54  ;;  %8496 = vmatmul.mubr.bf16.vlgmr.msra.gmra.mrb[112].mxu1 %v15082_v54 }
 0x755   :  { %8005 = vmatpush1.bf16.msra.mxu0 %v17012_v61  ;;  %8617 = vmatpush1.bf16.msra.mxu1 %v17075_v14 }
 0x756   :  { %8006 = vmatprep.subr.bf16.mxu0 %v17045_v47  ;;  %8618 = vmatprep.subr.bf16.mxu1 %v17114_v53 }
 0x757   :  { %v15936_v8 = vpop.f32.mrb[104].mxu0  ;;  %v15938_v56 = vpop.f32.mrb[104].mxu1  ;;  %7893 = vmatprep.mubr.bf16.mxu0 %v17115_v46  ;;  %8505 = vmatprep.mubr.bf16.mxu1 %v17115_v46 }
 0x758   :  { %v15942_v25 = vpop.f32.mrb[105].mxu0  ;;  %v15944_v17 = vpop.f32.mrb[105].mxu1 }
 0x759   :  { %8007 = vmatpush1.bf16.msra.mxu0 %v17014_v30  ;;  %8619 = vmatpush1.bf16.msra.mxu1 %v17077_v1  ;;  %v6918_v54 = vpop.f32.mrb[106].mxu0  ;;  %v7530_v61 = vpop.f32.mrb[106].mxu1  ;;  %v9605_v1 = vld [vmem:[#allocation7] sm:$0xff] }
 0x75a   :  { %v8841_v47 = vmax.f32 %v6904_v41, %v6918_v54  ;;  %v8843_v14 = vmax.f32 %v7516_v5, %v7530_v61  ;;  %8008 = vmatprep.subr.bf16.mxu0 %v17047_v28  ;;  %8620 = vmatprep.subr.bf16.mxu1 %v17116_v18  ;;  %v6920_v27 = vpop.f32.mrb[107].mxu0  ;;  %v7532_v33 = vpop.f32.mrb[107].mxu1  ;;  %v17118_v28 = vld [vmem:[#allocation109_spill] sm:$0xff] }
 0x75b   :  { %v8842_v55 = vmax.f32 %v6906_v9, %v6920_v27  ;;  %v8844_v43 = vmax.f32 %v7518_v58, %v7532_v33  ;;  %v17119_v58 = vld [vmem:[#allocation128_spill] sm:$0xff]  ;;  %9614 = vperm.xlu1 %11383, %v9605_v1  }
 0x75c   :  { %7894 = vmatmul.mubr.bf16.gmra.mrb[116].mxu0 %v17117_v0  ;;  %8506 = vmatmul.mubr.bf16.gmra.mrb[116].mxu1 %v17117_v0 }
 0x75d   :  { %v8877_v16 = vmax.f32 %v8841_v47, %v8842_v55  ;;  %v8928_v30 = vmax.f32 %v8843_v14, %v8844_v43  ;;  %8009 = vmatpush1.bf16.msra.mxu0 %v17016_v7  ;;  %8621 = vmatpush1.bf16.msra.mxu1 %v17079_v32  ;;  %v17122_v43 = vld [vmem:[#allocation62_spill] sm:$0xff] }
 0x75e   :  { %8010 = vmatprep.subr.bf16.mxu0 %v17049_v39  ;;  %8622 = vmatprep.subr.bf16.mxu1 %v17118_v28 }
 0x75f   :  { %v8904_v59 = vadd.f32 %v15714_v63, %v8877_v16  ;;  %v8940_v41 = vadd.f32 %v8928_v30, %v15714_v63  ;;  %v6924_v5 = vpop.f32.mrb[108].mxu0  ;;  %v7536_v9 = vpop.f32.mrb[108].mxu1  ;;  %7903 = vmatprep.mubr.bf16.mxu0 %v17119_v58  ;;  %8515 = vmatprep.mubr.bf16.mxu1 %v17119_v58  ;;  %v17124_v30 = vld [vmem:[#allocation129_spill] sm:$0xff] }
 0x760   :  { %v8849_v53 = vmax.f32 %v15912_v36, %v6924_v5  ;;  %v8851_v7 = vmax.f32 %v15914_v11, %v7536_v9  ;;  %v6926_v32 = vpop.f32.mrb[109].mxu0  ;;  %v7538_v46 = vpop.f32.mrb[109].mxu1  ;;  %v17120_v11 = vld [vmem:[#allocation113_spill] sm:$0xff]  ;;  %9624 = vperm.xlu1 %11383, %v9607_v4   ;;  %v17127_v5 = vld [vmem:[#allocation118_spill] sm:$0xff] }
 0x761   :  { %v8916_v39 = vmax.f32 %v8904_v59, 0.0  ;;  %v8952_v54 = vmax.f32 %v8940_v41, 0.0  ;;  %v8850_v61 = vmax.f32 %v15916_v20, %v6926_v32  ;;  %v8852_v47 = vmax.f32 %v15918_v51, %v7538_v46  ;;  %8011 = vmatpush1.bf16.msra.mxu0 %v17018_v38  ;;  %8623 = vmatpush1.bf16.msra.mxu1 %v17081_v50  ;;  %v6928_v14 = vpop.f32.mrb[110].mxu0  ;;  %v7540_v18 = vpop.f32.mrb[110].mxu1  ;;  %v17130_v32 = vld [vmem:[#allocation76_spill] sm:$0xff]  ;;  %v17169_v4 = vld [vmem:[#allocation146_spill] sm:$0xff] }
 0x762   :  { %v8857_v27 = vmax.f32 %v15936_v8, %v6928_v14  ;;  %v8859_v36 = vmax.f32 %v15938_v56, %v7540_v18  ;;  %8012 = vmatprep.subr.bf16.mxu0 %v17051_v57  ;;  %8624 = vmatprep.subr.bf16.mxu1 %v17120_v11  ;;  %v6930_v33 = vpop.f32.mrb[111].mxu0  ;;  %v7542_v55 = vpop.f32.mrb[111].mxu1  ;;  %v17121_v56 = vld [vmem:[#allocation72_spill] sm:$0xff]  ;;  %v17150_v14 = vld [vmem:[#allocation133_spill] sm:$0xff]  ;;  %v17151_v18 = vld [vmem:[#allocation134_spill] sm:$0xff] }
 0x763   :  { %9063 = vst [vmem:[%s16387_s10 + $0x120] sm:$0xff] %v8916_v39  ;;  %v15975_v38 = vpack.c.bf16 %v8916_v39, %v8915_v29  ;;  %9064 = vst [vmem:[%s16387_s10 + $0x128] sm:$0xff] %v8952_v54  ;;  %v15982_v50 = vpack.c.bf16 %v8952_v54, %v8951_v45  ;;  %v8878_v57 = vmax.f32 %v8849_v53, %v8850_v61  ;;  %v17128_v53 = vld [vmem:[#allocation74_spill] sm:$0xff]  ;;  %v17131_v46 = vld [vmem:[#allocation120_spill] sm:$0xff] }
 0x764   :  { %v8929_v20 = vmax.f32 %v8851_v7, %v8852_v47  ;;  %v8858_v51 = vmax.f32 %v15942_v25, %v6930_v33  ;;  %v8860_v8 = vmax.f32 %v15944_v17, %v7542_v55  ;;  %7904 = vmatmul.mubr.bf16.gmra.mrb[120].mxu0 %v17121_v56  ;;  %8516 = vmatmul.mubr.bf16.gmra.mrb[120].mxu1 %v17121_v56  ;;  %v17123_v25 = vld [vmem:[#allocation116_spill] sm:$0xff]  ;;  %v17146_v39 = vld [vmem:[#allocation42_spill] sm:$0xff]  ;;  %v17148_v61 = vld [vmem:[#allocation131_spill] sm:$0xff] }
 0x765   :  { %v8905_v12 = vadd.f32 %v15728_v10, %v8878_v57  ;;  %8013 = vmatpush1.bf16.msra.mxu0 %v17021_v22  ;;  %8625 = vmatpush1.bf16.msra.mxu1 %v17122_v43  ;;  %v17125_v22 = vld [vmem:[#allocation21_spill] sm:$0xff]  ;;  %v17129_v7 = vld [vmem:[#allocation56_spill] sm:$0xff]  ;;  %v17147_v54 = vld [vmem:[#allocation66_spill] sm:$0xff] }
 0x766   :  { %v8941_v29 = vadd.f32 %v8929_v20, %v15728_v10  ;;  %v8879_v45 = vmax.f32 %v8857_v27, %v8858_v51  ;;  %v8930_v0 = vmax.f32 %v8859_v36, %v8860_v8  ;;  %8014 = vmatprep.subr.bf16.mxu0 %v17053_v21  ;;  %8626 = vmatprep.subr.bf16.mxu1 %v17123_v25  ;;  %v17126_v21 = vld [vmem:[#allocation69_spill] sm:$0xff]  ;;  %v17149_v47 = vld [vmem:[#allocation132_spill] sm:$0xff]  ;;  %v17153_v36 = vld [vmem:[#allocation90_spill] sm:$0xff] }
 0x767   :  { %v8917_v17 = vmax.f32 %v8905_v12, 0.0  ;;  %7913 = vmatprep.mubr.bf16.mxu0 %v17124_v30  ;;  %8525 = vmatprep.mubr.bf16.mxu1 %v17124_v30  ;;  %v17152_v27 = vld [vmem:[#allocation41_spill] sm:$0xff]  ;;  %v17154_v11 = vld [vmem:[#allocation135_spill] sm:$0xff]  ;;  %v17155_v33 = vld [vmem:[#allocation22_spill] sm:$0xff] }
 0x768   :  { %v8953_v16 = vmax.f32 %v8941_v29, 0.0  ;;  %v8906_v1 = vadd.f32 %v15751_v35, %v8879_v45  ;;  %v8942_v28 = vadd.f32 %v8930_v0, %v15751_v35  ;;  %v17156_v55 = vld [vmem:[#allocation91_spill] sm:$0xff]  ;;  %v17157_v57 = vld [vmem:[#allocation136_spill] sm:$0xff]  ;;  %v17158_v20 = vld [vmem:[#allocation25_spill] sm:$0xff] }
 0x769   :  { %9067 = vst [vmem:[%s16387_s10 + $0x140] sm:$0xff] %v8917_v17  ;;  %8015 = vmatpush1.bf16.msra.mxu0 %v17125_v22  ;;  %8627 = vmatpush1.bf16.msra.mxu1 %v17126_v21  ;;  %v17159_v51 = vld [vmem:[#allocation51_spill] sm:$0xff]  ;;  %v17160_v8 = vld [vmem:[#allocation137_spill] sm:$0xff]  ;;  %v17161_v56 = vld [vmem:[#allocation138_spill] sm:$0xff] }
 0x76a   :  { %9068 = vst [vmem:[%s16387_s10 + $0x148] sm:$0xff] %v8953_v16  ;;  %v8918_v59 = vmax.f32 %v8906_v1, 0.0  ;;  %v8954_v41 = vmax.f32 %v8942_v28, 0.0  ;;  %8016 = vmatprep.subr.bf16.mxu0 %v17055_v44  ;;  %8628 = vmatprep.subr.bf16.mxu1 %v17127_v5  ;;  %v9609_v44 = vld [vmem:[#allocation7 + $0x20] sm:$0xff]  ;;  %v17162_v12 = vld [vmem:[#allocation139_spill] sm:$0xff]  ;;  %v17167_v29 = vld [vmem:[#allocation144_spill] sm:$0xff] }
 0x76b   :  { %9634 = vperm.xlu1 %11383, %v9609_v44   ;;  %v17168_v43 = vld [vmem:[#allocation145_spill] sm:$0xff]  ;;  %v17170_v45 = vld [vmem:[#allocation16_spill] sm:$0xff]  ;;  %v17172_v25 = vld [vmem:[#allocation18_spill] sm:$0xff]  ;;  %v11910_v5 = vmov 0.0  }
 0x76c   :  { %9071 = vst [vmem:[%s16387_s10 + $0x160] sm:$0xff] %v8918_v59  ;;  %v16011_v9 = vpack.c.bf16 %v8918_v59, %v8917_v17  ;;  %9072 = vst [vmem:[%s16387_s10 + $0x168] sm:$0xff] %v8954_v41  ;;  %v16016_v58 = vpack.c.bf16 %v8954_v41, %v8953_v16  ;;  %7914 = vmatmul.mubr.bf16.gmra.mrb[124].mxu0 %v17128_v53  ;;  %8526 = vmatmul.mubr.bf16.gmra.mrb[124].mxu1 %v17128_v53  ;;  %v17171_v0 = vld [vmem:[#allocation32_spill] sm:$0xff]  ;;  %v17173_v17 = vld [vmem:[#allocation19_spill] sm:$0xff] }
 0x76d   :  { %8017 = vmatpush1.bf16.msra.mxu0 %v17031_v31  ;;  %8629 = vmatpush1.bf16.msra.mxu1 %v17087_v37  ;;  %v17132_v31 = vld [vmem:[#allocation80_spill] sm:$0xff]  ;;  %v17133_v37 = vld [vmem:[#allocation126_spill] sm:$0xff]  ;;  %v17174_v16 = vld [vmem:[#allocation147_spill] sm:$0xff] }
 0x76e   :  { %8018 = vmatprep.subr.bf16.mxu0 %v17057_v48  ;;  %8630 = vmatprep.subr.bf16.mxu1 %v17129_v7  ;;  %v9611_v48 = vld [vmem:[#allocation7 + $0x30] sm:$0x3]  ;;  %v17175_v30 = vld [vmem:[#allocation20_spill] sm:$0xff]  ;;  %v17177_v28 = vld [vmem:[#allocation149_spill] sm:$0xff] }
 0x76f   :  { %7923 = vmatprep.mubr.bf16.mxu0 %v17130_v32  ;;  %8535 = vmatprep.mubr.bf16.mxu1 %v17130_v32  ;;  %v17176_v1 = vld [vmem:[#allocation148_spill] sm:$0xff]  ;;  %v17178_v22 = vld [vmem:[#allocation150_spill] sm:$0xff]  ;;  %v17179_v21 = vld [vmem:[#allocation151_spill] sm:$0xff] }
 0x770   :  { %9644 = vperm.xlu1 %11383, %v9611_v48   ;;  %v9083_v59 = vld [vmem:[#allocation6 + $0x38] sm:$0xff]  ;;  %v9075_v41 = vld [vmem:[#allocation6] sm:$0xff]  ;;  %v9085_v53 = vld [vmem:[#allocation6 + $0x48] sm:$0xff] }
 0x771   :  { %8019 = vmatpush1.bf16.msra.mxu0 %v17033_v52  ;;  %8631 = vmatpush1.bf16.msra.mxu1 %v17089_v26  ;;  %v17134_v52 = vld [vmem:[#allocation130_spill] sm:$0xff]  ;;  %v9077_v44 = vld [vmem:[#allocation6 + $0x10] sm:$0xff]  ;;  %v9078_v32 = vld [vmem:[#allocation6 + $0x18] sm:$0xff] }
 0x772   :  { %8020 = vmatprep.subr.bf16.mxu0 %v17059_v60  ;;  %8632 = vmatprep.subr.bf16.mxu1 %v17131_v46  ;;  %v17135_v60 = vld [vmem:[#allocation70_spill] sm:$0xff]  ;;  %v9086_v7 = vld [vmem:[#allocation6 + $0x50] sm:$0xff]  ;;  %v9087_v46 = vld [vmem:[#allocation6 + $0x58] sm:$0xff] }
 0x773   :  { %v17137_v26 = vld [vmem:[#allocation78_spill] sm:$0xff]  ;;  %v9088_v48 = vld [vmem:[#allocation6 + $0x60] sm:$0xff] }
 0x774   :  { %7924 = vmatmul.mubr.bf16.gmra.mrb[128].mxu0 %v17132_v31  ;;  %8536 = vmatmul.mubr.bf16.gmra.mrb[128].mxu1 %v17132_v31  ;;  %v9079_v31 = vld [vmem:[#allocation6 + $0x20] sm:$0xff] }
 0x775   :  { %8021 = vmatpush1.bf16.msra.mxu0 %v17035_v24  ;;  %8633 = vmatpush1.bf16.msra.mxu1 %v17092_v13  ;;  %v17136_v24 = vld [vmem:[#allocation82_spill] sm:$0xff]  ;;  %v17144_v13 = vld [vmem:[#allocation63_spill] sm:$0xff] }
 0x776   :  { %8022 = vmatprep.subr.bf16.mxu0 %v17069_v6  ;;  %8634 = vmatprep.subr.bf16.mxu1 %v17133_v37  ;;  %v9663_v6 = vld [vmem:[#allocation10] sm:$0xff] }
 0x777   :  { %7933 = vmatprep.mubr.bf16.mxu0 %v17134_v52  ;;  %8545 = vmatprep.mubr.bf16.mxu1 %v17134_v52  ;;  %v9080_v37 = vld [vmem:[#allocation6 + $0x28] sm:$0xff] }
 0x778   :  { %9667 = vperm.xlu1 %11383, %v9663_v6   ;;  %v9089_v52 = vld [vmem:[#allocation6 + $0x68] sm:$0x3] }
 0x779   :  { %8023 = vmatpush1.bf16.msra.mxu0 %v17037_v40  ;;  %8635 = vmatpush1.bf16.msra.mxu1 %v17095_v34  ;;  %v17138_v40 = vld [vmem:[#allocation84_spill] sm:$0xff]  ;;  %v17145_v34 = vld [vmem:[#allocation87_spill] sm:$0xff] }
 0x77a   :  { %8024 = vmatprep.subr.bf16.mxu0 %v17071_v2  ;;  %8636 = vmatprep.subr.bf16.mxu1 %v17135_v60  ;;  %v11908_v2 = vmov 0.0|0.0   ;;  %v9081_v60 = vld [vmem:[#allocation6 + $0x30] sm:$0x3] }
 0x77c   :  { %7934 = vmatmul.mubr.bf16.gmra.mrb[132].mxu0 %v17136_v24  ;;  %8546 = vmatmul.mubr.bf16.gmra.mrb[132].mxu1 %v17136_v24 }
 0x77d   :  { %8025 = vmatpush1.bf16.msra.mxu0 %v17039_v19  ;;  %8637 = vmatpush1.bf16.msra.mxu1 %v15112_v42  ;;  %v17139_v42 = vld [vmem:[#allocation86_spill] sm:$0xff]  ;;  %v17140_v19 = vld [vmem:[#allocation61_spill] sm:$0xff] }
 0x77e   :  { %8026 = vmatprep.subr.bf16.mxu0 %v17073_v3  ;;  %8638 = vmatprep.subr.bf16.mxu1 %v17137_v26  ;;  %v17141_v3 = vld [vmem:[#allocation85_spill] sm:$0xff] }
 0x77f   :  { %7943 = vmatprep.mubr.bf16.mxu0 %v17138_v40  ;;  %8555 = vmatprep.mubr.bf16.mxu1 %v17138_v40 }
 0x781   :  { %8027 = vmatpush1.bf16.msra.mxu0 %v17041_v23  ;;  %8639 = vmatpush1.bf16.msra.mxu1 %v15164_v62  ;;  %v17142_v23 = vld [vmem:[#allocation64_spill] sm:$0xff] }
 0x782   :  { %10710 = vmatprep.subr.bf16.mxu0 %v11908_v2  ;;  %10728 = vmatprep.subr.bf16.mxu1 %v11908_v2  ;;  %v17143_v62 = vld [vmem:[#allocation88_spill] sm:$0xff] }
 0x784   :  { %7944 = vmatmul.mubr.bf16.gmra.mrb[136].mxu0 %v17139_v42  ;;  %8556 = vmatmul.mubr.bf16.gmra.mrb[136].mxu1 %v17139_v42 }
 0x785   :  { %7953 = vmatprep.mubr.bf16.mxu0 %v17140_v19  ;;  %8565 = vmatprep.mubr.bf16.mxu1 %v17140_v19 }
 0x78c   :  { %7954 = vmatmul.mubr.bf16.gmra.mrb[140].mxu0 %v17141_v3  ;;  %8566 = vmatmul.mubr.bf16.gmra.mrb[140].mxu1 %v17141_v3 }
 0x78d   :  { %7963 = vmatprep.mubr.bf16.mxu0 %v17142_v23  ;;  %8575 = vmatprep.mubr.bf16.mxu1 %v17142_v23 }
 0x794   :  { %7964 = vmatmul.mubr.bf16.gmra.mrb[144].mxu0 %v17143_v62  ;;  %8576 = vmatmul.mubr.bf16.gmra.mrb[144].mxu1 %v17143_v62 }
 0x795   :  { %7973 = vmatprep.mubr.bf16.mxu0 %v17144_v13  ;;  %8585 = vmatprep.mubr.bf16.mxu1 %v17144_v13 }
 0x79c   :  { %7974 = vmatmul.mubr.bf16.gmra.mrb[148].mxu0 %v17145_v34  ;;  %8586 = vmatmul.mubr.bf16.gmra.mrb[148].mxu1 %v17145_v34 }
 0x79d   :  { %7983 = vmatprep.mubr.bf16.mxu0 %v17146_v39  ;;  %8595 = vmatprep.mubr.bf16.mxu1 %v17146_v39 }
 0x7a4   :  { %7984 = vmatmul.mubr.bf16.gmra.mrb[152].mxu0 %v17147_v54  ;;  %8596 = vmatmul.mubr.bf16.gmra.mrb[152].mxu1 %v17147_v54 }
 0x7a5   :  { %7993 = vmatprep.mubr.bf16.mxu0 %v17148_v61  ;;  %8605 = vmatprep.mubr.bf16.mxu1 %v17148_v61 }
 0x7ac   :  { %7994 = vmatmul.mubr.bf16.gmra.mrb[156].mxu0 %v17149_v47  ;;  %8606 = vmatmul.mubr.bf16.gmra.mrb[156].mxu1 %v17149_v47 }
 0x7ad   :  { %10373 = vmatprep.mubr.msk.bf16.mxu0 %vm6284_vm2, %v17150_v14  ;;  %10385 = vmatprep.mubr.msk.bf16.mxu1 %vm6284_vm2, %v17150_v14 }
 0x7b4   :  { %8037 = vmatmul.mubr.bf16.vlgmr.msra.gmra.mrb[112].mxu0 %v17151_v18  ;;  %8649 = vmatmul.mubr.bf16.vlgmr.msra.gmra.mrb[112].mxu1 %v17151_v18 }
 0x7b5   :  { %10712 = vmatpush3.bf16.msra.mxu0 %v17152_v27  ;;  %10730 = vmatpush3.bf16.msra.mxu1 %v17153_v36 }
 0x7b6   :  { %10713 = vmatprep.subr.bf16.mxu0 %v11908_v2  ;;  %10731 = vmatprep.subr.bf16.mxu1 %v11908_v2 }
 0x7b7   :  { %10374 = vmatprep.mubr.msk.bf16.mxu0 %vm6284_vm2, %v17154_v11  ;;  %10386 = vmatprep.mubr.msk.bf16.mxu1 %vm6284_vm2, %v17154_v11 }
 0x7b9   :  { %10715 = vmatpush3.bf16.msra.mxu0 %v17155_v33  ;;  %10733 = vmatpush3.bf16.msra.mxu1 %v17156_v55 }
 0x7ba   :  { %10716 = vmatprep.subr.bf16.mxu0 %v11908_v2  ;;  %10734 = vmatprep.subr.bf16.mxu1 %v11908_v2 }
 0x7bc   :  { %8047 = vmatmul.mubr.bf16.gmra.mrb[116].mxu0 %v17157_v57  ;;  %8659 = vmatmul.mubr.bf16.gmra.mrb[116].mxu1 %v17157_v57 }
 0x7bd   :  { %10718 = vmatpush3.bf16.msra.mxu0 %v17158_v20  ;;  %10736 = vmatpush3.bf16.msra.mxu1 %v17159_v51 }
 0x7be   :  { %10719 = vmatprep.subr.bf16.mxu0 %v11908_v2  ;;  %10737 = vmatprep.subr.bf16.mxu1 %v11908_v2 }
 0x7bf   :  { %10375 = vmatprep.mubr.msk.bf16.mxu0 %vm6284_vm2, %v17160_v8  ;;  %10387 = vmatprep.mubr.msk.bf16.mxu1 %vm6284_vm2, %v17160_v8 }
 0x7c1   :  { %10721 = vmatpush3.bf16.msra.mxu0 %v15908_v49  ;;  %10739 = vmatpush3.bf16.msra.mxu1 %v15903_v15  ;;  %v17163_v15 = vld [vmem:[#allocation140_spill] sm:$0xff]  ;;  %v17164_v49 = vld [vmem:[#allocation141_spill] sm:$0xff] }
 0x7c2   :  { %10722 = vmatprep.subr.bf16.mxu0 %v11908_v2  ;;  %10740 = vmatprep.subr.bf16.mxu1 %v11908_v2 }
 0x7c4   :  { %8057 = vmatmul.mubr.bf16.gmra.mrb[120].mxu0 %v17161_v56  ;;  %8669 = vmatmul.mubr.bf16.gmra.mrb[120].mxu1 %v17161_v56 }
 0x7c5   :  { %10724 = vmatpush3.bf16.msra.mxu0 %v15982_v50  ;;  %10742 = vmatpush3.bf16.msra.mxu1 %v15975_v38  ;;  %v17165_v38 = vld [vmem:[#allocation142_spill] sm:$0xff]  ;;  %v17166_v50 = vld [vmem:[#allocation143_spill] sm:$0xff] }
 0x7c6   :  { %10725 = vmatprep.subr.bf16.mxu0 %v11908_v2  ;;  %10743 = vmatprep.subr.bf16.mxu1 %v11908_v2 }
 0x7c7   :  { %10376 = vmatprep.mubr.msk.bf16.mxu0 %vm6284_vm2, %v17162_v12  ;;  %10388 = vmatprep.mubr.msk.bf16.mxu1 %vm6284_vm2, %v17162_v12 }
 0x7c9   :  { %10727 = vmatpush3.bf16.msra.mxu0 %v16016_v58  ;;  %10745 = vmatpush3.bf16.msra.mxu1 %v16011_v9  ;;  %v9084_v9 = vld [vmem:[#allocation6 + $0x40] sm:$0xff]  ;;  %v9076_v58 = vld [vmem:[#allocation6 + $0x8] sm:$0xff] }
 0x7ca   :  { %10746 = vmatprep.subr.bf16.mxu0 %v11908_v2  ;;  %10764 = vmatprep.subr.bf16.mxu1 %v11908_v2 }
 0x7cc   :  { %8067 = vmatmul.mubr.bf16.gmra.mrb[124].mxu0 %v17163_v15  ;;  %8679 = vmatmul.mubr.bf16.gmra.mrb[124].mxu1 %v17163_v15 }
 0x7cd   :  { %10377 = vmatprep.mubr.msk.bf16.mxu0 %vm6284_vm2, %v17164_v49  ;;  %10389 = vmatprep.mubr.msk.bf16.mxu1 %vm6284_vm2, %v17164_v49 }
 0x7d4   :  { %8077 = vmatmul.mubr.bf16.gmra.mrb[128].mxu0 %v17165_v38  ;;  %8689 = vmatmul.mubr.bf16.gmra.mrb[128].mxu1 %v17165_v38 }
 0x7d5   :  { %10378 = vmatprep.mubr.msk.bf16.mxu0 %vm6284_vm2, %v17166_v50  ;;  %10390 = vmatprep.mubr.msk.bf16.mxu1 %vm6284_vm2, %v17166_v50 }
 0x7dc   :  { %8087 = vmatmul.mubr.bf16.gmra.mrb[132].mxu0 %v17167_v29  ;;  %8699 = vmatmul.mubr.bf16.gmra.mrb[132].mxu1 %v17167_v29 }
 0x7dd   :  { %10379 = vmatprep.mubr.msk.bf16.mxu0 %vm6284_vm2, %v17168_v43  ;;  %10391 = vmatprep.mubr.msk.bf16.mxu1 %vm6284_vm2, %v17168_v43 }
 0x7e4   :  { %8097 = vmatmul.mubr.bf16.gmra.mrb[136].mxu0 %v17169_v4  ;;  %8709 = vmatmul.mubr.bf16.gmra.mrb[136].mxu1 %v17169_v4 }
 0x7e5   :  { %10380 = vmatprep.mubr.msk.bf16.mxu0 %vm6284_vm2, %v17170_v45  ;;  %10392 = vmatprep.mubr.msk.bf16.mxu1 %vm6284_vm2, %v17170_v45 }
 0x7ec   :  { %8107 = vmatmul.mubr.bf16.gmra.mrb[140].mxu0 %v17171_v0  ;;  %8719 = vmatmul.mubr.bf16.gmra.mrb[140].mxu1 %v17171_v0 }
 0x7ed   :  { %10381 = vmatprep.mubr.msk.bf16.mxu0 %vm6284_vm2, %v17172_v25  ;;  %10393 = vmatprep.mubr.msk.bf16.mxu1 %vm6284_vm2, %v17172_v25 }
 0x7f4   :  { %8117 = vmatmul.mubr.bf16.gmra.mrb[144].mxu0 %v17173_v17  ;;  %8729 = vmatmul.mubr.bf16.gmra.mrb[144].mxu1 %v17173_v17 }
 0x7f5   :  { %10382 = vmatprep.mubr.msk.bf16.mxu0 %vm6284_vm2, %v17174_v16  ;;  %10394 = vmatprep.mubr.msk.bf16.mxu1 %vm6284_vm2, %v17174_v16 }
 0x7fc   :  { %8127 = vmatmul.mubr.bf16.gmra.mrb[148].mxu0 %v17175_v30  ;;  %8739 = vmatmul.mubr.bf16.gmra.mrb[148].mxu1 %v17175_v30 }
 0x7fd   :  { %10383 = vmatprep.mubr.msk.bf16.mxu0 %vm6284_vm2, %v17176_v1  ;;  %10395 = vmatprep.mubr.msk.bf16.mxu1 %vm6284_vm2, %v17176_v1 }
 0x804   :  { %8137 = vmatmul.mubr.bf16.gmra.mrb[152].mxu0 %v17177_v28  ;;  %8749 = vmatmul.mubr.bf16.gmra.mrb[152].mxu1 %v17177_v28 }
 0x805   :  { %10384 = vmatprep.mubr.msk.bf16.mxu0 %vm6284_vm2, %v17178_v22  ;;  %10396 = vmatprep.mubr.msk.bf16.mxu1 %vm6284_vm2, %v17178_v22 }
 0x80c   :  { %8147 = vmatmul.mubr.bf16.gmra.mrb[156].mxu0 %v17179_v21  ;;  %8759 = vmatmul.mubr.bf16.gmra.mrb[156].mxu1 %v17179_v21 }
 0x80d   :  { %10537 = vmatprep.mubr.msk.f32.mxu0 %vm11909_vm4, %v11910_v5  ;;  %10582 = vmatprep.mubr.msk.f32.mxu1 %vm11909_vm4, %v11910_v5 }
 0x814   :  { %10538 = vmatmul.mubr.msk.f32.vlgmr.msra.gmra.mrb[160].mxu0 %vm9090_vm3, %v9083_v59  ;;  %10583 = vmatmul.mubr.msk.f32.vlgmr.msra.gmra.mrb[160].mxu1 %vm9090_vm3, %v9075_v41 }
 0x815   :  { %10540 = vmatprep.mubr.msk.f32.mxu0 %vm11909_vm4, %v11910_v5  ;;  %10585 = vmatprep.mubr.msk.f32.mxu1 %vm11909_vm4, %v11910_v5 }
 0x818   :  { %10541 = vmatmul.mubr.msk.f32.gmra.mrb[162].mxu0 %vm9090_vm3, %v9084_v9  ;;  %10586 = vmatmul.mubr.msk.f32.gmra.mrb[162].mxu1 %vm9090_vm3, %v9076_v58 }
 0x819   :  { %10543 = vmatprep.mubr.msk.f32.mxu0 %vm11909_vm4, %v11910_v5  ;;  %10588 = vmatprep.mubr.msk.f32.mxu1 %vm11909_vm4, %v11910_v5 }
 0x81c   :  { %10544 = vmatmul.mubr.msk.f32.gmra.mrb[164].mxu0 %vm9090_vm3, %v9085_v53  ;;  %10589 = vmatmul.mubr.msk.f32.gmra.mrb[164].mxu1 %vm9090_vm3, %v9077_v44 }
 0x81d   :  { %10546 = vmatprep.mubr.msk.f32.mxu0 %vm11909_vm4, %v11910_v5  ;;  %10591 = vmatprep.mubr.msk.f32.mxu1 %vm11909_vm4, %v11910_v5 }
 0x820   :  { %10547 = vmatmul.mubr.msk.f32.gmra.mrb[166].mxu0 %vm9090_vm3, %v9086_v7  ;;  %10592 = vmatmul.mubr.msk.f32.gmra.mrb[166].mxu1 %vm9090_vm3, %v9078_v32 }
 0x821   :  { %10549 = vmatprep.mubr.msk.f32.mxu0 %vm11909_vm4, %v11910_v5  ;;  %10594 = vmatprep.mubr.msk.f32.mxu1 %vm11909_vm4, %v11910_v5 }
 0x824   :  { %10550 = vmatmul.mubr.msk.f32.gmra.mrb[168].mxu0 %vm9090_vm3, %v9087_v46  ;;  %10595 = vmatmul.mubr.msk.f32.gmra.mrb[168].mxu1 %vm9090_vm3, %v9079_v31 }
 0x825   :  { %10552 = vmatprep.mubr.msk.f32.mxu0 %vm11909_vm4, %v11910_v5  ;;  %10597 = vmatprep.mubr.msk.f32.mxu1 %vm11909_vm4, %v11910_v5 }
 0x828   :  { %10553 = vmatmul.mubr.msk.f32.gmra.mrb[170].mxu0 %vm9090_vm3, %v9088_v48  ;;  %10598 = vmatmul.mubr.msk.f32.gmra.mrb[170].mxu1 %vm9090_vm3, %v9080_v37 }
 0x829   :  { %10555 = vmatprep.mubr.msk.f32.mxu0 %vm11909_vm4, %v11910_v5  ;;  %10600 = vmatprep.mubr.msk.f32.mxu1 %vm11909_vm4, %v11910_v5 }
 0x82c   :  { %10556 = vmatmul.mubr.msk.f32.gmra.mrb[172].mxu0 %vm9090_vm3, %v9089_v52  ;;  %10601 = vmatmul.mubr.msk.f32.gmra.mrb[172].mxu1 %vm9090_vm3, %v9081_v60 }
 0x82d   :  { %10627 = vmatprep.mubr.msk.f32.mxu0 %vm11909_vm4, %v11910_v5  ;;  %10672 = vmatprep.mubr.msk.f32.mxu1 %vm11909_vm4, %v11910_v5 }
 0x887   :  { %v8038_v24 = vpop.f32.mrb[112].mxu0  ;;  %v8650_v6 = vpop.f32.mrb[112].mxu1 }
 0x888   :  { %v8040_v26 = vpop.f32.mrb[113].mxu0  ;;  %v8652_v40 = vpop.f32.mrb[113].mxu1 }
 0x889   :  { %v8042_v42 = vpop.f32.mrb[114].mxu0  ;;  %v8654_v19 = vpop.f32.mrb[114].mxu1 }
 0x88a   :  { %v8044_v3 = vpop.f32.mrb[115].mxu0  ;;  %v8656_v23 = vpop.f32.mrb[115].mxu1 }
 0x88f   :  { %v8048_v62 = vpop.f32.mrb[116].mxu0  ;;  %v8660_v13 = vpop.f32.mrb[116].mxu1 }
 0x890   :  { %v8050_v34 = vpop.f32.mrb[117].mxu0  ;;  %v8662_v39 = vpop.f32.mrb[117].mxu1 }
 0x891   :  { %v8052_v54 = vpop.f32.mrb[118].mxu0  ;;  %v8664_v61 = vpop.f32.mrb[118].mxu1 }
 0x892   :  { %v8773_v47 = vmax.f32 %v8038_v24, %v8052_v54  ;;  %v8775_v14 = vmax.f32 %v8650_v6, %v8664_v61  ;;  %v8054_v18 = vpop.f32.mrb[119].mxu0  ;;  %v8666_v27 = vpop.f32.mrb[119].mxu1 }
 0x893   :  { %v8774_v36 = vmax.f32 %v8040_v26, %v8054_v18  ;;  %v8776_v11 = vmax.f32 %v8652_v40, %v8666_v27 }
 0x895   :  { %v8955_v33 = vmax.f32 %v8773_v47, %v8774_v36  ;;  %v8991_v55 = vmax.f32 %v8775_v14, %v8776_v11 }
 0x897   :  { %v8967_v57 = vadd.f32 %v8955_v33, %v15714_v63  ;;  %v9003_v20 = vadd.f32 %v8991_v55, %v15714_v63  ;;  %v8058_v51 = vpop.f32.mrb[120].mxu0  ;;  %v8670_v8 = vpop.f32.mrb[120].mxu1 }
 0x898   :  { %v8781_v56 = vmax.f32 %v8042_v42, %v8058_v51  ;;  %v8783_v12 = vmax.f32 %v8654_v19, %v8670_v8  ;;  %v8060_v15 = vpop.f32.mrb[121].mxu0  ;;  %v8672_v49 = vpop.f32.mrb[121].mxu1 }
 0x899   :  { %v8979_v38 = vmax.f32 %v8967_v57, 0.0  ;;  %v9015_v50 = vmax.f32 %v9003_v20, 0.0  ;;  %v8782_v29 = vmax.f32 %v8044_v3, %v8060_v15  ;;  %v8784_v43 = vmax.f32 %v8656_v23, %v8672_v49  ;;  %v8062_v4 = vpop.f32.mrb[122].mxu0  ;;  %v8674_v45 = vpop.f32.mrb[122].mxu1 }
 0x89a   :  { %v8789_v0 = vmax.f32 %v8048_v62, %v8062_v4  ;;  %v8791_v25 = vmax.f32 %v8660_v13, %v8674_v45  ;;  %v8064_v17 = vpop.f32.mrb[123].mxu0  ;;  %v8676_v16 = vpop.f32.mrb[123].mxu1 }
 0x89b   :  { %9029 = vst [vmem:[%s16387_s10 + $0x10] sm:$0xff] %v8979_v38  ;;  %9030 = vst [vmem:[%s16387_s10 + $0x18] sm:$0xff] %v9015_v50  ;;  %v8956_v30 = vmax.f32 %v8781_v56, %v8782_v29  ;;  %v8992_v1 = vmax.f32 %v8783_v12, %v8784_v43  ;;  %v8790_v28 = vmax.f32 %v8050_v34, %v8064_v17 }
 0x89c   :  { %v8792_v22 = vmax.f32 %v8662_v39, %v8676_v16 }
 0x89d   :  { %v8968_v21 = vadd.f32 %v8956_v30, %v15728_v10  ;;  %v9004_v59 = vadd.f32 %v8992_v1, %v15728_v10  ;;  %v8957_v41 = vmax.f32 %v8789_v0, %v8790_v28 }
 0x89e   :  { %v8993_v9 = vmax.f32 %v8791_v25, %v8792_v22 }
 0x89f   :  { %v8980_v58 = vmax.f32 %v8968_v21, 0.0  ;;  %v9016_v53 = vmax.f32 %v9004_v59, 0.0  ;;  %v8969_v44 = vadd.f32 %v8957_v41, %v15751_v35  ;;  %v8068_v32 = vpop.f32.mrb[124].mxu0  ;;  %v8680_v46 = vpop.f32.mrb[124].mxu1 }
 0x8a0   :  { %v9005_v7 = vadd.f32 %v8993_v9, %v15751_v35  ;;  %v8070_v31 = vpop.f32.mrb[125].mxu0  ;;  %v8682_v48 = vpop.f32.mrb[125].mxu1 }
 0x8a1   :  { %9033 = vst [vmem:[%s16387_s10 + $0x30] sm:$0xff] %v8980_v58  ;;  %v10747_v37 = vpack.c.bf16 %v8980_v58, %v8979_v38  ;;  %9034 = vst [vmem:[%s16387_s10 + $0x38] sm:$0xff] %v9016_v53  ;;  %v10765_v52 = vpack.c.bf16 %v9016_v53, %v9015_v50  ;;  %v8981_v60 = vmax.f32 %v8969_v44, 0.0  ;;  %v8072_v6 = vpop.f32.mrb[126].mxu0  ;;  %v8684_v26 = vpop.f32.mrb[126].mxu1 }
 0x8a2   :  { %v9017_v24 = vmax.f32 %v9005_v7, 0.0  ;;  %v8074_v40 = vpop.f32.mrb[127].mxu0  ;;  %v8686_v42 = vpop.f32.mrb[127].mxu1 }
 0x8a3   :  { %9037 = vst [vmem:[%s16387_s10 + $0x50] sm:$0xff] %v8981_v60  ;;  %10748 = vmatpush3.bf16.msra.mxu0 %v10747_v37  ;;  %10766 = vmatpush3.bf16.msra.mxu1 %v10765_v52 }
 0x8a4   :  { %9038 = vst [vmem:[%s16387_s10 + $0x58] sm:$0xff] %v9017_v24  ;;  %10749 = vmatprep.subr.bf16.mxu0 %v11908_v2  ;;  %10767 = vmatprep.subr.bf16.mxu1 %v11908_v2 }
 0x8a7   :  { %v8078_v19 = vpop.f32.mrb[128].mxu0  ;;  %v8690_v3 = vpop.f32.mrb[128].mxu1 }
 0x8a8   :  { %v8080_v23 = vpop.f32.mrb[129].mxu0  ;;  %v8692_v62 = vpop.f32.mrb[129].mxu1 }
 0x8a9   :  { %v8082_v13 = vpop.f32.mrb[130].mxu0  ;;  %v8694_v34 = vpop.f32.mrb[130].mxu1 }
 0x8aa   :  { %v8797_v39 = vmax.f32 %v8068_v32, %v8082_v13  ;;  %v8799_v54 = vmax.f32 %v8680_v46, %v8694_v34  ;;  %v8084_v61 = vpop.f32.mrb[131].mxu0  ;;  %v8696_v47 = vpop.f32.mrb[131].mxu1 }
 0x8ab   :  { %v8798_v14 = vmax.f32 %v8070_v31, %v8084_v61  ;;  %v8800_v18 = vmax.f32 %v8682_v48, %v8696_v47 }
 0x8ad   :  { %v8958_v27 = vmax.f32 %v8797_v39, %v8798_v14  ;;  %v8994_v36 = vmax.f32 %v8799_v54, %v8800_v18 }
 0x8af   :  { %v8970_v11 = vadd.f32 %v8958_v27, %v15714_v63  ;;  %v9006_v33 = vadd.f32 %v8994_v36, %v15714_v63  ;;  %v8088_v55 = vpop.f32.mrb[132].mxu0  ;;  %v8700_v57 = vpop.f32.mrb[132].mxu1 }
 0x8b0   :  { %v8805_v20 = vmax.f32 %v8072_v6, %v8088_v55  ;;  %v8807_v51 = vmax.f32 %v8684_v26, %v8700_v57  ;;  %v8090_v8 = vpop.f32.mrb[133].mxu0  ;;  %v8702_v56 = vpop.f32.mrb[133].mxu1 }
 0x8b1   :  { %v8982_v12 = vmax.f32 %v8970_v11, 0.0  ;;  %v9018_v15 = vmax.f32 %v9006_v33, 0.0  ;;  %v8806_v49 = vmax.f32 %v8074_v40, %v8090_v8  ;;  %v8808_v38 = vmax.f32 %v8686_v42, %v8702_v56  ;;  %v8092_v50 = vpop.f32.mrb[134].mxu0  ;;  %v8704_v29 = vpop.f32.mrb[134].mxu1 }
 0x8b2   :  { %v8813_v43 = vmax.f32 %v8078_v19, %v8092_v50  ;;  %v8815_v4 = vmax.f32 %v8690_v3, %v8704_v29  ;;  %v8094_v45 = vpop.f32.mrb[135].mxu0  ;;  %v8706_v0 = vpop.f32.mrb[135].mxu1 }
 0x8b3   :  { %9041 = vst [vmem:[%s16387_s10 + $0x70] sm:$0xff] %v8982_v12  ;;  %v10750_v25 = vpack.c.bf16 %v8982_v12, %v8981_v60  ;;  %9042 = vst [vmem:[%s16387_s10 + $0x78] sm:$0xff] %v9018_v15  ;;  %v10768_v17 = vpack.c.bf16 %v9018_v15, %v9017_v24  ;;  %v8959_v16 = vmax.f32 %v8805_v20, %v8806_v49 }
 0x8b4   :  { %v8995_v30 = vmax.f32 %v8807_v51, %v8808_v38  ;;  %v8814_v1 = vmax.f32 %v8080_v23, %v8094_v45  ;;  %v8816_v28 = vmax.f32 %v8692_v62, %v8706_v0 }
 0x8b5   :  { %v8971_v22 = vadd.f32 %v8959_v16, %v15728_v10  ;;  %10751 = vmatpush3.bf16.msra.mxu0 %v10750_v25  ;;  %10769 = vmatpush3.bf16.msra.mxu1 %v10768_v17 }
 0x8b6   :  { %v9007_v21 = vadd.f32 %v8995_v30, %v15728_v10  ;;  %v8960_v59 = vmax.f32 %v8813_v43, %v8814_v1  ;;  %v8996_v41 = vmax.f32 %v8815_v4, %v8816_v28  ;;  %10752 = vmatprep.subr.bf16.mxu0 %v11908_v2  ;;  %10770 = vmatprep.subr.bf16.mxu1 %v11908_v2 }
 0x8b7   :  { %v8983_v9 = vmax.f32 %v8971_v22, 0.0  ;;  %v8098_v53 = vpop.f32.mrb[136].mxu0  ;;  %v8710_v44 = vpop.f32.mrb[136].mxu1 }
 0x8b8   :  { %v9019_v58 = vmax.f32 %v9007_v21, 0.0  ;;  %v8972_v7 = vadd.f32 %v8960_v59, %v15751_v35  ;;  %v9008_v32 = vadd.f32 %v8996_v41, %v15751_v35  ;;  %v8100_v46 = vpop.f32.mrb[137].mxu0  ;;  %v8712_v31 = vpop.f32.mrb[137].mxu1 }
 0x8b9   :  { %9045 = vst [vmem:[%s16387_s10 + $0x90] sm:$0xff] %v8983_v9  ;;  %v8102_v48 = vpop.f32.mrb[138].mxu0  ;;  %v8714_v37 = vpop.f32.mrb[138].mxu1 }
 0x8ba   :  { %9046 = vst [vmem:[%s16387_s10 + $0x98] sm:$0xff] %v9019_v58  ;;  %v8984_v52 = vmax.f32 %v8972_v7, 0.0  ;;  %v9020_v60 = vmax.f32 %v9008_v32, 0.0  ;;  %v8104_v24 = vpop.f32.mrb[139].mxu0  ;;  %v8716_v6 = vpop.f32.mrb[139].mxu1 }
 0x8bc   :  { %9049 = vst [vmem:[%s16387_s10 + $0xb0] sm:$0xff] %v8984_v52  ;;  %v10753_v26 = vpack.c.bf16 %v8984_v52, %v8983_v9  ;;  %9050 = vst [vmem:[%s16387_s10 + $0xb8] sm:$0xff] %v9020_v60  ;;  %v10771_v40 = vpack.c.bf16 %v9020_v60, %v9019_v58 }
 0x8be   :  { %10754 = vmatpush3.bf16.msra.mxu0 %v10753_v26  ;;  %10772 = vmatpush3.bf16.msra.mxu1 %v10771_v40 }
 0x8bf   :  { %v8108_v42 = vpop.f32.mrb[140].mxu0  ;;  %v8720_v19 = vpop.f32.mrb[140].mxu1  ;;  %10755 = vmatprep.subr.bf16.mxu0 %v11908_v2  ;;  %10773 = vmatprep.subr.bf16.mxu1 %v11908_v2 }
 0x8c0   :  { %v8110_v3 = vpop.f32.mrb[141].mxu0  ;;  %v8722_v23 = vpop.f32.mrb[141].mxu1 }
 0x8c1   :  { %v8112_v62 = vpop.f32.mrb[142].mxu0  ;;  %v8724_v13 = vpop.f32.mrb[142].mxu1 }
 0x8c2   :  { %v8821_v34 = vmax.f32 %v8098_v53, %v8112_v62  ;;  %v8823_v39 = vmax.f32 %v8710_v44, %v8724_v13  ;;  %v8114_v54 = vpop.f32.mrb[143].mxu0  ;;  %v8726_v61 = vpop.f32.mrb[143].mxu1 }
 0x8c3   :  { %v8822_v47 = vmax.f32 %v8100_v46, %v8114_v54  ;;  %v8824_v14 = vmax.f32 %v8712_v31, %v8726_v61 }
 0x8c5   :  { %v8961_v18 = vmax.f32 %v8821_v34, %v8822_v47  ;;  %v8997_v27 = vmax.f32 %v8823_v39, %v8824_v14 }
 0x8c7   :  { %v8973_v36 = vadd.f32 %v8961_v18, %v15714_v63  ;;  %v9009_v11 = vadd.f32 %v8997_v27, %v15714_v63  ;;  %v8118_v33 = vpop.f32.mrb[144].mxu0  ;;  %v8730_v55 = vpop.f32.mrb[144].mxu1 }
 0x8c8   :  { %v8829_v57 = vmax.f32 %v8102_v48, %v8118_v33  ;;  %v8831_v20 = vmax.f32 %v8714_v37, %v8730_v55  ;;  %v8120_v51 = vpop.f32.mrb[145].mxu0  ;;  %v8732_v8 = vpop.f32.mrb[145].mxu1 }
 0x8c9   :  { %v8985_v56 = vmax.f32 %v8973_v36, 0.0  ;;  %v9021_v12 = vmax.f32 %v9009_v11, 0.0  ;;  %v8830_v15 = vmax.f32 %v8104_v24, %v8120_v51  ;;  %v8832_v49 = vmax.f32 %v8716_v6, %v8732_v8  ;;  %v8122_v38 = vpop.f32.mrb[146].mxu0  ;;  %v8734_v50 = vpop.f32.mrb[146].mxu1 }
 0x8ca   :  { %v8837_v29 = vmax.f32 %v8108_v42, %v8122_v38  ;;  %v8839_v43 = vmax.f32 %v8720_v19, %v8734_v50  ;;  %v8124_v4 = vpop.f32.mrb[147].mxu0  ;;  %v8736_v45 = vpop.f32.mrb[147].mxu1 }
 0x8cb   :  { %9053 = vst [vmem:[%s16387_s10 + $0xd0] sm:$0xff] %v8985_v56  ;;  %9054 = vst [vmem:[%s16387_s10 + $0xd8] sm:$0xff] %v9021_v12  ;;  %v8962_v0 = vmax.f32 %v8829_v57, %v8830_v15  ;;  %v8998_v25 = vmax.f32 %v8831_v20, %v8832_v49  ;;  %v8838_v17 = vmax.f32 %v8110_v3, %v8124_v4 }
 0x8cc   :  { %v8840_v16 = vmax.f32 %v8722_v23, %v8736_v45 }
 0x8cd   :  { %v8974_v30 = vadd.f32 %v8962_v0, %v15728_v10  ;;  %v9010_v1 = vadd.f32 %v8998_v25, %v15728_v10  ;;  %v8963_v28 = vmax.f32 %v8837_v29, %v8838_v17 }
 0x8ce   :  { %v8999_v22 = vmax.f32 %v8839_v43, %v8840_v16 }
 0x8cf   :  { %v8986_v21 = vmax.f32 %v8974_v30, 0.0  ;;  %v9022_v59 = vmax.f32 %v9010_v1, 0.0  ;;  %v8975_v41 = vadd.f32 %v8963_v28, %v15751_v35  ;;  %v8128_v58 = vpop.f32.mrb[148].mxu0  ;;  %v8740_v53 = vpop.f32.mrb[148].mxu1 }
 0x8d0   :  { %v9011_v9 = vadd.f32 %v8999_v22, %v15751_v35  ;;  %v8130_v44 = vpop.f32.mrb[149].mxu0  ;;  %v8742_v7 = vpop.f32.mrb[149].mxu1 }
 0x8d1   :  { %9057 = vst [vmem:[%s16387_s10 + $0xf0] sm:$0xff] %v8986_v21  ;;  %v10756_v32 = vpack.c.bf16 %v8986_v21, %v8985_v56  ;;  %9058 = vst [vmem:[%s16387_s10 + $0xf8] sm:$0xff] %v9022_v59  ;;  %v10774_v46 = vpack.c.bf16 %v9022_v59, %v9021_v12  ;;  %v8987_v31 = vmax.f32 %v8975_v41, 0.0  ;;  %v8132_v37 = vpop.f32.mrb[150].mxu0  ;;  %v8744_v52 = vpop.f32.mrb[150].mxu1 }
 0x8d2   :  { %v9023_v48 = vmax.f32 %v9011_v9, 0.0  ;;  %v8134_v60 = vpop.f32.mrb[151].mxu0  ;;  %v8746_v24 = vpop.f32.mrb[151].mxu1  ;;  %v9334_v9 = vld [vmem:[#allocation6 + $0x70] sm:$0xff] }
 0x8d3   :  { %9061 = vst [vmem:[%s16387_s10 + $0x110] sm:$0xff] %v8987_v31  ;;  %10757 = vmatpush3.bf16.msra.mxu0 %v10756_v32  ;;  %10775 = vmatpush3.bf16.msra.mxu1 %v10774_v46  ;;  %v9472_v32 = vld [vmem:[#allocation6 + $0xb8] sm:$0xff] }
 0x8d4   :  { %9062 = vst [vmem:[%s16387_s10 + $0x118] sm:$0xff] %v9023_v48  ;;  %10758 = vmatprep.subr.bf16.mxu0 %v11908_v2  ;;  %10776 = vmatprep.subr.bf16.mxu1 %v11908_v2 }
 0x8d7   :  { %v8138_v6 = vpop.f32.mrb[152].mxu0  ;;  %v8750_v26 = vpop.f32.mrb[152].mxu1 }
 0x8d8   :  { %v8140_v40 = vpop.f32.mrb[153].mxu0  ;;  %v8752_v42 = vpop.f32.mrb[153].mxu1 }
 0x8d9   :  { %v8142_v19 = vpop.f32.mrb[154].mxu0  ;;  %v8754_v3 = vpop.f32.mrb[154].mxu1 }
 0x8da   :  { %v8845_v23 = vmax.f32 %v8128_v58, %v8142_v19  ;;  %v8847_v62 = vmax.f32 %v8740_v53, %v8754_v3  ;;  %v8144_v13 = vpop.f32.mrb[155].mxu0  ;;  %v8756_v34 = vpop.f32.mrb[155].mxu1  ;;  %v9470_v58 = vld [vmem:[#allocation6 + $0xa8] sm:$0xff]  ;;  %v9335_v53 = vld [vmem:[#allocation6 + $0x78] sm:$0xff]  ;;  %v9340_v19 = vld [vmem:[#allocation6 + $0xa0] sm:$0x3] }
 0x8db   :  { %v8846_v39 = vmax.f32 %v8130_v44, %v8144_v13  ;;  %v8848_v54 = vmax.f32 %v8742_v7, %v8756_v34  ;;  %v9471_v44 = vld [vmem:[#allocation6 + $0xb0] sm:$0xff]  ;;  %v9336_v7 = vld [vmem:[#allocation6 + $0x80] sm:$0xff]  ;;  %v9476_v3 = vld [vmem:[#allocation6 + $0xd8] sm:$0x3] }
 0x8dd   :  { %v8964_v61 = vmax.f32 %v8845_v23, %v8846_v39  ;;  %v9000_v47 = vmax.f32 %v8847_v62, %v8848_v54 }
 0x8df   :  { %v8976_v14 = vadd.f32 %v8964_v61, %v15714_v63  ;;  %v9012_v18 = vadd.f32 %v9000_v47, %v15714_v63  ;;  %v8148_v27 = vpop.f32.mrb[156].mxu0  ;;  %v8760_v36 = vpop.f32.mrb[156].mxu1 }
 0x8e0   :  { %v8853_v11 = vmax.f32 %v8132_v37, %v8148_v27  ;;  %v8855_v33 = vmax.f32 %v8744_v52, %v8760_v36  ;;  %v8150_v55 = vpop.f32.mrb[157].mxu0  ;;  %v8762_v57 = vpop.f32.mrb[157].mxu1 }
 0x8e1   :  { %v8988_v20 = vmax.f32 %v8976_v14, 0.0  ;;  %v9024_v51 = vmax.f32 %v9012_v18, 0.0  ;;  %v8854_v8 = vmax.f32 %v8134_v60, %v8150_v55  ;;  %v8856_v56 = vmax.f32 %v8746_v24, %v8762_v57  ;;  %v8152_v12 = vpop.f32.mrb[158].mxu0  ;;  %v8764_v15 = vpop.f32.mrb[158].mxu1  ;;  %v9337_v60 = vld [vmem:[#allocation6 + $0x88] sm:$0xff]  ;;  %v9473_v24 = vld [vmem:[#allocation6 + $0xc0] sm:$0xff] }
 0x8e2   :  { %v8861_v49 = vmax.f32 %v8138_v6, %v8152_v12  ;;  %v8863_v38 = vmax.f32 %v8750_v26, %v8764_v15  ;;  %v8154_v50 = vpop.f32.mrb[159].mxu0  ;;  %v8766_v29 = vpop.f32.mrb[159].mxu1  ;;  %v9338_v6 = vld [vmem:[#allocation6 + $0x90] sm:$0xff]  ;;  %v9474_v26 = vld [vmem:[#allocation6 + $0xc8] sm:$0xff] }
 0x8e3   :  { %9065 = vst [vmem:[%s16387_s10 + $0x130] sm:$0xff] %v8988_v20  ;;  %v10759_v63 = vpack.c.bf16 %v8988_v20, %v8987_v31  ;;  %9066 = vst [vmem:[%s16387_s10 + $0x138] sm:$0xff] %v9024_v51  ;;  %v10777_v43 = vpack.c.bf16 %v9024_v51, %v9023_v48  ;;  %v8965_v4 = vmax.f32 %v8853_v11, %v8854_v8 }
 0x8e4   :  { %v9001_v45 = vmax.f32 %v8855_v33, %v8856_v56  ;;  %v8862_v0 = vmax.f32 %v8140_v40, %v8154_v50  ;;  %v8864_v25 = vmax.f32 %v8752_v42, %v8766_v29  ;;  %v9339_v40 = vld [vmem:[#allocation6 + $0x98] sm:$0xff]  ;;  %v9475_v42 = vld [vmem:[#allocation6 + $0xd0] sm:$0xff] }
 0x8e5   :  { %v8977_v17 = vadd.f32 %v8965_v4, %v15728_v10  ;;  %10760 = vmatpush3.bf16.msra.mxu0 %v10759_v63  ;;  %10778 = vmatpush3.bf16.msra.mxu1 %v10777_v43 }
 0x8e6   :  { %v9013_v16 = vadd.f32 %v9001_v45, %v15728_v10  ;;  %v8966_v30 = vmax.f32 %v8861_v49, %v8862_v0  ;;  %v9002_v1 = vmax.f32 %v8863_v38, %v8864_v25  ;;  %10761 = vmatprep.subr.bf16.mxu0 %v11908_v2  ;;  %10779 = vmatprep.subr.bf16.mxu1 %v11908_v2  ;;  %v9661_v45 = vld [vmem:[#allocation9] sm:$0xff] }
 0x8e7   :  { %v8989_v28 = vmax.f32 %v8977_v17, 0.0  ;;  %v9178_v46 = vpop.f32.mrb[160].mxu0  ;;  %v9299_v31 = vpop.f32.mrb[160].mxu1 }
 0x8e8   :  { %v9025_v22 = vmax.f32 %v9013_v16, 0.0  ;;  %v8978_v21 = vadd.f32 %v8966_v30, %v15751_v35  ;;  %v9014_v59 = vadd.f32 %v9002_v1, %v15751_v35  ;;  %v10539_v48 = vpop.f32.mrb[161].mxu0  ;;  %v9300_v37 = vadd.f32 %v9299_v31, %v9178_v46  ;;  %v10584_v52 = vpop.f32.mrb[161].mxu1 }
 0x8e9   :  { %9069 = vst [vmem:[%s16387_s10 + $0x150] sm:$0xff] %v8989_v28 }
 0x8ea   :  { %9070 = vst [vmem:[%s16387_s10 + $0x158] sm:$0xff] %v9025_v22  ;;  %v8990_v10 = vmax.f32 %v8978_v21, 0.0  ;;  %v9026_v41 = vmax.f32 %v9014_v59, 0.0 }
 0x8eb   :  { %v9183_v23 = vpop.f32.mrb[162].mxu0  ;;  %v9304_v13 = vpop.f32.mrb[162].mxu1 }
 0x8ec   :  { %9073 = vst [vmem:[%s16387_s10 + $0x170] sm:$0xff] %v8990_v10  ;;  %v10762_v2 = vpack.c.bf16 %v8990_v10, %v8989_v28  ;;  %9074 = vst [vmem:[%s16387_s10 + $0x178] sm:$0xff] %v9026_v41  ;;  %v10780_v35 = vpack.c.bf16 %v9026_v41, %v9025_v22  ;;  %v10542_v62 = vpop.f32.mrb[163].mxu0  ;;  %v9305_v34 = vadd.f32 %v9304_v13, %v9183_v23  ;;  %v10587_v39 = vpop.f32.mrb[163].mxu1 }
 0x8ed   :  { %v9615_v41 = vpop.permute.xlu1 %9614 }
 0x8ee   :  { %10763 = vmatpush3.bf16.msra.mxu0 %v10762_v2  ;;  %10781 = vmatpush3.bf16.msra.mxu1 %v10780_v35  ;;  %v9620_v2 = vpop.permute.xlu0 %9619 }
 0x8ef   :  { %v9188_v54 = vpop.f32.mrb[164].mxu0  ;;  %v9309_v47 = vpop.f32.mrb[164].mxu1 }
 0x8f0   :  { %v10545_v61 = vpop.f32.mrb[165].mxu0  ;;  %v9310_v14 = vadd.f32 %v9309_v47, %v9188_v54  ;;  %v10590_v18 = vpop.f32.mrb[165].mxu1 }
 0x8f1   :  { %10628 = vmatmul.mubr.msk.f32.vlgmr.msra.gmra.mrb[174].mxu0 %vm9090_vm3, %v9334_v9  ;;  %10673 = vmatmul.mubr.msk.f32.vlgmr.msra.gmra.mrb[174].mxu1 %vm9090_vm3, %v9470_v58 }
 0x8f2   :  { %10630 = vmatprep.mubr.msk.f32.mxu0 %vm11909_vm4, %v11910_v5  ;;  %10675 = vmatprep.mubr.msk.f32.mxu1 %vm11909_vm4, %v11910_v5 }
 0x8f3   :  { %v9193_v27 = vpop.f32.mrb[166].mxu0  ;;  %v9314_v11 = vpop.f32.mrb[166].mxu1 }
 0x8f4   :  { %v10548_v36 = vpop.f32.mrb[167].mxu0  ;;  %v9315_v33 = vadd.f32 %v9314_v11, %v9193_v27 }
 0x8f5   :  { %10631 = vmatmul.mubr.msk.f32.gmra.mrb[176].mxu0 %vm9090_vm3, %v9335_v53  ;;  %10676 = vmatmul.mubr.msk.f32.gmra.mrb[176].mxu1 %vm9090_vm3, %v9471_v44 }
 0x8f6   :  { %10633 = vmatprep.mubr.msk.f32.mxu0 %vm11909_vm4, %v11910_v5  ;;  %10678 = vmatprep.mubr.msk.f32.mxu1 %vm11909_vm4, %v11910_v5 }
 0x8f7   :  { %v9198_v55 = vpop.f32.mrb[168].mxu0 }
 0x8f8   :  { %v10551_v57 = vpop.f32.mrb[169].mxu0 }
 0x8f9   :  { %10634 = vmatmul.mubr.msk.f32.gmra.mrb[178].mxu0 %vm9090_vm3, %v9336_v7  ;;  %10679 = vmatmul.mubr.msk.f32.gmra.mrb[178].mxu1 %vm9090_vm3, %v9472_v32 }
 0x8fa   :  { %10636 = vmatprep.mubr.msk.f32.mxu0 %vm11909_vm4, %v11910_v5  ;;  %10681 = vmatprep.mubr.msk.f32.mxu1 %vm11909_vm4, %v11910_v5 }
 0x8fb   :  { %v9203_v56 = vpop.f32.mrb[170].mxu0 }
 0x8fc   :  { %v10554_v12 = vpop.f32.mrb[171].mxu0 }
 0x8fd   :  { %10637 = vmatmul.mubr.msk.f32.gmra.mrb[180].mxu0 %vm9090_vm3, %v9337_v60  ;;  %10682 = vmatmul.mubr.msk.f32.gmra.mrb[180].mxu1 %vm9090_vm3, %v9473_v24 }
 0x8fe   :  { %10639 = vmatprep.mubr.msk.f32.mxu0 %vm11909_vm4, %v11910_v5  ;;  %10684 = vmatprep.mubr.msk.f32.mxu1 %vm11909_vm4, %v11910_v5 }
 0x8ff   :  { %v9208_v50 = vpop.f32.mrb[172].mxu0 }
 0x900   :  { %v10557_v29 = vpop.f32.mrb[173].mxu0 }
 0x901   :  { %10640 = vmatmul.mubr.msk.f32.gmra.mrb[182].mxu0 %vm9090_vm3, %v9338_v6  ;;  %10685 = vmatmul.mubr.msk.f32.gmra.mrb[182].mxu1 %vm9090_vm3, %v9474_v26 }
 0x902   :  { %10642 = vmatprep.mubr.msk.f32.mxu0 %vm11909_vm4, %v11910_v5  ;;  %10687 = vmatprep.mubr.msk.f32.mxu1 %vm11909_vm4, %v11910_v5 }
 0x905   :  { %10643 = vmatmul.mubr.msk.f32.gmra.mrb[184].mxu0 %vm9090_vm3, %v9339_v40  ;;  %10688 = vmatmul.mubr.msk.f32.gmra.mrb[184].mxu1 %vm9090_vm3, %v9475_v42  ;;  %v9625_v42 = vpop.permute.xlu1 %9624 }
 0x906   :  { %10645 = vmatprep.mubr.msk.f32.mxu0 %vm11909_vm4, %v11910_v5  ;;  %10690 = vmatprep.mubr.msk.f32.mxu1 %vm11909_vm4, %v11910_v5  ;;  %v10593_v5 = vpop.f32.mrb[167].mxu1 }
 0x907   :  { %v9319_v20 = vpop.f32.mrb[168].mxu1 }
 0x908   :  { %v9320_v51 = vadd.f32 %v9319_v20, %v9198_v55  ;;  %v10596_v8 = vpop.f32.mrb[169].mxu1 }
 0x909   :  { %10646 = vmatmul.mubr.msk.f32.gmra.mrb[186].mxu0 %vm9090_vm3, %v9340_v19  ;;  %10691 = vmatmul.mubr.msk.f32.gmra.mrb[186].mxu1 %vm9090_vm3, %v9476_v3  ;;  %v9324_v15 = vpop.f32.mrb[170].mxu1  ;;  %v9630_v19 = vpop.permute.xlu0 %9629 }
 0x90a   :  { %v9325_v49 = vadd.f32 %v9324_v15, %v9203_v56  ;;  %v10599_v38 = vpop.f32.mrb[171].mxu1  ;;  %10707 = vmatprep.mubr.msk.f32.mxu0 %vm9675_vm5, %v9661_v45  ;;  %v9635_v57 = vpop.permute.xlu1 %9634 }
 0x90b   :  { %v9329_v63 = vpop.f32.mrb[172].mxu1 }
 0x90c   :  { %v16362_v43 = vadd.f32 %v9329_v63, %v9208_v50  ;;  %v10602_v4 = vpop.f32.mrb[173].mxu1 }
 0x90d   :  { %v9640_v20 = vpop.permute.xlu0 %9639 }
 0x9c4   :  { %v9428_v0 = vpop.f32.mrb[174].mxu0  ;;  %v9564_v25 = vpop.f32.mrb[174].mxu1 }
 0x9c5   :  { %v9462_v17 = vadd.f32 %v9428_v0, %v9300_v37  ;;  %v10629_v16 = vpop.f32.mrb[175].mxu0  ;;  %v10674_v30 = vpop.f32.mrb[175].mxu1 }
 0x9c6   :  { %v9662_v16 = vld [vmem:[#allocation9 + $0x8] sm:$0x3] }
 0x9c7   :  { %v9598_v1 = vadd.f32 %v9564_v25, %v9462_v17 }
 0x9c8   :  { %v9433_v28 = vpop.f32.mrb[176].mxu0  ;;  %v9569_v22 = vpop.f32.mrb[176].mxu1 }
 0x9c9   :  { %v9463_v21 = vadd.f32 %v9433_v28, %v9305_v34  ;;  %v10632_v59 = vpop.f32.mrb[177].mxu0  ;;  %v10677_v10 = vpop.f32.mrb[177].mxu1  ;;  %v9647_v35 = vadd.f32 %v9615_v41, %v9598_v1 }
 0x9cb   :  { %v9599_v9 = vadd.f32 %v9569_v22, %v9463_v21  ;;  %v9654_v31 = vmax.f32 %v9647_v35, 0.0 }
 0x9cc   :  { %v9438_v58 = vpop.f32.mrb[178].mxu0  ;;  %v9574_v53 = vpop.f32.mrb[178].mxu1 }
 0x9cd   :  { %v9648_v44 = vadd.f32 %v9620_v2, %v9599_v9  ;;  %v9464_v7 = vadd.f32 %v9438_v58, %v9310_v14  ;;  %v10635_v32 = vpop.f32.mrb[179].mxu0  ;;  %v10680_v46 = vpop.f32.mrb[179].mxu1 }
 0x9cf   :  { %v9655_v48 = vmax.f32 %v9648_v44, 0.0  ;;  %v9600_v37 = vadd.f32 %v9574_v53, %v9464_v7 }
 0x9d0   :  { %v9443_v52 = vpop.f32.mrb[180].mxu0  ;;  %v9579_v60 = vpop.f32.mrb[180].mxu1 }
 0x9d1   :  { %v9465_v24 = vadd.f32 %v9443_v52, %v9315_v33  ;;  %v10638_v6 = vpop.f32.mrb[181].mxu0  ;;  %v10683_v26 = vpop.f32.mrb[181].mxu1  ;;  %v10782_v40 = vpack.c.bf16 %v9655_v48, %v9654_v31  ;;  %v9649_v3 = vadd.f32 %v9625_v42, %v9600_v37 }
 0x9d3   :  { %v9601_v23 = vadd.f32 %v9579_v60, %v9465_v24  ;;  %10783 = vmatprep.subr.bf16.mxu0 %v10782_v40  ;;  %v9656_v47 = vmax.f32 %v9649_v3, 0.0 }
 0x9d4   :  { %v9448_v62 = vpop.f32.mrb[182].mxu0  ;;  %10785 = vmatpush3.bf16.msra.mxu0 %v10782_v40  ;;  %v9584_v13 = vpop.f32.mrb[182].mxu1 }
 0x9d5   :  { %v9650_v34 = vadd.f32 %v9630_v19, %v9601_v23  ;;  %v9466_v39 = vadd.f32 %v9448_v62, %v9320_v51  ;;  %v10641_v54 = vpop.f32.mrb[183].mxu0  ;;  %v10686_v61 = vpop.f32.mrb[183].mxu1 }
 0x9d7   :  { %v9657_v14 = vmax.f32 %v9650_v34, 0.0  ;;  %v9602_v18 = vadd.f32 %v9584_v13, %v9466_v39 }
 0x9d8   :  { %v9453_v27 = vpop.f32.mrb[184].mxu0  ;;  %v9589_v36 = vpop.f32.mrb[184].mxu1 }
 0x9d9   :  { %v9467_v11 = vadd.f32 %v9453_v27, %v9325_v49  ;;  %v10644_v33 = vpop.f32.mrb[185].mxu0  ;;  %v10689_v5 = vpop.f32.mrb[185].mxu1  ;;  %v10786_v55 = vpack.c.bf16 %v9657_v14, %v9656_v47  ;;  %v9651_v8 = vadd.f32 %v9635_v57, %v9602_v18 }
 0x9da   :  { %v9645_v49 = vpop.permute.xlu1 %9644 }
 0x9db   :  { %v9603_v56 = vadd.f32 %v9589_v36, %v9467_v11  ;;  %10787 = vmatprep.subr.bf16.mxu0 %v10786_v55  ;;  %v9658_v63 = vmax.f32 %v9651_v8, 0.0 }
 0x9dc   :  { %v9458_v12 = vpop.f32.mrb[186].mxu0  ;;  %10789 = vmatpush3.bf16.msra.mxu0 %v10786_v55  ;;  %v9594_v15 = vpop.f32.mrb[186].mxu1 }
 0x9dd   :  { %v9652_v51 = vadd.f32 %v9640_v20, %v9603_v56  ;;  %v9468_v38 = vadd.f32 %v9458_v12, %v16362_v43  ;;  %v10647_v50 = vpop.f32.mrb[187].mxu0  ;;  %v10692_v29 = vpop.f32.mrb[187].mxu1 }
 0x9de   :  { %v9673_v43 = vpop.permute.xlu0 %9672  ;;  %v9668_v1 = vpop.permute.xlu1 %9667 }
 0x9df   :  { %v9659_v4 = vmax.f32 %v9652_v51, 0.0  ;;  %v9604_v45 = vadd.f32 %v9594_v15, %v9468_v38 }
 0x9e1   :  { %v9653_v0 = vadd.f32 %v9645_v49, %v9604_v45  ;;  %v10790_v25 = vpack.c.bf16 %v9659_v4, %v9658_v63 }
 0x9e3   :  { %v9660_v17 = vmax.f32 %v9653_v0, 0.0  ;;  %10791 = vmatprep.subr.bf16.mxu0 %v10790_v25 }
 0x9e4   :  { %10793 = vmatpush3.bf16.msra.mxu0 %v10790_v25 }
 0x9e5   :  { %10705 = vmatprep.subr.msk.mxu0 %vm9682_vm6, %v9660_v17 }
 0x9e8   :  { %10706 = vmatpush3.msk.msra.mxu0 %vm9682_vm6, %v9660_v17 }
 0x9e9   :  { %10708 = vmatmul.mubr.msk.f32.vlgmr.msra.gmra.mrb[188].mxu0 %vm9675_vm5, %v9662_v16 }
 0xabc   :  { %v10709_v30 = vpop.f32.mrb[188].mxu0 }
 0xabd   :  { %v9758_v28 = vadd.f32 %v10709_v30, %v9673_v43  ;;  %v9752_v22 = vpop.f32.mrb[189].mxu0 }
 0xabe   :  { %v9753_v21 = vadd.f32 %v9752_v22, %v9668_v1 }
 0xabf   :  { %v9761_v59 = vsel %vm9682_vm6, %v9758_v28, -inf }
 0xac0   :  { %v9762_v10 = vmax.f32 %v9753_v21, %v9761_v59 }
 0xac2   :  { %v9763_v41 = vrot.slane %v9762_v10, 4 }
 0xac4   :  { %v9764_v2 = vmax.f32 %v9762_v10, %v9763_v41 }
 0xac6   :  { %v9765_v35 = vrot.slane %v9764_v2, 2 }
 0xac8   :  { %v9766_v9 = vmax.f32 %v9764_v2, %v9765_v35 }
 0xaca   :  { %v9767_v58 = vrot.slane %v9766_v9, 1 }
 0xacc   :  { %v9768_v53 = vmax.f32 %v9766_v9, %v9767_v58 }
 0xace   :  { %v9769_v44 = vsub.f32 %v9753_v21, %v9768_v53  ;;  %v9770_v7 = vsub.f32 %v9758_v28, %v9768_v53 }
 0xad0   :  { %v9771_v32 = vmul.f32 1.442695, %v9769_v44  ;;  %v9773_v46 = vmul.f32 1.442695, %v9770_v7 }
 0xad2   :  { %11540 = vpow2.f32 %v9771_v32 }
 0xad3   :  { %11542 = vpow2.f32 %v9773_v46 }
 0xadc   :  { %v11541_v31 = vpop.eup %11540 }
 0xadd   :  { %v11543_v48 = vpop.eup %11542 }
 0xade   :  { %v9775_v37 = vsel %vm9682_vm6, %v11543_v48, 0.0 }
 0xadf   :  { %v9776_v52 = vadd.f32 %v11541_v31, %v9775_v37 }
 0xae1   :  { %v9777_v60 = vrot.slane %v9776_v52, 4 }
 0xae3   :  { %v9778_v24 = vadd.f32 %v9777_v60, %v9776_v52 }
 0xae5   :  { %v9779_v6 = vrot.slane %v9778_v24, 2 }
 0xae7   :  { %v9780_v26 = vadd.f32 %v9779_v6, %v9778_v24 }
 0xae9   :  { %v9781_v40 = vrot.slane %v9780_v26, 1 }
 0xaeb   :  { %v9782_v42 = vadd.f32 %v9781_v40, %v9780_v26 }
 0xaed   :  { %11544 = vlog2.f32 %v9782_v42 }
 0xaf7   :  { %v11545_v19 = vpop.eup %11544 }
 0xaf8   :  { %v9784_v3 = vmul.f32 0.6931472, %v11545_v19 }
 0xafa   :  { %v9785_v23 = vsub.f32 %v9769_v44, %v9784_v3  ;;  %v9786_v62 = vsub.f32 %v9770_v7, %v9784_v3 }
 0xafc   :  { %9787 = vst [vmem:[%s16386_s9] sm:$0xff] %v9785_v23  ;;  %9788 = vst [vmem:[%s16386_s9 + $0x8] sm:$0x3] %v9786_v62 }
 0xafd   :  { %9797 = vsyncpa [#allocation3], 1 }
 0xafe   :  { %9798 = vsyncpa [#allocation5], 1 }
 0xaff   :  { %9799 = vsyncpa [#allocation8], 1 }
 0xb00   :  { %9800 = vsyncpa [#allocation11], 1 }

</bundles_post_ra>
